<compile_context>
chip_gen: v6e
topology: v6e:2x2x1
jax: 0.10.0
libtpu: 0.0.40
codegen_flags: <defaults>
</compile_context>

<pallas_src>
import functools

import numpy as np

import jax
import jax.numpy as jnp
from jax import lax
from jax.experimental import pallas as pl
from jax.experimental.pallas import tpu as pltpu


# ----------------------------------------------------------------------------
# Small helpers
# ----------------------------------------------------------------------------
def _round_up(x, m):
    return ((x + m - 1) // m) * m


def _silu(x):
    return x * jax.nn.sigmoid(x)


def _bspec(m, c):
    """Per-batch-element block of a (N, m, c) array."""
    return pl.BlockSpec((1, m, c), lambda i: (i, 0, 0))


def _cspec(*shape):
    """Whole-array block (weights / constants), same for every grid step."""
    nd = len(shape)
    return pl.BlockSpec(shape, lambda i: (0,) * nd)


def _upsample_matrix(h_in, w_in, h_out, w_out):
    """Constant matrix U with up(x)_flat = U @ x_flat for bilinear 2x,
    align_corners=True (== nn.UpsamplingBilinear2d)."""
    def axis_weights(isz, osz):
        m = np.zeros((osz, isz), np.float32)
        if isz == 1:
            m[:, 0] = 1.0
            return m
        src = np.arange(osz, dtype=np.float64) * (isz - 1) / (osz - 1)
        i0 = np.clip(np.floor(src).astype(np.int64), 0, isz - 2)
        f = src - i0
        for o in range(osz):
            m[o, i0[o]] += 1.0 - f[o]
            m[o, i0[o] + 1] += f[o]
        return m

    av = axis_weights(h_in, h_out)          # (H, h_in)
    ah = axis_weights(w_in, w_out)          # (W, w_in)
    return jnp.asarray(np.kron(av, ah), jnp.float32)   # (H*W, h_in*w_in)


# ----------------------------------------------------------------------------
# In-kernel depthwise 3x3 conv on a spatially-flattened tile
# ----------------------------------------------------------------------------
def _dw3x3_flat(pad_ref, h, wd_ref, H, W, PAD):
    """Depthwise 3x3, stride 1, pad 1.  h: (H*W, C) f32 value.
    pad_ref: VMEM scratch (H*W + 2*PAD, C) f32 used as a zero-halo buffer."""
    M = H * W
    C = h.shape[-1]

    zband = jnp.zeros((PAD, C), jnp.float32)
    pad_ref[0:PAD, :] = zband                       # top halo (covers y < 0)
    pad_ref[PAD + M:PAD + M + PAD, :] = zband       # bottom halo (y >= H)
    pad_ref[PAD:PAD + M, :] = h                     # interior

    # x-position of every flattened row, to mask horizontal wrap-around.
    iota = lax.broadcasted_iota(jnp.int32, (M, 1), 0)
    if (W & (W - 1)) == 0:
        col = iota & (W - 1)
    else:
        col = iota % W
    m_left = (col != 0).astype(jnp.float32)
    m_right = (col != (W - 1)).astype(jnp.float32)

    acc = jnp.zeros((M, C), jnp.float32)
    for dy in (-1, 0, 1):
        for dx in (-1, 0, 1):
            k = (dy + 1) * 3 + (dx + 1)
            off = PAD + dy * W + dx
            tap = pad_ref[off:off + M, :] * wd_ref[k:k + 1, :]
            if dx == -1:
                tap = tap * m_left
            elif dx == 1:
                tap = tap * m_right
            acc = acc + tap
    return acc


# ----------------------------------------------------------------------------
# Fused CMFPNetUp stage kernel:
#   cat(inputs1, up2x(inputs2)) -> InvertedResidual -> ReLU
#                               -> InvertedResidual(+res) -> ReLU
# ----------------------------------------------------------------------------
def _cmfp_up_kernel(x1_ref, x2_ref, u_ref,
                    a_w1a, a_w1b, a_b1, a_wd, a_bd, a_w2, a_b2,
                    c_w1, c_b1, c_wd, c_bd, c_w2, c_b2,
                    o_ref, pad1_ref, pad2_ref, *, H, W, M2, PAD):
    x1 = x1_ref[0]                                   # (M, C1)  bf16
    x2 = x2_ref[0]                                   # (M2, C2) bf16

    # ---- conv1 expand: upsample folded into the matmul ----
    t = jnp.dot(x2, a_w1b[...], preferred_element_type=jnp.float32)       # (M2, hid1)
    if M2 == 1:
        up_part = t                                  # 1x1 -> 2x2 is replication
    else:
        up_part = jnp.dot(u_ref[...], t, preferred_element_type=jnp.float32)
    h = jnp.dot(x1, a_w1a[...], preferred_element_type=jnp.float32)
    h = h + up_part + a_b1[...]
    h = _silu(h)

    # ---- conv1 depthwise 3x3 + SiLU ----
    d = _dw3x3_flat(pad1_ref, h, a_wd, H, W, PAD) + a_bd[...]
    d = _silu(d)

    # ---- conv1 project + ReLU (no residual: inp != oup) ----
    y1 = jnp.dot(d.astype(jnp.bfloat16), a_w2[...],
                 preferred_element_type=jnp.float32) + a_b2[...]
    y1 = jnp.maximum(y1, 0.0)

    # ---- conv2 (residual InvertedResidual) + ReLU ----
    h2 = jnp.dot(y1.astype(jnp.bfloat16), c_w1[...],
                 preferred_element_type=jnp.float32) + c_b1[...]
    h2 = _silu(h2)
    d2 = _dw3x3_flat(pad2_ref, h2, c_wd, H, W, PAD) + c_bd[...]
    d2 = _silu(d2)
    y2 = jnp.dot(d2.astype(jnp.bfloat16), c_w2[...],
                 preferred_element_type=jnp.float32) + c_b2[...]
    y2 = jnp.maximum(y2 + y1, 0.0)

    o_ref[0] = y2.astype(o_ref.dtype)


# ----------------------------------------------------------------------------
# Fused head kernel: up_conv (upsample 2x + residual InvertedResidual)
# followed by the final 1x1 conv (output padded to 128 lanes).
# ----------------------------------------------------------------------------
def _head_kernel(x_ref, u_ref, w1, b1, wd, bd, w2, b2, wf, bf,
                 o_ref, pad_ref, *, H, W, PAD):
    x = x_ref[0]                                     # (M2, Cin) bf16
    U = u_ref[...]                                   # (M, M2)   f32

    xu = jnp.dot(U, x.astype(jnp.float32),
                 preferred_element_type=jnp.float32)              # residual (M, Cin)

    t = jnp.dot(x, w1[...], preferred_element_type=jnp.float32)   # (M2, hid)
    h = jnp.dot(U, t, preferred_element_type=jnp.float32) + b1[...]
    h = _silu(h)
    d = _dw3x3_flat(pad_ref, h, wd, H, W, PAD) + bd[...]
    d = _silu(d)
    y = jnp.dot(d.astype(jnp.bfloat16), w2[...],
                preferred_element_type=jnp.float32) + b2[...]
    y = y + xu                                       # IR residual, no activation

    out = jnp.dot(y.astype(jnp.bfloat16), wf[...],
                  preferred_element_type=jnp.float32) + bf[...]
    o_ref[0] = out.astype(o_ref.dtype)


# ----------------------------------------------------------------------------
# Wrappers (one pallas_call per decoder stage)
# ----------------------------------------------------------------------------
_VMEM_LIMIT = 48 * 1024 * 1024


def run_cmfp_up(p, x1, x2, H, W):
    """x1: (N, H*W, C1) bf16, x2: (N, (H/2)*(W/2), C2) bf16 -> (N, H*W, Cout) bf16."""
    n, M, C1 = x1.shape
    _, M2, C2 = x2.shape
    assert M == H * W and M2 == (H // 2) * (W // 2)
    c1, c2 = p["c1"], p["c2"]
    hid1 = c1["w1a"].shape[1]
    hid2 = c2["w1"].shape[1]
    cout = c1["w2"].shape[1]
    PAD = _round_up(W + 1, 8)
    U = _upsample_matrix(H // 2, W // 2, H, W)

    kern = functools.partial(_cmfp_up_kernel, H=H, W=W, M2=M2, PAD=PAD)
    in_specs = [
        _bspec(M, C1), _bspec(M2, C2), _cspec(M, M2),
        _cspec(C1, hid1), _cspec(C2, hid1), _cspec(1, hid1),
        _cspec(9, hid1), _cspec(1, hid1), _cspec(hid1, cout), _cspec(1, cout),
        _cspec(cout, hid2), _cspec(1, hid2), _cspec(9, hid2), _cspec(1, hid2),
        _cspec(hid2, cout), _cspec(1, cout),
    ]
    args = (x1, x2, U,
            c1["w1a"], c1["w1b"], c1["b1"], c1["wd"], c1["bd"], c1["w2"], c1["b2"],
            c2["w1"], c2["b1"], c2["wd"], c2["bd"], c2["w2"], c2["b2"])

    return pl.pallas_call(
        kern,
        out_shape=jax.ShapeDtypeStruct((n, M, cout), jnp.bfloat16),
        grid=(n,),
        in_specs=in_specs,
        out_specs=_bspec(M, cout),
        scratch_shapes=[pltpu.VMEM((M + 2 * PAD, hid1), jnp.float32),
                        pltpu.VMEM((M + 2 * PAD, hid2), jnp.float32)],
        compiler_params=pltpu.CompilerParams(
            dimension_semantics=("parallel",),
            vmem_limit_bytes=_VMEM_LIMIT),
    )(*args)


def run_head(params, x, H, W):
    """up_conv + final 1x1 conv.  x: (N, (H/2)*(W/2), Cin) bf16 ->
    (N, H*W, 128) f32 logits (lane-padded)."""
    n, M2, cin = x.shape
    M = H * W
    uc = params["upconv"]
    hid = uc["w1"].shape[1]
    cpad = params["final_w"].shape[1]
    PAD = _round_up(W + 1, 8)
    U = _upsample_matrix(H // 2, W // 2, H, W)

    kern = functools.partial(_head_kernel, H=H, W=W, PAD=PAD)
    in_specs = [
        _bspec(M2, cin), _cspec(M, M2),
        _cspec(cin, hid), _cspec(1, hid), _cspec(9, hid), _cspec(1, hid),
        _cspec(hid, cin), _cspec(1, cin),
        _cspec(cin, cpad), _cspec(1, cpad),
    ]
    args = (x, U, uc["w1"], uc["b1"], uc["wd"], uc["bd"], uc["w2"], uc["b2"],
            params["final_w"], params["final_b"])

    return pl.pallas_call(
        kern,
        out_shape=jax.ShapeDtypeStruct((n, M, cpad), jnp.float32),
        grid=(n,),
        in_specs=in_specs,
        out_specs=_bspec(M, cpad),
        scratch_shapes=[pltpu.VMEM((M + 2 * PAD, hid), jnp.float32)],
        compiler_params=pltpu.CompilerParams(
            dimension_semantics=("parallel",),
            vmem_limit_bytes=_VMEM_LIMIT),
    )(*args)


def cmfpnet_decoder_forward(params, feats_nhwc, num_classes=3):
    """feats_nhwc: [feat1(64c), feat2(128c), feat3(192c), feat4(256c), feat5(512c)]
    (NHWC, f32).  Returns NCHW logits."""
    def flat(x):
        n, h, w, c = x.shape
        return x.astype(jnp.bfloat16).reshape(n, h * w, c)

    f1, f2, f3, f4, f5 = feats_nhwc
    up4 = run_cmfp_up(params["up4"], flat(f4), flat(f5), f4.shape[1], f4.shape[2])
    up3 = run_cmfp_up(params["up3"], flat(f3), up4, f3.shape[1], f3.shape[2])
    up2 = run_cmfp_up(params["up2"], flat(f2), up3, f2.shape[1], f2.shape[2])
    up1 = run_cmfp_up(params["up1"], flat(f1), up2, f1.shape[1], f1.shape[2])

    Ho, Wo = 2 * f1.shape[1], 2 * f1.shape[2]
    logits = run_head(params, up1, Ho, Wo)                  # (N, Ho*Wo, 128) f32
    n = logits.shape[0]
    out = logits[:, :, :num_classes].reshape(n, Ho, Wo, num_classes)
    return jnp.transpose(out, (0, 3, 1, 2))                 # NCHW


# ----------------------------------------------------------------------------
# Deterministic parameter init (BatchNorm folded, eval mode, eps=1e-5)
# ----------------------------------------------------------------------------
def _init_bn(key, c):
    k1, k2, k3, k4 = jax.random.split(key, 4)
    gamma = 1.0 + 0.1 * jax.random.normal(k1, (c,), jnp.float32)
    beta = 0.1 * jax.random.normal(k2, (c,), jnp.float32)
    mean = 0.1 * jax.random.normal(k3, (c,), jnp.float32)
    var = 1.0 + 0.1 * jax.random.uniform(k4, (c,), jnp.float32)
    return gamma, beta, mean, var


def _fold_bn(w, bn, eps=1e-5):
    gamma, beta, mean, var = bn
    scale = gamma / jnp.sqrt(var + eps)
    return w * scale, (beta - mean * scale)[None, :]


def _init_ir_parts(key, inp, oup, expand=2):
    hidden = inp * expand
    ks = jax.random.split(key, 6)
    w1 = jax.random.normal(ks[0], (inp, hidden), jnp.float32) * (2.0 / inp) ** 0.5
    wdw = jax.random.normal(ks[1], (3, 3, hidden), jnp.float32) * (2.0 / 9.0) ** 0.5
    w2 = jax.random.normal(ks[2], (hidden, oup), jnp.float32) * (2.0 / hidden) ** 0.5
    w1f, b1f = _fold_bn(w1, _init_bn(ks[3], hidden))
    wdwf, bdwf = _fold_bn(wdw, _init_bn(ks[4], hidden))
    w2f, b2f = _fold_bn(w2, _init_bn(ks[5], oup))
    return w1f, b1f, wdwf.reshape(9, hidden), bdwf, w2f, b2f


def init_ir(key, inp, oup):
    w1f, b1f, wdf, bdf, w2f, b2f = _init_ir_parts(key, inp, oup)
    return dict(w1=w1f.astype(jnp.bfloat16), b1=b1f, wd=wdf, bd=bdf,
                w2=w2f.astype(jnp.bfloat16), b2=b2f)


def init_ir_split(key, c1, c2, oup):
    """InvertedResidual whose input is cat(inputs1[c1 ch], up(inputs2)[c2 ch])."""
    w1f, b1f, wdf, bdf, w2f, b2f = _init_ir_parts(key, c1 + c2, oup)
    return dict(w1a=w1f[:c1].astype(jnp.bfloat16),
                w1b=w1f[c1:].astype(jnp.bfloat16),
                b1=b1f, wd=wdf, bd=bdf,
                w2=w2f.astype(jnp.bfloat16), b2=b2f)


def init_cmfpnet(key, num_classes=3):
    ks = jax.random.split(key, 11)
    fw = 0.1 * jax.random.normal(ks[9], (64, num_classes), jnp.float32)
    fb = 0.1 * jax.random.normal(ks[10], (1, num_classes), jnp.float32)
    cpad = _round_up(num_classes, 128)               # lane-dense final output
    fw_p = jnp.zeros((64, cpad), jnp.float32).at[:, :num_classes].set(fw)
    fb_p = jnp.zeros((1, cpad), jnp.float32).at[:, :num_classes].set(fb)
    return {
        "up4": dict(c1=init_ir_split(ks[0], 256, 512, 512), c2=init_ir(ks[1], 512, 512)),
        "up3": dict(c1=init_ir_split(ks[2], 192, 512, 256), c2=init_ir(ks[3], 256, 256)),
        "up2": dict(c1=init_ir_split(ks[4], 128, 256, 128), c2=init_ir(ks[5], 128, 128)),
        "up1": dict(c1=init_ir_split(ks[6], 64, 128, 64),  c2=init_ir(ks[7], 64, 64)),
        "upconv": init_ir(ks[8], 64, 64),
        "final_w": fw_p.astype(jnp.bfloat16),
        "final_b": fb_p,
    }


# ----------------------------------------------------------------------------
if __name__ == "__main__":
    key = jax.random.PRNGKey(0)
    kp, kf = jax.random.split(key)
    num_classes = 3
    params = init_cmfpnet(kp, num_classes=num_classes)

    B = 2
    # Encoder feature pyramid (channels 64/128/192/256/512) built as NHWC
    # inputs directly, since the encoder / MAFFAB classes are undefined.
    feat_shapes = [(B, 16, 16, 64), (B, 8, 8, 128), (B, 4, 4, 192),
                   (B, 2, 2, 256), (B, 1, 1, 512)]
    fkeys = jax.random.split(kf, 5)
    feats = [0.5 * jax.random.normal(k, s, jnp.float32)
             for k, s in zip(fkeys, feat_shapes)]

    out = cmfpnet_decoder_forward(params, feats, num_classes=num_classes)
    out = jax.block_until_ready(out)
    assert out.shape == (B, num_classes, 32, 32), out.shape
    assert bool(jnp.all(jnp.isfinite(out)))
    print("KERNEL_OK")
</pallas_src>

<mosaic_0001>
module attributes {stable_mosaic.version = 11 : i64} {
  func.func @_cmfp_up_kernel(%arg0: i32, %arg1: memref<1x4x256xbf16, #tpu.memory_space<vmem>>, %arg2: memref<1x1x512xbf16, #tpu.memory_space<vmem>>, %arg3: memref<4x1xf32, #tpu.memory_space<vmem>>, %arg4: memref<256x1536xbf16, #tpu.memory_space<vmem>>, %arg5: memref<512x1536xbf16, #tpu.memory_space<vmem>>, %arg6: memref<1x1536xf32, #tpu.memory_space<vmem>>, %arg7: memref<9x1536xf32, #tpu.memory_space<vmem>>, %arg8: memref<1x1536xf32, #tpu.memory_space<vmem>>, %arg9: memref<1536x512xbf16, #tpu.memory_space<vmem>>, %arg10: memref<1x512xf32, #tpu.memory_space<vmem>>, %arg11: memref<512x1024xbf16, #tpu.memory_space<vmem>>, %arg12: memref<1x1024xf32, #tpu.memory_space<vmem>>, %arg13: memref<9x1024xf32, #tpu.memory_space<vmem>>, %arg14: memref<1x1024xf32, #tpu.memory_space<vmem>>, %arg15: memref<1024x512xbf16, #tpu.memory_space<vmem>>, %arg16: memref<1x512xf32, #tpu.memory_space<vmem>>, %arg17: memref<1x4x512xbf16, #tpu.memory_space<vmem>>, %arg18: memref<20x1536xf32, #tpu.memory_space<vmem>>, %arg19: memref<20x1024xf32, #tpu.memory_space<vmem>>) attributes {dimension_semantics = [#tpu.dimension_semantics<parallel>], iteration_bounds = array<i64: 2>, scalar_prefetch = 0 : i64, scratch_operands = 2 : i64, tpu.core_type = #tpu.core_type<tc>, window_params = [{transform_indices = @transform_0, window_bounds = array<i64: 1, 4, 256>}, {transform_indices = @transform_1, window_bounds = array<i64: 1, 1, 512>}, {pipeline_mode = #tpu.pipeline_mode<synchronous>, transform_indices = @transform_2, window_bounds = array<i64: 4, 1>}, {pipeline_mode = #tpu.pipeline_mode<synchronous>, transform_indices = @transform_3, window_bounds = array<i64: 256, 1536>}, {pipeline_mode = #tpu.pipeline_mode<synchronous>, transform_indices = @transform_4, window_bounds = array<i64: 512, 1536>}, {pipeline_mode = #tpu.pipeline_mode<synchronous>, transform_indices = @transform_5, window_bounds = array<i64: 1, 1536>}, {pipeline_mode = #tpu.pipeline_mode<synchronous>, transform_indices = @transform_6, window_bounds = array<i64: 9, 1536>}, {pipeline_mode = #tpu.pipeline_mode<synchronous>, transform_indices = @transform_7, window_bounds = array<i64: 1, 1536>}, {pipeline_mode = #tpu.pipeline_mode<synchronous>, transform_indices = @transform_8, window_bounds = array<i64: 1536, 512>}, {pipeline_mode = #tpu.pipeline_mode<synchronous>, transform_indices = @transform_9, window_bounds = array<i64: 1, 512>}, {pipeline_mode = #tpu.pipeline_mode<synchronous>, transform_indices = @transform_10, window_bounds = array<i64: 512, 1024>}, {pipeline_mode = #tpu.pipeline_mode<synchronous>, transform_indices = @transform_11, window_bounds = array<i64: 1, 1024>}, {pipeline_mode = #tpu.pipeline_mode<synchronous>, transform_indices = @transform_12, window_bounds = array<i64: 9, 1024>}, {pipeline_mode = #tpu.pipeline_mode<synchronous>, transform_indices = @transform_13, window_bounds = array<i64: 1, 1024>}, {pipeline_mode = #tpu.pipeline_mode<synchronous>, transform_indices = @transform_14, window_bounds = array<i64: 1024, 512>}, {pipeline_mode = #tpu.pipeline_mode<synchronous>, transform_indices = @transform_15, window_bounds = array<i64: 1, 512>}, {transform_indices = @transform_16, window_bounds = array<i64: 1, 4, 512>}]} {
    %c0 = arith.constant 0 : index
    %c0_0 = arith.constant 0 : index
    %c0_1 = arith.constant 0 : index
    %0 = vector.load %arg1[%c0, %c0_0, %c0_1] : memref<1x4x256xbf16, #tpu.memory_space<vmem>>, vector<1x4x256xbf16>
    %1 = vector.shape_cast %0 : vector<1x4x256xbf16> to vector<4x256xbf16>
    %c0_2 = arith.constant 0 : index
    %c0_3 = arith.constant 0 : index
    %c0_4 = arith.constant 0 : index
    %2 = vector.load %arg2[%c0_2, %c0_3, %c0_4] : memref<1x1x512xbf16, #tpu.memory_space<vmem>>, vector<1x1x512xbf16>
    %3 = vector.shape_cast %2 : vector<1x1x512xbf16> to vector<1x512xbf16>
    %c0_5 = arith.constant 0 : index
    %c0_6 = arith.constant 0 : index
    %4 = vector.load %arg5[%c0_5, %c0_6] : memref<512x1536xbf16, #tpu.memory_space<vmem>>, vector<512x1536xbf16>
    %cst = arith.constant dense<0.000000e+00> : vector<1x1536xf32>
    %5 = tpu.matmul %3, %4, %cst {dimension_numbers = #tpu.dot_dimension_numbers<[1], [0], [0], [1], [0, 0, 1, 1], [], []>} : vector<1x512xbf16>, vector<512x1536xbf16>, vector<1x1536xf32> -> vector<1x1536xf32>
    %c0_7 = arith.constant 0 : index
    %c0_8 = arith.constant 0 : index
    %6 = vector.load %arg4[%c0_7, %c0_8] : memref<256x1536xbf16, #tpu.memory_space<vmem>>, vector<256x1536xbf16>
    %cst_9 = arith.constant dense<0.000000e+00> : vector<4x1536xf32>
    %7 = tpu.matmul %1, %6, %cst_9 {dimension_numbers = #tpu.dot_dimension_numbers<[1], [0], [0], [1], [0, 0, 1, 1], [], []>} : vector<4x256xbf16>, vector<256x1536xbf16>, vector<4x1536xf32> -> vector<4x1536xf32>
    %8 = vector.broadcast %5 : vector<1x1536xf32> to vector<4x1536xf32>
    %9 = arith.addf %7, %8 : vector<4x1536xf32>
    %c0_10 = arith.constant 0 : index
    %c0_11 = arith.constant 0 : index
    %10 = vector.load %arg6[%c0_10, %c0_11] : memref<1x1536xf32, #tpu.memory_space<vmem>>, vector<1x1536xf32>
    %11 = vector.broadcast %10 : vector<1x1536xf32> to vector<4x1536xf32>
    %12 = arith.addf %9, %11 : vector<4x1536xf32>
    %13 = arith.negf %12 : vector<4x1536xf32>
    %14 = math.exp %13 : vector<4x1536xf32>
    %cst_12 = arith.constant 1.000000e+00 : f32
    %15 = vector.broadcast %cst_12 : f32 to vector<4x1536xf32>
    %16 = arith.addf %15, %14 : vector<4x1536xf32>
    %17 = arith.divf %15, %16 : vector<4x1536xf32>
    %18 = arith.mulf %12, %17 : vector<4x1536xf32>
    %cst_13 = arith.constant 0.000000e+00 : f32
    %19 = vector.broadcast %cst_13 : f32 to vector<8x1536xf32>
    %c0_14 = arith.constant 0 : index
    %c0_15 = arith.constant 0 : index
    %20 = vector.load %arg18[%c0_14, %c0_15] : memref<20x1536xf32, #tpu.memory_space<vmem>>, vector<8x1536xf32>
    tpu.vector_store %arg18[%c0_14, %c0_15], %19 {strides = array<i32>} : memref<20x1536xf32, #tpu.memory_space<vmem>>, vector<8x1536xf32>,
    %c12 = arith.constant 12 : index
    %c0_16 = arith.constant 0 : index
    %21 = vector.load %arg18[%c12, %c0_16] : memref<20x1536xf32, #tpu.memory_space<vmem>>, vector<8x1536xf32>
    tpu.vector_store %arg18[%c12, %c0_16], %19 {strides = array<i32>} : memref<20x1536xf32, #tpu.memory_space<vmem>>, vector<8x1536xf32>,
    %c8 = arith.constant 8 : index
    %c0_17 = arith.constant 0 : index
    %22 = vector.load %arg18[%c8, %c0_17] : memref<20x1536xf32, #tpu.memory_space<vmem>>, vector<4x1536xf32>
    tpu.vector_store %arg18[%c8, %c0_17], %18 {strides = array<i32>} : memref<20x1536xf32, #tpu.memory_space<vmem>>, vector<4x1536xf32>,
    %23 = tpu.iota {dimensions = array<i32: 0>} : vector<4x1xi32>
    %c1_i32 = arith.constant 1 : i32
    %24 = vector.broadcast %c1_i32 : i32 to vector<4x1xi32>
    %25 = arith.andi %23, %24 : vector<4x1xi32>
    %c0_i32 = arith.constant 0 : i32
    %26 = vector.broadcast %c0_i32 : i32 to vector<4x1xi32>
    %27 = arith.cmpi ne, %25, %26 : vector<4x1xi32>
    %28 = arith.extui %27 : vector<4x1xi1> to vector<4x1xi32>
    %29 = arith.sitofp %28 : vector<4x1xi32> to vector<4x1xf32>
    %c1_i32_18 = arith.constant 1 : i32
    %30 = vector.broadcast %c1_i32_18 : i32 to vector<4x1xi32>
    %31 = arith.cmpi ne, %25, %30 : vector<4x1xi32>
    %32 = arith.extui %31 : vector<4x1xi1> to vector<4x1xi32>
    %33 = arith.sitofp %32 : vector<4x1xi32> to vector<4x1xf32>
    %cst_19 = arith.constant 0.000000e+00 : f32
    %34 = vector.broadcast %cst_19 : f32 to vector<4x1536xf32>
    %c5 = arith.constant 5 : index
    %c0_20 = arith.constant 0 : index
    %35 = vector.load %arg18[%c5, %c0_20] : memref<20x1536xf32, #tpu.memory_space<vmem>>, vector<4x1536xf32>
    %c0_21 = arith.constant 0 : index
    %c0_22 = arith.constant 0 : index
    %36 = vector.load %arg7[%c0_21, %c0_22] : memref<9x1536xf32, #tpu.memory_space<vmem>>, vector<1x1536xf32>
    %37 = vector.broadcast %36 : vector<1x1536xf32> to vector<4x1536xf32>
    %38 = arith.mulf %35, %37 : vector<4x1536xf32>
    %39 = vector.broadcast %29 : vector<4x1xf32> to vector<4x1536xf32>
    %40 = arith.mulf %38, %39 : vector<4x1536xf32>
    %41 = arith.addf %34, %40 : vector<4x1536xf32>
    %c6 = arith.constant 6 : index
    %c0_23 = arith.constant 0 : index
    %42 = vector.load %arg18[%c6, %c0_23] : memref<20x1536xf32, #tpu.memory_space<vmem>>, vector<4x1536xf32>
    %c1 = arith.constant 1 : index
    %c0_24 = arith.constant 0 : index
    %43 = vector.load %arg7[%c1, %c0_24] : memref<9x1536xf32, #tpu.memory_space<vmem>>, vector<1x1536xf32>
    %44 = vector.broadcast %43 : vector<1x1536xf32> to vector<4x1536xf32>
    %45 = arith.mulf %42, %44 : vector<4x1536xf32>
    %46 = arith.addf %41, %45 : vector<4x1536xf32>
    %c7 = arith.constant 7 : index
    %c0_25 = arith.constant 0 : index
    %47 = vector.load %arg18[%c7, %c0_25] : memref<20x1536xf32, #tpu.memory_space<vmem>>, vector<4x1536xf32>
    %c2 = arith.constant 2 : index
    %c0_26 = arith.constant 0 : index
    %48 = vector.load %arg7[%c2, %c0_26] : memref<9x1536xf32, #tpu.memory_space<vmem>>, vector<1x1536xf32>
    %49 = vector.broadcast %48 : vector<1x1536xf32> to vector<4x1536xf32>
    %50 = arith.mulf %47, %49 : vector<4x1536xf32>
    %51 = vector.broadcast %33 : vector<4x1xf32> to vector<4x1536xf32>
    %52 = arith.mulf %50, %51 : vector<4x1536xf32>
    %53 = arith.addf %46, %52 : vector<4x1536xf32>
    %c7_27 = arith.constant 7 : index
    %c0_28 = arith.constant 0 : index
    %54 = vector.load %arg18[%c7_27, %c0_28] : memref<20x1536xf32, #tpu.memory_space<vmem>>, vector<4x1536xf32>
    %c3 = arith.constant 3 : index
    %c0_29 = arith.constant 0 : index
    %55 = vector.load %arg7[%c3, %c0_29] : memref<9x1536xf32, #tpu.memory_space<vmem>>, vector<1x1536xf32>
    %56 = vector.broadcast %55 : vector<1x1536xf32> to vector<4x1536xf32>
    %57 = arith.mulf %54, %56 : vector<4x1536xf32>
    %58 = vector.broadcast %29 : vector<4x1xf32> to vector<4x1536xf32>
    %59 = arith.mulf %57, %58 : vector<4x1536xf32>
    %60 = arith.addf %53, %59 : vector<4x1536xf32>
    %c8_30 = arith.constant 8 : index
    %c0_31 = arith.constant 0 : index
    %61 = vector.load %arg18[%c8_30, %c0_31] : memref<20x1536xf32, #tpu.memory_space<vmem>>, vector<4x1536xf32>
    %c4 = arith.constant 4 : index
    %c0_32 = arith.constant 0 : index
    %62 = vector.load %arg7[%c4, %c0_32] : memref<9x1536xf32, #tpu.memory_space<vmem>>, vector<1x1536xf32>
    %63 = vector.broadcast %62 : vector<1x1536xf32> to vector<4x1536xf32>
    %64 = arith.mulf %61, %63 : vector<4x1536xf32>
    %65 = arith.addf %60, %64 : vector<4x1536xf32>
    %c9 = arith.constant 9 : index
    %c0_33 = arith.constant 0 : index
    %66 = vector.load %arg18[%c9, %c0_33] : memref<20x1536xf32, #tpu.memory_space<vmem>>, vector<4x1536xf32>
    %c5_34 = arith.constant 5 : index
    %c0_35 = arith.constant 0 : index
    %67 = vector.load %arg7[%c5_34, %c0_35] : memref<9x1536xf32, #tpu.memory_space<vmem>>, vector<1x1536xf32>
    %68 = vector.broadcast %67 : vector<1x1536xf32> to vector<4x1536xf32>
    %69 = arith.mulf %66, %68 : vector<4x1536xf32>
    %70 = vector.broadcast %33 : vector<4x1xf32> to vector<4x1536xf32>
    %71 = arith.mulf %69, %70 : vector<4x1536xf32>
    %72 = arith.addf %65, %71 : vector<4x1536xf32>
    %c9_36 = arith.constant 9 : index
    %c0_37 = arith.constant 0 : index
    %73 = vector.load %arg18[%c9_36, %c0_37] : memref<20x1536xf32, #tpu.memory_space<vmem>>, vector<4x1536xf32>
    %c6_38 = arith.constant 6 : index
    %c0_39 = arith.constant 0 : index
    %74 = vector.load %arg7[%c6_38, %c0_39] : memref<9x1536xf32, #tpu.memory_space<vmem>>, vector<1x1536xf32>
    %75 = vector.broadcast %74 : vector<1x1536xf32> to vector<4x1536xf32>
    %76 = arith.mulf %73, %75 : vector<4x1536xf32>
    %77 = vector.broadcast %29 : vector<4x1xf32> to vector<4x1536xf32>
    %78 = arith.mulf %76, %77 : vector<4x1536xf32>
    %79 = arith.addf %72, %78 : vector<4x1536xf32>
    %c10 = arith.constant 10 : index
    %c0_40 = arith.constant 0 : index
    %80 = vector.load %arg18[%c10, %c0_40] : memref<20x1536xf32, #tpu.memory_space<vmem>>, vector<4x1536xf32>
    %c7_41 = arith.constant 7 : index
    %c0_42 = arith.constant 0 : index
    %81 = vector.load %arg7[%c7_41, %c0_42] : memref<9x1536xf32, #tpu.memory_space<vmem>>, vector<1x1536xf32>
    %82 = vector.broadcast %81 : vector<1x1536xf32> to vector<4x1536xf32>
    %83 = arith.mulf %80, %82 : vector<4x1536xf32>
    %84 = arith.addf %79, %83 : vector<4x1536xf32>
    %c11 = arith.constant 11 : index
    %c0_43 = arith.constant 0 : index
    %85 = vector.load %arg18[%c11, %c0_43] : memref<20x1536xf32, #tpu.memory_space<vmem>>, vector<4x1536xf32>
    %c8_44 = arith.constant 8 : index
    %c0_45 = arith.constant 0 : index
    %86 = vector.load %arg7[%c8_44, %c0_45] : memref<9x1536xf32, #tpu.memory_space<vmem>>, vector<1x1536xf32>
    %87 = vector.broadcast %86 : vector<1x1536xf32> to vector<4x1536xf32>
    %88 = arith.mulf %85, %87 : vector<4x1536xf32>
    %89 = vector.broadcast %33 : vector<4x1xf32> to vector<4x1536xf32>
    %90 = arith.mulf %88, %89 : vector<4x1536xf32>
    %91 = arith.addf %84, %90 : vector<4x1536xf32>
    %c0_46 = arith.constant 0 : index
    %c0_47 = arith.constant 0 : index
    %92 = vector.load %arg8[%c0_46, %c0_47] : memref<1x1536xf32, #tpu.memory_space<vmem>>, vector<1x1536xf32>
    %93 = vector.broadcast %92 : vector<1x1536xf32> to vector<4x1536xf32>
    %94 = arith.addf %91, %93 : vector<4x1536xf32>
    %95 = arith.negf %94 : vector<4x1536xf32>
    %96 = math.exp %95 : vector<4x1536xf32>
    %cst_48 = arith.constant 1.000000e+00 : f32
    %97 = vector.broadcast %cst_48 : f32 to vector<4x1536xf32>
    %98 = arith.addf %97, %96 : vector<4x1536xf32>
    %99 = arith.divf %97, %98 : vector<4x1536xf32>
    %100 = arith.mulf %94, %99 : vector<4x1536xf32>
    %101 = arith.truncf %100 : vector<4x1536xf32> to vector<4x1536xbf16>
    %c0_49 = arith.constant 0 : index
    %c0_50 = arith.constant 0 : index
    %102 = vector.load %arg9[%c0_49, %c0_50] : memref<1536x512xbf16, #tpu.memory_space<vmem>>, vector<1536x512xbf16>
    %cst_51 = arith.constant dense<0.000000e+00> : vector<4x512xf32>
    %103 = tpu.matmul %101, %102, %cst_51 {dimension_numbers = #tpu.dot_dimension_numbers<[1], [0], [0], [1], [0, 0, 1, 1], [], []>} : vector<4x1536xbf16>, vector<1536x512xbf16>, vector<4x512xf32> -> vector<4x512xf32>
    %c0_52 = arith.constant 0 : index
    %c0_53 = arith.constant 0 : index
    %104 = vector.load %arg10[%c0_52, %c0_53] : memref<1x512xf32, #tpu.memory_space<vmem>>, vector<1x512xf32>
    %105 = vector.broadcast %104 : vector<1x512xf32> to vector<4x512xf32>
    %106 = arith.addf %103, %105 : vector<4x512xf32>
    %cst_54 = arith.constant 0.000000e+00 : f32
    %107 = vector.broadcast %cst_54 : f32 to vector<4x512xf32>
    %108 = arith.maximumf %106, %107 : vector<4x512xf32>
    %109 = arith.truncf %108 : vector<4x512xf32> to vector<4x512xbf16>
    %c0_55 = arith.constant 0 : index
    %c0_56 = arith.constant 0 : index
    %110 = vector.load %arg11[%c0_55, %c0_56] : memref<512x1024xbf16, #tpu.memory_space<vmem>>, vector<512x1024xbf16>
    %cst_57 = arith.constant dense<0.000000e+00> : vector<4x1024xf32>
    %111 = tpu.matmul %109, %110, %cst_57 {dimension_numbers = #tpu.dot_dimension_numbers<[1], [0], [0], [1], [0, 0, 1, 1], [], []>} : vector<4x512xbf16>, vector<512x1024xbf16>, vector<4x1024xf32> -> vector<4x1024xf32>
    %c0_58 = arith.constant 0 : index
    %c0_59 = arith.constant 0 : index
    %112 = vector.load %arg12[%c0_58, %c0_59] : memref<1x1024xf32, #tpu.memory_space<vmem>>, vector<1x1024xf32>
    %113 = vector.broadcast %112 : vector<1x1024xf32> to vector<4x1024xf32>
    %114 = arith.addf %111, %113 : vector<4x1024xf32>
    %115 = arith.negf %114 : vector<4x1024xf32>
    %116 = math.exp %115 : vector<4x1024xf32>
    %cst_60 = arith.constant 1.000000e+00 : f32
    %117 = vector.broadcast %cst_60 : f32 to vector<4x1024xf32>
    %118 = arith.addf %117, %116 : vector<4x1024xf32>
    %119 = arith.divf %117, %118 : vector<4x1024xf32>
    %120 = arith.mulf %114, %119 : vector<4x1024xf32>
    %cst_61 = arith.constant 0.000000e+00 : f32
    %121 = vector.broadcast %cst_61 : f32 to vector<8x1024xf32>
    %c0_62 = arith.constant 0 : index
    %c0_63 = arith.constant 0 : index
    %122 = vector.load %arg19[%c0_62, %c0_63] : memref<20x1024xf32, #tpu.memory_space<vmem>>, vector<8x1024xf32>
    tpu.vector_store %arg19[%c0_62, %c0_63], %121 {strides = array<i32>} : memref<20x1024xf32, #tpu.memory_space<vmem>>, vector<8x1024xf32>,
    %c12_64 = arith.constant 12 : index
    %c0_65 = arith.constant 0 : index
    %123 = vector.load %arg19[%c12_64, %c0_65] : memref<20x1024xf32, #tpu.memory_space<vmem>>, vector<8x1024xf32>
    tpu.vector_store %arg19[%c12_64, %c0_65], %121 {strides = array<i32>} : memref<20x1024xf32, #tpu.memory_space<vmem>>, vector<8x1024xf32>,
    %c8_66 = arith.constant 8 : index
    %c0_67 = arith.constant 0 : index
    %124 = vector.load %arg19[%c8_66, %c0_67] : memref<20x1024xf32, #tpu.memory_space<vmem>>, vector<4x1024xf32>
    tpu.vector_store %arg19[%c8_66, %c0_67], %120 {strides = array<i32>} : memref<20x1024xf32, #tpu.memory_space<vmem>>, vector<4x1024xf32>,
    %125 = tpu.iota {dimensions = array<i32: 0>} : vector<4x1xi32>
    %c1_i32_68 = arith.constant 1 : i32
    %126 = vector.broadcast %c1_i32_68 : i32 to vector<4x1xi32>
    %127 = arith.andi %125, %126 : vector<4x1xi32>
    %c0_i32_69 = arith.constant 0 : i32
    %128 = vector.broadcast %c0_i32_69 : i32 to vector<4x1xi32>
    %129 = arith.cmpi ne, %127, %128 : vector<4x1xi32>
    %130 = arith.extui %129 : vector<4x1xi1> to vector<4x1xi32>
    %131 = arith.sitofp %130 : vector<4x1xi32> to vector<4x1xf32>
    %c1_i32_70 = arith.constant 1 : i32
    %132 = vector.broadcast %c1_i32_70 : i32 to vector<4x1xi32>
    %133 = arith.cmpi ne, %127, %132 : vector<4x1xi32>
    %134 = arith.extui %133 : vector<4x1xi1> to vector<4x1xi32>
    %135 = arith.sitofp %134 : vector<4x1xi32> to vector<4x1xf32>
    %cst_71 = arith.constant 0.000000e+00 : f32
    %136 = vector.broadcast %cst_71 : f32 to vector<4x1024xf32>
    %c5_72 = arith.constant 5 : index
    %c0_73 = arith.constant 0 : index
    %137 = vector.load %arg19[%c5_72, %c0_73] : memref<20x1024xf32, #tpu.memory_space<vmem>>, vector<4x1024xf32>
    %c0_74 = arith.constant 0 : index
    %c0_75 = arith.constant 0 : index
    %138 = vector.load %arg13[%c0_74, %c0_75] : memref<9x1024xf32, #tpu.memory_space<vmem>>, vector<1x1024xf32>
    %139 = vector.broadcast %138 : vector<1x1024xf32> to vector<4x1024xf32>
    %140 = arith.mulf %137, %139 : vector<4x1024xf32>
    %141 = vector.broadcast %131 : vector<4x1xf32> to vector<4x1024xf32>
    %142 = arith.mulf %140, %141 : vector<4x1024xf32>
    %143 = arith.addf %136, %142 : vector<4x1024xf32>
    %c6_76 = arith.constant 6 : index
    %c0_77 = arith.constant 0 : index
    %144 = vector.load %arg19[%c6_76, %c0_77] : memref<20x1024xf32, #tpu.memory_space<vmem>>, vector<4x1024xf32>
    %c1_78 = arith.constant 1 : index
    %c0_79 = arith.constant 0 : index
    %145 = vector.load %arg13[%c1_78, %c0_79] : memref<9x1024xf32, #tpu.memory_space<vmem>>, vector<1x1024xf32>
    %146 = vector.broadcast %145 : vector<1x1024xf32> to vector<4x1024xf32>
    %147 = arith.mulf %144, %146 : vector<4x1024xf32>
    %148 = arith.addf %143, %147 : vector<4x1024xf32>
    %c7_80 = arith.constant 7 : index
    %c0_81 = arith.constant 0 : index
    %149 = vector.load %arg19[%c7_80, %c0_81] : memref<20x1024xf32, #tpu.memory_space<vmem>>, vector<4x1024xf32>
    %c2_82 = arith.constant 2 : index
    %c0_83 = arith.constant 0 : index
    %150 = vector.load %arg13[%c2_82, %c0_83] : memref<9x1024xf32, #tpu.memory_space<vmem>>, vector<1x1024xf32>
    %151 = vector.broadcast %150 : vector<1x1024xf32> to vector<4x1024xf32>
    %152 = arith.mulf %149, %151 : vector<4x1024xf32>
    %153 = vector.broadcast %135 : vector<4x1xf32> to vector<4x1024xf32>
    %154 = arith.mulf %152, %153 : vector<4x1024xf32>
    %155 = arith.addf %148, %154 : vector<4x1024xf32>
    %c7_84 = arith.constant 7 : index
    %c0_85 = arith.constant 0 : index
    %156 = vector.load %arg19[%c7_84, %c0_85] : memref<20x1024xf32, #tpu.memory_space<vmem>>, vector<4x1024xf32>
    %c3_86 = arith.constant 3 : index
    %c0_87 = arith.constant 0 : index
    %157 = vector.load %arg13[%c3_86, %c0_87] : memref<9x1024xf32, #tpu.memory_space<vmem>>, vector<1x1024xf32>
    %158 = vector.broadcast %157 : vector<1x1024xf32> to vector<4x1024xf32>
    %159 = arith.mulf %156, %158 : vector<4x1024xf32>
    %160 = vector.broadcast %131 : vector<4x1xf32> to vector<4x1024xf32>
    %161 = arith.mulf %159, %160 : vector<4x1024xf32>
    %162 = arith.addf %155, %161 : vector<4x1024xf32>
    %c8_88 = arith.constant 8 : index
    %c0_89 = arith.constant 0 : index
    %163 = vector.load %arg19[%c8_88, %c0_89] : memref<20x1024xf32, #tpu.memory_space<vmem>>, vector<4x1024xf32>
    %c4_90 = arith.constant 4 : index
    %c0_91 = arith.constant 0 : index
    %164 = vector.load %arg13[%c4_90, %c0_91] : memref<9x1024xf32, #tpu.memory_space<vmem>>, vector<1x1024xf32>
    %165 = vector.broadcast %164 : vector<1x1024xf32> to vector<4x1024xf32>
    %166 = arith.mulf %163, %165 : vector<4x1024xf32>
    %167 = arith.addf %162, %166 : vector<4x1024xf32>
    %c9_92 = arith.constant 9 : index
    %c0_93 = arith.constant 0 : index
    %168 = vector.load %arg19[%c9_92, %c0_93] : memref<20x1024xf32, #tpu.memory_space<vmem>>, vector<4x1024xf32>
    %c5_94 = arith.constant 5 : index
    %c0_95 = arith.constant 0 : index
    %169 = vector.load %arg13[%c5_94, %c0_95] : memref<9x1024xf32, #tpu.memory_space<vmem>>, vector<1x1024xf32>
    %170 = vector.broadcast %169 : vector<1x1024xf32> to vector<4x1024xf32>
    %171 = arith.mulf %168, %170 : vector<4x1024xf32>
    %172 = vector.broadcast %135 : vector<4x1xf32> to vector<4x1024xf32>
    %173 = arith.mulf %171, %172 : vector<4x1024xf32>
    %174 = arith.addf %167, %173 : vector<4x1024xf32>
    %c9_96 = arith.constant 9 : index
    %c0_97 = arith.constant 0 : index
    %175 = vector.load %arg19[%c9_96, %c0_97] : memref<20x1024xf32, #tpu.memory_space<vmem>>, vector<4x1024xf32>
    %c6_98 = arith.constant 6 : index
    %c0_99 = arith.constant 0 : index
    %176 = vector.load %arg13[%c6_98, %c0_99] : memref<9x1024xf32, #tpu.memory_space<vmem>>, vector<1x1024xf32>
    %177 = vector.broadcast %176 : vector<1x1024xf32> to vector<4x1024xf32>
    %178 = arith.mulf %175, %177 : vector<4x1024xf32>
    %179 = vector.broadcast %131 : vector<4x1xf32> to vector<4x1024xf32>
    %180 = arith.mulf %178, %179 : vector<4x1024xf32>
    %181 = arith.addf %174, %180 : vector<4x1024xf32>
    %c10_100 = arith.constant 10 : index
    %c0_101 = arith.constant 0 : index
    %182 = vector.load %arg19[%c10_100, %c0_101] : memref<20x1024xf32, #tpu.memory_space<vmem>>, vector<4x1024xf32>
    %c7_102 = arith.constant 7 : index
    %c0_103 = arith.constant 0 : index
    %183 = vector.load %arg13[%c7_102, %c0_103] : memref<9x1024xf32, #tpu.memory_space<vmem>>, vector<1x1024xf32>
    %184 = vector.broadcast %183 : vector<1x1024xf32> to vector<4x1024xf32>
    %185 = arith.mulf %182, %184 : vector<4x1024xf32>
    %186 = arith.addf %181, %185 : vector<4x1024xf32>
    %c11_104 = arith.constant 11 : index
    %c0_105 = arith.constant 0 : index
    %187 = vector.load %arg19[%c11_104, %c0_105] : memref<20x1024xf32, #tpu.memory_space<vmem>>, vector<4x1024xf32>
    %c8_106 = arith.constant 8 : index
    %c0_107 = arith.constant 0 : index
    %188 = vector.load %arg13[%c8_106, %c0_107] : memref<9x1024xf32, #tpu.memory_space<vmem>>, vector<1x1024xf32>
    %189 = vector.broadcast %188 : vector<1x1024xf32> to vector<4x1024xf32>
    %190 = arith.mulf %187, %189 : vector<4x1024xf32>
    %191 = vector.broadcast %135 : vector<4x1xf32> to vector<4x1024xf32>
    %192 = arith.mulf %190, %191 : vector<4x1024xf32>
    %193 = arith.addf %186, %192 : vector<4x1024xf32>
    %c0_108 = arith.constant 0 : index
    %c0_109 = arith.constant 0 : index
    %194 = vector.load %arg14[%c0_108, %c0_109] : memref<1x1024xf32, #tpu.memory_space<vmem>>, vector<1x1024xf32>
    %195 = vector.broadcast %194 : vector<1x1024xf32> to vector<4x1024xf32>
    %196 = arith.addf %193, %195 : vector<4x1024xf32>
    %197 = arith.negf %196 : vector<4x1024xf32>
    %198 = math.exp %197 : vector<4x1024xf32>
    %cst_110 = arith.constant 1.000000e+00 : f32
    %199 = vector.broadcast %cst_110 : f32 to vector<4x1024xf32>
    %200 = arith.addf %199, %198 : vector<4x1024xf32>
    %201 = arith.divf %199, %200 : vector<4x1024xf32>
    %202 = arith.mulf %196, %201 : vector<4x1024xf32>
    %203 = arith.truncf %202 : vector<4x1024xf32> to vector<4x1024xbf16>
    %c0_111 = arith.constant 0 : index
    %c0_112 = arith.constant 0 : index
    %204 = vector.load %arg15[%c0_111, %c0_112] : memref<1024x512xbf16, #tpu.memory_space<vmem>>, vector<1024x512xbf16>
    %cst_113 = arith.constant dense<0.000000e+00> : vector<4x512xf32>
    %205 = tpu.matmul %203, %204, %cst_113 {dimension_numbers = #tpu.dot_dimension_numbers<[1], [0], [0], [1], [0, 0, 1, 1], [], []>} : vector<4x1024xbf16>, vector<1024x512xbf16>, vector<4x512xf32> -> vector<4x512xf32>
    %c0_114 = arith.constant 0 : index
    %c0_115 = arith.constant 0 : index
    %206 = vector.load %arg16[%c0_114, %c0_115] : memref<1x512xf32, #tpu.memory_space<vmem>>, vector<1x512xf32>
    %207 = vector.broadcast %206 : vector<1x512xf32> to vector<4x512xf32>
    %208 = arith.addf %205, %207 : vector<4x512xf32>
    %209 = arith.addf %208, %108 : vector<4x512xf32>
    %cst_116 = arith.constant 0.000000e+00 : f32
    %210 = vector.broadcast %cst_116 : f32 to vector<4x512xf32>
    %211 = arith.maximumf %209, %210 : vector<4x512xf32>
    %212 = arith.truncf %211 : vector<4x512xf32> to vector<4x512xbf16>
    %c0_117 = arith.constant 0 : index
    %c0_118 = arith.constant 0 : index
    %c0_119 = arith.constant 0 : index
    %213 = vector.load %arg17[%c0_117, %c0_118, %c0_119] : memref<1x4x512xbf16, #tpu.memory_space<vmem>>, vector<1x4x512xbf16>
    %214 = vector.shape_cast %213 : vector<1x4x512xbf16> to vector<4x512xbf16>
    %215 = vector.shape_cast %212 : vector<4x512xbf16> to vector<1x4x512xbf16>
    tpu.vector_store %arg17[%c0_117, %c0_118, %c0_119], %215 {strides = array<i32>} : memref<1x4x512xbf16, #tpu.memory_space<vmem>>, vector<1x4x512xbf16>,
    return
  }
  func.func @transform_0(%arg0: i32) -> (i32, i32, i32) {
    %c0_i32 = arith.constant 0 : i32
    %c0_i32_0 = arith.constant 0 : i32
    %c0_i32_1 = arith.constant 0 : i32
    return %arg0, %c0_i32, %c0_i32_0 : i32, i32, i32
  }
  func.func @transform_1(%arg0: i32) -> (i32, i32, i32) {
    %c0_i32 = arith.constant 0 : i32
    %c0_i32_0 = arith.constant 0 : i32
    %c0_i32_1 = arith.constant 0 : i32
    return %arg0, %c0_i32, %c0_i32_0 : i32, i32, i32
  }
  func.func @transform_2(%arg0: i32) -> (i32, i32) {
    %c0_i32 = arith.constant 0 : i32
    %c0_i32_0 = arith.constant 0 : i32
    %c0_i32_1 = arith.constant 0 : i32
    return %c0_i32, %c0_i32_0 : i32, i32
  }
  func.func @transform_3(%arg0: i32) -> (i32, i32) {
    %c0_i32 = arith.constant 0 : i32
    %c0_i32_0 = arith.constant 0 : i32
    %c0_i32_1 = arith.constant 0 : i32
    return %c0_i32, %c0_i32_0 : i32, i32
  }
  func.func @transform_4(%arg0: i32) -> (i32, i32) {
    %c0_i32 = arith.constant 0 : i32
    %c0_i32_0 = arith.constant 0 : i32
    %c0_i32_1 = arith.constant 0 : i32
    return %c0_i32, %c0_i32_0 : i32, i32
  }
  func.func @transform_5(%arg0: i32) -> (i32, i32) {
    %c0_i32 = arith.constant 0 : i32
    %c0_i32_0 = arith.constant 0 : i32
    %c0_i32_1 = arith.constant 0 : i32
    return %c0_i32, %c0_i32_0 : i32, i32
  }
  func.func @transform_6(%arg0: i32) -> (i32, i32) {
    %c0_i32 = arith.constant 0 : i32
    %c0_i32_0 = arith.constant 0 : i32
    %c0_i32_1 = arith.constant 0 : i32
    return %c0_i32, %c0_i32_0 : i32, i32
  }
  func.func @transform_7(%arg0: i32) -> (i32, i32) {
    %c0_i32 = arith.constant 0 : i32
    %c0_i32_0 = arith.constant 0 : i32
    %c0_i32_1 = arith.constant 0 : i32
    return %c0_i32, %c0_i32_0 : i32, i32
  }
  func.func @transform_8(%arg0: i32) -> (i32, i32) {
    %c0_i32 = arith.constant 0 : i32
    %c0_i32_0 = arith.constant 0 : i32
    %c0_i32_1 = arith.constant 0 : i32
    return %c0_i32, %c0_i32_0 : i32, i32
  }
  func.func @transform_9(%arg0: i32) -> (i32, i32) {
    %c0_i32 = arith.constant 0 : i32
    %c0_i32_0 = arith.constant 0 : i32
    %c0_i32_1 = arith.constant 0 : i32
    return %c0_i32, %c0_i32_0 : i32, i32
  }
  func.func @transform_10(%arg0: i32) -> (i32, i32) {
    %c0_i32 = arith.constant 0 : i32
    %c0_i32_0 = arith.constant 0 : i32
    %c0_i32_1 = arith.constant 0 : i32
    return %c0_i32, %c0_i32_0 : i32, i32
  }
  func.func @transform_11(%arg0: i32) -> (i32, i32) {
    %c0_i32 = arith.constant 0 : i32
    %c0_i32_0 = arith.constant 0 : i32
    %c0_i32_1 = arith.constant 0 : i32
    return %c0_i32, %c0_i32_0 : i32, i32
  }
  func.func @transform_12(%arg0: i32) -> (i32, i32) {
    %c0_i32 = arith.constant 0 : i32
    %c0_i32_0 = arith.constant 0 : i32
    %c0_i32_1 = arith.constant 0 : i32
    return %c0_i32, %c0_i32_0 : i32, i32
  }
  func.func @transform_13(%arg0: i32) -> (i32, i32) {
    %c0_i32 = arith.constant 0 : i32
    %c0_i32_0 = arith.constant 0 : i32
    %c0_i32_1 = arith.constant 0 : i32
    return %c0_i32, %c0_i32_0 : i32, i32
  }
  func.func @transform_14(%arg0: i32) -> (i32, i32) {
    %c0_i32 = arith.constant 0 : i32
    %c0_i32_0 = arith.constant 0 : i32
    %c0_i32_1 = arith.constant 0 : i32
    return %c0_i32, %c0_i32_0 : i32, i32
  }
  func.func @transform_15(%arg0: i32) -> (i32, i32) {
    %c0_i32 = arith.constant 0 : i32
    %c0_i32_0 = arith.constant 0 : i32
    %c0_i32_1 = arith.constant 0 : i32
    return %c0_i32, %c0_i32_0 : i32, i32
  }
  func.func @transform_16(%arg0: i32) -> (i32, i32, i32) {
    %c0_i32 = arith.constant 0 : i32
    %c0_i32_0 = arith.constant 0 : i32
    %c0_i32_1 = arith.constant 0 : i32
    return %arg0, %c0_i32, %c0_i32_0 : i32, i32, i32
  }
}

</mosaic_0001>

<bundles_post_ra>
// kernel: tpu_custom_call.1
= control target key start
LH: loop header
LB: loop body
LE: loop exit
PB: predicated region body
PF: predicated region fallthrough
CT: control target
= control target key end

     0   :  { %s22590_s0 = inlined_call_operand.hbm [shape: bf16[2,4,256], index: 0, kind: input, shape index: {}]   ;;  %s22591_s1 = inlined_call_operand.vmem [shape: bf16[2,1,512], index: 1, kind: input, shape index: {}]   ;;  %s22592_s2 = inlined_call_operand.vmem [shape: f32[4,1], index: 2, kind: input, shape index: {}]   ;;  %s22593_s3 = inlined_call_operand.hbm [shape: bf16[256,1536], index: 3, kind: input, shape index: {}]   ;;  %s22594_s4 = inlined_call_operand.hbm [shape: bf16[512,1536], index: 4, kind: input, shape index: {}]   ;;  %s22595_s5 = inlined_call_operand.hbm [shape: f32[1,1536], index: 5, kind: input, shape index: {}]   ;;  %s22596_s6 = inlined_call_operand.hbm [shape: f32[9,1536], index: 6, kind: input, shape index: {}]   ;;  %s22597_s7 = inlined_call_operand.hbm [shape: f32[1,1536], index: 7, kind: input, shape index: {}]   ;;  %s22598_s8 = inlined_call_operand.hbm [shape: bf16[1536,512], index: 8, kind: input, shape index: {}]   ;;  %s22599_s9 = inlined_call_operand.hbm [shape: f32[1,512], index: 9, kind: input, shape index: {}]   ;;  %s22600_s10 = inlined_call_operand.hbm [shape: bf16[512,1024], index: 10, kind: input, shape index: {}]   ;;  %s22601_s11 = inlined_call_operand.hbm [shape: f32[1,1024], index: 11, kind: input, shape index: {}]   ;;  %s22602_s12 = inlined_call_operand.hbm [shape: f32[9,1024], index: 12, kind: input, shape index: {}]   ;;  %s22603_s13 = inlined_call_operand.hbm [shape: f32[1,1024], index: 13, kind: input, shape index: {}]   ;;  %s22604_s14 = inlined_call_operand.hbm [shape: bf16[1024,512], index: 14, kind: input, shape index: {}]   ;;  %s22605_s15 = inlined_call_operand.hbm [shape: f32[1,512], index: 15, kind: input, shape index: {}]   ;;  %s22606_s16 = inlined_call_operand.hbm [shape: bf16[2,4,512], index: 16, kind: output, shape index: {}]  }
   0x1   :  { %22709 = sst [smem:[#allocation105_spill]] %s22590_s0 }
   0x2   :  { %22710 = sst [smem:[#allocation106_spill]] %s22591_s1 }
   0x3   :  { %22711 = sst [smem:[#allocation107_spill]] %s22593_s3 }
   0x4   :  { %22712 = sst [smem:[#allocation108_spill]] %s22594_s4 }
   0x5   :  { %22713 = sst [smem:[#allocation109_spill]] %s22595_s5 }
   0x6   :  { %22714 = sst [smem:[#allocation110_spill]] %s22596_s6 }
   0x7   :  { %22715 = sst [smem:[#allocation111_spill]] %s22597_s7 }
   0x8   :  { %22716 = sst [smem:[#allocation112_spill]] %s22598_s8 }
   0x9   :  { %22717 = sst [smem:[#allocation113_spill]] %s22599_s9 }
   0xa   :  { %22718 = sst [smem:[#allocation114_spill]] %s22600_s10 }
   0xb   :  { %22719 = sst [smem:[#allocation115_spill]] %s22606_s16 }
   0xc   :  { %21 = vsyncpa [#allocation5], 0 }
   0xd   :  { %23 = vsyncpa [#allocation5 + $0x1], 0 }
   0xe   :  { %24 = vsyncpa [#allocation8], 0 }
   0xf   :  { %25 = vsyncpa [#allocation11], 0 }
  0x10   :  { %26 = vsyncpa [#allocation14], 0 }
  0x11   :  { %27 = vsyncpa [#allocation17], 0 }
  0x12   :  { %28 = vsyncpa [#allocation20], 0 }
  0x13   :  { %29 = vsyncpa [#allocation23], 0 }
  0x14   :  { %30 = vsyncpa [#allocation26], 0 }
  0x15   :  { %31 = vsyncpa [#allocation6], 0 }
  0x16   :  { %33 = vsyncpa [#allocation6 + $0x1], 0  ;;  %s19989_s20 = smov 0   ;;  %s19991_s2 = smov 0  }
  0x17   :  { %s19993_s21 = smov 0   ;;  %s19995_s22 = smov 0  }
  0x18 LB: > { %s19876_s23 = smov [#allocation7]   ;;  %s20010_s25 = sadd.s32 4294967295, %s19874_s22   ;;  %s19874_s22 = sphi %s19995_s22, %s23071_s22   ;;  %s19870_s21 = sphi %s19993_s21, %s23070_s21   ;;  %s19866_s2 = sphi %s19991_s2, %s23069_s2   ;;  %s19862_s20 = sphi %s19989_s20, %s23068_s20  }
  0x19   : > { %s431_s24 = sshll.u32 %s19876_s23, 4  ;;  %p15573_p0 = scmp.ge.s32.totalorder %s19874_s22, 1  ;;  %s432_s24 = int_to_ptr.vmem [resolvable:$true] %s431_s24 }
  0x1a   : > { %p22610_p1 = scmp.eq.s32.totalorder %s20010_s25, 0  ;;  %p416_p2 = scmp.lt.s32.totalorder %s19874_s22, 3 }
  0x1b   : > { %s19877_s27 = smov [#allocation10]   ;;  %s19878_s0 = smov [#allocation13]  }
  0x1c   : > { %p20015_p3 = pnand %p15573_p0, %p416_p2  ;;  %s458_s28 = sshll.u32 %s19877_s27, 4  ;;  %s459_s28 = int_to_ptr.vmem [resolvable:$true] %s458_s28 }
  0x1d   : > { %s482_s30 = sshll.u32 %s19878_s0, 4  ;;  %s19427_s18 = scalar_lea.vmem %s432_s24, 24576  ;;  %s20028_s30 = int_to_ptr.vmem [resolvable:$true] %s482_s30 }
  0x1e   : > { %s22720_s26 = scalar_select %p20015_p3, 1, 0 }
  0x1f   : > { %p17209_p5 = pneg %p20015_p3  ;;  %p19428_p8 = scmp.ne.s32.totalorder %s432_s24, %s19427_s18 }
  0x20   : > { %p19435_p11 = scmp.lt.s32.totalorder %s432_s24, %s432_s24  ;;  %p19436_p12 = scmp.lt.s32.totalorder %s19427_s18, %s19427_s18 }
  0x21   : > { %p20024_p6 = pnand %p17209_p5, %p22610_p1 }
  0x22   : > { %p19437_p13 = por %p19436_p12, %p19435_p11 }
  0x23   : > { %p20032_p7 = pneg %p20024_p6 }
  0x25   : > { %p19430_p9 = pnand %p19428_p8, %p20032_p7 }
  0x27   : > { %p19431_p10 = pneg %p19430_p9 }
  0x29   : > { %p19438_p0 = pnand %p19437_p13, %p19431_p10 }
  0x2b   : > { %19441 = shalt.err (!%p19438_p0)
}
  0x2c   : > { %s22609_s19 = smov 768   ;;  %s19880_s23 = smov 48  }
  0x2d   : > { %s22723_s3 = sld [smem:[#allocation107_spill]]  ;;  %s19453_s16 = scalar_lea.vmem %s459_s28, 192 }
  0x2e   : > { %p19454_p2 = scmp.ne.s32.totalorder %s459_s28, %s19453_s16  ;;  %p19461_p9 = scmp.lt.s32.totalorder %s459_s28, %s459_s28 }
  0x2f   : > { %p19462_p10 = scmp.lt.s32.totalorder %s19453_s16, %s19453_s16 }
  0x30   : > { %p19456_p5 = pnand %p19454_p2, %p20032_p7 }
  0x31   : > { %p19463_p11 = por %p19462_p10, %p19461_p9 }
  0x32   : > { %p19457_p8 = pneg %p19456_p5 }
  0x33   : > { %17212 = dma.hbm_to_vmem [thread:$0]  (!%p20024_p6), %s22723_s3, 24576, %s432_s24, [#allocation8], %s22609_s19, %s22609_s19, %s19880_s23  }
  0x34   : > { %p19464_p12 = pnand %p19463_p11, %p19457_p8 }
  0x36   : > { %19467 = shalt.err (!%p19464_p12)
}
  0x37   : > { %s22724_s5 = sld [smem:[#allocation109_spill]]  ;;  %s19479_s24 = scalar_lea.vmem %s20028_s30, 192 }
  0x38   : > { %p19480_p13 = scmp.ne.s32.totalorder %s20028_s30, %s19479_s24  ;;  %p19487_p5 = scmp.lt.s32.totalorder %s20028_s30, %s20028_s30 }
  0x39   : > { %p19488_p9 = scmp.lt.s32.totalorder %s19479_s24, %s19479_s24 }
  0x3a   : > { %p19482_p0 = pnand %p19480_p13, %p20032_p7 }
  0x3b   : > { %p19489_p8 = por %p19488_p9, %p19487_p5 }
  0x3c   : > { %p19483_p2 = pneg %p19482_p0 }
  0x3d   : > { %17218 = dma.hbm_to_vmem [thread:$0]  (!%p20024_p6), %s22724_s5, 192, %s459_s28, [#allocation11]  }
  0x3e   : > { %p19490_p10 = pnand %p19489_p8, %p19483_p2 }
  0x40   : > { %19493 = shalt.err (!%p19490_p10)
}
  0x41   : > { %s22725_s7 = sld [smem:[#allocation111_spill]]  ;;  %s19881_s28 = smov [#allocation16]  }
  0x42   : > { %s506_s27 = sshll.u32 %s19881_s28, 4  ;;  %s19882_s0 = smov [#allocation19]   ;;  %s507_s27 = int_to_ptr.vmem [resolvable:$true] %s506_s27 }
  0x43   : > { %s530_s18 = sshll.u32 %s19882_s0, 4  ;;  %s19505_s19 = scalar_lea.vmem %s507_s27, 64  ;;  %s531_s18 = int_to_ptr.vmem [resolvable:$true] %s530_s18 }
  0x44   : > { %p19506_p11 = scmp.ne.s32.totalorder %s507_s27, %s19505_s19  ;;  %p19513_p0 = scmp.lt.s32.totalorder %s507_s27, %s507_s27 }
  0x45   : > { %p19514_p2 = scmp.lt.s32.totalorder %s19505_s19, %s19505_s19 }
  0x46   : > { %p19508_p12 = pnand %p19506_p11, %p20032_p7 }
  0x47   : > { %17224 = dma.hbm_to_vmem [thread:$0]  (!%p20024_p6), %s22725_s7, 192, %s20028_s30, [#allocation14]  }
  0x48   : > { %p19509_p13 = pneg %p19508_p12  ;;  %p19515_p5 = por %p19514_p2, %p19513_p0 }
  0x4a   : > { %p19516_p9 = pnand %p19515_p5, %p19509_p13 }
  0x4c   : > { %19519 = shalt.err (!%p19516_p9)
}
  0x4d   : > { %s22726_s9 = sld [smem:[#allocation113_spill]]  ;;  %s19531_s30 = scalar_lea.vmem %s531_s18, 128 }
  0x4e   : > { %p19532_p8 = scmp.ne.s32.totalorder %s531_s18, %s19531_s30  ;;  %p19539_p11 = scmp.lt.s32.totalorder %s531_s18, %s531_s18 }
  0x4f   : > { %p19540_p12 = scmp.lt.s32.totalorder %s19531_s30, %s19531_s30 }
  0x50   : > { %p19534_p10 = pnand %p19532_p8, %p20032_p7 }
  0x51   : > { %p19541_p1 = por %p19540_p12, %p19539_p11 }
  0x52   : > { %p19535_p4 = pneg %p19534_p10 }
  0x53   : > { %17230 = dma.hbm_to_vmem [thread:$0]  (!%p20024_p6), %s22726_s9, 64, %s507_s27, [#allocation17]  }
  0x54   : > { %p19542_p3 = pnand %p19541_p1, %p19535_p4 }
  0x56   : > { %19545 = shalt.err (!%p19542_p3)
}
  0x57   : > { %17236 = dma.hbm_to_vmem [thread:$0]  (!%p20024_p6), %s22601_s11, 128, %s531_s18, [#allocation20]  }
  0x58   : > { %s19883_s28 = smov [#allocation22]   ;;  %s19884_s0 = smov [#allocation9]  }
  0x59   : > { %s554_s27 = sshll.u32 %s19883_s28, 4  ;;  %s444_s24 = sshll.u32 %s19884_s0, 4  ;;  %s555_s27 = int_to_ptr.vmem [resolvable:$true] %s554_s27  ;;  %s445_s24 = int_to_ptr.vmem [resolvable:$true] %s444_s24 }
  0x5a   : > { %s19557_s1 = scalar_lea.vmem %s555_s27, 128  ;;  %p19565_p5 = scmp.lt.s32.totalorder %s555_s27, %s555_s27 }
  0x5b   : > { %p19558_p13 = scmp.ne.s32.totalorder %s555_s27, %s19557_s1  ;;  %p19566_p1 = scmp.lt.s32.totalorder %s19557_s1, %s19557_s1 }
  0x5d   : > { %p19560_p0 = pnand %p19558_p13, %p20032_p7  ;;  %p19567_p3 = por %p19566_p1, %p19565_p5 }
  0x5f   : > { %p19561_p2 = pneg %p19560_p0 }
  0x61   : > { %p19568_p4 = pnand %p19567_p3, %p19561_p2 }
  0x63   : > { %19571 = shalt.err (!%p19568_p4)
}
  0x64   : > { %17242 = dma.hbm_to_vmem [thread:$0]  (!%p20024_p6), %s22603_s13, 128, %s555_s27, [#allocation23]  }
  0x65   : > { %s19583_s18 = scalar_lea.vmem %s445_s24, 49152  ;;  %p19591_p11 = scmp.lt.s32.totalorder %s445_s24, %s445_s24 }
  0x66   : > { %p19584_p9 = scmp.ne.s32.totalorder %s445_s24, %s19583_s18  ;;  %p19592_p12 = scmp.lt.s32.totalorder %s19583_s18, %s19583_s18 }
  0x68   : > { %p19586_p8 = pnand %p19584_p9, %p20032_p7  ;;  %p19593_p13 = por %p19592_p12, %p19591_p11 }
  0x6a   : > { %p19587_p10 = pneg %p19586_p8 }
  0x6c   : > { %p19594_p0 = pnand %p19593_p13, %p19587_p10 }
  0x6e   : > { %19597 = shalt.err (!%p19594_p0)
}
  0x6f   : > { %s22727_s16 = smov 768   ;;  %s22728_s4 = sld [smem:[#allocation108_spill]] }
  0x70   : > { %s19885_s27 = smov [#allocation12]  }
  0x71   : > { %s468_s1 = sshll.u32 %s19885_s27, 4  ;;  %s469_s1 = int_to_ptr.vmem [resolvable:$true] %s468_s1 }
  0x72   : > { %s19609_s30 = scalar_lea.vmem %s469_s1, 3072  ;;  %p19617_p3 = scmp.lt.s32.totalorder %s469_s1, %s469_s1 }
  0x73   : > { %p19610_p2 = scmp.ne.s32.totalorder %s469_s1, %s19609_s30  ;;  %p19618_p4 = scmp.lt.s32.totalorder %s19609_s30, %s19609_s30 }
  0x75   : > { %17215 = dma.hbm_to_vmem [thread:$0]  (!%p20024_p6), %s22728_s4, 49152, %s445_s24, [#allocation8], %s22727_s16, %s22727_s16, %s19880_s23  }
  0x76   : > { %p19612_p5 = pnand %p19610_p2, %p20032_p7  ;;  %p19619_p9 = por %p19618_p4, %p19617_p3 }
  0x78   : > { %p19613_p1 = pneg %p19612_p5 }
  0x7a   : > { %p19620_p8 = pnand %p19619_p9, %p19613_p1 }
  0x7c   : > { %19623 = shalt.err (!%p19620_p8)
}
  0x7d   : > { %s19886_s19 = smov 1536   ;;  %s19887_s18 = smov 96  }
  0x7e   : > { %s22729_s6 = sld [smem:[#allocation110_spill]]  ;;  %s19888_s24 = smov [#allocation15]  }
  0x7f   : > { %s492_s16 = sshll.u32 %s19888_s24, 4  ;;  %s493_s16 = int_to_ptr.vmem [resolvable:$true] %s492_s16 }
  0x80   : > { %s19635_s0 = scalar_lea.vmem %s493_s16, 49152  ;;  %p19643_p13 = scmp.lt.s32.totalorder %s493_s16, %s493_s16 }
  0x81   : > { %p19636_p10 = scmp.ne.s32.totalorder %s493_s16, %s19635_s0  ;;  %p19644_p0 = scmp.lt.s32.totalorder %s19635_s0, %s19635_s0 }
  0x83   : > { %p19638_p11 = pnand %p19636_p10, %p20032_p7  ;;  %p19645_p2 = por %p19644_p0, %p19643_p13 }
  0x84   : > { %17221 = dma.hbm_to_vmem [thread:$0]  (!%p20024_p6), %s22729_s6, 3072, %s469_s1, [#allocation11], %s19886_s19, %s19886_s19, %s19887_s18  }
  0x85   : > { %p19639_p12 = pneg %p19638_p11 }
  0x87   : > { %p19646_p5 = pnand %p19645_p2, %p19639_p12 }
  0x89   : > { %19649 = shalt.err (!%p19646_p5)
}
  0x8a   : > { %s22612_s27 = smov 256   ;;  %s22613_s30 = smov 16  }
  0x8b   : > { %s22730_s8 = sld [smem:[#allocation112_spill]]  ;;  %s19891_s18 = smov [#allocation18]  }
  0x8c   : > { %s516_s28 = sshll.u32 %s19891_s18, 4  ;;  %s517_s28 = int_to_ptr.vmem [resolvable:$true] %s516_s28 }
  0x8d   : > { %s19661_s23 = scalar_lea.vmem %s517_s28, 32768  ;;  %p19669_p9 = scmp.lt.s32.totalorder %s517_s28, %s517_s28 }
  0x8e   : > { %p19662_p1 = scmp.ne.s32.totalorder %s517_s28, %s19661_s23  ;;  %p19670_p8 = scmp.lt.s32.totalorder %s19661_s23, %s19661_s23 }
  0x90   : > { %p19664_p3 = pnand %p19662_p1, %p20032_p7  ;;  %p19671_p10 = por %p19670_p8, %p19669_p9 }
  0x91   : > { %17227 = dma.hbm_to_vmem [thread:$0]  (!%p20024_p6), %s22730_s8, 49152, %s493_s16, [#allocation14], %s22612_s27, %s22612_s27, %s22613_s30  }
  0x92   : > { %p19665_p4 = pneg %p19664_p3 }
  0x94   : > { %p19672_p11 = pnand %p19671_p10, %p19665_p4 }
  0x96   : > { %19675 = shalt.err (!%p19672_p11)
}
  0x97   : > { %s19892_s24 = smov 512   ;;  %s19893_s0 = smov 32  }
  0x98   : > { %s22731_s10 = sld [smem:[#allocation114_spill]]  ;;  %s19894_s19 = smov [#allocation21]  }
  0x99   : > { %s540_s18 = sshll.u32 %s19894_s19, 4  ;;  %s541_s18 = int_to_ptr.vmem [resolvable:$true] %s540_s18 }
  0x9a   : > { %s19687_s27 = scalar_lea.vmem %s541_s18, 2048  ;;  %p19695_p2 = scmp.lt.s32.totalorder %s541_s18, %s541_s18 }
  0x9b   : > { %p19688_p12 = scmp.ne.s32.totalorder %s541_s18, %s19687_s27  ;;  %p19696_p5 = scmp.lt.s32.totalorder %s19687_s27, %s19687_s27 }
  0x9d   : > { %p19690_p13 = pnand %p19688_p12, %p20032_p7  ;;  %p19697_p1 = por %p19696_p5, %p19695_p2 }
  0x9e   : > { %17233 = dma.hbm_to_vmem [thread:$0]  (!%p20024_p6), %s22731_s10, 32768, %s517_s28, [#allocation17], %s19892_s24, %s19892_s24, %s19893_s0  }
  0x9f   : > { %p19691_p0 = pneg %p19690_p13 }
  0xa1   : > { %p19698_p3 = pnand %p19697_p1, %p19691_p0 }
  0xa3   : > { %19701 = shalt.err (!%p19698_p3)
}
  0xa4   : > { %s19895_s23 = smov 1024   ;;  %s19896_s30 = smov 64  }
  0xa5   : > { %17239 = dma.hbm_to_vmem [thread:$0]  (!%p20024_p6), %s22602_s12, 2048, %s541_s18, [#allocation20], %s19895_s23, %s19895_s23, %s19896_s30  }
  0xa6   : > { %s19897_s24 = smov [#allocation24]   ;;  %s19898_s16 = smov [#allocation25]  }
  0xa7   : > { %s564_s0 = sshll.u32 %s19897_s24, 4  ;;  %s578_s19 = sshll.u32 %s19898_s16, 4  ;;  %s565_s0 = int_to_ptr.vmem [resolvable:$true] %s564_s0  ;;  %s579_s19 = int_to_ptr.vmem [resolvable:$true] %s578_s19 }
  0xa8   : > { %s19713_s3 = scalar_lea.vmem %s565_s0, 32768  ;;  %p19721_p10 = scmp.lt.s32.totalorder %s565_s0, %s565_s0 }
  0xa9   : > { %p19714_p4 = scmp.ne.s32.totalorder %s565_s0, %s19713_s3  ;;  %p19722_p11 = scmp.lt.s32.totalorder %s19713_s3, %s19713_s3 }
  0xab   : > { %p19716_p9 = pnand %p19714_p4, %p20032_p7  ;;  %p19723_p12 = por %p19722_p11, %p19721_p10 }
  0xad   : > { %p19717_p8 = pneg %p19716_p9 }
  0xaf   : > { %p19724_p13 = pnand %p19723_p12, %p19717_p8 }
  0xb1   : > { %19727 = shalt.err (!%p19724_p13)
}
  0xb2   : > { %s22732_s27 = smov 16   ;;  %s22733_s1 = smov 256  }
  0xb3   : > { %17245 = dma.hbm_to_vmem [thread:$0]  (!%p20024_p6), %s22604_s14, 32768, %s565_s0, [#allocation23], %s22733_s1, %s22733_s1, %s22732_s27  }
  0xb4   : > { %s19739_s23 = scalar_lea.vmem %s579_s19, 64  ;;  %p19747_p1 = scmp.lt.s32.totalorder %s579_s19, %s579_s19 }
  0xb5   : > { %p19740_p0 = scmp.ne.s32.totalorder %s579_s19, %s19739_s23  ;;  %p19748_p3 = scmp.lt.s32.totalorder %s19739_s23, %s19739_s23 }
  0xb7   : > { %p19742_p2 = pnand %p19740_p0, %p20032_p7  ;;  %p19749_p4 = por %p19748_p3, %p19747_p1 }
  0xb9   : > { %p19743_p5 = pneg %p19742_p2 }
  0xbb   : > { %p19750_p9 = pnand %p19749_p4, %p19743_p5 }
  0xbd   : > { %19753 = shalt.err (!%p19750_p9)
}
  0xbe   : > { %17248 = dma.hbm_to_vmem [thread:$0]  (!%p20024_p6), %s22605_s15, 64, %s579_s19, [#allocation26]  }
  0xbf   : > { %s15572_s17 = sadd.s32 4294967294, %s19874_s22   ;;  %s20146_s29 = sadd.s32 1, %s19874_s22  }
  0xc0   : > { %s46_s24 = sadd.s32 1, %s19870_s21  ;;  %s43_s0 = ssub.s32 %s19874_s22, %s20146_s29 }
  0xc1   : > { %p53_p7 = scmp.ne.s32.totalorder %s19870_s21, %s19866_s2  ;;  %p44_p8 = scmp.eq.s32.totalorder %s43_s0, 0 }
  0xc2   : > { %p54_p10 = scmp.eq.s32.totalorder %s19874_s22, 0  ;;  %p59_p11 = scmp.ne.s32.totalorder %s19866_s2, %s19862_s20 }
  0xc3   : > { %p403_p12 = scmp.eq.s32.totalorder %s20010_s25, 1  ;;  %p22734_p0 = scmp.eq.s32.totalorder %s20010_s25, 0 }
  0xc4   : > { %s20158_s16 = scalar_select %p44_p8, %s19870_s21, %s46_s24  }
  0xc5   : > { %p55_p13 = por %p54_p10, %p53_p7  ;;  %p20162_p2 = por %p22734_p0, %p59_p11 }
  0xc6   : > { %p20166_p6 = por %p403_p12, %p53_p7  ;;  %p409_p5 = scmp.eq.s32.totalorder %s15572_s17, 1 }
  0xc7   : > { %s22735_s27 = scalar_select %p20162_p2, 1, 0 }
  0xc8   : > { %s22736_s19 = scalar_select %p20166_p6, 1, 0 }
  0xc9   : > { %p17270_p1 = scmp.lt.s32.totalorder %s19874_s22, 2  ;;  %s589_s1 = sand.u32 1, %s19870_s21  }
  0xca   : > { %p20172_p3 = por %p409_p5, %p59_p11  ;;  %s15588_s18 = sshll.u32 %s589_s1, 2 }
  0xcb   : > { %s17151_s23 = sshll.u32 %s19874_s22, 6  ;;  %s22738_s24 = sld [smem:[#allocation105_spill]] }
  0xcc   : > { %s22737_s30 = scalar_select %p20172_p3, 1, 0 }
  0xcd   : > { %s593_s4 = scalar_lea.vmem [#allocation4], %s15588_s18  ;;  %p20182_p4 = pnand %p17270_p1, %p55_p13 }
  0xce   : > { %s601_s5 = sshll.u32 %s593_s4, 4  ;;  %s590_s6 = scalar_lea.sflag [#allocation5], %s589_s1  ;;  %s602_s5 = int_to_ptr.vmem [resolvable:$true] %s601_s5 }
  0xcf   : > { %p19756_p7 = pneg %p20182_p4 }
  0xd1   : > { %s20180_s0 = scalar_lea.hbm %s22738_s24, %s17151_s23  ;;  %s19759_s28 = scalar_lea.hbm %s22738_s24, 128 }
  0xd2   : > { %s19754_s7 = scalar_lea.hbm %s20180_s0, 64  ;;  %p19760_p11 = scmp.lt.s32.totalorder %s20180_s0, %s22738_s24 }
  0xd3   : > { %p19755_p9 = scmp.ne.s32.totalorder %s20180_s0, %s19754_s7  ;;  %p19761_p12 = scmp.lt.s32.totalorder %s19759_s28, %s19754_s7 }
  0xd5   : > { %p19757_p8 = pnand %p19756_p7, %p19755_p9  ;;  %p19762_p13 = por %p19761_p12, %p19760_p11 }
  0xd7   : > { %p19758_p10 = pneg %p19757_p8 }
  0xd9   : > { %p19763_p0 = pnand %p19762_p13, %p19758_p10 }
  0xdb   : > { %19766 = shalt.err (!%p19763_p0)
}
  0xdc   : > { %s19767_s4 = scalar_lea.vmem %s602_s5, 64  ;;  %s19899_s1 = smov [#allocation4]  }
  0xdd   : > { %p19768_p5 = scmp.ne.s32.totalorder %s602_s5, %s19767_s4  ;;  %s19772_s9 = sshll.u32 %s19899_s1, 4  ;;  %s19773_s9 = int_to_ptr.vmem [resolvable:$false] %s19772_s9 }
  0xde   : > { %s19774_s10 = scalar_lea.vmem %s19773_s9, 128  ;;  %p19775_p9 = scmp.lt.s32.totalorder %s602_s5, %s19773_s9 }
  0xdf   : > { %p19770_p1 = pnand %p19768_p5, %p19756_p7  ;;  %p19776_p8 = scmp.lt.s32.totalorder %s19774_s10, %s19767_s4 }
  0xe1   : > { %p19771_p3 = pneg %p19770_p1  ;;  %p19777_p6 = por %p19776_p8, %p19775_p9 }
  0xe3   : > { %p19778_p2 = pnand %p19777_p6, %p19771_p3 }
  0xe5   : > { %19781 = shalt.err (!%p19778_p2)
}
  0xe6   : > { %17252 = dma.hbm_to_vmem [thread:$0]  (!%p20182_p4), %s20180_s0, 64, %s602_s5, %s590_s6  }
  0xe7   : > { %p22740_p10 = scmp.ne.s32.totalorder %s22720_s26, 0 }
  0xe9   : > { %617 = sbr.rel (%p22740_p10) target bundleno = 2493 (0x9bd), region = 84 }
  0xee   : > { %s20203_s7 = sand.u32 1, %s19866_s2   ;;  %p22741_p7 = scmp.ne.s32.totalorder %s22735_s27, 0 }
  0xef   : > { %s15592_s8 = sshll.u32 %s20203_s7, 2  ;;  %s620_s23 = scalar_lea.sflag [#allocation5], %s20203_s7 }
  0xf0   : > { %s20207_s9 = scalar_lea.vmem [#allocation4], %s15592_s8 }
  0xf1   : > { %19825 = dma.done.wait (%p22741_p7), %s620_s23, 64  }
  0xf2   : > { %19827 = vsyncadd (%p22741_p7), %s620_s23, 4294967232  ;;  %p22742_p2 = scmp.eq.s32.totalorder %s20010_s25, 0 }
  0xf4   : > { %19829 = dma.done.wait (%p22742_p2), [#allocation8], 73728   ;;  %p22743_p6 = pmov %p22742_p2 }
  0xf5   : > { %p22744_p3 = pmov %p22742_p2 }
  0xf6   : > { %19831 = vsyncadd (%p22743_p6), [#allocation8], 4294893568 }
  0xf7   : > { %19833 = dma.done.wait (%p22744_p3), [#allocation11], 3264   ;;  %p22745_p4 = pmov %p22742_p2 }
  0xf8   : > { %p22746_p11 = pmov %p22742_p2 }
  0xf9   : > { %19835 = vsyncadd (%p22745_p4), [#allocation11], 4294964032 }
  0xfa   : > { %19837 = dma.done.wait (%p22746_p11), [#allocation14], 49344   ;;  %p22747_p12 = pmov %p22742_p2 }
  0xfb   : > { %p22748_p13 = pmov %p22742_p2 }
  0xfc   : > { %19839 = vsyncadd (%p22747_p12), [#allocation14], 4294917952 }
  0xfd   : > { %19841 = dma.done.wait (%p22748_p13), [#allocation17], 32832   ;;  %p22749_p0 = pmov %p22742_p2 }
  0xff   : > { %19843 = vsyncadd (%p22749_p0), [#allocation17], 4294934464  ;;  %p22750_p5 = pmov %p22749_p0 }
 0x100   : > { %p22751_p1 = pmov %p22749_p0 }
 0x101   : > { %19845 = dma.done.wait (%p22750_p5), [#allocation20], 2176  }
 0x102   : > { %19847 = vsyncadd (%p22751_p1), [#allocation20], 4294965120  ;;  %p22752_p9 = pmov %p22749_p0 }
 0x103   : > { %p22753_p8 = pmov %p22749_p0 }
 0x104   : > { %19849 = dma.done.wait (%p22752_p9), [#allocation23], 32896  }
 0x105   : > { %19851 = vsyncadd (%p22753_p8), [#allocation23], 4294934400  ;;  %p22754_p10 = pmov %p22749_p0 }
 0x106   : > { %p22755_p7 = pmov %p22749_p0 }
 0x107   : > { %19853 = dma.done.wait (%p22754_p10), [#allocation26], 64  }
 0x108   : > { %19855 = vsyncadd (%p22755_p7), [#allocation26], 4294967232  ;;  %v19900_v0 = vmov 0.0   ;;  %v17343_v1 = vld [vmem:[#allocation9 + $0x2a4] ss:$48 sps:$4 sm:$0xff]   ;;  %p728_p2 = scmp.lt.s32.totalorder %s20010_s25, 1  ;;  %v1130_v41 = vlaneseq }
 0x109   : > { %5176 = vst [vmem:[#allocation2 + $0xb0] sm:$0xff] %v19900_v0  ;;  %5177 = vst [vmem:[#allocation2 + $0xd0] sm:$0xff] %v19900_v0  ;;  %v17345_v2 = vld [vmem:[#allocation9 + $0x8a4] ss:$48 sps:$4 sm:$0xff]   ;;  %3067 = vmatprep.subr.bf16.mxu0 %v17343_v1  ;;  %v17347_v3 = vld [vmem:[#allocation9 + $0x2a0] ss:$48 sps:$4 sm:$0xff]  }
 0x10a   : > { %5178 = vst [vmem:[#allocation2 + $0x10] sm:$0xff] %v19900_v0  ;;  %5179 = vst [vmem:[#allocation2 + $0x48] sm:$0xff] %v19900_v0  ;;  %v17348_v4 = vld [vmem:[#allocation9 + $0x8a0] ss:$48 sps:$4 sm:$0xff]   ;;  %3108 = vmatprep.subr.bf16.mxu1 %v17345_v2  ;;  %v17349_v5 = vld [vmem:[#allocation9 + $0x244] ss:$48 sps:$4 sm:$0xff]   ;;  %3068 = vmatpush1.bf16.msra.mxu0 %v17347_v3 }
 0x10b   : > { %5180 = vst [vmem:[#allocation2 + $0x108] sm:$0xff] %v19900_v0  ;;  %5181 = vst [vmem:[#allocation2 + $0x68] sm:$0xff] %v19900_v0  ;;  %3109 = vmatpush1.bf16.msra.mxu1 %v17348_v4  ;;  %v17351_v6 = vld [vmem:[#allocation9 + $0x844] ss:$48 sps:$4 sm:$0xff]   ;;  %v17353_v7 = vld [vmem:[#allocation9 + $0x240] ss:$48 sps:$4 sm:$0xff]   ;;  %3069 = vmatprep.subr.bf16.mxu0 %v17349_v5 }
 0x10c   : > { %5182 = vst [vmem:[#allocation2 + $0x30] sm:$0xff] %v19900_v0  ;;  %5183 = vst [vmem:[#allocation2 + $0x18] sm:$0xff] %v19900_v0  ;;  %v17354_v8 = vld [vmem:[#allocation9 + $0x840] ss:$48 sps:$4 sm:$0xff]   ;;  %3110 = vmatprep.subr.bf16.mxu1 %v17351_v6  ;;  %v17355_v9 = vld [vmem:[#allocation9 + $0x1e4] ss:$48 sps:$4 sm:$0xff]  }
 0x10d   : > { %5184 = vst [vmem:[#allocation2 + $0x80] sm:$0xff] %v19900_v0  ;;  %5185 = vst [vmem:[#allocation2 + $0x110] sm:$0xff] %v19900_v0  ;;  %v17357_v10 = vld [vmem:[#allocation9 + $0x7e4] ss:$48 sps:$4 sm:$0xff]   ;;  %v17359_v11 = vld [vmem:[#allocation9 + $0x1e0] ss:$48 sps:$4 sm:$0xff]  }
 0x10e   : > { %5186 = vst [vmem:[#allocation2 + $0x118] sm:$0xff] %v19900_v0  ;;  %5187 = vst [vmem:[#allocation2 + $0x98] sm:$0xff] %v19900_v0  ;;  %v17360_v12 = vld [vmem:[#allocation9 + $0x7e0] ss:$48 sps:$4 sm:$0xff]   ;;  %3070 = vmatpush1.bf16.msra.mxu0 %v17353_v7  ;;  %v17361_v13 = vld [vmem:[#allocation9 + $0x184] ss:$48 sps:$4 sm:$0xff]  }
 0x10f   : > { %5188 = vst [vmem:[#allocation2 + $0xf8] sm:$0xf0] %v19900_v0  ;;  %5189 = vst [vmem:[#allocation2 + $0x38] sm:$0xf0] %v19900_v0  ;;  %3111 = vmatpush1.bf16.msra.mxu1 %v17354_v8  ;;  %3071 = vmatprep.subr.bf16.mxu0 %v17355_v9  ;;  %v17363_v14 = vld [vmem:[#allocation9 + $0x784] ss:$48 sps:$4 sm:$0xff]  }
 0x110   : > { %5190 = vst [vmem:[#allocation2 + $0x8] sm:$0xf0] %v19900_v0  ;;  %5191 = vst [vmem:[#allocation2 + $0x78] sm:$0xf0] %v19900_v0  ;;  %3112 = vmatprep.subr.bf16.mxu1 %v17357_v10  ;;  %v17365_v15 = vld [vmem:[#allocation9 + $0x180] ss:$48 sps:$4 sm:$0xff]  }
 0x111   : > { %5192 = vst [vmem:[#allocation2 + $0x20] sm:$0xf0] %v19900_v0  ;;  %5193 = vst [vmem:[#allocation2 + $0xc8] sm:$0xf0] %v19900_v0  ;;  %v17366_v16 = vld [vmem:[#allocation9 + $0x780] ss:$48 sps:$4 sm:$0xff]  }
 0x112   : > { %5194 = vst [vmem:[#allocation2 + $0x90] sm:$0xf0] %v19900_v0  ;;  %5195 = vst [vmem:[#allocation2 + $0xa0] sm:$0xf0] %v19900_v0  ;;  %3072 = vmatpush1.bf16.msra.mxu0 %v17359_v11  ;;  %v17367_v17 = vld [vmem:[#allocation9 + $0x124] ss:$48 sps:$4 sm:$0xff]  }
 0x113   : > { %5196 = vst [vmem:[#allocation2 + $0x70] sm:$0xf0] %v19900_v0  ;;  %5197 = vst [vmem:[#allocation2 + $0x58] sm:$0xf0] %v19900_v0  ;;  %3113 = vmatpush1.bf16.msra.mxu1 %v17360_v12  ;;  %3073 = vmatprep.subr.bf16.mxu0 %v17361_v13  ;;  %v17369_v18 = vld [vmem:[#allocation9 + $0x724] ss:$48 sps:$4 sm:$0xff]  }
 0x114   : > { %5198 = vst [vmem:[#allocation2 + $0xe0] sm:$0xf0] %v19900_v0  ;;  %5199 = vst [vmem:[#allocation2 + $0x60] sm:$0xf0] %v19900_v0  ;;  %3114 = vmatprep.subr.bf16.mxu1 %v17363_v14  ;;  %v17371_v19 = vld [vmem:[#allocation9 + $0x120] ss:$48 sps:$4 sm:$0xff]  }
 0x115   : > { %12056 = vst [vmem:[#allocation3 + $0x80] sm:$0xff] %v19900_v0  ;;  %12057 = vst [vmem:[#allocation3 + $0x68] sm:$0xff] %v19900_v0  ;;  %v17372_v20 = vld [vmem:[#allocation9 + $0x720] ss:$48 sps:$4 sm:$0xff]   ;;  %v17373_v21 = vld [vmem:[#allocation9 + $0xc4] ss:$48 sps:$4 sm:$0xff]  }
 0x116   : > { %12058 = vst [vmem:[#allocation3 + $0xb8] sm:$0xff] %v19900_v0  ;;  %12059 = vst [vmem:[#allocation3] sm:$0xff] %v19900_v0  ;;  %3074 = vmatpush1.bf16.msra.mxu0 %v17365_v15  ;;  %v17375_v22 = vld [vmem:[#allocation9 + $0x6c4] ss:$48 sps:$4 sm:$0xff]   ;;  %v17377_v23 = vld [vmem:[#allocation9 + $0xc0] ss:$48 sps:$4 sm:$0xff]  }
 0x117   : > { %12060 = vst [vmem:[#allocation3 + $0x48] sm:$0xff] %v19900_v0  ;;  %12061 = vst [vmem:[#allocation3 + $0x98] sm:$0xff] %v19900_v0  ;;  %3115 = vmatpush1.bf16.msra.mxu1 %v17366_v16  ;;  %3075 = vmatprep.subr.bf16.mxu0 %v17367_v17  ;;  %v17378_v24 = vld [vmem:[#allocation9 + $0x6c0] ss:$48 sps:$4 sm:$0xff]   ;;  %v17379_v25 = vld [vmem:[#allocation9 + $0x64] ss:$48 sps:$4 sm:$0xff]  }
 0x118   : > { %12062 = vst [vmem:[#allocation3 + $0x28] sm:$0xff] %v19900_v0  ;;  %12063 = vst [vmem:[#allocation3 + $0x90] sm:$0xff] %v19900_v0  ;;  %3116 = vmatprep.subr.bf16.mxu1 %v17369_v18  ;;  %v17381_v26 = vld [vmem:[#allocation9 + $0x664] ss:$48 sps:$4 sm:$0xff]   ;;  %v17383_v27 = vld [vmem:[#allocation9 + $0x60] ss:$48 sps:$4 sm:$0xff]  }
 0x119   : > { %12064 = vst [vmem:[#allocation3 + $0x10] sm:$0xf0] %v19900_v0  ;;  %12065 = vst [vmem:[#allocation3 + $0x20] sm:$0xf0] %v19900_v0  ;;  %v17384_v28 = vld [vmem:[#allocation9 + $0x660] ss:$48 sps:$4 sm:$0xff]  }
 0x11a   : > { %12066 = vst [vmem:[#allocation3 + $0x8] sm:$0xf0] %v19900_v0  ;;  %12067 = vst [vmem:[#allocation3 + $0x88] sm:$0xf0] %v19900_v0  ;;  %3076 = vmatpush1.bf16.msra.mxu0 %v17371_v19  ;;  %v17385_v29 = vld [vmem:[#allocation9 + $0x4] ss:$48 sps:$4 sm:$0xff]  }
 0x11b   : > { %12068 = vst [vmem:[#allocation3 + $0x30] sm:$0xf0] %v19900_v0  ;;  %12069 = vst [vmem:[#allocation3 + $0x38] sm:$0xf0] %v19900_v0  ;;  %3117 = vmatpush1.bf16.msra.mxu1 %v17372_v20  ;;  %3077 = vmatprep.subr.bf16.mxu0 %v17373_v21  ;;  %v17387_v30 = vld [vmem:[#allocation9 + $0x604] ss:$48 sps:$4 sm:$0xff]  }
 0x11c   : > { %12070 = vst [vmem:[#allocation3 + $0x78] sm:$0xf0] %v19900_v0  ;;  %12071 = vst [vmem:[#allocation3 + $0x50] sm:$0xf0] %v19900_v0  ;;  %3118 = vmatprep.subr.bf16.mxu1 %v17375_v22  ;;  %v17389_v31 = vld [vmem:[#allocation9] ss:$48 sps:$4 sm:$0xff]  }
 0x11d   : > { %v17390_v32 = vld [vmem:[#allocation9 + $0x600] ss:$48 sps:$4 sm:$0xff]   ;;  %v17391_v33 = vld [vmem:[#allocation9 + $0x5a4] ss:$48 sps:$4 sm:$0xff]   ;;  %s729_s5 = scalar_select %p728_p2, %s20010_s25, 1  ;;  %v20243_v47 = vshrl.u32 %v1130_v41, 7 }
 0x11e   : > { %3078 = vmatpush1.bf16.msra.mxu0 %v17377_v23  ;;  %v17393_v34 = vld [vmem:[#allocation9 + $0xba4] ss:$48 sps:$4 sm:$0xff]   ;;  %v17395_v35 = vld [vmem:[#allocation9 + $0x5a0] ss:$48 sps:$4 sm:$0xff]   ;;  %v19901_v39 = vmov 1966171168  }
 0x11f   : > { %3119 = vmatpush1.bf16.msra.mxu1 %v17378_v24  ;;  %3079 = vmatprep.subr.bf16.mxu0 %v17379_v25  ;;  %v17396_v36 = vld [vmem:[#allocation9 + $0xba0] ss:$48 sps:$4 sm:$0xff]   ;;  %v17397_v37 = vld [vmem:[#allocation9 + $0x544] ss:$48 sps:$4 sm:$0xff]   ;;  %v1128_v40 = vunpack.c.l.s4 %v19901_v39  ;;  %s15607_s6 = sshll.u32 %s729_s5, 2  ;;  %22756 = vst [vmem:[#allocation37_spill] sm:$0xff] %v20243_v47 }
 0x120   : > { %3120 = vmatprep.subr.bf16.mxu1 %v17381_v26  ;;  %v17399_v38 = vld [vmem:[#allocation9 + $0xb44] ss:$48 sps:$4 sm:$0xff]   ;;  %v17401_v42 = vld [vmem:[#allocation9 + $0x540] ss:$48 sps:$4 sm:$0xff]   ;;  %s22757_s27 = sld [smem:[#allocation106_spill]]  ;;  %vm5539_vm2 = vcmask 1046528  }
 0x121   : > { %v17402_v43 = vld [vmem:[#allocation9 + $0xb40] ss:$48 sps:$4 sm:$0xff]   ;;  %v17403_v44 = vld [vmem:[#allocation9 + $0x4e4] ss:$48 sps:$4 sm:$0xff]   ;;  %v1129_v46 = vunpack.c.0.s8 %v1128_v40  ;;  %v17441_v12 = vld [vmem:[#allocation9 + $0x2ac] ss:$48 sps:$4 sm:$0xff]  }
 0x122   : > { %3080 = vmatpush1.bf16.msra.mxu0 %v17383_v27  ;;  %v17405_v45 = vld [vmem:[#allocation9 + $0xae4] ss:$48 sps:$4 sm:$0xff]   ;;  %v17407_v48 = vld [vmem:[#allocation9 + $0x4e0] ss:$48 sps:$4 sm:$0xff]   ;;  %v17444_v13 = vld [vmem:[#allocation9 + $0x8ac] ss:$48 sps:$4 sm:$0xff]  }
 0x123   : > { %3121 = vmatpush1.bf16.msra.mxu1 %v17384_v28  ;;  %3081 = vmatprep.subr.bf16.mxu0 %v17385_v29  ;;  %v17408_v49 = vld [vmem:[#allocation9 + $0xae0] ss:$48 sps:$4 sm:$0xff]   ;;  %v17409_v50 = vld [vmem:[#allocation9 + $0x484] ss:$48 sps:$4 sm:$0xff]   ;;  %v1132_v52 = vsub.s32 %v1129_v46, %v20243_v47  ;;  %v17439_v15 = vld [vmem:[#allocation9 + $0x2a8] ss:$48 sps:$4 sm:$0xff]  }
 0x124   : > { %3122 = vmatprep.subr.bf16.mxu1 %v17387_v30  ;;  %v17411_v51 = vld [vmem:[#allocation9 + $0xa84] ss:$48 sps:$4 sm:$0xff]   ;;  %v17413_v54 = vld [vmem:[#allocation9 + $0x480] ss:$48 sps:$4 sm:$0xff]   ;;  %v17442_v16 = vld [vmem:[#allocation9 + $0x8a8] ss:$48 sps:$4 sm:$0xff]  }
 0x125   : > { %v17414_v55 = vld [vmem:[#allocation9 + $0xa80] ss:$48 sps:$4 sm:$0xff]   ;;  %v17415_v57 = vld [vmem:[#allocation9 + $0x424] ss:$48 sps:$4 sm:$0xff]   ;;  %v17447_v17 = vld [vmem:[#allocation9 + $0x24c] ss:$48 sps:$4 sm:$0xff]  }
 0x126   : > { %3082 = vmatpush1.bf16.msra.mxu0 %v17389_v31  ;;  %s731_s0 = scalar_lea.vmem %s22757_s27, %s15607_s6  ;;  %v17417_v58 = vld [vmem:[#allocation9 + $0xa24] ss:$48 sps:$4 sm:$0xff]   ;;  %v17419_v60 = vld [vmem:[#allocation9 + $0x420] ss:$48 sps:$4 sm:$0xff]   ;;  %v17450_v18 = vld [vmem:[#allocation9 + $0x84c] ss:$48 sps:$4 sm:$0xff]  }
 0x127   : > { %3123 = vmatpush1.bf16.msra.mxu1 %v17390_v32  ;;  %3083 = vmatprep.subr.bf16.mxu0 %v17391_v33  ;;  %v15608_v53 = vld.sshfl [vmem:[%s731_s0] sm:$0x33 pattern:$0x75316420]  ;;  %v17420_v61 = vld [vmem:[#allocation9 + $0xa20] ss:$48 sps:$4 sm:$0xff]  }
 0x128   : > { %3124 = vmatprep.subr.bf16.mxu1 %v17393_v34  ;;  %v1126_v56 = vcombine.high %v15608_v53, %v15608_v53  ;;  %v17421_v63 = vld [vmem:[#allocation9 + $0x3c4] ss:$48 sps:$4 sm:$0xff]   ;;  %v17425_v1 = vld [vmem:[#allocation9 + $0x3c0] ss:$48 sps:$4 sm:$0xff]   ;;  %v20257_v10 = vrot.slane %v15608_v53, %v1132_v52  ;;  %v17445_v19 = vld [vmem:[#allocation9 + $0x248] ss:$48 sps:$4 sm:$0xff]  }
 0x129   : > { %v17423_v0 = vld [vmem:[#allocation9 + $0x9c4] ss:$48 sps:$4 sm:$0xff]   ;;  %v17426_v2 = vld [vmem:[#allocation9 + $0x9c0] ss:$48 sps:$4 sm:$0xff]   ;;  %v17448_v20 = vld [vmem:[#allocation9 + $0x848] ss:$48 sps:$4 sm:$0xff]  }
 0x12a   : > { %3084 = vmatpush2.bf16.msra.mxu0 %v17395_v35  ;;  %v20249_v59 = vrot.slane %v1126_v56, %v1132_v52  ;;  %v17427_v3 = vld [vmem:[#allocation9 + $0x364] ss:$48 sps:$4 sm:$0xff]   ;;  %v17431_v5 = vld [vmem:[#allocation9 + $0x360] ss:$48 sps:$4 sm:$0xff]   ;;  %v20261_v14 = vcombine.high %v20257_v10, %v20257_v10  ;;  %v17453_v21 = vld [vmem:[#allocation9 + $0x1ec] ss:$48 sps:$4 sm:$0xff]  }
 0x12b   : > { %3125 = vmatpush2.bf16.msra.mxu1 %v17396_v36  ;;  %3085 = vmatprep.subr.bf16.mxu0 %v17397_v37  ;;  %v17429_v4 = vld [vmem:[#allocation9 + $0x964] ss:$48 sps:$4 sm:$0xff]   ;;  %v17432_v6 = vld [vmem:[#allocation9 + $0x960] ss:$48 sps:$4 sm:$0xff]   ;;  %v17456_v22 = vld [vmem:[#allocation9 + $0x7ec] ss:$48 sps:$4 sm:$0xff]  }
 0x12c   : > { %3126 = vmatprep.subr.bf16.mxu1 %v17399_v38  ;;  %v20253_v62 = vcombine.high %v20249_v59, %v20249_v59  ;;  %3099 = vmatprep.mubr.bf16.mxu0 %v20249_v59  ;;  %v17433_v7 = vld [vmem:[#allocation9 + $0x304] ss:$48 sps:$4 sm:$0xff]   ;;  %v17437_v9 = vld [vmem:[#allocation9 + $0x300] ss:$48 sps:$4 sm:$0xff]   ;;  %v17451_v23 = vld [vmem:[#allocation9 + $0x1e8] ss:$48 sps:$4 sm:$0xff]  }
 0x12d   : > { %v17435_v8 = vld [vmem:[#allocation9 + $0x904] ss:$48 sps:$4 sm:$0xff]   ;;  %v17438_v11 = vld [vmem:[#allocation9 + $0x900] ss:$48 sps:$4 sm:$0xff]   ;;  %v17454_v24 = vld [vmem:[#allocation9 + $0x7e8] ss:$48 sps:$4 sm:$0xff]  }
 0x12e   : > { %3086 = vmatpush2.bf16.msra.mxu0 %v17401_v42  ;;  %3140 = vmatprep.mubr.bf16.mxu1 %v20253_v62  ;;  %v17459_v25 = vld [vmem:[#allocation9 + $0x18c] ss:$48 sps:$4 sm:$0xff]   ;;  %v17457_v27 = vld [vmem:[#allocation9 + $0x188] ss:$48 sps:$4 sm:$0xff]   ;;  %vm5791_vm3 = vcmask 1045504   ;;  %s15606_s17 = sshll.u32 %s20203_s7, 3 }
 0x12f   : > { %3127 = vmatpush2.bf16.msra.mxu1 %v17402_v43  ;;  %3087 = vmatprep.subr.bf16.mxu0 %v17403_v44  ;;  %v17462_v26 = vld [vmem:[#allocation9 + $0x78c] ss:$48 sps:$4 sm:$0xff]   ;;  %v17460_v28 = vld [vmem:[#allocation9 + $0x788] ss:$48 sps:$4 sm:$0xff]   ;;  %s17152_s3 = sshll.u32 %s20010_s25, 7  ;;  %s727_s28 = scalar_lea.vmem [#allocation27], %s15606_s17 }
 0x130   : > { %3128 = vmatprep.subr.bf16.mxu1 %v17405_v45  ;;  %v17465_v29 = vld [vmem:[#allocation9 + $0x12c] ss:$48 sps:$4 sm:$0xff]   ;;  %v17463_v31 = vld [vmem:[#allocation9 + $0x128] ss:$48 sps:$4 sm:$0xff]   ;;  %s15366_s18 = sshll.u32 %s727_s28, 4  ;;  %s23064_s8 = sld [smem:[#allocation115_spill]]  ;;  %s15367_s18 = int_to_ptr.vmem [resolvable:$true] %s15366_s18 }
 0x131   : > { %v17468_v30 = vld [vmem:[#allocation9 + $0x72c] ss:$48 sps:$4 sm:$0xff]   ;;  %v17466_v32 = vld [vmem:[#allocation9 + $0x728] ss:$48 sps:$4 sm:$0xff]   ;;  %s19782_s5 = scalar_lea.vmem %s15367_s18, 128  ;;  %p23065_p3 = scmp.ne.s32.totalorder %s22736_s19, 0 }
 0x132   : > { %3088 = vmatpush2.bf16.msra.mxu0 %v17407_v48  ;;  %v17471_v33 = vld [vmem:[#allocation9 + $0xcc] ss:$48 sps:$4 sm:$0xff]   ;;  %v17469_v35 = vld [vmem:[#allocation9 + $0xc8] ss:$48 sps:$4 sm:$0xff]   ;;  %p19783_p6 = scmp.ne.s32.totalorder %s15367_s18, %s19782_s5  ;;  %s19903_s6 = smov [#allocation27]  }
 0x133   : > { %3129 = vmatpush2.bf16.msra.mxu1 %v17408_v49  ;;  %3089 = vmatprep.subr.bf16.mxu0 %v17409_v50  ;;  %v17474_v34 = vld [vmem:[#allocation9 + $0x6cc] ss:$48 sps:$4 sm:$0xff]   ;;  %v17472_v36 = vld [vmem:[#allocation9 + $0x6c8] ss:$48 sps:$4 sm:$0xff]   ;;  %s19786_s10 = sshll.u32 %s19903_s6, 4  ;;  %s19787_s10 = int_to_ptr.vmem [resolvable:$false] %s19786_s10 }
 0x134   : > { %3130 = vmatprep.subr.bf16.mxu1 %v17411_v51  ;;  %v17477_v37 = vld [vmem:[#allocation9 + $0x6c] ss:$48 sps:$4 sm:$0xff]   ;;  %v17475_v39 = vld [vmem:[#allocation9 + $0x68] ss:$48 sps:$4 sm:$0xff]   ;;  %p19784_p4 = pnand %p19783_p6, %p23065_p3  ;;  %s19788_s25 = scalar_lea.vmem %s19787_s10, 256 }
 0x135   : > { %v17480_v38 = vld [vmem:[#allocation9 + $0x66c] ss:$48 sps:$4 sm:$0xff]   ;;  %v17478_v40 = vld [vmem:[#allocation9 + $0x668] ss:$48 sps:$4 sm:$0xff]   ;;  %p19789_p12 = scmp.lt.s32.totalorder %s15367_s18, %s19787_s10  ;;  %p19790_p13 = scmp.lt.s32.totalorder %s19788_s25, %s19782_s5 }
 0x136   : > { %3090 = vmatpush2.bf16.msra.mxu0 %v17413_v54  ;;  %v17483_v41 = vld [vmem:[#allocation9 + $0xc] ss:$48 sps:$4 sm:$0xff]   ;;  %v17481_v43 = vld [vmem:[#allocation9 + $0x8] ss:$48 sps:$4 sm:$0xff]   ;;  %s15364_s23 = scalar_lea.hbm %s23064_s8, %s17152_s3  ;;  %p19785_p11 = pneg %p19784_p4 }
 0x137   : > { %3131 = vmatpush2.bf16.msra.mxu1 %v17414_v55  ;;  %3091 = vmatprep.subr.bf16.mxu0 %v17415_v57  ;;  %v17486_v42 = vld [vmem:[#allocation9 + $0x60c] ss:$48 sps:$4 sm:$0xff]   ;;  %v17484_v44 = vld [vmem:[#allocation9 + $0x608] ss:$48 sps:$4 sm:$0xff]   ;;  %p19791_p0 = por %p19790_p13, %p19789_p12 }
 0x138   : > { %3132 = vmatprep.subr.bf16.mxu1 %v17417_v58  ;;  %v17489_v45 = vld [vmem:[#allocation9 + $0x5ac] ss:$48 sps:$4 sm:$0xff]   ;;  %v17487_v48 = vld [vmem:[#allocation9 + $0x5a8] ss:$48 sps:$4 sm:$0xff]  }
 0x139   : > { %v17492_v46 = vld [vmem:[#allocation9 + $0xbac] ss:$48 sps:$4 sm:$0xff]   ;;  %v17490_v49 = vld [vmem:[#allocation9 + $0xba8] ss:$48 sps:$4 sm:$0xff]   ;;  %p19792_p5 = pnand %p19791_p0, %p19785_p11 }
 0x13a   : > { %3092 = vmatpush2.bf16.msra.mxu0 %v17419_v60  ;;  %v17495_v50 = vld [vmem:[#allocation9 + $0x54c] ss:$48 sps:$4 sm:$0xff]   ;;  %v17493_v52 = vld [vmem:[#allocation9 + $0x548] ss:$48 sps:$4 sm:$0xff]  }
 0x13b   : > { %3133 = vmatpush2.bf16.msra.mxu1 %v17420_v61  ;;  %3093 = vmatprep.subr.bf16.mxu0 %v17421_v63  ;;  %v17498_v51 = vld [vmem:[#allocation9 + $0xb4c] ss:$48 sps:$4 sm:$0xff]   ;;  %v17496_v53 = vld [vmem:[#allocation9 + $0xb48] ss:$48 sps:$4 sm:$0xff]  }
 0x13c   : > { %3134 = vmatprep.subr.bf16.mxu1 %v17423_v0  ;;  %v17501_v54 = vld [vmem:[#allocation9 + $0x4ec] ss:$48 sps:$4 sm:$0xff]   ;;  %v17499_v56 = vld [vmem:[#allocation9 + $0x4e8] ss:$48 sps:$4 sm:$0xff]  }
 0x13d   : > { %v17504_v55 = vld [vmem:[#allocation9 + $0xaec] ss:$48 sps:$4 sm:$0xff]   ;;  %v17502_v57 = vld [vmem:[#allocation9 + $0xae8] ss:$48 sps:$4 sm:$0xff]  }
 0x13e   : > { %3094 = vmatpush2.bf16.msra.mxu0 %v17425_v1  ;;  %v17507_v58 = vld [vmem:[#allocation9 + $0x48c] ss:$48 sps:$4 sm:$0xff]   ;;  %v17505_v61 = vld [vmem:[#allocation9 + $0x488] ss:$48 sps:$4 sm:$0xff]  }
 0x13f   : > { %3135 = vmatpush2.bf16.msra.mxu1 %v17426_v2  ;;  %3095 = vmatprep.subr.bf16.mxu0 %v17427_v3  ;;  %v17510_v60 = vld [vmem:[#allocation9 + $0xa8c] ss:$48 sps:$4 sm:$0xff]   ;;  %v17508_v63 = vld [vmem:[#allocation9 + $0xa88] ss:$48 sps:$4 sm:$0xff]  }
 0x140   : > { %3136 = vmatprep.subr.bf16.mxu1 %v17429_v4  ;;  %v17513_v0 = vld [vmem:[#allocation9 + $0x42c] ss:$48 sps:$4 sm:$0xff]   ;;  %v17511_v2 = vld [vmem:[#allocation9 + $0x428] ss:$48 sps:$4 sm:$0xff]  }
 0x141   : > { %v17516_v1 = vld [vmem:[#allocation9 + $0xa2c] ss:$48 sps:$4 sm:$0xff]   ;;  %v17514_v3 = vld [vmem:[#allocation9 + $0xa28] ss:$48 sps:$4 sm:$0xff]  }
 0x142   : > { %3096 = vmatpush2.bf16.msra.mxu0 %v17431_v5  ;;  %v17519_v4 = vld [vmem:[#allocation9 + $0x3cc] ss:$48 sps:$4 sm:$0xff]  }
 0x143   : > { %3137 = vmatpush2.bf16.msra.mxu1 %v17432_v6  ;;  %3097 = vmatprep.subr.bf16.mxu0 %v17433_v7  ;;  %v17522_v5 = vld [vmem:[#allocation9 + $0x9cc] ss:$48 sps:$4 sm:$0xff]   ;;  %v17517_v6 = vld [vmem:[#allocation9 + $0x3c8] ss:$48 sps:$4 sm:$0xff]  }
 0x144   : > { %3138 = vmatprep.subr.bf16.mxu1 %v17435_v8  ;;  %v17520_v7 = vld [vmem:[#allocation9 + $0x9c8] ss:$48 sps:$4 sm:$0xff]   ;;  %v17525_v8 = vld [vmem:[#allocation9 + $0x36c] ss:$48 sps:$4 sm:$0xff]  }
 0x146   : > { %3098 = vmatpush2.bf16.msra.mxu0 %v17437_v9  ;;  %v17528_v9 = vld [vmem:[#allocation9 + $0x96c] ss:$48 sps:$4 sm:$0xff]  }
 0x147   : > { %3139 = vmatpush2.bf16.msra.mxu1 %v17438_v11  ;;  %3149 = vmatprep.subr.bf16.mxu0 %v17441_v12  ;;  %v17523_v11 = vld [vmem:[#allocation9 + $0x368] ss:$48 sps:$4 sm:$0xff]  }
 0x148   : > { %3190 = vmatprep.subr.bf16.mxu1 %v17444_v13  ;;  %v17526_v12 = vld [vmem:[#allocation9 + $0x968] ss:$48 sps:$4 sm:$0xff]   ;;  %v17531_v13 = vld [vmem:[#allocation9 + $0x30c] ss:$48 sps:$4 sm:$0xff]  }
 0x149   : > { %3100 = vmatmul.mubr.bf16.vlgmr.msra.gmra.mxu0 %v20257_v10 }
 0x14a   : > { %3141 = vmatmul.mubr.bf16.vlgmr.msra.gmra.mxu1 %v20261_v14  ;;  %3150 = vmatpush1.bf16.msra.mxu0 %v17439_v15  ;;  %v17534_v15 = vld [vmem:[#allocation9 + $0x90c] ss:$48 sps:$4 sm:$0xff]  }
 0x14b   : > { %3191 = vmatpush1.bf16.msra.mxu1 %v17442_v16  ;;  %3151 = vmatprep.subr.bf16.mxu0 %v17447_v17  ;;  %v17529_v16 = vld [vmem:[#allocation9 + $0x308] ss:$48 sps:$4 sm:$0xff]  }
 0x14c   : > { %3192 = vmatprep.subr.bf16.mxu1 %v17450_v18  ;;  %3181 = vmatprep.mubr.bf16.mxu0 %v20249_v59  ;;  %v17532_v17 = vld [vmem:[#allocation9 + $0x908] ss:$48 sps:$4 sm:$0xff]   ;;  %v17537_v18 = vld [vmem:[#allocation9 + $0x2b4] ss:$48 sps:$4 sm:$0xff]  }
 0x14d   : > { %3222 = vmatprep.mubr.bf16.mxu1 %v20253_v62 }
 0x14e   : > { %3152 = vmatpush1.bf16.msra.mxu0 %v17445_v19  ;;  %v17540_v19 = vld [vmem:[#allocation9 + $0x8b4] ss:$48 sps:$4 sm:$0xff]  }
 0x14f   : > { %3193 = vmatpush1.bf16.msra.mxu1 %v17448_v20  ;;  %3153 = vmatprep.subr.bf16.mxu0 %v17453_v21  ;;  %v17535_v20 = vld [vmem:[#allocation9 + $0x2b0] ss:$48 sps:$4 sm:$0xff]  }
 0x150   : > { %3194 = vmatprep.subr.bf16.mxu1 %v17456_v22  ;;  %v17538_v21 = vld [vmem:[#allocation9 + $0x8b0] ss:$48 sps:$4 sm:$0xff]   ;;  %v17543_v22 = vld [vmem:[#allocation9 + $0x254] ss:$48 sps:$4 sm:$0xff]  }
 0x152   : > { %3154 = vmatpush1.bf16.msra.mxu0 %v17451_v23  ;;  %v17546_v23 = vld [vmem:[#allocation9 + $0x854] ss:$48 sps:$4 sm:$0xff]  }
 0x153   : > { %3195 = vmatpush1.bf16.msra.mxu1 %v17454_v24  ;;  %3155 = vmatprep.subr.bf16.mxu0 %v17459_v25  ;;  %v17541_v24 = vld [vmem:[#allocation9 + $0x250] ss:$48 sps:$4 sm:$0xff]  }
 0x154   : > { %3196 = vmatprep.subr.bf16.mxu1 %v17462_v26  ;;  %v17544_v25 = vld [vmem:[#allocation9 + $0x850] ss:$48 sps:$4 sm:$0xff]   ;;  %v17549_v26 = vld [vmem:[#allocation9 + $0x1f4] ss:$48 sps:$4 sm:$0xff]  }
 0x156   : > { %3156 = vmatpush1.bf16.msra.mxu0 %v17457_v27  ;;  %v17552_v27 = vld [vmem:[#allocation9 + $0x7f4] ss:$48 sps:$4 sm:$0xff]  }
 0x157   : > { %3197 = vmatpush1.bf16.msra.mxu1 %v17460_v28  ;;  %3157 = vmatprep.subr.bf16.mxu0 %v17465_v29  ;;  %v17547_v28 = vld [vmem:[#allocation9 + $0x1f0] ss:$48 sps:$4 sm:$0xff]  }
 0x158   : > { %3198 = vmatprep.subr.bf16.mxu1 %v17468_v30  ;;  %v17550_v29 = vld [vmem:[#allocation9 + $0x7f0] ss:$48 sps:$4 sm:$0xff]   ;;  %v17555_v30 = vld [vmem:[#allocation9 + $0x194] ss:$48 sps:$4 sm:$0xff]  }
 0x15a   : > { %3158 = vmatpush1.bf16.msra.mxu0 %v17463_v31  ;;  %v17558_v31 = vld [vmem:[#allocation9 + $0x794] ss:$48 sps:$4 sm:$0xff]  }
 0x15b   : > { %3199 = vmatpush1.bf16.msra.mxu1 %v17466_v32  ;;  %3159 = vmatprep.subr.bf16.mxu0 %v17471_v33  ;;  %v17553_v32 = vld [vmem:[#allocation9 + $0x190] ss:$48 sps:$4 sm:$0xff]  }
 0x15c   : > { %3200 = vmatprep.subr.bf16.mxu1 %v17474_v34  ;;  %v17556_v33 = vld [vmem:[#allocation9 + $0x790] ss:$48 sps:$4 sm:$0xff]   ;;  %v17561_v34 = vld [vmem:[#allocation9 + $0x134] ss:$48 sps:$4 sm:$0xff]  }
 0x15e   : > { %3160 = vmatpush1.bf16.msra.mxu0 %v17469_v35  ;;  %v17564_v35 = vld [vmem:[#allocation9 + $0x734] ss:$48 sps:$4 sm:$0xff]  }
 0x15f   : > { %3201 = vmatpush1.bf16.msra.mxu1 %v17472_v36  ;;  %3161 = vmatprep.subr.bf16.mxu0 %v17477_v37  ;;  %v17559_v36 = vld [vmem:[#allocation9 + $0x130] ss:$48 sps:$4 sm:$0xff]  }
 0x160   : > { %3202 = vmatprep.subr.bf16.mxu1 %v17480_v38  ;;  %v17562_v37 = vld [vmem:[#allocation9 + $0x730] ss:$48 sps:$4 sm:$0xff]   ;;  %v17567_v38 = vld [vmem:[#allocation9 + $0xd4] ss:$48 sps:$4 sm:$0xff]  }
 0x162   : > { %3162 = vmatpush1.bf16.msra.mxu0 %v17475_v39  ;;  %v17570_v39 = vld [vmem:[#allocation9 + $0x6d4] ss:$48 sps:$4 sm:$0xff]  }
 0x163   : > { %3203 = vmatpush1.bf16.msra.mxu1 %v17478_v40  ;;  %3163 = vmatprep.subr.bf16.mxu0 %v17483_v41  ;;  %v17565_v40 = vld [vmem:[#allocation9 + $0xd0] ss:$48 sps:$4 sm:$0xff]  }
 0x164   : > { %3204 = vmatprep.subr.bf16.mxu1 %v17486_v42  ;;  %v17568_v41 = vld [vmem:[#allocation9 + $0x6d0] ss:$48 sps:$4 sm:$0xff]   ;;  %v17573_v42 = vld [vmem:[#allocation9 + $0x74] ss:$48 sps:$4 sm:$0xff]  }
 0x166   : > { %3164 = vmatpush1.bf16.msra.mxu0 %v17481_v43  ;;  %v17576_v43 = vld [vmem:[#allocation9 + $0x674] ss:$48 sps:$4 sm:$0xff]  }
 0x167   : > { %3205 = vmatpush1.bf16.msra.mxu1 %v17484_v44  ;;  %3165 = vmatprep.subr.bf16.mxu0 %v17489_v45  ;;  %v17571_v44 = vld [vmem:[#allocation9 + $0x70] ss:$48 sps:$4 sm:$0xff]  }
 0x168   : > { %3206 = vmatprep.subr.bf16.mxu1 %v17492_v46  ;;  %v17574_v45 = vld [vmem:[#allocation9 + $0x670] ss:$48 sps:$4 sm:$0xff]   ;;  %v17579_v46 = vld [vmem:[#allocation9 + $0x14] ss:$48 sps:$4 sm:$0xff]  }
 0x16a   : > { %3166 = vmatpush2.bf16.msra.mxu0 %v17487_v48  ;;  %v17582_v48 = vld [vmem:[#allocation9 + $0x614] ss:$48 sps:$4 sm:$0xff]  }
 0x16b   : > { %3207 = vmatpush2.bf16.msra.mxu1 %v17490_v49  ;;  %3167 = vmatprep.subr.bf16.mxu0 %v17495_v50  ;;  %v17577_v49 = vld [vmem:[#allocation9 + $0x10] ss:$48 sps:$4 sm:$0xff]  }
 0x16c   : > { %3208 = vmatprep.subr.bf16.mxu1 %v17498_v51  ;;  %v17580_v50 = vld [vmem:[#allocation9 + $0x610] ss:$48 sps:$4 sm:$0xff]   ;;  %v17585_v51 = vld [vmem:[#allocation9 + $0x5b4] ss:$48 sps:$4 sm:$0xff]  }
 0x16e   : > { %3168 = vmatpush2.bf16.msra.mxu0 %v17493_v52  ;;  %v17588_v52 = vld [vmem:[#allocation9 + $0xbb4] ss:$48 sps:$4 sm:$0xff]  }
 0x16f   : > { %3209 = vmatpush2.bf16.msra.mxu1 %v17496_v53  ;;  %3169 = vmatprep.subr.bf16.mxu0 %v17501_v54  ;;  %v17583_v53 = vld [vmem:[#allocation9 + $0x5b0] ss:$48 sps:$4 sm:$0xff]  }
 0x170   : > { %3210 = vmatprep.subr.bf16.mxu1 %v17504_v55  ;;  %v17586_v54 = vld [vmem:[#allocation9 + $0xbb0] ss:$48 sps:$4 sm:$0xff]   ;;  %v17591_v55 = vld [vmem:[#allocation9 + $0x554] ss:$48 sps:$4 sm:$0xff]  }
 0x172   : > { %3170 = vmatpush2.bf16.msra.mxu0 %v17499_v56  ;;  %v17594_v56 = vld [vmem:[#allocation9 + $0xb54] ss:$48 sps:$4 sm:$0xff]  }
 0x173   : > { %3211 = vmatpush2.bf16.msra.mxu1 %v17502_v57  ;;  %3171 = vmatprep.subr.bf16.mxu0 %v17507_v58  ;;  %v17589_v57 = vld [vmem:[#allocation9 + $0x550] ss:$48 sps:$4 sm:$0xff]  }
 0x174   : > { %3212 = vmatprep.subr.bf16.mxu1 %v17510_v60  ;;  %v17592_v58 = vld [vmem:[#allocation9 + $0xb50] ss:$48 sps:$4 sm:$0xff]   ;;  %v17597_v60 = vld [vmem:[#allocation9 + $0x4f4] ss:$48 sps:$4 sm:$0xff]  }
 0x176   : > { %3172 = vmatpush2.bf16.msra.mxu0 %v17505_v61  ;;  %v17600_v61 = vld [vmem:[#allocation9 + $0xaf4] ss:$48 sps:$4 sm:$0xff]  }
 0x177   : > { %3213 = vmatpush2.bf16.msra.mxu1 %v17508_v63  ;;  %3173 = vmatprep.subr.bf16.mxu0 %v17513_v0  ;;  %v17595_v63 = vld [vmem:[#allocation9 + $0x4f0] ss:$48 sps:$4 sm:$0xff]  }
 0x178   : > { %3214 = vmatprep.subr.bf16.mxu1 %v17516_v1  ;;  %v17598_v0 = vld [vmem:[#allocation9 + $0xaf0] ss:$48 sps:$4 sm:$0xff]   ;;  %v17603_v1 = vld [vmem:[#allocation9 + $0x494] ss:$48 sps:$4 sm:$0xff]  }
 0x17a   : > { %3174 = vmatpush2.bf16.msra.mxu0 %v17511_v2  ;;  %v17606_v2 = vld [vmem:[#allocation9 + $0xa94] ss:$48 sps:$4 sm:$0xff]  }
 0x17b   : > { %3215 = vmatpush2.bf16.msra.mxu1 %v17514_v3  ;;  %3175 = vmatprep.subr.bf16.mxu0 %v17519_v4  ;;  %v17601_v3 = vld [vmem:[#allocation9 + $0x490] ss:$48 sps:$4 sm:$0xff]  }
 0x17c   : > { %3216 = vmatprep.subr.bf16.mxu1 %v17522_v5  ;;  %v17604_v4 = vld [vmem:[#allocation9 + $0xa90] ss:$48 sps:$4 sm:$0xff]   ;;  %v17609_v5 = vld [vmem:[#allocation9 + $0x434] ss:$48 sps:$4 sm:$0xff]  }
 0x17e   : > { %3176 = vmatpush2.bf16.msra.mxu0 %v17517_v6  ;;  %v17612_v6 = vld [vmem:[#allocation9 + $0xa34] ss:$48 sps:$4 sm:$0xff]  }
 0x17f   : > { %3217 = vmatpush2.bf16.msra.mxu1 %v17520_v7  ;;  %3177 = vmatprep.subr.bf16.mxu0 %v17525_v8  ;;  %v17607_v7 = vld [vmem:[#allocation9 + $0x430] ss:$48 sps:$4 sm:$0xff]  }
 0x180   : > { %3218 = vmatprep.subr.bf16.mxu1 %v17528_v9  ;;  %v17610_v8 = vld [vmem:[#allocation9 + $0xa30] ss:$48 sps:$4 sm:$0xff]   ;;  %v17615_v9 = vld [vmem:[#allocation9 + $0x3d4] ss:$48 sps:$4 sm:$0xff]  }
 0x182   : > { %3178 = vmatpush2.bf16.msra.mxu0 %v17523_v11  ;;  %v17618_v11 = vld [vmem:[#allocation9 + $0x9d4] ss:$48 sps:$4 sm:$0xff]  }
 0x183   : > { %3219 = vmatpush2.bf16.msra.mxu1 %v17526_v12  ;;  %3179 = vmatprep.subr.bf16.mxu0 %v17531_v13  ;;  %v17613_v12 = vld [vmem:[#allocation9 + $0x3d0] ss:$48 sps:$4 sm:$0xff]  }
 0x184   : > { %3220 = vmatprep.subr.bf16.mxu1 %v17534_v15  ;;  %v17616_v13 = vld [vmem:[#allocation9 + $0x9d0] ss:$48 sps:$4 sm:$0xff]   ;;  %v17621_v15 = vld [vmem:[#allocation9 + $0x374] ss:$48 sps:$4 sm:$0xff]  }
 0x186   : > { %3180 = vmatpush2.bf16.msra.mxu0 %v17529_v16  ;;  %v17624_v16 = vld [vmem:[#allocation9 + $0x974] ss:$48 sps:$4 sm:$0xff]  }
 0x187   : > { %3221 = vmatpush2.bf16.msra.mxu1 %v17532_v17  ;;  %3231 = vmatprep.subr.bf16.mxu0 %v17537_v18  ;;  %v17619_v17 = vld [vmem:[#allocation9 + $0x370] ss:$48 sps:$4 sm:$0xff]  }
 0x188   : > { %3272 = vmatprep.subr.bf16.mxu1 %v17540_v19  ;;  %v17622_v18 = vld [vmem:[#allocation9 + $0x970] ss:$48 sps:$4 sm:$0xff]   ;;  %v17627_v19 = vld [vmem:[#allocation9 + $0x314] ss:$48 sps:$4 sm:$0xff]  }
 0x189   : > { %3182 = vmatmul.mubr.bf16.vlgmr.msra.gmra.mxu0 %v20257_v10 }
 0x18a   : > { %3223 = vmatmul.mubr.bf16.vlgmr.msra.gmra.mxu1 %v20261_v14  ;;  %3232 = vmatpush1.bf16.msra.mxu0 %v17535_v20  ;;  %v17630_v20 = vld [vmem:[#allocation9 + $0x914] ss:$48 sps:$4 sm:$0xff]  }
 0x18b   : > { %3273 = vmatpush1.bf16.msra.mxu1 %v17538_v21  ;;  %3233 = vmatprep.subr.bf16.mxu0 %v17543_v22  ;;  %v17625_v21 = vld [vmem:[#allocation9 + $0x310] ss:$48 sps:$4 sm:$0xff]  }
 0x18c   : > { %3274 = vmatprep.subr.bf16.mxu1 %v17546_v23  ;;  %3263 = vmatprep.mubr.bf16.mxu0 %v20249_v59  ;;  %v17628_v22 = vld [vmem:[#allocation9 + $0x910] ss:$48 sps:$4 sm:$0xff]   ;;  %v17633_v23 = vld [vmem:[#allocation9 + $0x2bc] ss:$48 sps:$4 sm:$0xff]  }
 0x18d   : > { %3304 = vmatprep.mubr.bf16.mxu1 %v20253_v62 }
 0x18e   : > { %3234 = vmatpush1.bf16.msra.mxu0 %v17541_v24  ;;  %v17636_v24 = vld [vmem:[#allocation9 + $0x8bc] ss:$48 sps:$4 sm:$0xff]  }
 0x18f   : > { %3275 = vmatpush1.bf16.msra.mxu1 %v17544_v25  ;;  %3235 = vmatprep.subr.bf16.mxu0 %v17549_v26  ;;  %v17631_v25 = vld [vmem:[#allocation9 + $0x2b8] ss:$48 sps:$4 sm:$0xff]  }
 0x190   : > { %3276 = vmatprep.subr.bf16.mxu1 %v17552_v27  ;;  %v17634_v26 = vld [vmem:[#allocation9 + $0x8b8] ss:$48 sps:$4 sm:$0xff]   ;;  %v17639_v27 = vld [vmem:[#allocation9 + $0x25c] ss:$48 sps:$4 sm:$0xff]  }
 0x192   : > { %3236 = vmatpush1.bf16.msra.mxu0 %v17547_v28  ;;  %v17642_v28 = vld [vmem:[#allocation9 + $0x85c] ss:$48 sps:$4 sm:$0xff]  }
 0x193   : > { %3277 = vmatpush1.bf16.msra.mxu1 %v17550_v29  ;;  %3237 = vmatprep.subr.bf16.mxu0 %v17555_v30  ;;  %v17637_v29 = vld [vmem:[#allocation9 + $0x258] ss:$48 sps:$4 sm:$0xff]  }
 0x194   : > { %3278 = vmatprep.subr.bf16.mxu1 %v17558_v31  ;;  %v17640_v30 = vld [vmem:[#allocation9 + $0x858] ss:$48 sps:$4 sm:$0xff]   ;;  %v17645_v31 = vld [vmem:[#allocation9 + $0x1fc] ss:$48 sps:$4 sm:$0xff]  }
 0x196   : > { %3238 = vmatpush1.bf16.msra.mxu0 %v17553_v32  ;;  %v17648_v32 = vld [vmem:[#allocation9 + $0x7fc] ss:$48 sps:$4 sm:$0xff]  }
 0x197   : > { %3279 = vmatpush1.bf16.msra.mxu1 %v17556_v33  ;;  %3239 = vmatprep.subr.bf16.mxu0 %v17561_v34  ;;  %v17643_v33 = vld [vmem:[#allocation9 + $0x1f8] ss:$48 sps:$4 sm:$0xff]  }
 0x198   : > { %3280 = vmatprep.subr.bf16.mxu1 %v17564_v35  ;;  %v17646_v34 = vld [vmem:[#allocation9 + $0x7f8] ss:$48 sps:$4 sm:$0xff]   ;;  %v17651_v35 = vld [vmem:[#allocation9 + $0x19c] ss:$48 sps:$4 sm:$0xff]  }
 0x19a   : > { %3240 = vmatpush1.bf16.msra.mxu0 %v17559_v36  ;;  %v17654_v36 = vld [vmem:[#allocation9 + $0x79c] ss:$48 sps:$4 sm:$0xff]  }
 0x19b   : > { %3281 = vmatpush1.bf16.msra.mxu1 %v17562_v37  ;;  %3241 = vmatprep.subr.bf16.mxu0 %v17567_v38  ;;  %v17649_v37 = vld [vmem:[#allocation9 + $0x198] ss:$48 sps:$4 sm:$0xff]  }
 0x19c   : > { %3282 = vmatprep.subr.bf16.mxu1 %v17570_v39  ;;  %v17652_v38 = vld [vmem:[#allocation9 + $0x798] ss:$48 sps:$4 sm:$0xff]   ;;  %v17657_v39 = vld [vmem:[#allocation9 + $0x13c] ss:$48 sps:$4 sm:$0xff]  }
 0x19e   : > { %3242 = vmatpush1.bf16.msra.mxu0 %v17565_v40  ;;  %v17660_v40 = vld [vmem:[#allocation9 + $0x73c] ss:$48 sps:$4 sm:$0xff]  }
 0x19f   : > { %3283 = vmatpush1.bf16.msra.mxu1 %v17568_v41  ;;  %3243 = vmatprep.subr.bf16.mxu0 %v17573_v42  ;;  %v17655_v41 = vld [vmem:[#allocation9 + $0x138] ss:$48 sps:$4 sm:$0xff]  }
 0x1a0   : > { %3284 = vmatprep.subr.bf16.mxu1 %v17576_v43  ;;  %v17658_v42 = vld [vmem:[#allocation9 + $0x738] ss:$48 sps:$4 sm:$0xff]   ;;  %v17663_v43 = vld [vmem:[#allocation9 + $0xdc] ss:$48 sps:$4 sm:$0xff]  }
 0x1a2   : > { %3244 = vmatpush1.bf16.msra.mxu0 %v17571_v44  ;;  %v17666_v44 = vld [vmem:[#allocation9 + $0x6dc] ss:$48 sps:$4 sm:$0xff]  }
 0x1a3   : > { %3285 = vmatpush1.bf16.msra.mxu1 %v17574_v45  ;;  %3245 = vmatprep.subr.bf16.mxu0 %v17579_v46  ;;  %v17661_v45 = vld [vmem:[#allocation9 + $0xd8] ss:$48 sps:$4 sm:$0xff]  }
 0x1a4   : > { %3286 = vmatprep.subr.bf16.mxu1 %v17582_v48  ;;  %v17664_v46 = vld [vmem:[#allocation9 + $0x6d8] ss:$48 sps:$4 sm:$0xff]   ;;  %v17669_v48 = vld [vmem:[#allocation9 + $0x7c] ss:$48 sps:$4 sm:$0xff]  }
 0x1a6   : > { %3246 = vmatpush1.bf16.msra.mxu0 %v17577_v49  ;;  %v17672_v49 = vld [vmem:[#allocation9 + $0x67c] ss:$48 sps:$4 sm:$0xff]  }
 0x1a7   : > { %3287 = vmatpush1.bf16.msra.mxu1 %v17580_v50  ;;  %3247 = vmatprep.subr.bf16.mxu0 %v17585_v51  ;;  %v17667_v50 = vld [vmem:[#allocation9 + $0x78] ss:$48 sps:$4 sm:$0xff]  }
 0x1a8   : > { %3288 = vmatprep.subr.bf16.mxu1 %v17588_v52  ;;  %v17670_v51 = vld [vmem:[#allocation9 + $0x678] ss:$48 sps:$4 sm:$0xff]   ;;  %v17675_v52 = vld [vmem:[#allocation9 + $0x1c] ss:$48 sps:$4 sm:$0xff]  }
 0x1aa   : > { %3248 = vmatpush2.bf16.msra.mxu0 %v17583_v53  ;;  %v17678_v53 = vld [vmem:[#allocation9 + $0x61c] ss:$48 sps:$4 sm:$0xff]  }
 0x1ab   : > { %3289 = vmatpush2.bf16.msra.mxu1 %v17586_v54  ;;  %3249 = vmatprep.subr.bf16.mxu0 %v17591_v55  ;;  %v17673_v54 = vld [vmem:[#allocation9 + $0x18] ss:$48 sps:$4 sm:$0xff]  }
 0x1ac   : > { %3290 = vmatprep.subr.bf16.mxu1 %v17594_v56  ;;  %v17676_v55 = vld [vmem:[#allocation9 + $0x618] ss:$48 sps:$4 sm:$0xff]   ;;  %v17681_v56 = vld [vmem:[#allocation9 + $0x5bc] ss:$48 sps:$4 sm:$0xff]  }
 0x1ae   : > { %3250 = vmatpush2.bf16.msra.mxu0 %v17589_v57  ;;  %v17684_v57 = vld [vmem:[#allocation9 + $0xbbc] ss:$48 sps:$4 sm:$0xff]  }
 0x1af   : > { %3291 = vmatpush2.bf16.msra.mxu1 %v17592_v58  ;;  %3251 = vmatprep.subr.bf16.mxu0 %v17597_v60  ;;  %v17679_v58 = vld [vmem:[#allocation9 + $0x5b8] ss:$48 sps:$4 sm:$0xff]  }
 0x1b0   : > { %3292 = vmatprep.subr.bf16.mxu1 %v17600_v61  ;;  %v17682_v60 = vld [vmem:[#allocation9 + $0xbb8] ss:$48 sps:$4 sm:$0xff]   ;;  %v17687_v61 = vld [vmem:[#allocation9 + $0x55c] ss:$48 sps:$4 sm:$0xff]  }
 0x1b2   : > { %3252 = vmatpush2.bf16.msra.mxu0 %v17595_v63  ;;  %v17690_v63 = vld [vmem:[#allocation9 + $0xb5c] ss:$48 sps:$4 sm:$0xff]  }
 0x1b3   : > { %3293 = vmatpush2.bf16.msra.mxu1 %v17598_v0  ;;  %3253 = vmatprep.subr.bf16.mxu0 %v17603_v1  ;;  %v17685_v0 = vld [vmem:[#allocation9 + $0x558] ss:$48 sps:$4 sm:$0xff]  }
 0x1b4   : > { %3294 = vmatprep.subr.bf16.mxu1 %v17606_v2  ;;  %v17688_v1 = vld [vmem:[#allocation9 + $0xb58] ss:$48 sps:$4 sm:$0xff]   ;;  %v17693_v2 = vld [vmem:[#allocation9 + $0x4fc] ss:$48 sps:$4 sm:$0xff]  }
 0x1b6   : > { %3254 = vmatpush2.bf16.msra.mxu0 %v17601_v3  ;;  %v17696_v3 = vld [vmem:[#allocation9 + $0xafc] ss:$48 sps:$4 sm:$0xff]  }
 0x1b7   : > { %3295 = vmatpush2.bf16.msra.mxu1 %v17604_v4  ;;  %3255 = vmatprep.subr.bf16.mxu0 %v17609_v5  ;;  %v17691_v4 = vld [vmem:[#allocation9 + $0x4f8] ss:$48 sps:$4 sm:$0xff]  }
 0x1b8   : > { %3296 = vmatprep.subr.bf16.mxu1 %v17612_v6  ;;  %v17694_v5 = vld [vmem:[#allocation9 + $0xaf8] ss:$48 sps:$4 sm:$0xff]   ;;  %v17699_v6 = vld [vmem:[#allocation9 + $0x49c] ss:$48 sps:$4 sm:$0xff]  }
 0x1ba   : > { %3256 = vmatpush2.bf16.msra.mxu0 %v17607_v7  ;;  %v17702_v7 = vld [vmem:[#allocation9 + $0xa9c] ss:$48 sps:$4 sm:$0xff]  }
 0x1bb   : > { %3297 = vmatpush2.bf16.msra.mxu1 %v17610_v8  ;;  %3257 = vmatprep.subr.bf16.mxu0 %v17615_v9  ;;  %v17697_v8 = vld [vmem:[#allocation9 + $0x498] ss:$48 sps:$4 sm:$0xff]  }
 0x1bc   : > { %3298 = vmatprep.subr.bf16.mxu1 %v17618_v11  ;;  %v17700_v9 = vld [vmem:[#allocation9 + $0xa98] ss:$48 sps:$4 sm:$0xff]   ;;  %v17705_v11 = vld [vmem:[#allocation9 + $0x43c] ss:$48 sps:$4 sm:$0xff]  }
 0x1be   : > { %3258 = vmatpush2.bf16.msra.mxu0 %v17613_v12  ;;  %v17708_v12 = vld [vmem:[#allocation9 + $0xa3c] ss:$48 sps:$4 sm:$0xff]  }
 0x1bf   : > { %3299 = vmatpush2.bf16.msra.mxu1 %v17616_v13  ;;  %3259 = vmatprep.subr.bf16.mxu0 %v17621_v15  ;;  %v17703_v13 = vld [vmem:[#allocation9 + $0x438] ss:$48 sps:$4 sm:$0xff]  }
 0x1c0   : > { %3300 = vmatprep.subr.bf16.mxu1 %v17624_v16  ;;  %v17706_v15 = vld [vmem:[#allocation9 + $0xa38] ss:$48 sps:$4 sm:$0xff]   ;;  %v17711_v16 = vld [vmem:[#allocation9 + $0x3dc] ss:$48 sps:$4 sm:$0xff]  }
 0x1c2   : > { %3260 = vmatpush2.bf16.msra.mxu0 %v17619_v17  ;;  %v17714_v17 = vld [vmem:[#allocation9 + $0x9dc] ss:$48 sps:$4 sm:$0xff]  }
 0x1c3   : > { %3301 = vmatpush2.bf16.msra.mxu1 %v17622_v18  ;;  %3261 = vmatprep.subr.bf16.mxu0 %v17627_v19  ;;  %v17709_v18 = vld [vmem:[#allocation9 + $0x3d8] ss:$48 sps:$4 sm:$0xff]  }
 0x1c4   : > { %3302 = vmatprep.subr.bf16.mxu1 %v17630_v20  ;;  %v17712_v19 = vld [vmem:[#allocation9 + $0x9d8] ss:$48 sps:$4 sm:$0xff]   ;;  %v17717_v20 = vld [vmem:[#allocation9 + $0x37c] ss:$48 sps:$4 sm:$0xff]  }
 0x1c6   : > { %3262 = vmatpush2.bf16.msra.mxu0 %v17625_v21  ;;  %v17720_v21 = vld [vmem:[#allocation9 + $0x97c] ss:$48 sps:$4 sm:$0xff]  }
 0x1c7   : > { %3303 = vmatpush2.bf16.msra.mxu1 %v17628_v22  ;;  %3313 = vmatprep.subr.bf16.mxu0 %v17633_v23  ;;  %v17715_v22 = vld [vmem:[#allocation9 + $0x378] ss:$48 sps:$4 sm:$0xff]  }
 0x1c8   : > { %3354 = vmatprep.subr.bf16.mxu1 %v17636_v24  ;;  %v17718_v23 = vld [vmem:[#allocation9 + $0x978] ss:$48 sps:$4 sm:$0xff]   ;;  %v17723_v24 = vld [vmem:[#allocation9 + $0x31c] ss:$48 sps:$4 sm:$0xff]  }
 0x1c9   : > { %3264 = vmatmul.mubr.bf16.vlgmr.msra.gmra.mxu0 %v20257_v10 }
 0x1ca   : > { %3305 = vmatmul.mubr.bf16.vlgmr.msra.gmra.mxu1 %v20261_v14  ;;  %3314 = vmatpush1.bf16.msra.mxu0 %v17631_v25  ;;  %v17726_v25 = vld [vmem:[#allocation9 + $0x91c] ss:$48 sps:$4 sm:$0xff]  }
 0x1cb   : > { %3355 = vmatpush1.bf16.msra.mxu1 %v17634_v26  ;;  %3315 = vmatprep.subr.bf16.mxu0 %v17639_v27  ;;  %v17721_v26 = vld [vmem:[#allocation9 + $0x318] ss:$48 sps:$4 sm:$0xff]  }
 0x1cc   : > { %3356 = vmatprep.subr.bf16.mxu1 %v17642_v28  ;;  %3345 = vmatprep.mubr.bf16.mxu0 %v20249_v59  ;;  %v17724_v27 = vld [vmem:[#allocation9 + $0x918] ss:$48 sps:$4 sm:$0xff]   ;;  %v17729_v28 = vld [vmem:[#allocation9 + $0x2c4] ss:$48 sps:$4 sm:$0xff]  }
 0x1cd   : > { %3386 = vmatprep.mubr.bf16.mxu1 %v20253_v62 }
 0x1ce   : > { %3316 = vmatpush1.bf16.msra.mxu0 %v17637_v29  ;;  %v17732_v29 = vld [vmem:[#allocation9 + $0x8c4] ss:$48 sps:$4 sm:$0xff]  }
 0x1cf   : > { %3357 = vmatpush1.bf16.msra.mxu1 %v17640_v30  ;;  %3317 = vmatprep.subr.bf16.mxu0 %v17645_v31  ;;  %v17727_v30 = vld [vmem:[#allocation9 + $0x2c0] ss:$48 sps:$4 sm:$0xff]  }
 0x1d0   : > { %3358 = vmatprep.subr.bf16.mxu1 %v17648_v32  ;;  %v17730_v31 = vld [vmem:[#allocation9 + $0x8c0] ss:$48 sps:$4 sm:$0xff]   ;;  %v17735_v32 = vld [vmem:[#allocation9 + $0x264] ss:$48 sps:$4 sm:$0xff]  }
 0x1d2   : > { %3318 = vmatpush1.bf16.msra.mxu0 %v17643_v33  ;;  %v17738_v33 = vld [vmem:[#allocation9 + $0x864] ss:$48 sps:$4 sm:$0xff]  }
 0x1d3   : > { %3359 = vmatpush1.bf16.msra.mxu1 %v17646_v34  ;;  %3319 = vmatprep.subr.bf16.mxu0 %v17651_v35  ;;  %v17733_v34 = vld [vmem:[#allocation9 + $0x260] ss:$48 sps:$4 sm:$0xff]  }
 0x1d4   : > { %3360 = vmatprep.subr.bf16.mxu1 %v17654_v36  ;;  %v17736_v35 = vld [vmem:[#allocation9 + $0x860] ss:$48 sps:$4 sm:$0xff]  }
 0x1d6   : > { %3320 = vmatpush1.bf16.msra.mxu0 %v17649_v37 }
 0x1d7   : > { %3361 = vmatpush1.bf16.msra.mxu1 %v17652_v38  ;;  %3321 = vmatprep.subr.bf16.mxu0 %v17657_v39 }
 0x1d8   : > { %3362 = vmatprep.subr.bf16.mxu1 %v17660_v40 }
 0x1da   : > { %3322 = vmatpush1.bf16.msra.mxu0 %v17655_v41  ;;  %v17741_v41 = vld [vmem:[#allocation9 + $0x204] ss:$48 sps:$4 sm:$0xff]  }
 0x1db   : > { %3363 = vmatpush1.bf16.msra.mxu1 %v17658_v42  ;;  %3323 = vmatprep.subr.bf16.mxu0 %v17663_v43  ;;  %v17744_v42 = vld [vmem:[#allocation9 + $0x804] ss:$48 sps:$4 sm:$0xff]  }
 0x1dc   : > { %3364 = vmatprep.subr.bf16.mxu1 %v17666_v44  ;;  %v17739_v44 = vld [vmem:[#allocation9 + $0x200] ss:$48 sps:$4 sm:$0xff]  }
 0x1de   : > { %3324 = vmatpush1.bf16.msra.mxu0 %v17661_v45  ;;  %v17742_v45 = vld [vmem:[#allocation9 + $0x800] ss:$48 sps:$4 sm:$0xff]  }
 0x1df   : > { %3365 = vmatpush1.bf16.msra.mxu1 %v17664_v46  ;;  %3325 = vmatprep.subr.bf16.mxu0 %v17669_v48 }
 0x1e0   : > { %3366 = vmatprep.subr.bf16.mxu1 %v17672_v49 }
 0x1e2   : > { %3326 = vmatpush1.bf16.msra.mxu0 %v17667_v50 }
 0x1e3   : > { %3367 = vmatpush1.bf16.msra.mxu1 %v17670_v51  ;;  %3327 = vmatprep.subr.bf16.mxu0 %v17675_v52  ;;  %v17747_v51 = vld [vmem:[#allocation9 + $0x1a4] ss:$48 sps:$4 sm:$0xff]  }
 0x1e4   : > { %3368 = vmatprep.subr.bf16.mxu1 %v17678_v53  ;;  %v17750_v52 = vld [vmem:[#allocation9 + $0x7a4] ss:$48 sps:$4 sm:$0xff]   ;;  %v17745_v53 = vld [vmem:[#allocation9 + $0x1a0] ss:$48 sps:$4 sm:$0xff]  }
 0x1e6   : > { %3328 = vmatpush1.bf16.msra.mxu0 %v17673_v54  ;;  %v17748_v54 = vld [vmem:[#allocation9 + $0x7a0] ss:$48 sps:$4 sm:$0xff]  }
 0x1e7   : > { %3369 = vmatpush1.bf16.msra.mxu1 %v17676_v55  ;;  %3329 = vmatprep.subr.bf16.mxu0 %v17681_v56  ;;  %v17753_v55 = vld [vmem:[#allocation9 + $0x144] ss:$48 sps:$4 sm:$0xff]  }
 0x1e8   : > { %3370 = vmatprep.subr.bf16.mxu1 %v17684_v57  ;;  %v17756_v56 = vld [vmem:[#allocation9 + $0x744] ss:$48 sps:$4 sm:$0xff]   ;;  %v17751_v57 = vld [vmem:[#allocation9 + $0x140] ss:$48 sps:$4 sm:$0xff]  }
 0x1ea   : > { %3330 = vmatpush2.bf16.msra.mxu0 %v17679_v58  ;;  %v17754_v58 = vld [vmem:[#allocation9 + $0x740] ss:$48 sps:$4 sm:$0xff]  }
 0x1eb   : > { %3371 = vmatpush2.bf16.msra.mxu1 %v17682_v60  ;;  %3331 = vmatprep.subr.bf16.mxu0 %v17687_v61  ;;  %v17759_v60 = vld [vmem:[#allocation9 + $0xe4] ss:$48 sps:$4 sm:$0xff]  }
 0x1ec   : > { %3372 = vmatprep.subr.bf16.mxu1 %v17690_v63  ;;  %v17762_v61 = vld [vmem:[#allocation9 + $0x6e4] ss:$48 sps:$4 sm:$0xff]   ;;  %v17757_v63 = vld [vmem:[#allocation9 + $0xe0] ss:$48 sps:$4 sm:$0xff]  }
 0x1ee   : > { %3332 = vmatpush2.bf16.msra.mxu0 %v17685_v0  ;;  %v17760_v0 = vld [vmem:[#allocation9 + $0x6e0] ss:$48 sps:$4 sm:$0xff]  }
 0x1ef   : > { %3373 = vmatpush2.bf16.msra.mxu1 %v17688_v1  ;;  %3333 = vmatprep.subr.bf16.mxu0 %v17693_v2  ;;  %v17765_v1 = vld [vmem:[#allocation9 + $0x84] ss:$48 sps:$4 sm:$0xff]  }
 0x1f0   : > { %3374 = vmatprep.subr.bf16.mxu1 %v17696_v3  ;;  %v17768_v2 = vld [vmem:[#allocation9 + $0x684] ss:$48 sps:$4 sm:$0xff]   ;;  %v17763_v3 = vld [vmem:[#allocation9 + $0x80] ss:$48 sps:$4 sm:$0xff]  }
 0x1f2   : > { %3334 = vmatpush2.bf16.msra.mxu0 %v17691_v4  ;;  %v17766_v4 = vld [vmem:[#allocation9 + $0x680] ss:$48 sps:$4 sm:$0xff]  }
 0x1f3   : > { %3375 = vmatpush2.bf16.msra.mxu1 %v17694_v5  ;;  %3335 = vmatprep.subr.bf16.mxu0 %v17699_v6  ;;  %v17771_v5 = vld [vmem:[#allocation9 + $0x24] ss:$48 sps:$4 sm:$0xff]  }
 0x1f4   : > { %3376 = vmatprep.subr.bf16.mxu1 %v17702_v7  ;;  %v17774_v6 = vld [vmem:[#allocation9 + $0x624] ss:$48 sps:$4 sm:$0xff]   ;;  %v17769_v7 = vld [vmem:[#allocation9 + $0x20] ss:$48 sps:$4 sm:$0xff]  }
 0x1f6   : > { %3336 = vmatpush2.bf16.msra.mxu0 %v17697_v8  ;;  %v17772_v8 = vld [vmem:[#allocation9 + $0x620] ss:$48 sps:$4 sm:$0xff]  }
 0x1f7   : > { %3377 = vmatpush2.bf16.msra.mxu1 %v17700_v9  ;;  %3337 = vmatprep.subr.bf16.mxu0 %v17705_v11  ;;  %v17777_v9 = vld [vmem:[#allocation9 + $0x5c4] ss:$48 sps:$4 sm:$0xff]  }
 0x1f8   : > { %3378 = vmatprep.subr.bf16.mxu1 %v17708_v12  ;;  %v17780_v11 = vld [vmem:[#allocation9 + $0xbc4] ss:$48 sps:$4 sm:$0xff]   ;;  %v17775_v12 = vld [vmem:[#allocation9 + $0x5c0] ss:$48 sps:$4 sm:$0xff]  }
 0x1fa   : > { %3338 = vmatpush2.bf16.msra.mxu0 %v17703_v13  ;;  %v17778_v13 = vld [vmem:[#allocation9 + $0xbc0] ss:$48 sps:$4 sm:$0xff]  }
 0x1fb   : > { %3379 = vmatpush2.bf16.msra.mxu1 %v17706_v15  ;;  %3339 = vmatprep.subr.bf16.mxu0 %v17711_v16  ;;  %v17783_v15 = vld [vmem:[#allocation9 + $0x564] ss:$48 sps:$4 sm:$0xff]  }
 0x1fc   : > { %3380 = vmatprep.subr.bf16.mxu1 %v17714_v17  ;;  %v17786_v16 = vld [vmem:[#allocation9 + $0xb64] ss:$48 sps:$4 sm:$0xff]   ;;  %v17781_v17 = vld [vmem:[#allocation9 + $0x560] ss:$48 sps:$4 sm:$0xff]  }
 0x1fe   : > { %3340 = vmatpush2.bf16.msra.mxu0 %v17709_v18  ;;  %v17784_v18 = vld [vmem:[#allocation9 + $0xb60] ss:$48 sps:$4 sm:$0xff]  }
 0x1ff   : > { %3381 = vmatpush2.bf16.msra.mxu1 %v17712_v19  ;;  %3341 = vmatprep.subr.bf16.mxu0 %v17717_v20  ;;  %v17789_v19 = vld [vmem:[#allocation9 + $0x504] ss:$48 sps:$4 sm:$0xff]  }
 0x200   : > { %3382 = vmatprep.subr.bf16.mxu1 %v17720_v21  ;;  %v17792_v20 = vld [vmem:[#allocation9 + $0xb04] ss:$48 sps:$4 sm:$0xff]   ;;  %v17787_v21 = vld [vmem:[#allocation9 + $0x500] ss:$48 sps:$4 sm:$0xff]  }
 0x202   : > { %3342 = vmatpush2.bf16.msra.mxu0 %v17715_v22  ;;  %v17790_v22 = vld [vmem:[#allocation9 + $0xb00] ss:$48 sps:$4 sm:$0xff]  }
 0x203   : > { %3383 = vmatpush2.bf16.msra.mxu1 %v17718_v23  ;;  %3343 = vmatprep.subr.bf16.mxu0 %v17723_v24  ;;  %v17795_v23 = vld [vmem:[#allocation9 + $0x4a4] ss:$48 sps:$4 sm:$0xff]  }
 0x204   : > { %3384 = vmatprep.subr.bf16.mxu1 %v17726_v25  ;;  %v17798_v24 = vld [vmem:[#allocation9 + $0xaa4] ss:$48 sps:$4 sm:$0xff]   ;;  %v17793_v25 = vld [vmem:[#allocation9 + $0x4a0] ss:$48 sps:$4 sm:$0xff]  }
 0x206   : > { %3344 = vmatpush2.bf16.msra.mxu0 %v17721_v26  ;;  %v17796_v26 = vld [vmem:[#allocation9 + $0xaa0] ss:$48 sps:$4 sm:$0xff]  }
 0x207   : > { %3385 = vmatpush2.bf16.msra.mxu1 %v17724_v27  ;;  %3395 = vmatprep.subr.bf16.mxu0 %v17729_v28  ;;  %v17801_v27 = vld [vmem:[#allocation9 + $0x444] ss:$48 sps:$4 sm:$0xff]  }
 0x208   : > { %3436 = vmatprep.subr.bf16.mxu1 %v17732_v29  ;;  %v17804_v28 = vld [vmem:[#allocation9 + $0xa44] ss:$48 sps:$4 sm:$0xff]   ;;  %v17799_v29 = vld [vmem:[#allocation9 + $0x440] ss:$48 sps:$4 sm:$0xff]  }
 0x209   : > { %v3101_v36 = vpop.f32.mrf.mxu0  ;;  %3346 = vmatmul.mubr.bf16.vlgmr.msra.gmra.mxu0 %v20257_v10 }
 0x20a   : > { %v3142_v37 = vpop.f32.mrf.mxu1  ;;  %3387 = vmatmul.mubr.bf16.vlgmr.msra.gmra.mxu1 %v20261_v14  ;;  %3396 = vmatpush1.bf16.msra.mxu0 %v17727_v30  ;;  %v17802_v30 = vld [vmem:[#allocation9 + $0xa40] ss:$48 sps:$4 sm:$0xff]  }
 0x20b   : > { %v20277_v38 = vadd.f32 %v3142_v37, %v3101_v36  ;;  %3437 = vmatpush1.bf16.msra.mxu1 %v17730_v31  ;;  %v3103_v39 = vpop.f32.mrf.mxu0  ;;  %3397 = vmatprep.subr.bf16.mxu0 %v17735_v32  ;;  %v17807_v31 = vld [vmem:[#allocation9 + $0x3e4] ss:$48 sps:$4 sm:$0xff]   ;;  %v17811_v37 = vld [vmem:[#allocation9 + $0x380] ss:$48 sps:$4 sm:$0xff]  }
 0x20c   : > { %v3144_v40 = vpop.f32.mrf.mxu1  ;;  %3438 = vmatprep.subr.bf16.mxu1 %v17738_v33  ;;  %3427 = vmatprep.mubr.bf16.mxu0 %v20249_v59  ;;  %v17810_v32 = vld [vmem:[#allocation9 + $0x9e4] ss:$48 sps:$4 sm:$0xff]   ;;  %v17805_v33 = vld [vmem:[#allocation9 + $0x3e0] ss:$48 sps:$4 sm:$0xff]  }
 0x20d   : > { %v20279_v43 = vadd.f32 %v3144_v40, %v3103_v39  ;;  %3468 = vmatprep.mubr.bf16.mxu1 %v20253_v62  ;;  %v3105_v46 = vpop.f32.mrf.mxu0  ;;  %v17816_v36 = vld [vmem:[#allocation9 + $0x984] ss:$48 sps:$4 sm:$0xff]   ;;  %v17814_v39 = vld [vmem:[#allocation9 + $0x980] ss:$48 sps:$4 sm:$0xff]  }
 0x20e   : > { %v3146_v48 = vpop.f32.mrf.mxu1  ;;  %3398 = vmatpush1.bf16.msra.mxu0 %v17733_v34  ;;  %v17808_v34 = vld [vmem:[#allocation9 + $0x9e0] ss:$48 sps:$4 sm:$0xff]   ;;  %v17819_v40 = vld [vmem:[#allocation9 + $0x324] ss:$48 sps:$4 sm:$0xff]   ;;  %v17828_v46 = vld [vmem:[#allocation9 + $0x8cc] ss:$48 sps:$4 sm:$0xff]  }
 0x20f   : > { %3439 = vmatpush1.bf16.msra.mxu1 %v17736_v35  ;;  %v3106_v49 = vpop.f32.mrf.mxu0  ;;  %3399 = vmatprep.subr.bf16.mxu0 %v17741_v41  ;;  %v17813_v35 = vld [vmem:[#allocation9 + $0x384] ss:$48 sps:$4 sm:$0xff]   ;;  %v17823_v48 = vld [vmem:[#allocation9 + $0x2c8] ss:$48 sps:$4 sm:$0xff]  }
 0x210   : > { %v3147_v50 = vpop.f32.mrf.mxu1  ;;  %3440 = vmatprep.subr.bf16.mxu1 %v17744_v42  ;;  %v17822_v41 = vld [vmem:[#allocation9 + $0x924] ss:$48 sps:$4 sm:$0xff]   ;;  %v17817_v42 = vld [vmem:[#allocation9 + $0x320] ss:$48 sps:$4 sm:$0xff]   ;;  %v17826_v49 = vld [vmem:[#allocation9 + $0x8c8] ss:$48 sps:$4 sm:$0xff]  }
 0x211   : > { %v17831_v50 = vld [vmem:[#allocation9 + $0x26c] ss:$48 sps:$4 sm:$0xff]  }
 0x212   : > { %3400 = vmatpush1.bf16.msra.mxu0 %v17739_v44  ;;  %v17820_v44 = vld [vmem:[#allocation9 + $0x920] ss:$48 sps:$4 sm:$0xff]  }
 0x213   : > { %3441 = vmatpush1.bf16.msra.mxu1 %v17742_v45  ;;  %3401 = vmatprep.subr.bf16.mxu0 %v17747_v51  ;;  %v17825_v45 = vld [vmem:[#allocation9 + $0x2cc] ss:$48 sps:$4 sm:$0xff]  }
 0x214   : > { %3442 = vmatprep.subr.bf16.mxu1 %v17750_v52  ;;  %v17834_v51 = vld [vmem:[#allocation9 + $0x86c] ss:$48 sps:$4 sm:$0xff]   ;;  %v17829_v52 = vld [vmem:[#allocation9 + $0x268] ss:$48 sps:$4 sm:$0xff]  }
 0x216   : > { %3402 = vmatpush1.bf16.msra.mxu0 %v17745_v53  ;;  %v17832_v53 = vld [vmem:[#allocation9 + $0x868] ss:$48 sps:$4 sm:$0xff]  }
 0x217   : > { %3443 = vmatpush1.bf16.msra.mxu1 %v17748_v54  ;;  %3403 = vmatprep.subr.bf16.mxu0 %v17753_v55 }
 0x218   : > { %3444 = vmatprep.subr.bf16.mxu1 %v17756_v56 }
 0x21a   : > { %3404 = vmatpush1.bf16.msra.mxu0 %v17751_v57 }
 0x21b   : > { %3445 = vmatpush1.bf16.msra.mxu1 %v17754_v58  ;;  %3405 = vmatprep.subr.bf16.mxu0 %v17759_v60  ;;  %v17837_v60 = vld [vmem:[#allocation9 + $0x20c] ss:$48 sps:$4 sm:$0xff]  }
 0x21c   : > { %3446 = vmatprep.subr.bf16.mxu1 %v17762_v61  ;;  %v17840_v61 = vld [vmem:[#allocation9 + $0x80c] ss:$48 sps:$4 sm:$0xff]  }
 0x21e   : > { %3406 = vmatpush1.bf16.msra.mxu0 %v17757_v63 }
 0x21f   : > { %3447 = vmatpush1.bf16.msra.mxu1 %v17760_v0  ;;  %3407 = vmatprep.subr.bf16.mxu0 %v17765_v1  ;;  %v17835_v0 = vld [vmem:[#allocation9 + $0x208] ss:$48 sps:$4 sm:$0xff]  }
 0x220   : > { %3448 = vmatprep.subr.bf16.mxu1 %v17768_v2  ;;  %v17838_v1 = vld [vmem:[#allocation9 + $0x808] ss:$48 sps:$4 sm:$0xff]  }
 0x222   : > { %3408 = vmatpush1.bf16.msra.mxu0 %v17763_v3 }
 0x223   : > { %3449 = vmatpush1.bf16.msra.mxu1 %v17766_v4  ;;  %3409 = vmatprep.subr.bf16.mxu0 %v17771_v5 }
 0x224   : > { %3450 = vmatprep.subr.bf16.mxu1 %v17774_v6  ;;  %v17843_v6 = vld [vmem:[#allocation9 + $0x1ac] ss:$48 sps:$4 sm:$0xff]  }
 0x226   : > { %3410 = vmatpush1.bf16.msra.mxu0 %v17769_v7  ;;  %v17846_v7 = vld [vmem:[#allocation9 + $0x7ac] ss:$48 sps:$4 sm:$0xff]  }
 0x227   : > { %3451 = vmatpush1.bf16.msra.mxu1 %v17772_v8  ;;  %3411 = vmatprep.subr.bf16.mxu0 %v17777_v9  ;;  %v17841_v8 = vld [vmem:[#allocation9 + $0x1a8] ss:$48 sps:$4 sm:$0xff]  }
 0x228   : > { %3452 = vmatprep.subr.bf16.mxu1 %v17780_v11  ;;  %v17844_v9 = vld [vmem:[#allocation9 + $0x7a8] ss:$48 sps:$4 sm:$0xff]   ;;  %v17849_v11 = vld [vmem:[#allocation9 + $0x14c] ss:$48 sps:$4 sm:$0xff]  }
 0x22a   : > { %3412 = vmatpush2.bf16.msra.mxu0 %v17775_v12  ;;  %v17850_v12 = vld [vmem:[#allocation9 + $0x748] ss:$48 sps:$4 sm:$0xff]  }
 0x22b   : > { %3453 = vmatpush2.bf16.msra.mxu1 %v17778_v13  ;;  %3413 = vmatprep.subr.bf16.mxu0 %v17783_v15  ;;  %v17855_v13 = vld [vmem:[#allocation9 + $0xec] ss:$48 sps:$4 sm:$0xff]  }
 0x22c   : > { %3454 = vmatprep.subr.bf16.mxu1 %v17786_v16  ;;  %v17858_v15 = vld [vmem:[#allocation9 + $0x6ec] ss:$48 sps:$4 sm:$0xff]   ;;  %v17853_v16 = vld [vmem:[#allocation9 + $0xe8] ss:$48 sps:$4 sm:$0xff]  }
 0x22e   : > { %3414 = vmatpush2.bf16.msra.mxu0 %v17781_v17  ;;  %v17856_v17 = vld [vmem:[#allocation9 + $0x6e8] ss:$48 sps:$4 sm:$0xff]  }
 0x22f   : > { %3455 = vmatpush2.bf16.msra.mxu1 %v17784_v18  ;;  %3415 = vmatprep.subr.bf16.mxu0 %v17789_v19  ;;  %v17861_v18 = vld [vmem:[#allocation9 + $0x8c] ss:$48 sps:$4 sm:$0xff]  }
 0x230   : > { %3456 = vmatprep.subr.bf16.mxu1 %v17792_v20  ;;  %v17864_v19 = vld [vmem:[#allocation9 + $0x68c] ss:$48 sps:$4 sm:$0xff]   ;;  %v17859_v20 = vld [vmem:[#allocation9 + $0x88] ss:$48 sps:$4 sm:$0xff]  }
 0x232   : > { %3416 = vmatpush2.bf16.msra.mxu0 %v17787_v21  ;;  %v17862_v21 = vld [vmem:[#allocation9 + $0x688] ss:$48 sps:$4 sm:$0xff]  }
 0x233   : > { %3457 = vmatpush2.bf16.msra.mxu1 %v17790_v22  ;;  %3417 = vmatprep.subr.bf16.mxu0 %v17795_v23  ;;  %v17867_v22 = vld [vmem:[#allocation9 + $0x2c] ss:$48 sps:$4 sm:$0xff]  }
 0x234   : > { %3458 = vmatprep.subr.bf16.mxu1 %v17798_v24  ;;  %v17870_v23 = vld [vmem:[#allocation9 + $0x62c] ss:$48 sps:$4 sm:$0xff]   ;;  %v17865_v24 = vld [vmem:[#allocation9 + $0x28] ss:$48 sps:$4 sm:$0xff]  }
 0x236   : > { %3418 = vmatpush2.bf16.msra.mxu0 %v17793_v25  ;;  %v17868_v25 = vld [vmem:[#allocation9 + $0x628] ss:$48 sps:$4 sm:$0xff]  }
 0x237   : > { %3459 = vmatpush2.bf16.msra.mxu1 %v17796_v26  ;;  %3419 = vmatprep.subr.bf16.mxu0 %v17801_v27  ;;  %v17873_v26 = vld [vmem:[#allocation9 + $0x5cc] ss:$48 sps:$4 sm:$0xff]  }
 0x238   : > { %3460 = vmatprep.subr.bf16.mxu1 %v17804_v28  ;;  %v17876_v27 = vld [vmem:[#allocation9 + $0xbcc] ss:$48 sps:$4 sm:$0xff]   ;;  %v17871_v28 = vld [vmem:[#allocation9 + $0x5c8] ss:$48 sps:$4 sm:$0xff]  }
 0x23a   : > { %3420 = vmatpush2.bf16.msra.mxu0 %v17799_v29  ;;  %v17874_v29 = vld [vmem:[#allocation9 + $0xbc8] ss:$48 sps:$4 sm:$0xff]  }
 0x23b   : > { %3461 = vmatpush2.bf16.msra.mxu1 %v17802_v30  ;;  %3421 = vmatprep.subr.bf16.mxu0 %v17807_v31  ;;  %v17879_v30 = vld [vmem:[#allocation9 + $0x56c] ss:$48 sps:$4 sm:$0xff]  }
 0x23c   : > { %3462 = vmatprep.subr.bf16.mxu1 %v17810_v32  ;;  %v17882_v31 = vld [vmem:[#allocation9 + $0xb6c] ss:$48 sps:$4 sm:$0xff]   ;;  %v17877_v32 = vld [vmem:[#allocation9 + $0x568] ss:$48 sps:$4 sm:$0xff]  }
 0x23e   : > { %3422 = vmatpush2.bf16.msra.mxu0 %v17805_v33  ;;  %v17880_v33 = vld [vmem:[#allocation9 + $0xb68] ss:$48 sps:$4 sm:$0xff]  }
 0x23f   : > { %3463 = vmatpush2.bf16.msra.mxu1 %v17808_v34  ;;  %3423 = vmatprep.subr.bf16.mxu0 %v17813_v35  ;;  %v17885_v34 = vld [vmem:[#allocation9 + $0x50c] ss:$48 sps:$4 sm:$0xff]  }
 0x240   : > { %3464 = vmatprep.subr.bf16.mxu1 %v17816_v36  ;;  %v17888_v35 = vld [vmem:[#allocation9 + $0xb0c] ss:$48 sps:$4 sm:$0xff]   ;;  %v17883_v36 = vld [vmem:[#allocation9 + $0x508] ss:$48 sps:$4 sm:$0xff]  }
 0x242   : > { %3424 = vmatpush2.bf16.msra.mxu0 %v17811_v37  ;;  %v17886_v37 = vld [vmem:[#allocation9 + $0xb08] ss:$48 sps:$4 sm:$0xff]  }
 0x243   : > { %3465 = vmatpush2.bf16.msra.mxu1 %v17814_v39  ;;  %3425 = vmatprep.subr.bf16.mxu0 %v17819_v40  ;;  %v17891_v39 = vld [vmem:[#allocation9 + $0x4ac] ss:$48 sps:$4 sm:$0xff]  }
 0x244   : > { %3466 = vmatprep.subr.bf16.mxu1 %v17822_v41  ;;  %v17894_v40 = vld [vmem:[#allocation9 + $0xaac] ss:$48 sps:$4 sm:$0xff]   ;;  %v17889_v41 = vld [vmem:[#allocation9 + $0x4a8] ss:$48 sps:$4 sm:$0xff]  }
 0x246   : > { %3426 = vmatpush2.bf16.msra.mxu0 %v17817_v42  ;;  %v17892_v42 = vld [vmem:[#allocation9 + $0xaa8] ss:$48 sps:$4 sm:$0xff]  }
 0x247   : > { %3467 = vmatpush2.bf16.msra.mxu1 %v17820_v44  ;;  %3477 = vmatprep.subr.bf16.mxu0 %v17825_v45  ;;  %v17897_v44 = vld [vmem:[#allocation9 + $0x44c] ss:$48 sps:$4 sm:$0xff]  }
 0x248   : > { %3518 = vmatprep.subr.bf16.mxu1 %v17828_v46  ;;  %v17900_v45 = vld [vmem:[#allocation9 + $0xa4c] ss:$48 sps:$4 sm:$0xff]   ;;  %v17895_v46 = vld [vmem:[#allocation9 + $0x448] ss:$48 sps:$4 sm:$0xff]  }
 0x249   : > { %v3183_v54 = vpop.f32.mrf.mxu0  ;;  %3428 = vmatmul.mubr.bf16.vlgmr.msra.gmra.mxu0 %v20257_v10 }
 0x24a   : > { %v3224_v55 = vpop.f32.mrf.mxu1  ;;  %3469 = vmatmul.mubr.bf16.vlgmr.msra.gmra.mxu1 %v20261_v14  ;;  %3478 = vmatpush1.bf16.msra.mxu0 %v17823_v48  ;;  %v17898_v48 = vld [vmem:[#allocation9 + $0xa48] ss:$48 sps:$4 sm:$0xff]  }
 0x24b   : > { %v20285_v56 = vadd.f32 %v3224_v55, %v3183_v54  ;;  %3519 = vmatpush1.bf16.msra.mxu1 %v17826_v49  ;;  %v3185_v57 = vpop.f32.mrf.mxu0  ;;  %3479 = vmatprep.subr.bf16.mxu0 %v17831_v50  ;;  %v17903_v49 = vld [vmem:[#allocation9 + $0x3ec] ss:$48 sps:$4 sm:$0xff]   ;;  %v17907_v55 = vld [vmem:[#allocation9 + $0x388] ss:$48 sps:$4 sm:$0xff]  }
 0x24c   : > { %v3226_v58 = vpop.f32.mrf.mxu1  ;;  %3520 = vmatprep.subr.bf16.mxu1 %v17834_v51  ;;  %3509 = vmatprep.mubr.bf16.mxu0 %v20249_v59  ;;  %v17852_v59 = vld [vmem:[#allocation9 + $0x74c] ss:$48 sps:$4 sm:$0xff]   ;;  %v17901_v51 = vld [vmem:[#allocation9 + $0x3e8] ss:$48 sps:$4 sm:$0xff]  }
 0x24d   : > { %v20287_v63 = vadd.f32 %v3226_v58, %v3185_v57  ;;  %3550 = vmatprep.mubr.bf16.mxu1 %v20253_v62  ;;  %v3187_v2 = vpop.f32.mrf.mxu0  ;;  %v17847_v62 = vld [vmem:[#allocation9 + $0x148] ss:$48 sps:$4 sm:$0xff]   ;;  %v17906_v50 = vld [vmem:[#allocation9 + $0x9ec] ss:$48 sps:$4 sm:$0xff]  }
 0x24e   : > { %v3228_v3 = vpop.f32.mrf.mxu1  ;;  %3480 = vmatpush1.bf16.msra.mxu0 %v17829_v52  ;;  %v17904_v52 = vld [vmem:[#allocation9 + $0x9e8] ss:$48 sps:$4 sm:$0xff]   ;;  %v17912_v54 = vld [vmem:[#allocation9 + $0x98c] ss:$48 sps:$4 sm:$0xff]  }
 0x24f   : > { %3521 = vmatpush1.bf16.msra.mxu1 %v17832_v53  ;;  %v3188_v4 = vpop.f32.mrf.mxu0  ;;  %3481 = vmatprep.subr.bf16.mxu0 %v17837_v60  ;;  %v17909_v53 = vld [vmem:[#allocation9 + $0x38c] ss:$48 sps:$4 sm:$0xff]   ;;  %v17910_v57 = vld [vmem:[#allocation9 + $0x988] ss:$48 sps:$4 sm:$0xff]  }
 0x250   : > { %v3229_v5 = vpop.f32.mrf.mxu1  ;;  %3522 = vmatprep.subr.bf16.mxu1 %v17840_v61  ;;  %v17915_v58 = vld [vmem:[#allocation9 + $0x32c] ss:$48 sps:$4 sm:$0xff]   ;;  %v17913_v61 = vld [vmem:[#allocation9 + $0x328] ss:$48 sps:$4 sm:$0xff]   ;;  %v17919_v4 = vld [vmem:[#allocation7 + $0x2a0] ss:$48 sps:$4 sm:$0xff]  }
 0x251   : > { %v17918_v60 = vld [vmem:[#allocation9 + $0x92c] ss:$48 sps:$4 sm:$0xff]   ;;  %v17922_v5 = vld [vmem:[#allocation7 + $0x2a8] ss:$48 sps:$4 sm:$0xff]  }
 0x252   : > { %3482 = vmatpush1.bf16.msra.mxu0 %v17835_v0  ;;  %v17916_v0 = vld [vmem:[#allocation9 + $0x928] ss:$48 sps:$4 sm:$0xff]   ;;  %v17924_v2 = vld [vmem:[#allocation7 + $0x2ac] ss:$48 sps:$4 sm:$0xff]  }
 0x253   : > { %3523 = vmatpush1.bf16.msra.mxu1 %v17838_v1  ;;  %3483 = vmatprep.subr.bf16.mxu0 %v17843_v6  ;;  %v17921_v1 = vld [vmem:[#allocation7 + $0x2a4] ss:$48 sps:$4 sm:$0xff]   ;;  %v20292_v3 = vld.sshfl [vmem:[%s20207_s9] sm:$0x33 pattern:$0x76325410] }
 0x254   : > { %3524 = vmatprep.subr.bf16.mxu1 %v17846_v7  ;;  %v17927_v6 = vld [vmem:[#allocation7 + $0x244] ss:$48 sps:$4 sm:$0xff]   ;;  %v17930_v7 = vld [vmem:[#allocation7 + $0x24c] ss:$48 sps:$4 sm:$0xff]  }
 0x256   : > { %3484 = vmatpush1.bf16.msra.mxu0 %v17841_v8  ;;  %v17925_v8 = vld [vmem:[#allocation7 + $0x240] ss:$48 sps:$4 sm:$0xff]  }
 0x257   : > { %3525 = vmatpush1.bf16.msra.mxu1 %v17844_v9  ;;  %3485 = vmatprep.subr.bf16.mxu0 %v17849_v11  ;;  %v17928_v9 = vld [vmem:[#allocation7 + $0x248] ss:$48 sps:$4 sm:$0xff]   ;;  %v20296_v11 = vcombine.high %v20292_v3, %v20292_v3 }
 0x258   : > { %3526 = vmatprep.subr.bf16.mxu1 %v17852_v59 }
 0x25a   : > { %3486 = vmatpush1.bf16.msra.mxu0 %v17847_v62 }
 0x25b   : > { %3527 = vmatpush1.bf16.msra.mxu1 %v17850_v12  ;;  %3487 = vmatprep.subr.bf16.mxu0 %v17855_v13 }
 0x25c   : > { %3528 = vmatprep.subr.bf16.mxu1 %v17858_v15 }
 0x25e   : > { %3488 = vmatpush1.bf16.msra.mxu0 %v17853_v16  ;;  %v17933_v16 = vld [vmem:[#allocation7 + $0x1e4] ss:$48 sps:$4 sm:$0xff]  }
 0x25f   : > { %3529 = vmatpush1.bf16.msra.mxu1 %v17856_v17  ;;  %3489 = vmatprep.subr.bf16.mxu0 %v17861_v18  ;;  %v17936_v17 = vld [vmem:[#allocation7 + $0x1ec] ss:$48 sps:$4 sm:$0xff]  }
 0x260   : > { %3530 = vmatprep.subr.bf16.mxu1 %v17864_v19  ;;  %v17931_v19 = vld [vmem:[#allocation7 + $0x1e0] ss:$48 sps:$4 sm:$0xff]  }
 0x262   : > { %3490 = vmatpush1.bf16.msra.mxu0 %v17859_v20  ;;  %v17934_v20 = vld [vmem:[#allocation7 + $0x1e8] ss:$48 sps:$4 sm:$0xff]  }
 0x263   : > { %3531 = vmatpush1.bf16.msra.mxu1 %v17862_v21  ;;  %3491 = vmatprep.subr.bf16.mxu0 %v17867_v22 }
 0x264   : > { %3532 = vmatprep.subr.bf16.mxu1 %v17870_v23  ;;  %v17939_v23 = vld [vmem:[#allocation7 + $0x184] ss:$48 sps:$4 sm:$0xff]  }
 0x266   : > { %3492 = vmatpush1.bf16.msra.mxu0 %v17865_v24  ;;  %v17942_v24 = vld [vmem:[#allocation7 + $0x18c] ss:$48 sps:$4 sm:$0xff]  }
 0x267   : > { %3533 = vmatpush1.bf16.msra.mxu1 %v17868_v25  ;;  %3493 = vmatprep.subr.bf16.mxu0 %v17873_v26  ;;  %v17937_v25 = vld [vmem:[#allocation7 + $0x180] ss:$48 sps:$4 sm:$0xff]   ;;  %v17940_v26 = vld [vmem:[#allocation7 + $0x188] ss:$48 sps:$4 sm:$0xff]  }
 0x268   : > { %3534 = vmatprep.subr.bf16.mxu1 %v17876_v27  ;;  %v17945_v27 = vld [vmem:[#allocation7 + $0x124] ss:$48 sps:$4 sm:$0xff]  }
 0x26a   : > { %3494 = vmatpush2.bf16.msra.mxu0 %v17871_v28  ;;  %v17948_v28 = vld [vmem:[#allocation7 + $0x12c] ss:$48 sps:$4 sm:$0xff]  }
 0x26b   : > { %3535 = vmatpush2.bf16.msra.mxu1 %v17874_v29  ;;  %3495 = vmatprep.subr.bf16.mxu0 %v17879_v30  ;;  %v17943_v29 = vld [vmem:[#allocation7 + $0x120] ss:$48 sps:$4 sm:$0xff]   ;;  %v17946_v30 = vld [vmem:[#allocation7 + $0x128] ss:$48 sps:$4 sm:$0xff]  }
 0x26c   : > { %3536 = vmatprep.subr.bf16.mxu1 %v17882_v31  ;;  %v17951_v31 = vld [vmem:[#allocation7 + $0xc4] ss:$48 sps:$4 sm:$0xff]  }
 0x26e   : > { %3496 = vmatpush2.bf16.msra.mxu0 %v17877_v32  ;;  %v17954_v32 = vld [vmem:[#allocation7 + $0xcc] ss:$48 sps:$4 sm:$0xff]  }
 0x26f   : > { %3537 = vmatpush2.bf16.msra.mxu1 %v17880_v33  ;;  %3497 = vmatprep.subr.bf16.mxu0 %v17885_v34  ;;  %v17949_v33 = vld [vmem:[#allocation7 + $0xc0] ss:$48 sps:$4 sm:$0xff]   ;;  %v17952_v34 = vld [vmem:[#allocation7 + $0xc8] ss:$48 sps:$4 sm:$0xff]  }
 0x270   : > { %3538 = vmatprep.subr.bf16.mxu1 %v17888_v35  ;;  %v17957_v35 = vld [vmem:[#allocation7 + $0x64] ss:$48 sps:$4 sm:$0xff]  }
 0x272   : > { %3498 = vmatpush2.bf16.msra.mxu0 %v17883_v36  ;;  %v17960_v36 = vld [vmem:[#allocation7 + $0x6c] ss:$48 sps:$4 sm:$0xff]  }
 0x273   : > { %3539 = vmatpush2.bf16.msra.mxu1 %v17886_v37  ;;  %3499 = vmatprep.subr.bf16.mxu0 %v17891_v39  ;;  %v17955_v37 = vld [vmem:[#allocation7 + $0x60] ss:$48 sps:$4 sm:$0xff]   ;;  %v17958_v39 = vld [vmem:[#allocation7 + $0x68] ss:$48 sps:$4 sm:$0xff]  }
 0x274   : > { %3540 = vmatprep.subr.bf16.mxu1 %v17894_v40  ;;  %v17963_v40 = vld [vmem:[#allocation7 + $0x4] ss:$48 sps:$4 sm:$0xff]  }
 0x276   : > { %3500 = vmatpush2.bf16.msra.mxu0 %v17889_v41  ;;  %v17966_v41 = vld [vmem:[#allocation7 + $0xc] ss:$48 sps:$4 sm:$0xff]  }
 0x277   : > { %3541 = vmatpush2.bf16.msra.mxu1 %v17892_v42  ;;  %3501 = vmatprep.subr.bf16.mxu0 %v17897_v44  ;;  %v17961_v42 = vld [vmem:[#allocation7] ss:$48 sps:$4 sm:$0xff]   ;;  %v17964_v44 = vld [vmem:[#allocation7 + $0x8] ss:$48 sps:$4 sm:$0xff]  }
 0x278   : > { %3542 = vmatprep.subr.bf16.mxu1 %v17900_v45  ;;  %v17969_v45 = vld [vmem:[#allocation7 + $0x5a4] ss:$48 sps:$4 sm:$0xff]  }
 0x27a   : > { %3502 = vmatpush2.bf16.msra.mxu0 %v17895_v46  ;;  %v17972_v46 = vld [vmem:[#allocation7 + $0x5ac] ss:$48 sps:$4 sm:$0xff]  }
 0x27b   : > { %3543 = vmatpush2.bf16.msra.mxu1 %v17898_v48  ;;  %3503 = vmatprep.subr.bf16.mxu0 %v17903_v49  ;;  %v17967_v48 = vld [vmem:[#allocation7 + $0x5a0] ss:$48 sps:$4 sm:$0xff]   ;;  %v17970_v49 = vld [vmem:[#allocation7 + $0x5a8] ss:$48 sps:$4 sm:$0xff]  }
 0x27c   : > { %3544 = vmatprep.subr.bf16.mxu1 %v17906_v50  ;;  %v17975_v50 = vld [vmem:[#allocation7 + $0x544] ss:$48 sps:$4 sm:$0xff]  }
 0x27e   : > { %3504 = vmatpush2.bf16.msra.mxu0 %v17901_v51  ;;  %v17978_v51 = vld [vmem:[#allocation7 + $0x54c] ss:$48 sps:$4 sm:$0xff]  }
 0x27f   : > { %3545 = vmatpush2.bf16.msra.mxu1 %v17904_v52  ;;  %3505 = vmatprep.subr.bf16.mxu0 %v17909_v53  ;;  %v17973_v52 = vld [vmem:[#allocation7 + $0x540] ss:$48 sps:$4 sm:$0xff]   ;;  %v17976_v53 = vld [vmem:[#allocation7 + $0x548] ss:$48 sps:$4 sm:$0xff]  }
 0x280   : > { %3546 = vmatprep.subr.bf16.mxu1 %v17912_v54  ;;  %v17981_v54 = vld [vmem:[#allocation7 + $0x4e4] ss:$48 sps:$4 sm:$0xff]  }
 0x282   : > { %3506 = vmatpush2.bf16.msra.mxu0 %v17907_v55  ;;  %v17984_v55 = vld [vmem:[#allocation7 + $0x4ec] ss:$48 sps:$4 sm:$0xff]  }
 0x283   : > { %3547 = vmatpush2.bf16.msra.mxu1 %v17910_v57  ;;  %3507 = vmatprep.subr.bf16.mxu0 %v17915_v58  ;;  %v17979_v57 = vld [vmem:[#allocation7 + $0x4e0] ss:$48 sps:$4 sm:$0xff]   ;;  %v17982_v58 = vld [vmem:[#allocation7 + $0x4e8] ss:$48 sps:$4 sm:$0xff]  }
 0x284   : > { %3548 = vmatprep.subr.bf16.mxu1 %v17918_v60  ;;  %v17987_v60 = vld [vmem:[#allocation7 + $0x484] ss:$48 sps:$4 sm:$0xff]  }
 0x286   : > { %3508 = vmatpush2.bf16.msra.mxu0 %v17913_v61  ;;  %v17990_v61 = vld [vmem:[#allocation7 + $0x48c] ss:$48 sps:$4 sm:$0xff]  }
 0x287   : > { %3549 = vmatpush2.bf16.msra.mxu1 %v17916_v0  ;;  %4770 = vmatprep.subr.bf16.mxu0 %v17921_v1  ;;  %v17985_v0 = vld [vmem:[#allocation7 + $0x480] ss:$48 sps:$4 sm:$0xff]   ;;  %v17988_v1 = vld [vmem:[#allocation7 + $0x488] ss:$48 sps:$4 sm:$0xff]  }
 0x288   : > { %4811 = vmatprep.subr.bf16.mxu1 %v17924_v2  ;;  %v17993_v2 = vld [vmem:[#allocation7 + $0x424] ss:$48 sps:$4 sm:$0xff]  }
 0x289   : > { %v3265_v59 = vpop.f32.mrf.mxu0  ;;  %3510 = vmatmul.mubr.bf16.vlgmr.msra.gmra.mxu0 %v20257_v10 }
 0x28a   : > { %v3306_v62 = vpop.f32.mrf.mxu1  ;;  %3551 = vmatmul.mubr.bf16.vlgmr.msra.gmra.mxu1 %v20261_v14  ;;  %4771 = vmatpush1.bf16.msra.mxu0 %v17919_v4  ;;  %v17996_v4 = vld [vmem:[#allocation7 + $0x42c] ss:$48 sps:$4 sm:$0xff]  }
 0x28b   : > { %v20300_v12 = vadd.f32 %v3306_v62, %v3265_v59  ;;  %4812 = vmatpush1.bf16.msra.mxu1 %v17922_v5  ;;  %v3267_v13 = vpop.f32.mrf.mxu0  ;;  %4772 = vmatprep.subr.bf16.mxu0 %v17927_v6  ;;  %v17991_v5 = vld [vmem:[#allocation7 + $0x420] ss:$48 sps:$4 sm:$0xff]   ;;  %v17994_v6 = vld [vmem:[#allocation7 + $0x428] ss:$48 sps:$4 sm:$0xff]   ;;  %v18005_v62 = vld [vmem:[#allocation7 + $0x364] ss:$48 sps:$4 sm:$0xff]  }
 0x28c   : > { %v3308_v15 = vpop.f32.mrf.mxu1  ;;  %4813 = vmatprep.subr.bf16.mxu1 %v17930_v7  ;;  %4802 = vmatprep.mubr.bf16.mxu0 %v20296_v11  ;;  %v17999_v7 = vld [vmem:[#allocation7 + $0x3c4] ss:$48 sps:$4 sm:$0xff]   ;;  %v18000_v59 = vld [vmem:[#allocation7 + $0x3c8] ss:$48 sps:$4 sm:$0xff]  }
 0x28d   : > { %22758 = vst [vmem:[#allocation38_spill] sm:$0xff] %v20300_v12  ;;  %v20302_v18 = vadd.f32 %v3308_v15, %v3267_v13  ;;  %4843 = vmatprep.mubr.bf16.mxu1 %v20296_v11  ;;  %v3269_v10 = vpop.f32.mrf.mxu0  ;;  %v18008_v13 = vld [vmem:[#allocation7 + $0x36c] ss:$48 sps:$4 sm:$0xff]   ;;  %v18003_v15 = vld [vmem:[#allocation7 + $0x360] ss:$48 sps:$4 sm:$0xff]  }
 0x28e   : > { %v3310_v14 = vpop.f32.mrf.mxu1  ;;  %4773 = vmatpush1.bf16.msra.mxu0 %v17925_v8  ;;  %v18002_v8 = vld [vmem:[#allocation7 + $0x3cc] ss:$48 sps:$4 sm:$0xff]   ;;  %v18012_v10 = vld [vmem:[#allocation7 + $0x308] ss:$48 sps:$4 sm:$0xff]  }
 0x28f   : > { %22759 = vst [vmem:[#allocation39_spill] sm:$0xff] %v20302_v18  ;;  %4814 = vmatpush1.bf16.msra.mxu1 %v17928_v9  ;;  %v3270_v21 = vpop.f32.mrf.mxu0  ;;  %4774 = vmatprep.subr.bf16.mxu0 %v17933_v16  ;;  %v17997_v9 = vld [vmem:[#allocation7 + $0x3c0] ss:$48 sps:$4 sm:$0xff]   ;;  %v18006_v16 = vld [vmem:[#allocation7 + $0x368] ss:$48 sps:$4 sm:$0xff]  }
 0x290   : > { %v3311_v22 = vpop.f32.mrf.mxu1  ;;  %4815 = vmatprep.subr.bf16.mxu1 %v17936_v17  ;;  %v18011_v17 = vld [vmem:[#allocation7 + $0x304] ss:$48 sps:$4 sm:$0xff]   ;;  %v18020_v21 = vld [vmem:[#allocation7 + $0x2bc] ss:$48 sps:$4 sm:$0xff]  }
 0x291   : > { %v18017_v14 = vld [vmem:[#allocation7 + $0x2b4] ss:$48 sps:$4 sm:$0xff]   ;;  %v18015_v22 = vld [vmem:[#allocation7 + $0x2b0] ss:$48 sps:$4 sm:$0xff]  }
 0x292   : > { %4775 = vmatpush1.bf16.msra.mxu0 %v17931_v19  ;;  %v18014_v19 = vld [vmem:[#allocation7 + $0x30c] ss:$48 sps:$4 sm:$0xff]  }
 0x293   : > { %4816 = vmatpush1.bf16.msra.mxu1 %v17934_v20  ;;  %4776 = vmatprep.subr.bf16.mxu0 %v17939_v23  ;;  %v18009_v20 = vld [vmem:[#allocation7 + $0x300] ss:$48 sps:$4 sm:$0xff]   ;;  %v18018_v23 = vld [vmem:[#allocation7 + $0x2b8] ss:$48 sps:$4 sm:$0xff]  }
 0x294   : > { %4817 = vmatprep.subr.bf16.mxu1 %v17942_v24  ;;  %v18023_v24 = vld [vmem:[#allocation7 + $0x254] ss:$48 sps:$4 sm:$0xff]  }
 0x296   : > { %4777 = vmatpush1.bf16.msra.mxu0 %v17937_v25  ;;  %v18026_v25 = vld [vmem:[#allocation7 + $0x25c] ss:$48 sps:$4 sm:$0xff]  }
 0x297   : > { %4818 = vmatpush1.bf16.msra.mxu1 %v17940_v26  ;;  %4778 = vmatprep.subr.bf16.mxu0 %v17945_v27  ;;  %v18021_v26 = vld [vmem:[#allocation7 + $0x250] ss:$48 sps:$4 sm:$0xff]   ;;  %v18024_v27 = vld [vmem:[#allocation7 + $0x258] ss:$48 sps:$4 sm:$0xff]  }
 0x298   : > { %4819 = vmatprep.subr.bf16.mxu1 %v17948_v28 }
 0x29a   : > { %4779 = vmatpush1.bf16.msra.mxu0 %v17943_v29 }
 0x29b   : > { %4820 = vmatpush1.bf16.msra.mxu1 %v17946_v30  ;;  %4780 = vmatprep.subr.bf16.mxu0 %v17951_v31  ;;  %v18029_v30 = vld [vmem:[#allocation7 + $0x1f4] ss:$48 sps:$4 sm:$0xff]   ;;  %v18032_v31 = vld [vmem:[#allocation7 + $0x1fc] ss:$48 sps:$4 sm:$0xff]  }
 0x29c   : > { %4821 = vmatprep.subr.bf16.mxu1 %v17954_v32 }
 0x29e   : > { %4781 = vmatpush1.bf16.msra.mxu0 %v17949_v33 }
 0x29f   : > { %4822 = vmatpush1.bf16.msra.mxu1 %v17952_v34  ;;  %4782 = vmatprep.subr.bf16.mxu0 %v17957_v35 }
 0x2a0   : > { %4823 = vmatprep.subr.bf16.mxu1 %v17960_v36  ;;  %v18027_v36 = vld [vmem:[#allocation7 + $0x1f0] ss:$48 sps:$4 sm:$0xff]  }
 0x2a2   : > { %4783 = vmatpush1.bf16.msra.mxu0 %v17955_v37  ;;  %v18030_v37 = vld [vmem:[#allocation7 + $0x1f8] ss:$48 sps:$4 sm:$0xff]  }
 0x2a3   : > { %4824 = vmatpush1.bf16.msra.mxu1 %v17958_v39  ;;  %4784 = vmatprep.subr.bf16.mxu0 %v17963_v40  ;;  %v18035_v40 = vld [vmem:[#allocation7 + $0x194] ss:$48 sps:$4 sm:$0xff]  }
 0x2a4   : > { %4825 = vmatprep.subr.bf16.mxu1 %v17966_v41  ;;  %v18038_v41 = vld [vmem:[#allocation7 + $0x19c] ss:$48 sps:$4 sm:$0xff]  }
 0x2a6   : > { %4785 = vmatpush1.bf16.msra.mxu0 %v17961_v42 }
 0x2a7   : > { %4826 = vmatpush1.bf16.msra.mxu1 %v17964_v44  ;;  %4786 = vmatprep.subr.bf16.mxu0 %v17969_v45  ;;  %v18033_v45 = vld [vmem:[#allocation7 + $0x190] ss:$48 sps:$4 sm:$0xff]  }
 0x2a8   : > { %4827 = vmatprep.subr.bf16.mxu1 %v17972_v46  ;;  %v18036_v46 = vld [vmem:[#allocation7 + $0x198] ss:$48 sps:$4 sm:$0xff]  }
 0x2aa   : > { %4787 = vmatpush2.bf16.msra.mxu0 %v17967_v48  ;;  %v18041_v48 = vld [vmem:[#allocation7 + $0x134] ss:$48 sps:$4 sm:$0xff]  }
 0x2ab   : > { %4828 = vmatpush2.bf16.msra.mxu1 %v17970_v49  ;;  %4788 = vmatprep.subr.bf16.mxu0 %v17975_v50  ;;  %v18044_v49 = vld [vmem:[#allocation7 + $0x13c] ss:$48 sps:$4 sm:$0xff]   ;;  %v18039_v50 = vld [vmem:[#allocation7 + $0x130] ss:$48 sps:$4 sm:$0xff]  }
 0x2ac   : > { %4829 = vmatprep.subr.bf16.mxu1 %v17978_v51  ;;  %v18042_v51 = vld [vmem:[#allocation7 + $0x138] ss:$48 sps:$4 sm:$0xff]  }
 0x2ae   : > { %4789 = vmatpush2.bf16.msra.mxu0 %v17973_v52  ;;  %v18047_v52 = vld [vmem:[#allocation7 + $0xd4] ss:$48 sps:$4 sm:$0xff]  }
 0x2af   : > { %4830 = vmatpush2.bf16.msra.mxu1 %v17976_v53  ;;  %4790 = vmatprep.subr.bf16.mxu0 %v17981_v54  ;;  %v18050_v53 = vld [vmem:[#allocation7 + $0xdc] ss:$48 sps:$4 sm:$0xff]   ;;  %v18045_v54 = vld [vmem:[#allocation7 + $0xd0] ss:$48 sps:$4 sm:$0xff]  }
 0x2b0   : > { %4831 = vmatprep.subr.bf16.mxu1 %v17984_v55  ;;  %v18048_v55 = vld [vmem:[#allocation7 + $0xd8] ss:$48 sps:$4 sm:$0xff]  }
 0x2b2   : > { %4791 = vmatpush2.bf16.msra.mxu0 %v17979_v57  ;;  %v18053_v57 = vld [vmem:[#allocation7 + $0x74] ss:$48 sps:$4 sm:$0xff]  }
 0x2b3   : > { %4832 = vmatpush2.bf16.msra.mxu1 %v17982_v58  ;;  %4792 = vmatprep.subr.bf16.mxu0 %v17987_v60  ;;  %v18056_v58 = vld [vmem:[#allocation7 + $0x7c] ss:$48 sps:$4 sm:$0xff]   ;;  %v18051_v60 = vld [vmem:[#allocation7 + $0x70] ss:$48 sps:$4 sm:$0xff]  }
 0x2b4   : > { %4833 = vmatprep.subr.bf16.mxu1 %v17990_v61  ;;  %v18054_v61 = vld [vmem:[#allocation7 + $0x78] ss:$48 sps:$4 sm:$0xff]  }
 0x2b6   : > { %4793 = vmatpush2.bf16.msra.mxu0 %v17985_v0  ;;  %v18059_v0 = vld [vmem:[#allocation7 + $0x14] ss:$48 sps:$4 sm:$0xff]  }
 0x2b7   : > { %4834 = vmatpush2.bf16.msra.mxu1 %v17988_v1  ;;  %4794 = vmatprep.subr.bf16.mxu0 %v17993_v2  ;;  %v18062_v1 = vld [vmem:[#allocation7 + $0x1c] ss:$48 sps:$4 sm:$0xff]   ;;  %v18057_v2 = vld [vmem:[#allocation7 + $0x10] ss:$48 sps:$4 sm:$0xff]  }
 0x2b8   : > { %4835 = vmatprep.subr.bf16.mxu1 %v17996_v4  ;;  %v18060_v4 = vld [vmem:[#allocation7 + $0x18] ss:$48 sps:$4 sm:$0xff]  }
 0x2ba   : > { %4795 = vmatpush2.bf16.msra.mxu0 %v17991_v5  ;;  %v18065_v5 = vld [vmem:[#allocation7 + $0x5b4] ss:$48 sps:$4 sm:$0xff]  }
 0x2bb   : > { %4836 = vmatpush2.bf16.msra.mxu1 %v17994_v6  ;;  %4796 = vmatprep.subr.bf16.mxu0 %v17999_v7  ;;  %v18068_v6 = vld [vmem:[#allocation7 + $0x5bc] ss:$48 sps:$4 sm:$0xff]   ;;  %v18063_v7 = vld [vmem:[#allocation7 + $0x5b0] ss:$48 sps:$4 sm:$0xff]  }
 0x2bc   : > { %4837 = vmatprep.subr.bf16.mxu1 %v18002_v8  ;;  %v18066_v8 = vld [vmem:[#allocation7 + $0x5b8] ss:$48 sps:$4 sm:$0xff]  }
 0x2be   : > { %4797 = vmatpush2.bf16.msra.mxu0 %v17997_v9  ;;  %v18071_v9 = vld [vmem:[#allocation7 + $0x554] ss:$48 sps:$4 sm:$0xff]  }
 0x2bf   : > { %4838 = vmatpush2.bf16.msra.mxu1 %v18000_v59  ;;  %4798 = vmatprep.subr.bf16.mxu0 %v18005_v62  ;;  %v18074_v59 = vld [vmem:[#allocation7 + $0x55c] ss:$48 sps:$4 sm:$0xff]   ;;  %v18069_v62 = vld [vmem:[#allocation7 + $0x550] ss:$48 sps:$4 sm:$0xff]  }
 0x2c0   : > { %4839 = vmatprep.subr.bf16.mxu1 %v18008_v13  ;;  %v18072_v13 = vld [vmem:[#allocation7 + $0x558] ss:$48 sps:$4 sm:$0xff]  }
 0x2c2   : > { %4799 = vmatpush2.bf16.msra.mxu0 %v18003_v15  ;;  %v18077_v15 = vld [vmem:[#allocation7 + $0x4f4] ss:$48 sps:$4 sm:$0xff]  }
 0x2c3   : > { %4840 = vmatpush2.bf16.msra.mxu1 %v18006_v16  ;;  %4800 = vmatprep.subr.bf16.mxu0 %v18011_v17  ;;  %v18080_v16 = vld [vmem:[#allocation7 + $0x4fc] ss:$48 sps:$4 sm:$0xff]   ;;  %v18075_v17 = vld [vmem:[#allocation7 + $0x4f0] ss:$48 sps:$4 sm:$0xff]  }
 0x2c4   : > { %4841 = vmatprep.subr.bf16.mxu1 %v18014_v19  ;;  %v18078_v19 = vld [vmem:[#allocation7 + $0x4f8] ss:$48 sps:$4 sm:$0xff]  }
 0x2c6   : > { %4801 = vmatpush2.bf16.msra.mxu0 %v18009_v20  ;;  %v18083_v20 = vld [vmem:[#allocation7 + $0x494] ss:$48 sps:$4 sm:$0xff]  }
 0x2c7   : > { %4842 = vmatpush2.bf16.msra.mxu1 %v18012_v10  ;;  %4852 = vmatprep.subr.bf16.mxu0 %v18017_v14  ;;  %v18086_v10 = vld [vmem:[#allocation7 + $0x49c] ss:$48 sps:$4 sm:$0xff]   ;;  %v18081_v14 = vld [vmem:[#allocation7 + $0x490] ss:$48 sps:$4 sm:$0xff]  }
 0x2c8   : > { %4893 = vmatprep.subr.bf16.mxu1 %v18020_v21  ;;  %v18084_v21 = vld [vmem:[#allocation7 + $0x498] ss:$48 sps:$4 sm:$0xff]  }
 0x2c9   : > { %v3347_v28 = vpop.f32.mrf.mxu0  ;;  %4803 = vmatmul.mubr.bf16.vlgmr.msra.gmra.mxu0 %v20292_v3 }
 0x2ca   : > { %v3388_v29 = vpop.f32.mrf.mxu1  ;;  %4844 = vmatmul.mubr.bf16.vlgmr.msra.gmra.mxu1 %v20292_v3  ;;  %4853 = vmatpush1.bf16.msra.mxu0 %v18015_v22  ;;  %v18089_v22 = vld [vmem:[#allocation7 + $0x434] ss:$48 sps:$4 sm:$0xff]  }
 0x2cb   : > { %v20308_v32 = vadd.f32 %v3388_v29, %v3347_v28  ;;  %4894 = vmatpush1.bf16.msra.mxu1 %v18018_v23  ;;  %v3349_v33 = vpop.f32.mrf.mxu0  ;;  %4854 = vmatprep.subr.bf16.mxu0 %v18023_v24  ;;  %v18092_v23 = vld [vmem:[#allocation7 + $0x43c] ss:$48 sps:$4 sm:$0xff]   ;;  %v18087_v24 = vld [vmem:[#allocation7 + $0x430] ss:$48 sps:$4 sm:$0xff]   ;;  %v18096_v29 = vld [vmem:[#allocation7 + $0x3d8] ss:$48 sps:$4 sm:$0xff]  }
 0x2cc   : > { %v3390_v34 = vpop.f32.mrf.mxu1  ;;  %4895 = vmatprep.subr.bf16.mxu1 %v18026_v25  ;;  %4884 = vmatprep.mubr.bf16.mxu0 %v20296_v11  ;;  %v18090_v25 = vld [vmem:[#allocation7 + $0x438] ss:$48 sps:$4 sm:$0xff]   ;;  %v18093_v28 = vld [vmem:[#allocation7 + $0x3d0] ss:$48 sps:$4 sm:$0xff]  }
 0x2cd   : > { %22760 = vst [vmem:[#allocation40_spill] sm:$0xff] %v20308_v32  ;;  %v20310_v35 = vadd.f32 %v3390_v34, %v3349_v33  ;;  %4925 = vmatprep.mubr.bf16.mxu1 %v20296_v11  ;;  %v3351_v39 = vpop.f32.mrf.mxu0  ;;  %v18099_v33 = vld [vmem:[#allocation7 + $0x370] ss:$48 sps:$4 sm:$0xff]   ;;  %v18102_v34 = vld [vmem:[#allocation7 + $0x378] ss:$48 sps:$4 sm:$0xff]  }
 0x2ce   : > { %v3392_v3 = vpop.f32.mrf.mxu1  ;;  %4855 = vmatpush1.bf16.msra.mxu0 %v18021_v26  ;;  %v18095_v26 = vld [vmem:[#allocation7 + $0x3d4] ss:$48 sps:$4 sm:$0xff]   ;;  %v18105_v39 = vld [vmem:[#allocation7 + $0x310] ss:$48 sps:$4 sm:$0xff]   ;;  %v5235_v32 = vld [vmem:[#allocation2 + $0x10] sm:$0xe0] }
 0x2cf   : > { %22761 = vst [vmem:[#allocation41_spill] sm:$0xff] %v20310_v35  ;;  %4896 = vmatpush1.bf16.msra.mxu1 %v18024_v27  ;;  %v3352_v42 = vpop.f32.mrf.mxu0  ;;  %4856 = vmatprep.subr.bf16.mxu0 %v18029_v30  ;;  %v18098_v27 = vld [vmem:[#allocation7 + $0x3dc] ss:$48 sps:$4 sm:$0xff]   ;;  %v18101_v30 = vld [vmem:[#allocation7 + $0x374] ss:$48 sps:$4 sm:$0xff]  }
 0x2d0   : > { %v3393_v44 = vpop.f32.mrf.mxu1  ;;  %4897 = vmatprep.subr.bf16.mxu1 %v18032_v31  ;;  %v18104_v31 = vld [vmem:[#allocation7 + $0x37c] ss:$48 sps:$4 sm:$0xff]   ;;  %v18108_v3 = vld [vmem:[#allocation7 + $0x318] ss:$48 sps:$4 sm:$0xff]   ;;  %v18111_v42 = vld [vmem:[#allocation7 + $0x2c0] ss:$48 sps:$4 sm:$0xff]  }
 0x2d1   : > { %v18114_v44 = vld [vmem:[#allocation7 + $0x2c8] ss:$48 sps:$4 sm:$0xff]  }
 0x2d2   : > { %4857 = vmatpush1.bf16.msra.mxu0 %v18027_v36  ;;  %v18107_v36 = vld [vmem:[#allocation7 + $0x314] ss:$48 sps:$4 sm:$0xff]  }
 0x2d3   : > { %4898 = vmatpush1.bf16.msra.mxu1 %v18030_v37  ;;  %4858 = vmatprep.subr.bf16.mxu0 %v18035_v40  ;;  %v18110_v37 = vld [vmem:[#allocation7 + $0x31c] ss:$48 sps:$4 sm:$0xff]   ;;  %v18113_v40 = vld [vmem:[#allocation7 + $0x2c4] ss:$48 sps:$4 sm:$0xff]  }
 0x2d4   : > { %4899 = vmatprep.subr.bf16.mxu1 %v18038_v41  ;;  %v18116_v41 = vld [vmem:[#allocation7 + $0x2cc] ss:$48 sps:$4 sm:$0xff]  }
 0x2d6   : > { %4859 = vmatpush1.bf16.msra.mxu0 %v18033_v45  ;;  %v18119_v45 = vld [vmem:[#allocation7 + $0x264] ss:$48 sps:$4 sm:$0xff]  }
 0x2d7   : > { %4900 = vmatpush1.bf16.msra.mxu1 %v18036_v46  ;;  %4860 = vmatprep.subr.bf16.mxu0 %v18041_v48  ;;  %v18122_v46 = vld [vmem:[#allocation7 + $0x26c] ss:$48 sps:$4 sm:$0xff]   ;;  %v18117_v48 = vld [vmem:[#allocation7 + $0x260] ss:$48 sps:$4 sm:$0xff]  }
 0x2d8   : > { %4901 = vmatprep.subr.bf16.mxu1 %v18044_v49  ;;  %v18120_v49 = vld [vmem:[#allocation7 + $0x268] ss:$48 sps:$4 sm:$0xff]  }
 0x2da   : > { %4861 = vmatpush1.bf16.msra.mxu0 %v18039_v50 }
 0x2db   : > { %4902 = vmatpush1.bf16.msra.mxu1 %v18042_v51  ;;  %4862 = vmatprep.subr.bf16.mxu0 %v18047_v52  ;;  %v20315_v52 = vld.sshfl [vmem:[%s20207_s9] sm:$0x33 pattern:$0x76325410]  ;;  %s15352_s9 = scalar_lea.sflag [#allocation6], %s20203_s7 }
 0x2dc   : > { %4903 = vmatprep.subr.bf16.mxu1 %v18050_v53  ;;  %v18125_v53 = vld [vmem:[#allocation7 + $0x204] ss:$48 sps:$4 sm:$0xff]  }
 0x2de   : > { %4863 = vmatpush1.bf16.msra.mxu0 %v18045_v54  ;;  %v18128_v54 = vld [vmem:[#allocation7 + $0x20c] ss:$48 sps:$4 sm:$0xff]  }
 0x2df   : > { %4904 = vmatpush1.bf16.msra.mxu1 %v18048_v55  ;;  %4864 = vmatprep.subr.bf16.mxu0 %v18053_v57 }
 0x2e0   : > { %4905 = vmatprep.subr.bf16.mxu1 %v18056_v58 }
 0x2e2   : > { %4865 = vmatpush1.bf16.msra.mxu0 %v18051_v60 }
 0x2e3   : > { %4906 = vmatpush1.bf16.msra.mxu1 %v18054_v61  ;;  %4866 = vmatprep.subr.bf16.mxu0 %v18059_v0  ;;  %v18123_v61 = vld [vmem:[#allocation7 + $0x200] ss:$48 sps:$4 sm:$0xff]   ;;  %v18126_v0 = vld [vmem:[#allocation7 + $0x208] ss:$48 sps:$4 sm:$0xff]  }
 0x2e4   : > { %4907 = vmatprep.subr.bf16.mxu1 %v18062_v1 }
 0x2e6   : > { %4867 = vmatpush1.bf16.msra.mxu0 %v18057_v2 }
 0x2e7   : > { %4908 = vmatpush1.bf16.msra.mxu1 %v18060_v4  ;;  %4868 = vmatprep.subr.bf16.mxu0 %v18065_v5  ;;  %v18131_v4 = vld [vmem:[#allocation7 + $0x1a4] ss:$48 sps:$4 sm:$0xff]   ;;  %v18134_v5 = vld [vmem:[#allocation7 + $0x1ac] ss:$48 sps:$4 sm:$0xff]  }
 0x2e8   : > { %4909 = vmatprep.subr.bf16.mxu1 %v18068_v6 }
 0x2ea   : > { %4869 = vmatpush2.bf16.msra.mxu0 %v18063_v7 }
 0x2eb   : > { %4910 = vmatpush2.bf16.msra.mxu1 %v18066_v8  ;;  %4870 = vmatprep.subr.bf16.mxu0 %v18071_v9  ;;  %v18129_v8 = vld [vmem:[#allocation7 + $0x1a0] ss:$48 sps:$4 sm:$0xff]   ;;  %v18132_v9 = vld [vmem:[#allocation7 + $0x1a8] ss:$48 sps:$4 sm:$0xff]  }
 0x2ec   : > { %4911 = vmatprep.subr.bf16.mxu1 %v18074_v59  ;;  %v18137_v59 = vld [vmem:[#allocation7 + $0x144] ss:$48 sps:$4 sm:$0xff]  }
 0x2ee   : > { %4871 = vmatpush2.bf16.msra.mxu0 %v18069_v62  ;;  %v18140_v62 = vld [vmem:[#allocation7 + $0x14c] ss:$48 sps:$4 sm:$0xff]  }
 0x2ef   : > { %4912 = vmatpush2.bf16.msra.mxu1 %v18072_v13  ;;  %4872 = vmatprep.subr.bf16.mxu0 %v18077_v15  ;;  %v18135_v13 = vld [vmem:[#allocation7 + $0x140] ss:$48 sps:$4 sm:$0xff]   ;;  %v18143_v15 = vld [vmem:[#allocation7 + $0xe4] ss:$48 sps:$4 sm:$0xff]  }
 0x2f0   : > { %4913 = vmatprep.subr.bf16.mxu1 %v18080_v16  ;;  %v18146_v16 = vld [vmem:[#allocation7 + $0xec] ss:$48 sps:$4 sm:$0xff]  }
 0x2f2   : > { %4873 = vmatpush2.bf16.msra.mxu0 %v18075_v17  ;;  %v18141_v17 = vld [vmem:[#allocation7 + $0xe0] ss:$48 sps:$4 sm:$0xff]  }
 0x2f3   : > { %4914 = vmatpush2.bf16.msra.mxu1 %v18078_v19  ;;  %4874 = vmatprep.subr.bf16.mxu0 %v18083_v20  ;;  %v18144_v19 = vld [vmem:[#allocation7 + $0xe8] ss:$48 sps:$4 sm:$0xff]   ;;  %v18149_v20 = vld [vmem:[#allocation7 + $0x84] ss:$48 sps:$4 sm:$0xff]  }
 0x2f4   : > { %4915 = vmatprep.subr.bf16.mxu1 %v18086_v10  ;;  %v18152_v10 = vld [vmem:[#allocation7 + $0x8c] ss:$48 sps:$4 sm:$0xff]  }
 0x2f6   : > { %4875 = vmatpush2.bf16.msra.mxu0 %v18081_v14  ;;  %v18147_v14 = vld [vmem:[#allocation7 + $0x80] ss:$48 sps:$4 sm:$0xff]  }
 0x2f7   : > { %4916 = vmatpush2.bf16.msra.mxu1 %v18084_v21  ;;  %4876 = vmatprep.subr.bf16.mxu0 %v18089_v22  ;;  %v18150_v21 = vld [vmem:[#allocation7 + $0x88] ss:$48 sps:$4 sm:$0xff]   ;;  %v18155_v22 = vld [vmem:[#allocation7 + $0x24] ss:$48 sps:$4 sm:$0xff]  }
 0x2f8   : > { %4917 = vmatprep.subr.bf16.mxu1 %v18092_v23  ;;  %v18158_v23 = vld [vmem:[#allocation7 + $0x2c] ss:$48 sps:$4 sm:$0xff]  }
 0x2fa   : > { %4877 = vmatpush2.bf16.msra.mxu0 %v18087_v24  ;;  %v18153_v24 = vld [vmem:[#allocation7 + $0x20] ss:$48 sps:$4 sm:$0xff]  }
 0x2fb   : > { %4918 = vmatpush2.bf16.msra.mxu1 %v18090_v25  ;;  %4878 = vmatprep.subr.bf16.mxu0 %v18095_v26  ;;  %v18156_v25 = vld [vmem:[#allocation7 + $0x28] ss:$48 sps:$4 sm:$0xff]   ;;  %v18161_v26 = vld [vmem:[#allocation7 + $0x5c4] ss:$48 sps:$4 sm:$0xff]  }
 0x2fc   : > { %4919 = vmatprep.subr.bf16.mxu1 %v18098_v27  ;;  %v18164_v27 = vld [vmem:[#allocation7 + $0x5cc] ss:$48 sps:$4 sm:$0xff]  }
 0x2fe   : > { %4879 = vmatpush2.bf16.msra.mxu0 %v18093_v28  ;;  %v18159_v28 = vld [vmem:[#allocation7 + $0x5c0] ss:$48 sps:$4 sm:$0xff]  }
 0x2ff   : > { %4920 = vmatpush2.bf16.msra.mxu1 %v18096_v29  ;;  %4880 = vmatprep.subr.bf16.mxu0 %v18101_v30  ;;  %v18162_v29 = vld [vmem:[#allocation7 + $0x5c8] ss:$48 sps:$4 sm:$0xff]   ;;  %v18167_v30 = vld [vmem:[#allocation7 + $0x564] ss:$48 sps:$4 sm:$0xff]  }
 0x300   : > { %4921 = vmatprep.subr.bf16.mxu1 %v18104_v31  ;;  %v18170_v31 = vld [vmem:[#allocation7 + $0x56c] ss:$48 sps:$4 sm:$0xff]  }
 0x302   : > { %4881 = vmatpush2.bf16.msra.mxu0 %v18099_v33  ;;  %v18165_v33 = vld [vmem:[#allocation7 + $0x560] ss:$48 sps:$4 sm:$0xff]  }
 0x303   : > { %4922 = vmatpush2.bf16.msra.mxu1 %v18102_v34  ;;  %4882 = vmatprep.subr.bf16.mxu0 %v18107_v36  ;;  %v18168_v34 = vld [vmem:[#allocation7 + $0x568] ss:$48 sps:$4 sm:$0xff]   ;;  %v18173_v36 = vld [vmem:[#allocation7 + $0x504] ss:$48 sps:$4 sm:$0xff]  }
 0x304   : > { %4923 = vmatprep.subr.bf16.mxu1 %v18110_v37  ;;  %v18176_v37 = vld [vmem:[#allocation7 + $0x50c] ss:$48 sps:$4 sm:$0xff]  }
 0x306   : > { %4883 = vmatpush2.bf16.msra.mxu0 %v18105_v39  ;;  %v18171_v39 = vld [vmem:[#allocation7 + $0x500] ss:$48 sps:$4 sm:$0xff]  }
 0x307   : > { %4924 = vmatpush2.bf16.msra.mxu1 %v18108_v3  ;;  %4934 = vmatprep.subr.bf16.mxu0 %v18113_v40  ;;  %v18174_v3 = vld [vmem:[#allocation7 + $0x508] ss:$48 sps:$4 sm:$0xff]   ;;  %v18179_v40 = vld [vmem:[#allocation7 + $0x4a4] ss:$48 sps:$4 sm:$0xff]  }
 0x308   : > { %4975 = vmatprep.subr.bf16.mxu1 %v18116_v41  ;;  %v18182_v41 = vld [vmem:[#allocation7 + $0x4ac] ss:$48 sps:$4 sm:$0xff]  }
 0x309   : > { %v3429_v50 = vpop.f32.mrf.mxu0  ;;  %4885 = vmatmul.mubr.bf16.vlgmr.msra.gmra.mxu0 %v20315_v52 }
 0x30a   : > { %v3470_v51 = vpop.f32.mrf.mxu1  ;;  %4926 = vmatmul.mubr.bf16.vlgmr.msra.gmra.mxu1 %v20315_v52  ;;  %4935 = vmatpush1.bf16.msra.mxu0 %v18111_v42  ;;  %v18177_v42 = vld [vmem:[#allocation7 + $0x4a0] ss:$48 sps:$4 sm:$0xff]  }
 0x30b   : > { %v20319_v55 = vadd.f32 %v3470_v51, %v3429_v50  ;;  %4976 = vmatpush1.bf16.msra.mxu1 %v18114_v44  ;;  %v3431_v57 = vpop.f32.mrf.mxu0  ;;  %4936 = vmatprep.subr.bf16.mxu0 %v18119_v45  ;;  %v18180_v44 = vld [vmem:[#allocation7 + $0x4a8] ss:$48 sps:$4 sm:$0xff]   ;;  %v18185_v45 = vld [vmem:[#allocation7 + $0x444] ss:$48 sps:$4 sm:$0xff]   ;;  %v18194_v51 = vld [vmem:[#allocation7 + $0x3ec] ss:$48 sps:$4 sm:$0xff]  }
 0x30c   : > { %v3472_v58 = vpop.f32.mrf.mxu1  ;;  %4977 = vmatprep.subr.bf16.mxu1 %v18122_v46  ;;  %4966 = vmatprep.mubr.bf16.mxu0 %v20296_v11  ;;  %v18188_v46 = vld [vmem:[#allocation7 + $0x44c] ss:$48 sps:$4 sm:$0xff]   ;;  %v18191_v50 = vld [vmem:[#allocation7 + $0x3e4] ss:$48 sps:$4 sm:$0xff]  }
 0x30d   : > { %22762 = vst [vmem:[#allocation42_spill] sm:$0xff] %v20319_v55  ;;  %v20321_v60 = vadd.f32 %v3472_v58, %v3431_v57  ;;  %5007 = vmatprep.mubr.bf16.mxu1 %v20296_v11  ;;  %v3433_v1 = vpop.f32.mrf.mxu0  ;;  %v18138_v11 = vld [vmem:[#allocation7 + $0x148] ss:$48 sps:$4 sm:$0xff]   ;;  %v18197_v57 = vld [vmem:[#allocation7 + $0x384] ss:$48 sps:$4 sm:$0xff]  }
 0x30e   : > { %v3474_v2 = vpop.f32.mrf.mxu1  ;;  %4937 = vmatpush1.bf16.msra.mxu0 %v18117_v48  ;;  %v18183_v48 = vld [vmem:[#allocation7 + $0x440] ss:$48 sps:$4 sm:$0xff]   ;;  %v18200_v58 = vld [vmem:[#allocation7 + $0x38c] ss:$48 sps:$4 sm:$0xff]   ;;  %v18203_v1 = vld [vmem:[#allocation7 + $0x324] ss:$48 sps:$4 sm:$0xff]  }
 0x30f   : > { %22763 = vst [vmem:[#allocation43_spill] sm:$0xff] %v20321_v60  ;;  %4978 = vmatpush1.bf16.msra.mxu1 %v18120_v49  ;;  %v3434_v6 = vpop.f32.mrf.mxu0  ;;  %4938 = vmatprep.subr.bf16.mxu0 %v18125_v53  ;;  %v18186_v49 = vld [vmem:[#allocation7 + $0x448] ss:$48 sps:$4 sm:$0xff]   ;;  %v18189_v53 = vld [vmem:[#allocation7 + $0x3e0] ss:$48 sps:$4 sm:$0xff]  }
 0x310   : > { %v3475_v7 = vpop.f32.mrf.mxu1  ;;  %4979 = vmatprep.subr.bf16.mxu1 %v18128_v54  ;;  %v18192_v54 = vld [vmem:[#allocation7 + $0x3e8] ss:$48 sps:$4 sm:$0xff]   ;;  %v18206_v2 = vld [vmem:[#allocation7 + $0x32c] ss:$48 sps:$4 sm:$0xff]  }
 0x311   : > { %v18209_v6 = vld [vmem:[#allocation15 + $0xe4] ss:$16 sps:$4 sm:$0xff]  }
 0x312   : > { %4939 = vmatpush1.bf16.msra.mxu0 %v18123_v61  ;;  %v18195_v61 = vld [vmem:[#allocation7 + $0x380] ss:$48 sps:$4 sm:$0xff]   ;;  %v18212_v7 = vld [vmem:[#allocation15 + $0x2e4] ss:$16 sps:$4 sm:$0xff]  }
 0x313   : > { %4980 = vmatpush1.bf16.msra.mxu1 %v18126_v0  ;;  %4940 = vmatprep.subr.bf16.mxu0 %v18131_v4  ;;  %v18198_v0 = vld [vmem:[#allocation7 + $0x388] ss:$48 sps:$4 sm:$0xff]   ;;  %v18201_v4 = vld [vmem:[#allocation7 + $0x320] ss:$48 sps:$4 sm:$0xff]  }
 0x314   : > { %4981 = vmatprep.subr.bf16.mxu1 %v18134_v5  ;;  %v18204_v5 = vld [vmem:[#allocation7 + $0x328] ss:$48 sps:$4 sm:$0xff]  }
 0x316   : > { %4941 = vmatpush1.bf16.msra.mxu0 %v18129_v8  ;;  %v18207_v8 = vld [vmem:[#allocation15 + $0xe0] ss:$16 sps:$4 sm:$0xff]  }
 0x317   : > { %4982 = vmatpush1.bf16.msra.mxu1 %v18132_v9  ;;  %4942 = vmatprep.subr.bf16.mxu0 %v18137_v59  ;;  %v18210_v9 = vld [vmem:[#allocation15 + $0x2e0] ss:$16 sps:$4 sm:$0xff]   ;;  %v18215_v59 = vld [vmem:[#allocation15 + $0xc4] ss:$16 sps:$4 sm:$0xff]  }
 0x318   : > { %4983 = vmatprep.subr.bf16.mxu1 %v18140_v62  ;;  %v18218_v62 = vld [vmem:[#allocation15 + $0x2c4] ss:$16 sps:$4 sm:$0xff]  }
 0x31a   : > { %4943 = vmatpush1.bf16.msra.mxu0 %v18135_v13 }
 0x31b   : > { %4984 = vmatpush1.bf16.msra.mxu1 %v18138_v11  ;;  %4944 = vmatprep.subr.bf16.mxu0 %v18143_v15 }
 0x31c   : > { %4985 = vmatprep.subr.bf16.mxu1 %v18146_v16  ;;  %v18213_v16 = vld [vmem:[#allocation15 + $0xc0] ss:$16 sps:$4 sm:$0xff]  }
 0x31e   : > { %4945 = vmatpush1.bf16.msra.mxu0 %v18141_v17  ;;  %v18216_v17 = vld [vmem:[#allocation15 + $0x2c0] ss:$16 sps:$4 sm:$0xff]  }
 0x31f   : > { %4986 = vmatpush1.bf16.msra.mxu1 %v18144_v19  ;;  %4946 = vmatprep.subr.bf16.mxu0 %v18149_v20 }
 0x320   : > { %4987 = vmatprep.subr.bf16.mxu1 %v18152_v10  ;;  %v18221_v10 = vld [vmem:[#allocation15 + $0xa4] ss:$16 sps:$4 sm:$0xff]  }
 0x322   : > { %4947 = vmatpush1.bf16.msra.mxu0 %v18147_v14  ;;  %v18224_v14 = vld [vmem:[#allocation15 + $0x2a4] ss:$16 sps:$4 sm:$0xff]  }
 0x323   : > { %4988 = vmatpush1.bf16.msra.mxu1 %v18150_v21  ;;  %4948 = vmatprep.subr.bf16.mxu0 %v18155_v22 }
 0x324   : > { %4989 = vmatprep.subr.bf16.mxu1 %v18158_v23 }
 0x326   : > { %4949 = vmatpush1.bf16.msra.mxu0 %v18153_v24  ;;  %v18219_v24 = vld [vmem:[#allocation15 + $0xa0] ss:$16 sps:$4 sm:$0xff]  }
 0x327   : > { %4990 = vmatpush1.bf16.msra.mxu1 %v18156_v25  ;;  %4950 = vmatprep.subr.bf16.mxu0 %v18161_v26 }
 0x328   : > { %4991 = vmatprep.subr.bf16.mxu1 %v18164_v27  ;;  %v18227_v27 = vld [vmem:[#allocation15 + $0x84] ss:$16 sps:$4 sm:$0xff]  }
 0x32a   : > { %4951 = vmatpush2.bf16.msra.mxu0 %v18159_v28  ;;  %v18230_v28 = vld [vmem:[#allocation15 + $0x284] ss:$16 sps:$4 sm:$0xff]  }
 0x32b   : > { %4992 = vmatpush2.bf16.msra.mxu1 %v18162_v29  ;;  %4952 = vmatprep.subr.bf16.mxu0 %v18167_v30  ;;  %v18225_v29 = vld [vmem:[#allocation15 + $0x80] ss:$16 sps:$4 sm:$0xff]  }
 0x32c   : > { %4993 = vmatprep.subr.bf16.mxu1 %v18170_v31  ;;  %v18228_v30 = vld [vmem:[#allocation15 + $0x280] ss:$16 sps:$4 sm:$0xff]   ;;  %v18233_v31 = vld [vmem:[#allocation15 + $0x64] ss:$16 sps:$4 sm:$0xff]  }
 0x32e   : > { %4953 = vmatpush2.bf16.msra.mxu0 %v18165_v33  ;;  %v18236_v33 = vld [vmem:[#allocation15 + $0x264] ss:$16 sps:$4 sm:$0xff]  }
 0x32f   : > { %4994 = vmatpush2.bf16.msra.mxu1 %v18168_v34  ;;  %4954 = vmatprep.subr.bf16.mxu0 %v18173_v36  ;;  %v18231_v34 = vld [vmem:[#allocation15 + $0x60] ss:$16 sps:$4 sm:$0xff]  }
 0x330   : > { %4995 = vmatprep.subr.bf16.mxu1 %v18176_v37  ;;  %v18234_v36 = vld [vmem:[#allocation15 + $0x260] ss:$16 sps:$4 sm:$0xff]   ;;  %v18239_v37 = vld [vmem:[#allocation15 + $0x44] ss:$16 sps:$4 sm:$0xff]  }
 0x332   : > { %4955 = vmatpush2.bf16.msra.mxu0 %v18171_v39  ;;  %v18242_v39 = vld [vmem:[#allocation15 + $0x244] ss:$16 sps:$4 sm:$0xff]  }
 0x333   : > { %4996 = vmatpush2.bf16.msra.mxu1 %v18174_v3  ;;  %4956 = vmatprep.subr.bf16.mxu0 %v18179_v40  ;;  %v18237_v3 = vld [vmem:[#allocation15 + $0x40] ss:$16 sps:$4 sm:$0xff]  }
 0x334   : > { %4997 = vmatprep.subr.bf16.mxu1 %v18182_v41  ;;  %v18240_v40 = vld [vmem:[#allocation15 + $0x240] ss:$16 sps:$4 sm:$0xff]   ;;  %v18245_v41 = vld [vmem:[#allocation15 + $0x24] ss:$16 sps:$4 sm:$0xff]  }
 0x336   : > { %4957 = vmatpush2.bf16.msra.mxu0 %v18177_v42  ;;  %v18248_v42 = vld [vmem:[#allocation15 + $0x224] ss:$16 sps:$4 sm:$0xff]  }
 0x337   : > { %4998 = vmatpush2.bf16.msra.mxu1 %v18180_v44  ;;  %4958 = vmatprep.subr.bf16.mxu0 %v18185_v45  ;;  %v18243_v44 = vld [vmem:[#allocation15 + $0x20] ss:$16 sps:$4 sm:$0xff]  }
 0x338   : > { %4999 = vmatprep.subr.bf16.mxu1 %v18188_v46  ;;  %v18246_v45 = vld [vmem:[#allocation15 + $0x220] ss:$16 sps:$4 sm:$0xff]   ;;  %v18251_v46 = vld [vmem:[#allocation15 + $0x4] ss:$16 sps:$4 sm:$0xff]  }
 0x33a   : > { %4959 = vmatpush2.bf16.msra.mxu0 %v18183_v48  ;;  %v18254_v48 = vld [vmem:[#allocation15 + $0x204] ss:$16 sps:$4 sm:$0xff]  }
 0x33b   : > { %5000 = vmatpush2.bf16.msra.mxu1 %v18186_v49  ;;  %4960 = vmatprep.subr.bf16.mxu0 %v18191_v50  ;;  %v18249_v49 = vld [vmem:[#allocation15] ss:$16 sps:$4 sm:$0xff]  }
 0x33c   : > { %5001 = vmatprep.subr.bf16.mxu1 %v18194_v51  ;;  %v18252_v50 = vld [vmem:[#allocation15 + $0x200] ss:$16 sps:$4 sm:$0xff]   ;;  %v18257_v51 = vld [vmem:[#allocation15 + $0x1e4] ss:$16 sps:$4 sm:$0xff]  }
 0x33e   : > { %4961 = vmatpush2.bf16.msra.mxu0 %v18189_v53  ;;  %v18260_v53 = vld [vmem:[#allocation15 + $0x3e4] ss:$16 sps:$4 sm:$0xff]  }
 0x33f   : > { %5002 = vmatpush2.bf16.msra.mxu1 %v18192_v54  ;;  %4962 = vmatprep.subr.bf16.mxu0 %v18197_v57  ;;  %v18255_v54 = vld [vmem:[#allocation15 + $0x1e0] ss:$16 sps:$4 sm:$0xff]  }
 0x340   : > { %5003 = vmatprep.subr.bf16.mxu1 %v18200_v58  ;;  %v18258_v57 = vld [vmem:[#allocation15 + $0x3e0] ss:$16 sps:$4 sm:$0xff]   ;;  %v18263_v58 = vld [vmem:[#allocation15 + $0x1c4] ss:$16 sps:$4 sm:$0xff]  }
 0x342   : > { %4963 = vmatpush2.bf16.msra.mxu0 %v18195_v61  ;;  %v18266_v61 = vld [vmem:[#allocation15 + $0x3c4] ss:$16 sps:$4 sm:$0xff]  }
 0x343   : > { %5004 = vmatpush2.bf16.msra.mxu1 %v18198_v0  ;;  %4964 = vmatprep.subr.bf16.mxu0 %v18203_v1  ;;  %v18261_v0 = vld [vmem:[#allocation15 + $0x1c0] ss:$16 sps:$4 sm:$0xff]  }
 0x344   : > { %5005 = vmatprep.subr.bf16.mxu1 %v18206_v2  ;;  %v18264_v1 = vld [vmem:[#allocation15 + $0x3c0] ss:$16 sps:$4 sm:$0xff]   ;;  %v18269_v2 = vld [vmem:[#allocation15 + $0x1a4] ss:$16 sps:$4 sm:$0xff]  }
 0x346   : > { %4965 = vmatpush2.bf16.msra.mxu0 %v18201_v4  ;;  %v18272_v4 = vld [vmem:[#allocation15 + $0x3a4] ss:$16 sps:$4 sm:$0xff]  }
 0x347   : > { %5006 = vmatpush2.bf16.msra.mxu1 %v18204_v5  ;;  %9594 = vmatprep.subr.bf16.mxu0 %v18209_v6  ;;  %v18267_v5 = vld [vmem:[#allocation15 + $0x1a0] ss:$16 sps:$4 sm:$0xff]  }
 0x348   : > { %9635 = vmatprep.subr.bf16.mxu1 %v18212_v7  ;;  %v18270_v6 = vld [vmem:[#allocation15 + $0x3a0] ss:$16 sps:$4 sm:$0xff]   ;;  %v18275_v7 = vld [vmem:[#allocation15 + $0x184] ss:$16 sps:$4 sm:$0xff]  }
 0x349   : > { %v3511_v13 = vpop.f32.mrf.mxu0  ;;  %4967 = vmatmul.mubr.bf16.vlgmr.msra.gmra.mxu0 %v20315_v52 }
 0x34a   : > { %v3552_v11 = vpop.f32.mrf.mxu1  ;;  %5008 = vmatmul.mubr.bf16.vlgmr.msra.gmra.mxu1 %v20315_v52  ;;  %9595 = vmatpush1.bf16.msra.mxu0 %v18207_v8  ;;  %v18222_v52 = vld [vmem:[#allocation15 + $0x2a0] ss:$16 sps:$4 sm:$0xff]   ;;  %v18278_v8 = vld [vmem:[#allocation15 + $0x384] ss:$16 sps:$4 sm:$0xff]  }
 0x34b   : > { %v20327_v15 = vadd.f32 %v3552_v11, %v3511_v13  ;;  %9636 = vmatpush1.bf16.msra.mxu1 %v18210_v9  ;;  %v3513_v19 = vpop.f32.mrf.mxu0  ;;  %9596 = vmatprep.subr.bf16.mxu0 %v18215_v59  ;;  %v18273_v9 = vld [vmem:[#allocation15 + $0x180] ss:$16 sps:$4 sm:$0xff]   ;;  %v18284_v13 = vld [vmem:[#allocation15 + $0x364] ss:$16 sps:$4 sm:$0xff]  }
 0x34c   : > { %v3554_v20 = vpop.f32.mrf.mxu1  ;;  %9637 = vmatprep.subr.bf16.mxu1 %v18218_v62  ;;  %v18276_v59 = vld [vmem:[#allocation15 + $0x380] ss:$16 sps:$4 sm:$0xff]   ;;  %v18281_v62 = vld [vmem:[#allocation15 + $0x164] ss:$16 sps:$4 sm:$0xff]  }
 0x34d   : > { %22764 = vst [vmem:[#allocation44_spill] sm:$0xff] %v20327_v15  ;;  %v20329_v21 = vadd.f32 %v3554_v20, %v3513_v19  ;;  %v3515_v22 = vpop.f32.mrf.mxu0  ;;  %v18279_v11 = vld [vmem:[#allocation15 + $0x160] ss:$16 sps:$4 sm:$0xff]   ;;  %v18290_v19 = vld [vmem:[#allocation15 + $0x344] ss:$16 sps:$4 sm:$0xff]   ;;  %v5226_v20 = vand.u32 1, %v20243_v47 }
 0x34e   : > { %v3556_v23 = vpop.f32.mrf.mxu1  ;;  %9597 = vmatpush1.bf16.msra.mxu0 %v18213_v16  ;;  %v18282_v16 = vld [vmem:[#allocation15 + $0x360] ss:$16 sps:$4 sm:$0xff]   ;;  %v18293_v22 = vld [vmem:[#allocation15 + $0x124] ss:$16 sps:$4 sm:$0xff]  }
 0x34f   : > { %22765 = vst [vmem:[#allocation45_spill] sm:$0xff] %v20329_v21  ;;  %9638 = vmatpush1.bf16.msra.mxu1 %v18216_v17  ;;  %v3516_v25 = vpop.f32.mrf.mxu0  ;;  %9598 = vmatprep.subr.bf16.mxu0 %v18221_v10  ;;  %v18287_v17 = vld [vmem:[#allocation15 + $0x144] ss:$16 sps:$4 sm:$0xff]   ;;  %v18285_v10 = vld [vmem:[#allocation15 + $0x140] ss:$16 sps:$4 sm:$0xff]   ;;  %vm5227_vm0 = vcmp.ne.s32.totalorder %v5226_v20, 0 }
 0x350   : > { %v3557_v26 = vpop.f32.mrf.mxu1  ;;  %9639 = vmatprep.subr.bf16.mxu1 %v18224_v14  ;;  %v18288_v14 = vld [vmem:[#allocation15 + $0x340] ss:$16 sps:$4 sm:$0xff]   ;;  %v18296_v23 = vld [vmem:[#allocation15 + $0x324] ss:$16 sps:$4 sm:$0xff]   ;;  %vm5230_vm1 = vcmp.ne.s32.totalorder %v5226_v20, 1 }
 0x351   : > { %v18291_v25 = vld [vmem:[#allocation15 + $0x120] ss:$16 sps:$4 sm:$0xff]   ;;  %v20339_v26 = vsub.s32 2, %v20243_v47  ;;  %v5401_v15 = vld [vmem:[#allocation2 + $0x10] sm:$0xc0] }
 0x352   : > { %9599 = vmatpush1.bf16.msra.mxu0 %v18219_v24  ;;  %v20333_v24 = vsub.s32 0, %v20243_v47 }
 0x353   : > { %9640 = vmatpush1.bf16.msra.mxu1 %v18222_v52  ;;  %9600 = vmatprep.subr.bf16.mxu0 %v18227_v27  ;;  %v20336_v52 = vsub.s32 1, %v20243_v47  ;;  %22768 = vst [vmem:[#allocation48_spill] sm:$0xff] %v20339_v26  ;;  %v19408_v27 = vld [vmem:[#allocation2 + $0xb0] sm:$0xff] }
 0x354   : > { %9641 = vmatprep.subr.bf16.mxu1 %v18230_v28  ;;  %22766 = vst [vmem:[#allocation46_spill] sm:$0xff] %v20333_v24  ;;  %v16198_v28 = vsel %vm5227_vm0, 1.0, %v19408_v27 }
 0x355   : > { %22767 = vst [vmem:[#allocation47_spill] sm:$0xff] %v20336_v52 }
 0x356   : > { %9601 = vmatpush1.bf16.msra.mxu0 %v18225_v29  ;;  %v16199_v29 = vsel %vm5230_vm1, 1.0, %v19408_v27 }
 0x357   : > { %9642 = vmatpush1.bf16.msra.mxu1 %v18228_v30  ;;  %9602 = vmatprep.subr.bf16.mxu0 %v18233_v31  ;;  %v20342_v30 = vsub.s32 3, %v20243_v47  ;;  %v20345_v31 = vsub.s32 4, %v20243_v47 }
 0x358   : > { %9643 = vmatprep.subr.bf16.mxu1 %v18236_v33  ;;  %v18294_v33 = vld [vmem:[#allocation15 + $0x320] ss:$16 sps:$4 sm:$0xff]  }
 0x359   : > { %22769 = vst [vmem:[#allocation49_spill] sm:$0xff] %v20342_v30  ;;  %22770 = vst [vmem:[#allocation50_spill] sm:$0xff] %v20345_v31 }
 0x35a   : > { %9603 = vmatpush1.bf16.msra.mxu0 %v18231_v34  ;;  %v20348_v34 = vsub.s32 5, %v20243_v47 }
 0x35b   : > { %9644 = vmatpush1.bf16.msra.mxu1 %v18234_v36  ;;  %9604 = vmatprep.subr.bf16.mxu0 %v18239_v37  ;;  %v20351_v36 = vsub.s32 6, %v20243_v47  ;;  %v18299_v37 = vld [vmem:[#allocation15 + $0x104] ss:$16 sps:$4 sm:$0xff]  }
 0x35c   : > { %9645 = vmatprep.subr.bf16.mxu1 %v18242_v39  ;;  %22771 = vst [vmem:[#allocation51_spill] sm:$0xff] %v20348_v34  ;;  %v18302_v39 = vld [vmem:[#allocation15 + $0x304] ss:$16 sps:$4 sm:$0xff]  }
 0x35d   : > { %22772 = vst [vmem:[#allocation52_spill] sm:$0xff] %v20351_v36 }
 0x35e   : > { %9605 = vmatpush1.bf16.msra.mxu0 %v18237_v3  ;;  %v20354_v3 = vsub.s32 7, %v20243_v47  ;;  %v6740_v47 = vld [vmem:[#allocation12 + $0x60] ss:$8 sm:$0xf0] }
 0x35f   : > { %9646 = vmatpush1.bf16.msra.mxu1 %v18240_v40  ;;  %9606 = vmatprep.subr.bf16.mxu0 %v18245_v41  ;;  %v20356_v40 = vrot.slane %v16198_v28, 3  ;;  %v20358_v41 = vrot.slane %v16199_v29, 1 }
 0x360   : > { %9647 = vmatprep.subr.bf16.mxu1 %v18248_v42  ;;  %22773 = vst [vmem:[#allocation53_spill] sm:$0xff] %v20354_v3  ;;  %v20360_v42 = vrot.slane %v16198_v28, 1 }
 0x362   : > { %9607 = vmatpush1.bf16.msra.mxu0 %v18243_v44  ;;  %v5257_v44 = vld [vmem:[#allocation12] ss:$8 sm:$0xf] }
 0x363   : > { %9648 = vmatpush1.bf16.msra.mxu1 %v18246_v45  ;;  %9608 = vmatprep.subr.bf16.mxu0 %v18251_v46  ;;  %v5258_v45 = vld [vmem:[#allocation12] ss:$8 sm:$0xf0]  ;;  %v20362_v46 = vrot.slane %v16199_v29, 7 }
 0x364   : > { %9649 = vmatprep.subr.bf16.mxu1 %v18254_v48  ;;  %v20364_v48 = vrot.slane %v16198_v28, 7 }
 0x366   : > { %9609 = vmatpush1.bf16.msra.mxu0 %v18249_v49  ;;  %v18297_v49 = vld [vmem:[#allocation15 + $0x100] ss:$16 sps:$4 sm:$0xff]  }
 0x367   : > { %9650 = vmatpush1.bf16.msra.mxu1 %v18252_v50  ;;  %9610 = vmatprep.subr.bf16.mxu0 %v18257_v51  ;;  %v18300_v50 = vld [vmem:[#allocation15 + $0x300] ss:$16 sps:$4 sm:$0xff]   ;;  %v5649_v51 = vld [vmem:[#allocation12 + $0x2] ss:$8 sm:$0xf] }
 0x368   : > { %9651 = vmatprep.subr.bf16.mxu1 %v18260_v53  ;;  %v5650_v53 = vld [vmem:[#allocation12 + $0x2] ss:$8 sm:$0xf0] }
 0x36a   : > { %9611 = vmatpush2.bf16.msra.mxu0 %v18255_v54  ;;  %v5877_v54 = vld [vmem:[#allocation12 + $0x3] ss:$8 sm:$0xf] }
 0x36b   : > { %9652 = vmatpush2.bf16.msra.mxu1 %v18258_v57  ;;  %9612 = vmatprep.subr.bf16.mxu0 %v18263_v58  ;;  %v5878_v57 = vld [vmem:[#allocation12 + $0x3] ss:$8 sm:$0xf0]  ;;  %v3754_v58 = vrot.slane %v20277_v38, %v20333_v24  ;;  %v5425_v38 = vld [vmem:[#allocation12 + $0x1] ss:$8 sm:$0xf0] }
 0x36c   : > { %9653 = vmatprep.subr.bf16.mxu1 %v18266_v61  ;;  %v20368_v61 = vld [vmem:[#allocation10] sm:$0xff] }
 0x36d   : > { %22774 = vst [vmem:[#allocation54_spill] sm:$0xff] %v20368_v61  ;;  %v5027_v27 = vrot.slane %v20368_v61, %v20336_v52  ;;  %v5035_v28 = vrot.slane %v20368_v61, %v20342_v30 }
 0x36e   : > { %9613 = vmatpush2.bf16.msra.mxu0 %v18261_v0  ;;  %v20370_v0 = vor.u32 %v5258_v45, %v5257_v44  ;;  %v5400_v44 = vld [vmem:[#allocation2 + $0xd0] sm:$0xc0] }
 0x36f   : > { %9654 = vmatpush2.bf16.msra.mxu1 %v18264_v1  ;;  %9614 = vmatprep.subr.bf16.mxu0 %v18269_v2  ;;  %v5424_v1 = vld [vmem:[#allocation12 + $0x1] ss:$8 sm:$0xf] }
 0x370   : > { %9655 = vmatprep.subr.bf16.mxu1 %v18272_v4  ;;  %v18305_v2 = vld [vmem:[#allocation15 + $0x4e4] ss:$16 sps:$4 sm:$0xff]   ;;  %v20372_v4 = vrot.slane %v16199_v29, 5  ;;  %v20548_v18 = vrot.slane %v20370_v0, %v20339_v26 }
 0x371   : > { %v5625_v29 = vld [vmem:[#allocation2 + $0xd0] sm:$0x80] }
 0x372   : > { %9615 = vmatpush2.bf16.msra.mxu0 %v18267_v5  ;;  %v3762_v5 = vrot.slane %v20285_v56, %v20333_v24  ;;  %v20388_v56 = vor.u32 %v5878_v57, %v5877_v54  ;;  %22785 = vst [vmem:[#allocation65_spill] sm:$0xff] %v20548_v18 }
 0x373   : > { %9656 = vmatpush2.bf16.msra.mxu1 %v18270_v6  ;;  %9616 = vmatprep.subr.bf16.mxu0 %v18275_v7  ;;  %v3758_v6 = vrot.slane %v20279_v43, %v20333_v24  ;;  %v3766_v7 = vrot.slane %v20287_v63, %v20333_v24  ;;  %v5023_v43 = vrot.slane %v20368_v61, %v20333_v24 }
 0x374   : > { %9657 = vmatprep.subr.bf16.mxu1 %v18278_v8  ;;  %v18308_v8 = vld [vmem:[#allocation15 + $0x6e4] ss:$16 sps:$4 sm:$0xff]   ;;  %22775 = vst [vmem:[#allocation55_spill] sm:$0xff] %v20388_v56  ;;  %v5031_v63 = vrot.slane %v20368_v61, %v20339_v26 }
 0x376   : > { %9617 = vmatpush2.bf16.msra.mxu0 %v18273_v9  ;;  %v6588_v9 = vld [vmem:[#allocation12 + $0x7] ss:$8 sm:$0xf0] }
 0x377   : > { %9658 = vmatpush2.bf16.msra.mxu1 %v18276_v59  ;;  %9618 = vmatprep.subr.bf16.mxu0 %v18281_v62  ;;  %v20384_v59 = vrot.slane %v20370_v0, %v20336_v52  ;;  %v20386_v62 = vor.u32 %v5650_v53, %v5649_v51 }
 0x378   : > { %9659 = vmatprep.subr.bf16.mxu1 %v18284_v13  ;;  %v6587_v13 = vld [vmem:[#allocation12 + $0x7] ss:$8 sm:$0xf] }
 0x37a   : > { %9619 = vmatpush2.bf16.msra.mxu0 %v18279_v11  ;;  %v5627_v11 = vld [vmem:[#allocation2 + $0x48] sm:$0x80] }
 0x37b   : > { %9660 = vmatpush2.bf16.msra.mxu1 %v18282_v16  ;;  %9620 = vmatprep.subr.bf16.mxu0 %v18287_v17  ;;  %v5234_v16 = vld [vmem:[#allocation2 + $0xd0] sm:$0xe0] }
 0x37c   : > { %9661 = vmatprep.subr.bf16.mxu1 %v18290_v19 }
 0x37e   : > { %9621 = vmatpush2.bf16.msra.mxu0 %v18285_v10  ;;  %v20400_v10 = vor.u32 %v5425_v38, %v5424_v1  ;;  %v6116_v1 = vld [vmem:[#allocation12 + $0x4] ss:$8 sm:$0xf0] }
 0x37f   : > { %9662 = vmatpush2.bf16.msra.mxu1 %v18288_v14  ;;  %9622 = vmatprep.subr.bf16.mxu0 %v18293_v22  ;;  %v20404_v14 = vrot.slane %v20386_v62, %v20336_v52  ;;  %v20408_v22 = vrot.slane %v20388_v56, %v20336_v52 }
 0x380   : > { %9663 = vmatprep.subr.bf16.mxu1 %v18296_v23  ;;  %v20417_v45 = vrot.slane %v20400_v10, %v20336_v52  ;;  %v20453_v20 = vrot.slane %v20400_v10, %v20342_v30  ;;  %v20558_v12 = vrot.slane %v20400_v10, %v20339_v26 }
 0x382   : > { %9623 = vmatpush2.bf16.msra.mxu0 %v18291_v25  ;;  %22778 = vst [vmem:[#allocation58_spill] sm:$0xff] %v20453_v20  ;;  %22786 = vst [vmem:[#allocation66_spill] sm:$0xff] %v20558_v12 }
 0x383   : > { %9664 = vmatpush2.bf16.msra.mxu1 %v18294_v33  ;;  %9624 = vmatprep.subr.bf16.mxu0 %v18299_v37 }
 0x384   : > { %9665 = vmatprep.subr.bf16.mxu1 %v18302_v39  ;;  %v5325_v39 = vmul.f32 %v20384_v59, %v5234_v16  ;;  %v5945_v16 = vmul.f32 %v20408_v22, %v5625_v29 }
 0x386   : > { %9625 = vmatpush2.bf16.msra.mxu0 %v18297_v49  ;;  %v20421_v49 = vrot.slane %v20370_v0, %v20342_v30 }
 0x387   : > { %9666 = vmatpush2.bf16.msra.mxu1 %v18300_v50  ;;  %9676 = vmatprep.subr.bf16.mxu0 %v18305_v2  ;;  %v6267_v2 = vld [vmem:[#allocation12 + $0x5] ss:$8 sm:$0xf]  ;;  %v20433_v50 = vrot.slane %v20386_v62, %v20342_v30 }
 0x388   : > { %9717 = vmatprep.subr.bf16.mxu1 %v18308_v8  ;;  %v5717_v8 = vmul.f32 %v20404_v14, %v5625_v29 }
 0x389   : > { %v4804_v17 = vpop.f32.mrf.mxu0  ;;  %22776 = vst [vmem:[#allocation56_spill] sm:$0xff] %v20433_v50  ;;  %v5719_v60 = vmul.f32 %v20433_v50, %v5627_v11 }
 0x38a   : > { %v4845_v19 = vpop.f32.mrf.mxu1  ;;  %v4805_v23 = vadd.f32 %v4804_v17, %v3754_v58  ;;  %v6115_v58 = vld [vmem:[#allocation12 + $0x4] ss:$8 sm:$0xf]  ;;  %v6268_v17 = vld [vmem:[#allocation12 + $0x5] ss:$8 sm:$0xf0] }
 0x38b   : > { %v4846_v25 = vadd.f32 %v4845_v19, %v3762_v5  ;;  %v4806_v33 = vpop.f32.mrf.mxu0  ;;  %v5236_v19 = vld [vmem:[#allocation2 + $0x48] sm:$0xe0] }
 0x38c   : > { %v4847_v37 = vpop.f32.mrf.mxu1  ;;  %v20425_v51 = vadd.f32 %v5023_v43, %v4805_v23  ;;  %v4807_v54 = vadd.f32 %v4806_v33, %v3758_v6  ;;  %v20437_v43 = vrot.slane %v20388_v56, %v20342_v30 }
 0x38d   : > { %v20427_v53 = vadd.f32 %v5031_v63, %v4846_v25  ;;  %v4848_v57 = vadd.f32 %v4847_v37, %v3766_v7  ;;  %v4808_v5 = vpop.f32.mrf.mxu0  ;;  %v6421_v25 = vld [vmem:[#allocation12 + $0x6] ss:$8 sm:$0xf]  ;;  %v20446_v37 = vmul.f32 %v20356_v40, %v5325_v39  ;;  %v5327_v39 = vmul.f32 %v20421_v49, %v5236_v19 }
 0x38e   : > { %v4849_v38 = vpop.f32.mrf.mxu1  ;;  %22777 = vst [vmem:[#allocation57_spill] sm:$0xff] %v20437_v43  ;;  %v16186_v6 = vmul.f32 -1.442695, %v20425_v51  ;;  %v20441_v63 = vadd.f32 %v5027_v27, %v4807_v54  ;;  %v20449_v5 = vmul.f32 %v20417_v45, %v5400_v44  ;;  %v20461_v44 = vmul.f32 %v20358_v41, %v5717_v8  ;;  %v6739_v27 = vld [vmem:[#allocation12 + $0x60] ss:$8 sm:$0xf] }
 0x38f   : > { %v16188_v7 = vmul.f32 -1.442695, %v20427_v53  ;;  %v20443_v23 = vadd.f32 %v5035_v28, %v4848_v57  ;;  %v4809_v29 = vpop.f32.mrf.mxu0  ;;  %v6422_v38 = vld [vmem:[#allocation12 + $0x6] ss:$8 sm:$0xf0]  ;;  %v5947_v19 = vmul.f32 %v20437_v43, %v5627_v11  ;;  %v20542_v8 = vrot.slane %v20400_v10, %v20333_v24 }
 0x390   : > { %v4850_v33 = vpop.f32.mrf.mxu1  ;;  %19167 = vpow2.f32 %v16186_v6  ;;  %v16187_v28 = vmul.f32 -1.442695, %v20441_v63  ;;  %v5402_v57 = vld [vmem:[#allocation2 + $0x48] sm:$0xc0]  ;;  %v20463_v29 = vor.u32 %v6116_v1, %v6115_v58  ;;  %v20468_v6 = vmul.f32 %v20360_v42, %v5945_v16  ;;  %v5624_v11 = vld [vmem:[#allocation2 + $0xb0] sm:$0x80] }
 0x391   : > { %v16189_v54 = vmul.f32 -1.442695, %v20443_v23  ;;  %19169 = vpow2.f32 %v16188_v7  ;;  %v20465_v33 = vor.u32 %v6268_v17, %v6267_v2  ;;  %v20473_v7 = vor.u32 %v6422_v38, %v6421_v25  ;;  %v5399_v1 = vld [vmem:[#allocation2 + $0xb0] sm:$0xc0] }
 0x392   : > { %19171 = vpow2.f32 %v16187_v28  ;;  %v20476_v58 = vmul.f32 %v20453_v20, %v5402_v57  ;;  %v20482_v16 = vor.u32 %v6588_v9, %v6587_v13  ;;  %v20485_v17 = vmul.f32 %v20356_v40, %v5327_v39  ;;  %v5626_v57 = vld [vmem:[#allocation2 + $0x10] sm:$0x80] }
 0x393   : > { %19173 = vpow2.f32 %v16189_v54  ;;  %v20490_v38 = vor.u32 %v6740_v47, %v6739_v27  ;;  %v20498_v9 = vmul.f32 %v20358_v41, %v5719_v60  ;;  %v20501_v13 = vmul.f32 %v20360_v42, %v5947_v19  ;;  %v5233_v39 = vld [vmem:[#allocation2 + $0xb0] sm:$0xe0] }
 0x394   : > { %22779 = vst [vmem:[#allocation59_spill] sm:$0xff] %v20476_v58  ;;  %22780 = vst [vmem:[#allocation60_spill] sm:$0xff] %v20485_v17  ;;  %v20508_v27 = vrot.slane %v20386_v62, %v20333_v24  ;;  %v20512_v28 = vrot.slane %v20388_v56, %v20333_v24  ;;  %v20522_v47 = vrot.slane %v20386_v62, %v20339_v26 }
 0x395   : > { %22781 = vst [vmem:[#allocation61_spill] sm:$0xff] %v20498_v9  ;;  %22782 = vst [vmem:[#allocation62_spill] sm:$0xff] %v20501_v13  ;;  %v20530_v60 = vrot.slane %v20370_v0, %v20333_v24  ;;  %v20534_v19 = vrot.slane %v20388_v56, %v20339_v26  ;;  %v20561_v9 = vld [vmem:[#allocation13] sm:$0xff] }
 0x396   : > { %22783 = vst [vmem:[#allocation63_spill] sm:$0xff] %v20522_v47  ;;  %v5716_v55 = vmul.f32 %v20508_v27, %v5624_v11  ;;  %v5944_v35 = vmul.f32 %v20512_v28, %v5624_v11  ;;  %v5718_v11 = vmul.f32 %v20522_v47, %v5626_v57  ;;  %22787 = vst [vmem:[#allocation67_spill] sm:$0xff] %v20561_v9 }
 0x397   : > { %22784 = vst [vmem:[#allocation64_spill] sm:$0xff] %v20534_v19  ;;  %v5324_v17 = vmul.f32 %v20530_v60, %v5233_v39  ;;  %v5946_v2 = vmul.f32 %v20534_v19, %v5626_v57  ;;  %v20571_v43 = vrot.slane %v20561_v9, %v20336_v52  ;;  %v20574_v47 = vmul.f32 %v20542_v8, %v5399_v1 }
 0x398   : > { %v20579_v20 = vmul.f32 %v20358_v41, %v5716_v55  ;;  %v20582_v57 = vmul.f32 %v20360_v42, %v5944_v35  ;;  %v20586_v19 = vmul.f32 %v20558_v12, %v5401_v15  ;;  %v20589_v1 = vmul.f32 %v20358_v41, %v5718_v11 }
 0x399   : > { %22788 = vst [vmem:[#allocation68_spill] sm:$0xff] %v20571_v43  ;;  %22789 = vst [vmem:[#allocation69_spill] sm:$0xff] %v20574_v47  ;;  %v20595_v55 = vmul.f32 %v20360_v42, %v5946_v2  ;;  %v20615_v11 = vrot.slane %v20561_v9, %v20342_v30  ;;  %v20660_v35 = vrot.slane %v20370_v0, %v20348_v34  ;;  %v5403_v43 = vld [vmem:[#allocation2 + $0x108] sm:$0xc0] }
 0x39a   : > { %22790 = vst [vmem:[#allocation70_spill] sm:$0xff] %v20579_v20  ;;  %22791 = vst [vmem:[#allocation71_spill] sm:$0xff] %v20582_v57  ;;  %v5240_v57 = vld [vmem:[#allocation2 + $0x18] sm:$0xe0] }
 0x39b   : > { %22792 = vst [vmem:[#allocation72_spill] sm:$0xff] %v20586_v19  ;;  %22793 = vst [vmem:[#allocation73_spill] sm:$0xff] %v20589_v1  ;;  %v20696_v1 = vrot.slane %v20400_v10, %v20354_v3 }
 0x39c   : > { %22795 = vst [vmem:[#allocation75_spill] sm:$0xff] %v20595_v55  ;;  %22797 = vst [vmem:[#allocation77_spill] sm:$0xff] %v20615_v11  ;;  %v5406_v11 = vld [vmem:[#allocation2 + $0x18] sm:$0xc0] }
 0x39d   : > { %v19168_v13 = vpop.eup %19167  ;;  %22804 = vst [vmem:[#allocation84_spill] sm:$0xff] %v20660_v35  ;;  %22810 = vst [vmem:[#allocation90_spill] sm:$0xff] %v20696_v1  ;;  %v20719_v15 = vmul.f32 %v20696_v1, %v5406_v11 }
 0x39e   : > { %v19170_v61 = vpop.eup %19169  ;;  %v5128_v58 = vadd.f32 1.0, %v19168_v13  ;;  %v5326_v13 = vmul.f32 %v20548_v18, %v5235_v32  ;;  %v5404_v32 = vld [vmem:[#allocation2 + $0x68] sm:$0xc0] }
 0x39f   : > { %v19172_v50 = vpop.eup %19171  ;;  %v5130_v54 = vadd.f32 1.0, %v19170_v61  ;;  %v20592_v61 = vmul.f32 %v20356_v40, %v5324_v17  ;;  %v20632_v17 = vrot.slane %v20561_v9, %v20339_v26  ;;  %22816 = vst [vmem:[#allocation96_spill] sm:$0xff] %v20719_v15 }
 0x3a0   : > { %v19174_v25 = vpop.eup %19173  ;;  %19175 = vrcp.f32 %v5128_v58  ;;  %v5129_v21 = vadd.f32 1.0, %v19172_v50  ;;  %v20607_v2 = vmul.f32 %v20356_v40, %v5326_v13  ;;  %v20640_v13 = vrot.slane %v20400_v10, %v20345_v31 }
 0x3a1   : > { %19177 = vrcp.f32 %v5130_v54  ;;  %v5131_v39 = vadd.f32 1.0, %v19174_v25  ;;  %22794 = vst [vmem:[#allocation74_spill] sm:$0xff] %v20592_v61  ;;  %22799 = vst [vmem:[#allocation79_spill] sm:$0xff] %v20632_v17  ;;  %v20644_v58 = vrot.slane %v20386_v62, %v20345_v31  ;;  %v20648_v25 = vrot.slane %v20388_v56, %v20345_v31 }
 0x3a2   : > { %19179 = vrcp.f32 %v5129_v21  ;;  %22796 = vst [vmem:[#allocation76_spill] sm:$0xff] %v20607_v2  ;;  %v20624_v21 = vrot.slane %v20561_v9, %v20333_v24  ;;  %22801 = vst [vmem:[#allocation81_spill] sm:$0xff] %v20640_v13  ;;  %v20664_v17 = vrot.slane %v20400_v10, %v20348_v34  ;;  %v20668_v54 = vrot.slane %v20386_v62, %v20348_v34  ;;  %v5629_v9 = vld [vmem:[#allocation2 + $0x68] sm:$0x80] }
 0x3a3   : > { %19181 = vrcp.f32 %v5131_v39  ;;  %v20636_v39 = vrot.slane %v20370_v0, %v20345_v31  ;;  %22802 = vst [vmem:[#allocation82_spill] sm:$0xff] %v20644_v58  ;;  %22803 = vst [vmem:[#allocation83_spill] sm:$0xff] %v20648_v25  ;;  %v20672_v50 = vrot.slane %v20388_v56, %v20348_v34  ;;  %v5238_v2 = vld [vmem:[#allocation2 + $0x68] sm:$0xe0] }
 0x3a4   : > { %22798 = vst [vmem:[#allocation78_spill] sm:$0xff] %v20624_v21  ;;  %22805 = vst [vmem:[#allocation85_spill] sm:$0xff] %v20664_v17  ;;  %v20683_v19 = vmul.f32 %v20664_v17, %v5404_v32  ;;  %v5721_v12 = vmul.f32 %v20668_v54, %v5629_v9  ;;  %v5329_v55 = vmul.f32 %v20660_v35, %v5238_v2  ;;  %v5631_v32 = vld [vmem:[#allocation2 + $0x18] sm:$0x80] }
 0x3a5   : > { %22800 = vst [vmem:[#allocation80_spill] sm:$0xff] %v20636_v39  ;;  %22806 = vst [vmem:[#allocation86_spill] sm:$0xff] %v20668_v54  ;;  %v5949_v18 = vmul.f32 %v20672_v50, %v5629_v9  ;;  %v20692_v21 = vrot.slane %v20370_v0, %v20354_v3  ;;  %v20700_v54 = vrot.slane %v20386_v62, %v20354_v3 }
 0x3a6   : > { %22807 = vst [vmem:[#allocation87_spill] sm:$0xff] %v20672_v50  ;;  %22808 = vst [vmem:[#allocation88_spill] sm:$0xff] %v20683_v19  ;;  %v20704_v50 = vmul.f32 %v20358_v41, %v5721_v12  ;;  %v20711_v17 = vrot.slane %v20388_v56, %v20354_v3  ;;  %v20715_v61 = vmul.f32 %v20356_v40, %v5329_v55  ;;  %v20726_v55 = vld [vmem:[#allocation10 + $0x8] sm:$0xf] }
 0x3a7   : > { %22809 = vst [vmem:[#allocation89_spill] sm:$0xff] %v20692_v21  ;;  %22811 = vst [vmem:[#allocation91_spill] sm:$0xff] %v20700_v54  ;;  %v20707_v2 = vmul.f32 %v20360_v42, %v5949_v18  ;;  %v5331_v47 = vmul.f32 %v20692_v21, %v5240_v57  ;;  %v5723_v56 = vmul.f32 %v20700_v54, %v5631_v32  ;;  %v22833_v21 = vrot.slane %v20449_v5, 1 }
 0x3a8   : > { %22812 = vst [vmem:[#allocation92_spill] sm:$0xff] %v20704_v50  ;;  %22814 = vst [vmem:[#allocation94_spill] sm:$0xff] %v20711_v17  ;;  %v22830_v54 = vrot.slane %v20465_v33, %v20336_v52 }
 0x3a9   : > { %22813 = vst [vmem:[#allocation93_spill] sm:$0xff] %v20707_v2  ;;  %22815 = vst [vmem:[#allocation95_spill] sm:$0xff] %v20715_v61  ;;  %v20729_v57 = vmul.f32 %v20356_v40, %v5331_v47  ;;  %v5628_v47 = vld [vmem:[#allocation2 + $0x108] sm:$0x80]  ;;  %v20741_v11 = vmul.f32 %v20358_v41, %v5723_v56 }
 0x3aa   : > { %22817 = vst [vmem:[#allocation97_spill] sm:$0xff] %v20726_v55 }
 0x3ab   : > { %22818 = vst [vmem:[#allocation98_spill] sm:$0xff] %v20729_v57  ;;  %22819 = vst [vmem:[#allocation99_spill] sm:$0xff] %v20741_v11 }
 0x3ad   : > { %v19176_v9 = vpop.eup %19175 }
 0x3ae   : > { %v19178_v35 = vpop.eup %19177  ;;  %v5164_v20 = vmul.f32 %v19176_v9, %v20425_v51  ;;  %v5951_v9 = vmul.f32 %v20711_v17, %v5631_v32  ;;  %v5405_v32 = vld [vmem:[#allocation2 + $0x30] sm:$0xc0] }
 0x3af   : > { %v19180_v12 = vpop.eup %19179  ;;  %v5166_v19 = vmul.f32 %v19178_v35, %v20427_v53  ;;  %v5239_v35 = vld [vmem:[#allocation2 + $0x30] sm:$0xe0] }
 0x3b0   : > { %v19182_v34 = vpop.eup %19181  ;;  %5212 = vst [vmem:[#allocation2 + $0xf8] sm:$0xf] %v5164_v20  ;;  %v5165_v51 = vmul.f32 %v19180_v12, %v20441_v63  ;;  %v5237_v12 = vld [vmem:[#allocation2 + $0x108] sm:$0xe0]  ;;  %v20760_v20 = vmul.f32 %v20640_v13, %v5403_v43  ;;  %v20774_v43 = vrot.slane %v20400_v10, %v20351_v36 }
 0x3b1   : > { %5214 = vst [vmem:[#allocation2 + $0x8] sm:$0xf] %v5166_v19  ;;  %v5167_v53 = vmul.f32 %v19182_v34, %v20443_v23  ;;  %v20744_v19 = vmul.f32 %v20360_v42, %v5951_v9  ;;  %v5328_v9 = vmul.f32 %v20636_v39, %v5237_v12  ;;  %v5720_v23 = vmul.f32 %v20644_v58, %v5628_v47  ;;  %v20764_v34 = vld [vmem:[#allocation2 + $0x30] sm:$0x80]  ;;  %v22839_v39 = vld [vmem:[#allocation57_spill] sm:$0xff] }
 0x3b2   : > { %5213 = vst [vmem:[#allocation2 + $0x38] sm:$0xf] %v5165_v51  ;;  %v20770_v51 = vrot.slane %v20370_v0, %v20351_v36  ;;  %22822 = vst [vmem:[#allocation102_spill] sm:$0xff] %v20774_v43  ;;  %v20778_v12 = vrot.slane %v20386_v62, %v20351_v36 }
 0x3b3   : > { %22820 = vst [vmem:[#allocation100_spill] sm:$0xff] %v20744_v19  ;;  %5215 = vst [vmem:[#allocation2 + $0x78] sm:$0xf] %v5167_v53  ;;  %v5948_v53 = vmul.f32 %v20648_v25, %v5628_v47  ;;  %v20783_v18 = vmul.f32 %v20356_v40, %v5328_v9  ;;  %v20786_v56 = vmul.f32 %v20358_v41, %v5720_v23 }
 0x3b4   : > { %22821 = vst [vmem:[#allocation101_spill] sm:$0xff] %v20770_v51  ;;  %22823 = vst [vmem:[#allocation103_spill] sm:$0xff] %v20778_v12  ;;  %v20792_v62 = vmul.f32 %v20770_v51, %v5239_v35  ;;  %v20795_v47 = vmul.f32 %v20774_v43, %v5405_v32  ;;  %v20799_v9 = vmul.f32 %v20778_v12, %v20764_v34 }
 0x3b5   : > { %22824 = vst [vmem:[#allocation104_spill] sm:$0xff] %v20783_v18  ;;  %v20789_v10 = vmul.f32 %v20360_v42, %v5948_v53  ;;  %v22825_v12 = vrot.slane %v20463_v29, %v20333_v24 }
 0x3b7   : > { %v5245_v0 = vld [vmem:[#allocation2 + $0xf8] sm:$0x1]  ;;  %v6254_v51 = vld [vmem:[#allocation2 + $0xf8] sm:$0x1e] }
 0x3b8   : > { %v5411_v25 = vld [vmem:[#allocation2 + $0xf8] sm:$0x3]  ;;  %v20802_v23 = vmul.f32 %v20530_v60, %v5245_v0  ;;  %v6574_v32 = vld [vmem:[#allocation2 + $0xf8] sm:$0x3c] }
 0x3b9   : > { %v5636_v58 = vld [vmem:[#allocation2 + $0xf8] sm:$0x7]  ;;  %v20805_v63 = vmul.f32 %v20542_v8, %v5411_v25  ;;  %v22826_v8 = vrot.slane %v20465_v33, %v20333_v24 }
 0x3ba   : > { %v20808_v18 = vmul.f32 %v20508_v27, %v5636_v58  ;;  %v20811_v53 = vmul.f32 %v20512_v28, %v5636_v58  ;;  %v6102_v35 = vld [vmem:[#allocation2 + $0xf8] sm:$0xf]  ;;  %v22827_v28 = vrot.slane %v20473_v7, %v20333_v24  ;;  %v22828_v58 = vrot.slane %v20482_v16, %v20333_v24 }
 0x3bb   : > { %v5246_v43 = vld [vmem:[#allocation2 + $0x38] sm:$0x1]  ;;  %v20816_v60 = vmul.f32 %v22825_v12, %v6102_v35  ;;  %v20821_v25 = vmul.f32 %v22826_v8, %v6254_v51  ;;  %v6255_v15 = vld [vmem:[#allocation2 + $0x38] sm:$0x1e] }
 0x3bc   : > { %v5412_v19 = vld [vmem:[#allocation2 + $0x38] sm:$0x3]  ;;  %v20826_v27 = vmul.f32 %v22827_v28, %v6254_v51  ;;  %v20831_v0 = vmul.f32 %v22828_v58, %v6574_v32  ;;  %v5337_v55 = vmul.f32 %v20384_v59, %v5246_v43  ;;  %v6575_v17 = vld [vmem:[#allocation2 + $0x38] sm:$0x3c]  ;;  %v22829_v51 = vrot.slane %v20463_v29, %v20336_v52 }
 0x3bd   : > { %v5637_v11 = vld [vmem:[#allocation2 + $0x38] sm:$0x7]  ;;  %v5504_v12 = vmul.f32 %v20417_v45, %v5412_v19  ;;  %v6335_v32 = vmul.f32 %v22830_v54, %v6255_v15  ;;  %v22831_v59 = vrot.slane %v20473_v7, %v20336_v52 }
 0x3be   : > { %v5729_v35 = vmul.f32 %v20404_v14, %v5637_v11  ;;  %v5957_v57 = vmul.f32 %v20408_v22, %v5637_v11  ;;  %v6103_v8 = vld [vmem:[#allocation2 + $0x38] sm:$0xf]  ;;  %v22832_v14 = vrot.slane %v20482_v16, %v20336_v52  ;;  %v5364_v22 = vmul.f32 %v20356_v40, %v5337_v55 }
 0x3bf   : > { %v6183_v28 = vmul.f32 %v22829_v51, %v6103_v8  ;;  %v6489_v43 = vmul.f32 %v22831_v59, %v6255_v15  ;;  %v5544_v11 = vrot.slane %v5504_v12, 1  ;;  %v6727_v8 = vld [vmem:[#allocation2 + $0x38] sm:$0x78]  ;;  %v6349_v54 = vmul.f32 %v20362_v46, %v6335_v32  ;;  %v5248_v59 = vld [vmem:[#allocation2 + $0x78] sm:$0x1] }
 0x3c0   : > { %v20849_v45 = vmul.f32 %v22832_v14, %v6575_v17  ;;  %v5756_v19 = vmul.f32 %v20358_v41, %v5729_v35  ;;  %v5983_v58 = vmul.f32 %v20360_v42, %v5957_v57  ;;  %v5414_v2 = vld [vmem:[#allocation2 + $0x78] sm:$0x3]  ;;  %v22834_v32 = vrot.slane %v20490_v38, %v20336_v52 }
 0x3c1   : > { %v6207_v51 = vrot.slane %v6183_v28, 3  ;;  %v6503_v1 = vmul.f32 %v20364_v48, %v6489_v43  ;;  %v5545_v17 = vsel %vm5539_vm2, %v22833_v21, %v5544_v11  ;;  %v5613_v14 = vadd.f32 %v5544_v11, %v5364_v22  ;;  %v5639_v35 = vld [vmem:[#allocation2 + $0x78] sm:$0x7] }
 0x3c2   : > { %v5796_v55 = vrot.slane %v5756_v19, 2  ;;  %v6022_v12 = vrot.slane %v5983_v58, 2  ;;  %v5601_v57 = vadd.f32 %v5545_v17, %v20446_v37  ;;  %v6373_v50 = vrot.slane %v6349_v54, 4  ;;  %v6105_v61 = vld [vmem:[#allocation2 + $0x78] sm:$0xf]  ;;  %v22838_v54 = vld [vmem:[#allocation56_spill] sm:$0xff] }
 0x3c3   : > { %v6527_v28 = vrot.slane %v6503_v1, 4  ;;  %v6807_v43 = vmul.f32 %v22834_v32, %v6727_v8  ;;  %v22835_v15 = vrot.slane %v20461_v44, 2  ;;  %v22836_v21 = vrot.slane %v20468_v6, 2  ;;  %v22837_v1 = vld [vmem:[#allocation58_spill] sm:$0xff]  ;;  %v6257_v8 = vld [vmem:[#allocation2 + $0x78] sm:$0x1e] }
 0x3c4   : > { %v5865_v13 = vadd.f32 %v5796_v55, %v5613_v14  ;;  %v5339_v11 = vmul.f32 %v20421_v49, %v5248_v59  ;;  %v5506_v58 = vmul.f32 %v22837_v1, %v5414_v2  ;;  %v5731_v17 = vmul.f32 %v22838_v54, %v5639_v35 }
 0x3c5   : > { %v5797_v5 = vsel %vm5791_vm3, %v22835_v15, %v5796_v55  ;;  %v6023_v22 = vsel %vm5791_vm3, %v22836_v21, %v6022_v12  ;;  %v6821_v37 = vmul.f32 %v20372_v4, %v6807_v43  ;;  %v5959_v15 = vmul.f32 %v22839_v39, %v5639_v35 }
 0x3c6   : > { %v5853_v19 = vadd.f32 %v5797_v5, %v5601_v57  ;;  %v6091_v32 = vadd.f32 %v6022_v12, %v5865_v13  ;;  %v5366_v44 = vmul.f32 %v20356_v40, %v5339_v11  ;;  %v22840_v6 = vrot.slane %v20463_v29, %v20342_v30  ;;  %v22842_v11 = vld [vmem:[#allocation59_spill] sm:$0xff] }
 0x3c7   : > { %v6845_v21 = vrot.slane %v6821_v37, 6  ;;  %v5550_v49 = vrot.slane %v5506_v58, 1  ;;  %v5758_v59 = vmul.f32 %v20358_v41, %v5731_v17  ;;  %v5985_v2 = vmul.f32 %v20360_v42, %v5959_v15  ;;  %v6577_v17 = vld [vmem:[#allocation2 + $0x78] sm:$0x3c]  ;;  %v22845_v15 = vld [vmem:[#allocation61_spill] sm:$0xff] }
 0x3c8   : > { %v6185_v14 = vmul.f32 %v22840_v6, %v6105_v61  ;;  %v6079_v55 = vadd.f32 %v6023_v22, %v5853_v19  ;;  %v6243_v57 = vadd.f32 %v6207_v51, %v6091_v32  ;;  %v22841_v13 = vrot.slane %v20465_v33, %v20342_v30  ;;  %v22844_v19 = vld [vmem:[#allocation60_spill] sm:$0xff] }
 0x3c9   : > { %v22843_v39 = vrot.slane %v22842_v11, 1  ;;  %v5615_v1 = vadd.f32 %v5550_v49, %v5366_v44  ;;  %v5802_v61 = vrot.slane %v5758_v59, 2  ;;  %v6028_v58 = vrot.slane %v5985_v2, 2 }
 0x3ca   : > { %v6209_v43 = vrot.slane %v6185_v14, 3  ;;  %v6337_v12 = vmul.f32 %v22841_v13, %v6257_v8  ;;  %v6231_v5 = vadd.f32 %v6207_v51, %v6079_v55  ;;  %v6409_v22 = vadd.f32 %v6373_v50, %v6243_v57 }
 0x3cb   : > { %v5551_v35 = vsel %vm5539_vm2, %v22843_v39, %v5550_v49  ;;  %v22846_v6 = vrot.slane %v22845_v15, 2  ;;  %v5867_v13 = vadd.f32 %v5802_v61, %v5615_v1  ;;  %v22847_v51 = vrot.slane %v20473_v7, %v20342_v30  ;;  %v22848_v49 = vld [vmem:[#allocation62_spill] sm:$0xff]  ;;  %v4886_v39 = vpop.f32.mrf.mxu0 }
 0x3cc   : > { %v5603_v37 = vadd.f32 %v5551_v35, %v22844_v19  ;;  %v6351_v54 = vmul.f32 %v20362_v46, %v6337_v12  ;;  %v6397_v32 = vadd.f32 %v6373_v50, %v6231_v5  ;;  %v6563_v11 = vadd.f32 %v6527_v28, %v6409_v22  ;;  %v4927_v12 = vpop.f32.mrf.mxu1  ;;  %v22851_v19 = vld [vmem:[#allocation38_spill] sm:$0xff] }
 0x3cd   : > { %v5803_v14 = vsel %vm5791_vm3, %v22846_v6, %v5802_v61  ;;  %v6491_v55 = vmul.f32 %v22847_v51, %v6257_v8  ;;  %v22849_v59 = vrot.slane %v22848_v49, 2  ;;  %v6093_v50 = vadd.f32 %v6028_v58, %v5867_v13 }
 0x3ce   : > { %v5855_v44 = vadd.f32 %v5803_v14, %v5603_v37  ;;  %v6375_v2 = vrot.slane %v6351_v54, 4  ;;  %v6551_v35 = vadd.f32 %v6527_v28, %v6397_v32  ;;  %v22850_v1 = vrot.slane %v20482_v16, %v20342_v30  ;;  %v22853_v37 = vld [vmem:[#allocation40_spill] sm:$0xff]  ;;  %v4888_v28 = vpop.f32.mrf.mxu0 }
 0x3cf   : > { %v6029_v57 = vsel %vm5791_vm3, %v22849_v59, %v6028_v58  ;;  %v6505_v5 = vmul.f32 %v20364_v48, %v6491_v55  ;;  %v22852_v8 = vrot.slane %v22851_v19, %v20333_v24  ;;  %v22854_v15 = vrot.slane %v22853_v37, %v20333_v24  ;;  %v4929_v58 = vpop.f32.mrf.mxu1  ;;  %v22857_v59 = vld [vmem:[#allocation54_spill] sm:$0xff] }
 0x3d0   : > { %v6657_v61 = vmul.f32 %v22850_v1, %v6577_v17  ;;  %v22855_v54 = vrot.slane %v20849_v45, 5  ;;  %v6081_v51 = vadd.f32 %v6029_v57, %v5855_v44  ;;  %v6245_v55 = vadd.f32 %v6209_v43, %v6093_v50  ;;  %v4890_v50 = vpop.f32.mrf.mxu0 }
 0x3d1   : > { %v4887_v22 = vadd.f32 %v4886_v39, %v22852_v8  ;;  %v4928_v6 = vadd.f32 %v4927_v12, %v22854_v15  ;;  %v6529_v49 = vrot.slane %v6505_v5, 4  ;;  %v22858_v1 = vrot.slane %v22857_v59, %v20345_v31  ;;  %v22862_v8 = vld [vmem:[#allocation41_spill] sm:$0xff]  ;;  %v4931_v5 = vpop.f32.mrf.mxu1 }
 0x3d2   : > { %v6715_v14 = vadd.f32 %v22855_v54, %v6563_v11  ;;  %v22856_v32 = vmov %v22855_v54  ;;  %v6681_v17 = vrot.slane %v6657_v61, 5  ;;  %v22859_v12 = vrot.slane %v22857_v59, %v20351_v36  ;;  %v22860_v11 = vld [vmem:[#allocation39_spill] sm:$0xff] }
 0x3d3   : > { %v6703_v13 = vadd.f32 %v22856_v32, %v6551_v35  ;;  %v20915_v39 = vadd.f32 %v22858_v1, %v4887_v22  ;;  %v22861_v44 = vrot.slane %v22860_v11, %v20333_v24  ;;  %v22863_v45 = vrot.slane %v22862_v8, %v20333_v24  ;;  %v6729_v54 = vld [vmem:[#allocation2 + $0x78] sm:$0x78] }
 0x3d4   : > { %v20920_v19 = vadd.f32 %v22859_v12, %v4928_v6  ;;  %v6881_v37 = vadd.f32 %v6845_v21, %v6715_v14  ;;  %v6233_v15 = vadd.f32 %v6209_v43, %v6081_v51  ;;  %v6411_v22 = vadd.f32 %v6375_v2, %v6245_v55  ;;  %v22864_v1 = vld [vmem:[#allocation51_spill] sm:$0xff] }
 0x3d5   : > { %v4889_v57 = vadd.f32 %v4888_v28, %v22861_v44  ;;  %v4930_v35 = vadd.f32 %v4929_v58, %v22863_v45  ;;  %v6869_v61 = vadd.f32 %v6845_v21, %v6703_v13  ;;  %v16190_v32 = vmul.f32 -1.442695, %v20915_v39  ;;  %v4891_v44 = vpop.f32.mrf.mxu0  ;;  %v4932_v13 = vpop.f32.mrf.mxu1  ;;  %v22867_v21 = vld [vmem:[#allocation68_spill] sm:$0xff] }
 0x3d6   : > { %v16192_v6 = vmul.f32 -1.442695, %v20920_v19  ;;  %v22865_v12 = vrot.slane %v22857_v59, %v22864_v1  ;;  %v22866_v28 = vrot.slane %v22857_v59, %v20354_v3  ;;  %v20944_v14 = vadd.f32 %v22867_v21, %v6881_v37 }
 0x3d7   : > { %v20941_v43 = vadd.f32 %v22867_v21, %v6869_v61  ;;  %v6399_v51 = vadd.f32 %v6375_v2, %v6233_v15  ;;  %v6565_v55 = vadd.f32 %v6529_v49, %v6411_v22  ;;  %19183 = vpow2.f32 %v16190_v32 }
 0x3d8   : > { %v20933_v11 = vadd.f32 %v22865_v12, %v4889_v57  ;;  %v20938_v58 = vadd.f32 %v22866_v28, %v4930_v35  ;;  %v22868_v59 = vrot.slane %v20490_v38, %v20342_v30  ;;  %19185 = vpow2.f32 %v16192_v6  ;;  %v22869_v12 = vld [vmem:[#allocation69_spill] sm:$0xff] }
 0x3d9   : > { %v16201_v35 = vmul.f32 -1.442695, %v20941_v43  ;;  %v16213_v50 = vmul.f32 -1.442695, %v20944_v14  ;;  %v6553_v5 = vadd.f32 %v6529_v49, %v6399_v51  ;;  %v6717_v61 = vadd.f32 %v6681_v17, %v6565_v55 }
 0x3da   : > { %v16191_v8 = vmul.f32 -1.442695, %v20933_v11  ;;  %v16193_v57 = vmul.f32 -1.442695, %v20938_v58  ;;  %v6809_v45 = vmul.f32 %v22868_v59, %v6729_v54  ;;  %v5363_v37 = vmul.f32 %v20356_v40, %v20802_v23 }
 0x3db   : > { %v6705_v15 = vadd.f32 %v6681_v17, %v6553_v5  ;;  %v5541_v22 = vrot.slane %v20805_v63, 1  ;;  %v5755_v54 = vmul.f32 %v20358_v41, %v20808_v18  ;;  %v5982_v6 = vmul.f32 %v20360_v42, %v20811_v53  ;;  %v22871_v63 = vld [vmem:[#allocation74_spill] sm:$0xff] }
 0x3dc   : > { %19187 = vpow2.f32 %v16191_v8  ;;  %v6823_v2 = vmul.f32 %v20372_v4, %v6809_v45  ;;  %v6206_v49 = vrot.slane %v20816_v60, 3  ;;  %v22870_v28 = vrot.slane %v22869_v12, 1  ;;  %v22872_v18 = vld [vmem:[#allocation70_spill] sm:$0xff]  ;;  %v6726_v45 = vld [vmem:[#allocation2 + $0xf8] sm:$0x78] }
 0x3dd   : > { %19189 = vpow2.f32 %v16193_v57  ;;  %v5612_v23 = vadd.f32 %v5541_v22, %v5363_v37  ;;  %v5793_v13 = vrot.slane %v5755_v54, 2  ;;  %v6019_v55 = vrot.slane %v5982_v6, 2  ;;  %v5413_v54 = vld [vmem:[#allocation2 + $0x8] sm:$0x3] }
 0x3de   : > { %19191 = vpow2.f32 %v16201_v35  ;;  %v6847_v32 = vrot.slane %v6823_v2, 6  ;;  %v5542_v44 = vsel %vm5539_vm2, %v22870_v28, %v5541_v22  ;;  %v22873_v8 = vrot.slane %v22872_v18, 2  ;;  %v22874_v35 = vld [vmem:[#allocation77_spill] sm:$0xff]  ;;  %v22875_v2 = vld [vmem:[#allocation71_spill] sm:$0xff]  ;;  %v22879_v18 = vld [vmem:[#allocation66_spill] sm:$0xff] }
 0x3df   : > { %19193 = vpow2.f32 %v16213_v50  ;;  %v5600_v51 = vadd.f32 %v5542_v44, %v22871_v63  ;;  %v5864_v59 = vadd.f32 %v5793_v13, %v5612_v23  ;;  %v6348_v53 = vmul.f32 %v20362_v46, %v20821_v25  ;;  %v5247_v22 = vld [vmem:[#allocation2 + $0x8] sm:$0x1] }
 0x3e0   : > { %v6871_v17 = vadd.f32 %v6847_v32, %v6705_v15  ;;  %v6883_v21 = vadd.f32 %v6847_v32, %v6717_v61  ;;  %v5794_v57 = vsel %vm5791_vm3, %v22873_v8, %v5793_v13  ;;  %v6502_v60 = vmul.f32 %v20364_v48, %v20826_v27  ;;  %v5638_v32 = vld [vmem:[#allocation2 + $0x8] sm:$0x7] }
 0x3e1   : > { %v5852_v61 = vadd.f32 %v5794_v57, %v5600_v51  ;;  %v22876_v37 = vrot.slane %v22875_v2, 2  ;;  %v6090_v6 = vadd.f32 %v6019_v55, %v5864_v59  ;;  %v6372_v25 = vrot.slane %v6348_v53, 4  ;;  %v22878_v63 = vld [vmem:[#allocation65_spill] sm:$0xff]  ;;  %v22880_v57 = vld [vmem:[#allocation63_spill] sm:$0xff]  ;;  %v22881_v53 = vld [vmem:[#allocation64_spill] sm:$0xff] }
 0x3e2   : > { %v20974_v50 = vadd.f32 %v22874_v35, %v6871_v17  ;;  %v20977_v5 = vadd.f32 %v22874_v35, %v6883_v21  ;;  %v6526_v12 = vrot.slane %v6502_v60, 4  ;;  %v6678_v27 = vrot.slane %v20831_v0, 5 }
 0x3e3   : > { %v6020_v15 = vsel %vm5791_vm3, %v22876_v37, %v6019_v55  ;;  %v22877_v13 = vrot.slane %v20490_v38, %v20333_v24  ;;  %v6242_v21 = vadd.f32 %v6206_v49, %v6090_v6  ;;  %v5338_v51 = vmul.f32 %v22878_v63, %v5247_v22 }
 0x3e4   : > { %v16203_v28 = vmul.f32 -1.442695, %v20974_v50  ;;  %v16215_v44 = vmul.f32 -1.442695, %v20977_v5  ;;  %v6078_v23 = vadd.f32 %v6020_v15, %v5852_v61  ;;  %v5505_v8 = vmul.f32 %v22879_v18, %v5413_v54  ;;  %v19184_v35 = vpop.eup %19183 }
 0x3e5   : > { %v6806_v17 = vmul.f32 %v22877_v13, %v6726_v45  ;;  %v5730_v55 = vmul.f32 %v22880_v57, %v5638_v32  ;;  %v5958_v60 = vmul.f32 %v22881_v53, %v5638_v32  ;;  %v6408_v61 = vadd.f32 %v6372_v25, %v6242_v21  ;;  %v19186_v45 = vpop.eup %19185 }
 0x3e6   : > { %19195 = vpow2.f32 %v16203_v28  ;;  %v6230_v59 = vadd.f32 %v6206_v49, %v6078_v23  ;;  %v5365_v2 = vmul.f32 %v20356_v40, %v5338_v51  ;;  %v5547_v37 = vrot.slane %v5505_v8, 1  ;;  %v22882_v49 = vld [vmem:[#allocation72_spill] sm:$0xff] }
 0x3e7   : > { %v6820_v0 = vmul.f32 %v20372_v4, %v6806_v17  ;;  %19197 = vpow2.f32 %v16215_v44  ;;  %v5132_v15 = vadd.f32 1.0, %v19184_v35  ;;  %v5757_v54 = vmul.f32 %v20358_v41, %v5730_v55  ;;  %v22884_v51 = vld [vmem:[#allocation76_spill] sm:$0xff] }
 0x3e8   : > { %v6396_v6 = vadd.f32 %v6372_v25, %v6230_v59  ;;  %v5134_v63 = vadd.f32 1.0, %v19186_v45  ;;  %v6562_v28 = vadd.f32 %v6526_v12, %v6408_v61  ;;  %v22883_v23 = vrot.slane %v22882_v49, 1  ;;  %v6104_v45 = vld [vmem:[#allocation2 + $0x8] sm:$0xf] }
 0x3e9   : > { %v6844_v22 = vrot.slane %v6820_v0, 6  ;;  %v19188_v13 = vpop.eup %19187  ;;  %v5614_v32 = vadd.f32 %v5547_v37, %v5365_v2  ;;  %19199 = vrcp.f32 %v5132_v15  ;;  %v5799_v0 = vrot.slane %v5757_v54, 2  ;;  %v22885_v15 = vld [vmem:[#allocation73_spill] sm:$0xff] }
 0x3ea   : > { %v5548_v17 = vsel %vm5539_vm2, %v22883_v23, %v5547_v37  ;;  %v19190_v18 = vpop.eup %19189  ;;  %v5133_v44 = vadd.f32 1.0, %v19188_v13  ;;  %v6550_v21 = vadd.f32 %v6526_v12, %v6396_v6  ;;  %19201 = vrcp.f32 %v5134_v63  ;;  %v6256_v6 = vld [vmem:[#allocation2 + $0x8] sm:$0x1e]  ;;  %v22887_v23 = vld [vmem:[#allocation78_spill] sm:$0xff] }
 0x3eb   : > { %v5602_v8 = vadd.f32 %v5548_v17, %v22884_v51  ;;  %v19192_v57 = vpop.eup %19191  ;;  %v5135_v25 = vadd.f32 1.0, %v19190_v18  ;;  %v6714_v59 = vadd.f32 %v6678_v27, %v6562_v28  ;;  %v5984_v61 = vmul.f32 %v20360_v42, %v5958_v60  ;;  %v6576_v49 = vld [vmem:[#allocation2 + $0x8] sm:$0x3c] }
 0x3ec   : > { %v19194_v55 = vpop.eup %19193  ;;  %19203 = vrcp.f32 %v5133_v44  ;;  %v7053_v53 = vadd.f32 1.0, %v19192_v57  ;;  %v6702_v35 = vadd.f32 %v6678_v27, %v6550_v21  ;;  %v22886_v13 = vrot.slane %v22885_v15, 2 }
 0x3ed   : > { %19205 = vrcp.f32 %v5135_v25  ;;  %v7065_v2 = vadd.f32 1.0, %v19194_v55  ;;  %v6880_v37 = vadd.f32 %v6844_v22, %v6714_v59  ;;  %v5866_v54 = vadd.f32 %v5799_v0, %v5614_v32  ;;  %v6728_v25 = vld [vmem:[#allocation2 + $0x8] sm:$0x78] }
 0x3ee   : > { %v5800_v12 = vsel %vm5791_vm3, %v22886_v13, %v5799_v0  ;;  %19207 = vrcp.f32 %v7053_v53  ;;  %v6868_v63 = vadd.f32 %v6844_v22, %v6702_v35  ;;  %v6025_v27 = vrot.slane %v5984_v61, 2  ;;  %v22892_v0 = vld [vmem:[#allocation75_spill] sm:$0xff] }
 0x3ef   : > { %v5854_v28 = vadd.f32 %v5800_v12, %v5602_v8  ;;  %19209 = vrcp.f32 %v7065_v2  ;;  %v21004_v17 = vadd.f32 %v22887_v23, %v6880_v37  ;;  %v22888_v60 = vrot.slane %v20463_v29, %v20339_v26 }
 0x3f0   : > { %v21010_v44 = vadd.f32 %v22887_v23, %v6868_v63  ;;  %v22889_v21 = vrot.slane %v20465_v33, %v20339_v26  ;;  %v22890_v22 = vrot.slane %v20473_v7, %v20339_v26  ;;  %v22891_v8 = vrot.slane %v20482_v16, %v20339_v26 }
 0x3f1   : > { %v6184_v18 = vmul.f32 %v22888_v60, %v6104_v45  ;;  %v16212_v59 = vmul.f32 -1.442695, %v21004_v17  ;;  %v22893_v55 = vrot.slane %v22892_v0, 2  ;;  %v6092_v35 = vadd.f32 %v6025_v27, %v5866_v54 }
 0x3f2   : > { %v6336_v51 = vmul.f32 %v22889_v21, %v6256_v6  ;;  %v6490_v32 = vmul.f32 %v22890_v22, %v6256_v6  ;;  %v6656_v57 = vmul.f32 %v22891_v8, %v6576_v49  ;;  %v16200_v45 = vmul.f32 -1.442695, %v21010_v44 }
 0x3f3   : > { %v6026_v53 = vsel %vm5791_vm3, %v22893_v55, %v6025_v27  ;;  %v6208_v61 = vrot.slane %v6184_v18, 3  ;;  %v19196_v13 = vpop.eup %19195  ;;  %19211 = vpow2.f32 %v16212_v59  ;;  %v22894_v49 = vrot.slane %v20490_v38, %v20339_v26 }
 0x3f4   : > { %v6080_v2 = vadd.f32 %v6026_v53, %v5854_v28  ;;  %v6350_v37 = vmul.f32 %v20362_v46, %v6336_v51  ;;  %v6504_v15 = vmul.f32 %v20364_v48, %v6490_v32  ;;  %v6680_v6 = vrot.slane %v6656_v57, 5  ;;  %v19198_v23 = vpop.eup %19197  ;;  %v22895_v51 = vld [vmem:[#allocation67_spill] sm:$0xff] }
 0x3f5   : > { %v6244_v12 = vadd.f32 %v6208_v61, %v6092_v35  ;;  %v6808_v63 = vmul.f32 %v22894_v49, %v6728_v25  ;;  %v7055_v60 = vadd.f32 1.0, %v19196_v13  ;;  %19213 = vpow2.f32 %v16200_v45 }
 0x3f6   : > { %v6232_v54 = vadd.f32 %v6208_v61, %v6080_v2  ;;  %v6374_v27 = vrot.slane %v6350_v37, 4  ;;  %v7067_v18 = vadd.f32 1.0, %v19198_v23  ;;  %v6528_v21 = vrot.slane %v6504_v15, 4  ;;  %v19200_v25 = vpop.eup %19199 }
 0x3f7   : > { %v6822_v28 = vmul.f32 %v20372_v4, %v6808_v63  ;;  %v21034_v22 = vrot.slane %v22895_v51, %v22864_v1  ;;  %19215 = vrcp.f32 %v7055_v60  ;;  %v21038_v57 = vrot.slane %v22895_v51, %v20354_v3  ;;  %v19202_v53 = vpop.eup %19201 }
 0x3f8   : > { %v6398_v32 = vadd.f32 %v6374_v27, %v6232_v54  ;;  %v6410_v8 = vadd.f32 %v6374_v27, %v6244_v12  ;;  %19217 = vrcp.f32 %v7067_v18  ;;  %v5168_v35 = vmul.f32 %v19200_v25, %v20915_v39  ;;  %v22897_v18 = vld [vmem:[#allocation55_spill] sm:$0xff] }
 0x3f9   : > { %v6846_v59 = vrot.slane %v6822_v28, 6  ;;  %v19204_v37 = vpop.eup %19203  ;;  %v5170_v15 = vmul.f32 %v19202_v53, %v20920_v19  ;;  %v21047_v13 = vrot.slane %v22895_v51, %v20345_v31  ;;  %v21051_v12 = vmul.f32 %v20356_v40, %v20792_v62 }
 0x3fa   : > { %v6552_v61 = vadd.f32 %v6528_v21, %v6398_v32  ;;  %v6564_v45 = vadd.f32 %v6528_v21, %v6410_v8  ;;  %v19206_v63 = vpop.eup %19205  ;;  %5216 = vst [vmem:[#allocation2 + $0x20] sm:$0xf] %v5168_v35  ;;  %v5169_v39 = vmul.f32 %v19204_v37, %v20933_v11  ;;  %v21057_v54 = vmul.f32 %v20358_v41, %v20799_v9  ;;  %v5428_v37 = vld [vmem:[#allocation12 + $0x41] ss:$8 sm:$0xf] }
 0x3fb   : > { %22896 = vst [vmem:[#allocation58_spill] sm:$0xff] %v21047_v13  ;;  %v19208_v19 = vpop.eup %19207  ;;  %5218 = vst [vmem:[#allocation2 + $0x90] sm:$0xf] %v5170_v15  ;;  %v5171_v27 = vmul.f32 %v19206_v63, %v20938_v58  ;;  %v21062_v62 = vrot.slane %v22897_v18, %v20351_v36  ;;  %v22905_v8 = vld [vmem:[#allocation80_spill] sm:$0xff] }
 0x3fc   : > { %v6704_v23 = vadd.f32 %v6680_v6, %v6552_v61  ;;  %v6716_v60 = vadd.f32 %v6680_v6, %v6564_v45  ;;  %v19210_v28 = vpop.eup %19209  ;;  %5217 = vst [vmem:[#allocation2 + $0xc8] sm:$0xf] %v5169_v39  ;;  %v7125_v6 = vmul.f32 %v19208_v19, %v20941_v43  ;;  %v22898_v61 = vld [vmem:[#allocation79_spill] sm:$0xff] }
 0x3fd   : > { %5219 = vst [vmem:[#allocation2 + $0xa0] sm:$0xf] %v5171_v27  ;;  %v7137_v58 = vmul.f32 %v19210_v28, %v20944_v14  ;;  %v5950_v25 = vmul.f32 %v21062_v62, %v20764_v34  ;;  %v21087_v14 = vrot.slane %v22895_v51, %v20351_v36  ;;  %v5261_v34 = vld [vmem:[#allocation12 + $0x40] ss:$8 sm:$0xf] }
 0x3fe   : > { %v6870_v9 = vadd.f32 %v6846_v59, %v6704_v23  ;;  %v6882_v32 = vadd.f32 %v6846_v59, %v6716_v60  ;;  %v21093_v39 = vrot.slane %v5261_v34, %v20336_v52  ;;  %v21096_v23 = vrot.slane %v5428_v37, %v20336_v52  ;;  %v5653_v60 = vld [vmem:[#allocation12 + $0x42] ss:$8 sm:$0xf]  ;;  %v5881_v19 = vld [vmem:[#allocation12 + $0x43] ss:$8 sm:$0xf] }
 0x3ff   : > { %22899 = vst [vmem:[#allocation56_spill] sm:$0xff] %v21087_v14  ;;  %v7149_v15 = vpack.c.bf16 %v7137_v58, %v7125_v6  ;;  %v21090_v63 = vmul.f32 %v20360_v42, %v5950_v25  ;;  %v5408_v28 = vld [vmem:[#allocation2 + $0x110] sm:$0xc0]  ;;  %v21104_v6 = vrot.slane %v5881_v19, %v20336_v52 }
 0x400   : > { %v21078_v45 = vadd.f32 %v22898_v61, %v6870_v9  ;;  %v21081_v43 = vadd.f32 %v22898_v61, %v6882_v32  ;;  %22901 = vst [vmem:[#allocation59_spill] sm:$0xff] %v21093_v39  ;;  %22902 = vst [vmem:[#allocation60_spill] sm:$0xff] %v21096_v23  ;;  %v19212_v27 = vpop.eup %19211  ;;  %v21101_v9 = vrot.slane %v5653_v60, %v20336_v52 }
 0x401   : > { %22900 = vst [vmem:[#allocation57_spill] sm:$0xff] %v21090_v63  ;;  %22904 = vst [vmem:[#allocation62_spill] sm:$0xff] %v21104_v6  ;;  %v7575_v58 = vshrl.u32 %v7149_v15, 16  ;;  %v7578_v25 = vshll.u32 %v7149_v15, 16  ;;  %v7064_v61 = vadd.f32 1.0, %v19212_v27  ;;  %v21111_v11 = vmul.f32 %v21096_v23, %v5408_v28  ;;  %v22907_v15 = vld [vmem:[#allocation81_spill] sm:$0xff] }
 0x402   : > { %v16202_v18 = vmul.f32 -1.442695, %v21078_v45  ;;  %v16214_v51 = vmul.f32 -1.442695, %v21081_v43  ;;  %22903 = vst [vmem:[#allocation61_spill] sm:$0xff] %v21101_v9  ;;  %v19214_v32 = vpop.eup %19213  ;;  %v22912_v6 = vld [vmem:[#allocation87_spill] sm:$0xff] }
 0x403   : > { %v5249_v34 = vld [vmem:[#allocation2 + $0x20] sm:$0x1]  ;;  %v7052_v59 = vadd.f32 1.0, %v19214_v32  ;;  %22906 = vst [vmem:[#allocation38_spill] sm:$0xff] %v21111_v11  ;;  %v7577_v49 = vrot.slane %v7575_v58, 2  ;;  %v7580_v19 = vrot.slane %v7578_v25, 3 }
 0x404   : > { %19219 = vpow2.f32 %v16202_v18  ;;  %v21108_v35 = vmul.f32 %v22905_v8, %v5249_v34  ;;  %v5415_v53 = vld [vmem:[#allocation2 + $0x20] sm:$0x3]  ;;  %v19216_v60 = vpop.eup %19215  ;;  %v5250_v21 = vld [vmem:[#allocation2 + $0xc8] sm:$0x1]  ;;  %v6259_v14 = vld [vmem:[#allocation2 + $0xc8] sm:$0x1e] }
 0x405   : > { %19221 = vrcp.f32 %v7064_v61  ;;  %v5416_v2 = vld [vmem:[#allocation2 + $0xc8] sm:$0x3]  ;;  %v21114_v27 = vmul.f32 %v22907_v15, %v5415_v53  ;;  %v19218_v55 = vpop.eup %19217  ;;  %v7127_v32 = vmul.f32 %v19216_v60, %v20974_v50  ;;  %v22908_v18 = vld [vmem:[#allocation84_spill] sm:$0xff]  ;;  %v21119_v23 = vor.u32 %v7580_v19, %v7577_v49  ;;  %v22911_v25 = vld [vmem:[#allocation86_spill] sm:$0xff] }
 0x406   : > { %19223 = vrcp.f32 %v7052_v59  ;;  %v5341_v8 = vmul.f32 %v22908_v18, %v5250_v21  ;;  %v22909_v34 = vld [vmem:[#allocation85_spill] sm:$0xff]  ;;  %v7139_v58 = vmul.f32 %v19218_v55, %v20977_v5  ;;  %v22913_v21 = vrot.slane %v20463_v29, %v22864_v1  ;;  %v22916_v19 = vld [vmem:[#allocation88_spill] sm:$0xff] }
 0x407   : > { %v5508_v37 = vmul.f32 %v22909_v34, %v5416_v2  ;;  %v5641_v0 = vld [vmem:[#allocation2 + $0xc8] sm:$0x7]  ;;  %22910 = vst [vmem:[#allocation40_spill] sm:$0xff] %v21119_v23  ;;  %19225 = vpow2.f32 %v16214_v51  ;;  %9626 = vmatprep.mubr.bf16.mxu0 %v21119_v23  ;;  %v22914_v5 = vrot.slane %v20465_v33, %v22864_v1  ;;  %v22915_v51 = vrot.slane %v20473_v7, %v22864_v1 }
 0x408   : > { %v6107_v28 = vld [vmem:[#allocation2 + $0xc8] sm:$0xf]  ;;  %v5733_v61 = vmul.f32 %v22911_v25, %v5641_v0  ;;  %v5368_v53 = vmul.f32 %v20356_v40, %v5341_v8  ;;  %v5961_v50 = vmul.f32 %v22912_v6, %v5641_v0  ;;  %v7151_v2 = vpack.c.bf16 %v7139_v58, %v7127_v32  ;;  %v22918_v58 = vld [vmem:[#allocation95_spill] sm:$0xff] }
 0x409   : > { %v5556_v15 = vrot.slane %v5508_v37, 1  ;;  %v6187_v59 = vmul.f32 %v22913_v21, %v6107_v28  ;;  %v6339_v55 = vmul.f32 %v22914_v5, %v6259_v14  ;;  %v6493_v60 = vmul.f32 %v22915_v51, %v6259_v14  ;;  %v6579_v37 = vld [vmem:[#allocation2 + $0xc8] sm:$0x3c] }
 0x40a   : > { %v5760_v49 = vmul.f32 %v20358_v41, %v5733_v61  ;;  %v22917_v0 = vrot.slane %v22916_v19, 1  ;;  %v5987_v8 = vmul.f32 %v20360_v42, %v5961_v50  ;;  %v7591_v32 = vshrl.u32 %v7151_v2, 16  ;;  %v6731_v19 = vld [vmem:[#allocation2 + $0xc8] sm:$0x78] }
 0x40b   : > { %v5617_v18 = vadd.f32 %v5556_v15, %v5368_v53  ;;  %v6211_v34 = vrot.slane %v6187_v59, 3  ;;  %v7594_v28 = vshll.u32 %v7151_v2, 16  ;;  %v6353_v5 = vmul.f32 %v20362_v46, %v6339_v55  ;;  %v5252_v53 = vld [vmem:[#allocation2 + $0xa0] sm:$0x1]  ;;  %v22922_v55 = vld [vmem:[#allocation93_spill] sm:$0xff] }
 0x40c   : > { %v5557_v6 = vsel %vm5539_vm2, %v22917_v0, %v5556_v15  ;;  %v5808_v61 = vrot.slane %v5760_v49, 2  ;;  %v6034_v21 = vrot.slane %v5987_v8, 2  ;;  %v6507_v23 = vmul.f32 %v20364_v48, %v6493_v60  ;;  %v22920_v59 = vld [vmem:[#allocation92_spill] sm:$0xff] }
 0x40d   : > { %v5605_v25 = vadd.f32 %v5557_v6, %v22918_v58  ;;  %v22919_v14 = vrot.slane %v20482_v16, %v22864_v1  ;;  %v7593_v15 = vrot.slane %v7591_v32, 2  ;;  %v7596_v50 = vrot.slane %v7594_v28, 3  ;;  %v5418_v49 = vld [vmem:[#allocation2 + $0xa0] sm:$0x3] }
 0x40e   : > { %v22921_v0 = vrot.slane %v22920_v59, 2  ;;  %v5869_v6 = vadd.f32 %v5808_v61, %v5617_v18  ;;  %v5643_v8 = vld [vmem:[#allocation2 + $0xa0] sm:$0x7]  ;;  %v22923_v9 = vrot.slane %v22922_v55, 2  ;;  %v6377_v11 = vrot.slane %v6353_v5, 4  ;;  %v22928_v55 = vld [vmem:[#allocation91_spill] sm:$0xff] }
 0x40f   : > { %v21146_v51 = vmul.f32 %v22919_v14, %v6579_v37  ;;  %v6531_v39 = vrot.slane %v6507_v23, 4  ;;  %v6109_v37 = vld [vmem:[#allocation2 + $0xa0] sm:$0xf]  ;;  %v21154_v14 = vor.u32 %v7596_v50, %v7593_v15  ;;  %v22925_v28 = vrot.slane %v20490_v38, %v22864_v1 }
 0x410   : > { %v5809_v2 = vsel %vm5791_vm3, %v22921_v0, %v5808_v61  ;;  %v6035_v60 = vsel %vm5791_vm3, %v22923_v9, %v6034_v21  ;;  %v6095_v13 = vadd.f32 %v6034_v21, %v5869_v6  ;;  %v22926_v61 = vld [vmem:[#allocation89_spill] sm:$0xff]  ;;  %v5735_v63 = vmul.f32 %v22928_v55, %v5643_v8  ;;  %v22929_v21 = vld [vmem:[#allocation94_spill] sm:$0xff] }
 0x411   : > { %v5857_v58 = vadd.f32 %v5809_v2, %v5605_v25  ;;  %22924 = vst [vmem:[#allocation54_spill] sm:$0xff] %v21154_v14  ;;  %v6683_v32 = vrot.slane %v21146_v51, 5  ;;  %v6811_v59 = vmul.f32 %v22925_v28, %v6731_v19  ;;  %v5343_v0 = vmul.f32 %v22926_v61, %v5252_v53  ;;  %v22927_v25 = vld [vmem:[#allocation90_spill] sm:$0xff]  ;;  %v19220_v9 = vpop.eup %19219  ;;  %9667 = vmatprep.mubr.bf16.mxu1 %v21154_v14  ;;  %v22936_v14 = vld [vmem:[#allocation44_spill] sm:$0xff] }
 0x412   : > { %v5510_v2 = vmul.f32 %v22927_v25, %v5418_v49  ;;  %v6247_v23 = vadd.f32 %v6211_v34, %v6095_v13  ;;  %v5963_v15 = vmul.f32 %v22929_v21, %v5643_v8  ;;  %v22930_v51 = vrot.slane %v20463_v29, %v20354_v3  ;;  %v19222_v19 = vpop.eup %19221 }
 0x413   : > { %v6083_v18 = vadd.f32 %v6035_v60, %v5857_v58  ;;  %v6825_v5 = vmul.f32 %v20372_v4, %v6811_v59  ;;  %v7054_v6 = vadd.f32 1.0, %v19220_v9  ;;  %v5370_v49 = vmul.f32 %v20356_v40, %v5343_v0  ;;  %v19224_v60 = vpop.eup %19223  ;;  %v5009_v0 = vpop.f32.mrf.mxu1 }
 0x414   : > { %v21169_v50 = vmul.f32 %v22930_v51, %v6109_v37  ;;  %v5562_v58 = vrot.slane %v5510_v2, 1  ;;  %v7136_v28 = vmul.f32 %v19222_v19, %v21004_v17  ;;  %v6413_v61 = vadd.f32 %v6377_v11, %v6247_v23  ;;  %v19226_v25 = vpop.eup %19225  ;;  %v22931_v37 = vld [vmem:[#allocation96_spill] sm:$0xff]  ;;  %v22933_v51 = vld [vmem:[#allocation98_spill] sm:$0xff] }
 0x415   : > { %v6235_v53 = vadd.f32 %v6211_v34, %v6083_v18  ;;  %v6849_v13 = vrot.slane %v6825_v5, 6  ;;  %v5762_v59 = vmul.f32 %v20358_v41, %v5735_v63  ;;  %v7124_v8 = vmul.f32 %v19224_v60, %v21010_v44  ;;  %v4968_v18 = vpop.f32.mrf.mxu0  ;;  %v22934_v5 = vld [vmem:[#allocation42_spill] sm:$0xff]  ;;  %v5011_v60 = vpop.f32.mrf.mxu1 }
 0x416   : > { %19227 = vrcp.f32 %v7054_v6  ;;  %v22932_v21 = vrot.slane %v22931_v37, 1  ;;  %v7066_v34 = vadd.f32 1.0, %v19226_v25  ;;  %v6567_v2 = vadd.f32 %v6531_v39, %v6413_v61 }
 0x417   : > { %v6401_v55 = vadd.f32 %v6377_v11, %v6235_v53  ;;  %v5619_v17 = vadd.f32 %v5562_v58, %v5370_v49  ;;  %v7148_v23 = vpack.c.bf16 %v7136_v28, %v7124_v8  ;;  %v22935_v63 = vrot.slane %v22934_v5, %v20333_v24  ;;  %v4970_v53 = vpop.f32.mrf.mxu0  ;;  %v22938_v49 = vld [vmem:[#allocation97_spill] sm:$0xff] }
 0x418   : > { %v5563_v9 = vsel %vm5539_vm2, %v22932_v21, %v5562_v58  ;;  %v22937_v44 = vrot.slane %v22936_v14, %v20333_v24  ;;  %19229 = vrcp.f32 %v7066_v34  ;;  %v6719_v25 = vadd.f32 %v6683_v32, %v6567_v2  ;;  %v5013_v2 = vpop.f32.mrf.mxu1 }
 0x419   : > { %v5607_v1 = vadd.f32 %v5563_v9, %v22933_v51  ;;  %v4969_v19 = vadd.f32 %v4968_v18, %v22935_v63  ;;  %v6555_v6 = vadd.f32 %v6531_v39, %v6401_v55  ;;  %v5814_v37 = vrot.slane %v5762_v59, 2  ;;  %v22941_v39 = vld [vmem:[#allocation43_spill] sm:$0xff]  ;;  %v22943_v18 = vld [vmem:[#allocation45_spill] sm:$0xff]  ;;  %v6581_v2 = vld [vmem:[#allocation2 + $0xa0] sm:$0x3c] }
 0x41a   : > { %v5010_v11 = vadd.f32 %v5009_v0, %v22937_v44  ;;  %v5989_v61 = vmul.f32 %v20360_v42, %v5963_v15  ;;  %v7567_v21 = vshrl.u32 %v7148_v23, 16  ;;  %v7570_v9 = vshll.u32 %v7148_v23, 16  ;;  %v4972_v0 = vpop.f32.mrf.mxu0 }
 0x41b   : > { %v22939_v58 = vrot.slane %v22938_v49, %v20333_v24  ;;  %v22940_v8 = vrot.slane %v22938_v49, %v20339_v26  ;;  %v22942_v55 = vrot.slane %v22941_v39, %v20333_v24  ;;  %v22944_v59 = vrot.slane %v22943_v18, %v20333_v24  ;;  %v6261_v0 = vld [vmem:[#allocation2 + $0xa0] sm:$0x1e] }
 0x41c   : > { %v6707_v51 = vadd.f32 %v6683_v32, %v6555_v6  ;;  %v6885_v23 = vadd.f32 %v6849_v13, %v6719_v25  ;;  %v7569_v5 = vrot.slane %v7567_v21, 2  ;;  %v7572_v63 = vrot.slane %v7570_v9, 3  ;;  %v4973_v39 = vpop.f32.mrf.mxu0  ;;  %v5014_v32 = vpop.f32.mrf.mxu1  ;;  %v18311_v9 = vld [vmem:[#allocation15 + $0x4c4] ss:$16 sps:$4 sm:$0xff]  }
 0x41d   : > { %v21189_v28 = vadd.f32 %v22939_v58, %v4969_v19  ;;  %v21194_v14 = vadd.f32 %v22940_v8, %v5010_v11  ;;  %v4971_v34 = vadd.f32 %v4970_v53, %v22942_v55  ;;  %v5012_v15 = vadd.f32 %v5011_v60, %v22944_v59  ;;  %v18303_v11 = vld [vmem:[#allocation15 + $0x4e0] ss:$16 sps:$4 sm:$0xff]   ;;  %v22947_v55 = vld [vmem:[#allocation99_spill] sm:$0xff] }
 0x41e   : > { %v22945_v58 = vrot.slane %v22938_v49, %v20336_v52  ;;  %v22946_v53 = vrot.slane %v22938_v49, %v20342_v30  ;;  %v6873_v6 = vadd.f32 %v6849_v13, %v6707_v51  ;;  %v21215_v25 = vadd.f32 %v21034_v22, %v6885_v23 }
 0x41f   : > { %v16194_v19 = vmul.f32 -1.442695, %v21189_v28  ;;  %v16196_v44 = vmul.f32 -1.442695, %v21194_v14  ;;  %v21217_v21 = vor.u32 %v7572_v63, %v7569_v5  ;;  %v22948_v18 = vrot.slane %v22947_v55, 2 }
 0x420   : > { %v21207_v8 = vadd.f32 %v22945_v58, %v4971_v34  ;;  %v21212_v60 = vadd.f32 %v22946_v53, %v5012_v15  ;;  %v5871_v59 = vadd.f32 %v5814_v37, %v5619_v17  ;;  %v21225_v13 = vadd.f32 %v21034_v22, %v6873_v6  ;;  %v18309_v17 = vld [vmem:[#allocation15 + $0x4c0] ss:$16 sps:$4 sm:$0xff]   ;;  %v18317_v53 = vld [vmem:[#allocation15 + $0x4a4] ss:$16 sps:$4 sm:$0xff]  }
 0x421   : > { %19231 = vpow2.f32 %v16194_v19  ;;  %v5815_v34 = vsel %vm5791_vm3, %v22948_v18, %v5814_v37  ;;  %9627 = vmatmul.mubr.bf16.vlgmr.msra.gmra.mxu0 %v21217_v21  ;;  %v16217_v51 = vmul.f32 -1.442695, %v21215_v25  ;;  %v6040_v5 = vrot.slane %v5989_v61, 2  ;;  %v6733_v6 = vld [vmem:[#allocation2 + $0xa0] sm:$0x78] }
 0x422   : > { %19233 = vpow2.f32 %v16196_v44  ;;  %v16195_v49 = vmul.f32 -1.442695, %v21207_v8  ;;  %v16197_v15 = vmul.f32 -1.442695, %v21212_v60  ;;  %v5859_v23 = vadd.f32 %v5815_v34, %v5607_v1  ;;  %9677 = vmatpush1.bf16.msra.mxu0 %v18303_v11  ;;  %v22951_v1 = vld [vmem:[#allocation100_spill] sm:$0xff] }
 0x423   : > { %v6213_v63 = vrot.slane %v21169_v50, 3  ;;  %v16205_v37 = vmul.f32 -1.442695, %v21225_v13  ;;  %v22949_v19 = vrot.slane %v20465_v33, %v20354_v3  ;;  %v22950_v22 = vrot.slane %v20473_v7, %v20354_v3  ;;  %9678 = vmatprep.subr.bf16.mxu0 %v18311_v9  ;;  %v19228_v55 = vpop.eup %19227  ;;  %v5640_v9 = vld [vmem:[#allocation2 + $0x20] sm:$0x7] }
 0x424   : > { %19235 = vpow2.f32 %v16195_v49  ;;  %v22952_v61 = vrot.slane %v22951_v1, 2  ;;  %v6097_v11 = vadd.f32 %v6040_v5, %v5871_v59  ;;  %v22953_v39 = vrot.slane %v20482_v16, %v20354_v3  ;;  %v18315_v59 = vld [vmem:[#allocation15 + $0x4a0] ss:$16 sps:$4 sm:$0xff]  }
 0x425   : > { %v6341_v44 = vmul.f32 %v22949_v19, %v6261_v0  ;;  %v6495_v58 = vmul.f32 %v22950_v22, %v6261_v0  ;;  %19237 = vpow2.f32 %v16197_v15  ;;  %v7126_v49 = vmul.f32 %v19228_v55, %v21078_v45  ;;  %v6106_v55 = vld [vmem:[#allocation2 + $0x20] sm:$0xf] }
 0x426   : > { %v6041_v50 = vsel %vm5791_vm3, %v22952_v61, %v6040_v5  ;;  %v6661_v32 = vmul.f32 %v22953_v39, %v6581_v2  ;;  %19239 = vpow2.f32 %v16205_v37  ;;  %v6249_v15 = vadd.f32 %v6213_v63, %v6097_v11  ;;  %9679 = vmatpush1.bf16.msra.mxu0 %v18309_v17 }
 0x427   : > { %v6085_v18 = vadd.f32 %v6041_v50, %v5859_v23  ;;  %v6355_v34 = vmul.f32 %v20362_v46, %v6341_v44  ;;  %v6509_v0 = vmul.f32 %v20364_v48, %v6495_v58  ;;  %19241 = vpow2.f32 %v16217_v51  ;;  %v19230_v23 = vpop.eup %19229  ;;  %9680 = vmatprep.subr.bf16.mxu0 %v18317_v53  ;;  %v18323_v44 = vld [vmem:[#allocation15 + $0x484] ss:$16 sps:$4 sm:$0xff]   ;;  %v22956_v50 = vld [vmem:[#allocation83_spill] sm:$0xff] }
 0x428   : > { %v6685_v19 = vrot.slane %v6661_v32, 5  ;;  %v22954_v2 = vrot.slane %v20490_v38, %v20354_v3  ;;  %v5367_v58 = vmul.f32 %v20356_v40, %v21108_v35  ;;  %v5553_v45 = vrot.slane %v21114_v27, 1  ;;  %v22955_v51 = vld [vmem:[#allocation82_spill] sm:$0xff] }
 0x429   : > { %v6237_v5 = vadd.f32 %v6213_v63, %v6085_v18  ;;  %v6379_v22 = vrot.slane %v6355_v34, 4  ;;  %v6533_v1 = vrot.slane %v6509_v0, 4  ;;  %v5732_v61 = vmul.f32 %v22955_v51, %v5640_v9  ;;  %v18321_v0 = vld [vmem:[#allocation15 + $0x480] ss:$16 sps:$4 sm:$0xff]  }
 0x42a   : > { %v6813_v37 = vmul.f32 %v22954_v2, %v6733_v6  ;;  %v5960_v17 = vmul.f32 %v22956_v50, %v5640_v9  ;;  %v7138_v63 = vmul.f32 %v19230_v23, %v21081_v43  ;;  %v22957_v6 = vrot.slane %v20760_v20, 1  ;;  %9681 = vmatpush1.bf16.msra.mxu0 %v18315_v59 }
 0x42b   : > { %v6403_v11 = vadd.f32 %v6379_v22, %v6237_v5  ;;  %v6415_v39 = vadd.f32 %v6379_v22, %v6249_v15  ;;  %v5616_v18 = vadd.f32 %v5553_v45, %v5367_v58  ;;  %v5759_v35 = vmul.f32 %v20358_v41, %v5732_v61  ;;  %9682 = vmatprep.subr.bf16.mxu0 %v18323_v44  ;;  %v18329_v15 = vld [vmem:[#allocation15 + $0x464] ss:$16 sps:$4 sm:$0xff]  }
 0x42c   : > { %v6827_v32 = vmul.f32 %v20372_v4, %v6813_v37  ;;  %v5554_v53 = vsel %vm5539_vm2, %v22957_v6, %v5553_v45  ;;  %v5986_v27 = vmul.f32 %v20360_v42, %v5960_v17  ;;  %v7150_v34 = vpack.c.bf16 %v7138_v63, %v7126_v49  ;;  %v22958_v5 = vld [vmem:[#allocation104_spill] sm:$0xff] }
 0x42d   : > { %v6557_v9 = vadd.f32 %v6533_v1, %v6403_v11  ;;  %v6569_v2 = vadd.f32 %v6533_v1, %v6415_v39  ;;  %v5604_v22 = vadd.f32 %v5554_v53, %v22958_v5  ;;  %v5805_v37 = vrot.slane %v5759_v35, 2  ;;  %v18327_v53 = vld [vmem:[#allocation15 + $0x460] ss:$16 sps:$4 sm:$0xff]  }
 0x42e   : > { %v6851_v43 = vrot.slane %v6827_v32, 6  ;;  %v6031_v23 = vrot.slane %v5986_v27, 2  ;;  %v22959_v20 = vrot.slane %v20463_v29, %v20345_v31  ;;  %v19232_v45 = vpop.eup %19231  ;;  %v7583_v51 = vshrl.u32 %v7150_v34, 16  ;;  %9683 = vmatpush1.bf16.msra.mxu0 %v18321_v0  ;;  %v6258_v5 = vld [vmem:[#allocation2 + $0x20] sm:$0x1e] }
 0x42f   : > { %v7586_v61 = vshll.u32 %v7150_v34, 16  ;;  %v6709_v50 = vadd.f32 %v6685_v19, %v6557_v9  ;;  %v6721_v49 = vadd.f32 %v6685_v19, %v6569_v2  ;;  %v19234_v59 = vpop.eup %19233  ;;  %v5136_v17 = vadd.f32 1.0, %v19232_v45  ;;  %v18306_v34 = vld [vmem:[#allocation15 + $0x6e0] ss:$16 sps:$4 sm:$0xff]   ;;  %9684 = vmatprep.subr.bf16.mxu0 %v18329_v15  ;;  %v18335_v19 = vld [vmem:[#allocation15 + $0x444] ss:$16 sps:$4 sm:$0xff]  }
 0x430   : > { %v6186_v58 = vmul.f32 %v22959_v20, %v6106_v55  ;;  %v22960_v1 = vrot.slane %v20786_v56, 2  ;;  %v5868_v63 = vadd.f32 %v5805_v37, %v5616_v18  ;;  %v22961_v11 = vrot.slane %v20789_v10, 2  ;;  %v18314_v10 = vld [vmem:[#allocation15 + $0x6c4] ss:$16 sps:$4 sm:$0xff]   ;;  %v18333_v45 = vld [vmem:[#allocation15 + $0x440] ss:$16 sps:$4 sm:$0xff]  }
 0x431   : > { %v7585_v32 = vrot.slane %v7583_v51, 2  ;;  %v7588_v6 = vrot.slane %v7586_v61, 3  ;;  %v5138_v55 = vadd.f32 1.0, %v19234_v59  ;;  %v6875_v35 = vadd.f32 %v6851_v43, %v6709_v50  ;;  %v19236_v27 = vpop.eup %19235  ;;  %v18312_v61 = vld [vmem:[#allocation15 + $0x6c0] ss:$16 sps:$4 sm:$0xff]  }
 0x432   : > { %v5806_v44 = vsel %vm5791_vm3, %v22960_v1, %v5805_v37  ;;  %v6032_v39 = vsel %vm5791_vm3, %v22961_v11, %v6031_v23  ;;  %19243 = vrcp.f32 %v5136_v17  ;;  %v6887_v9 = vadd.f32 %v6851_v43, %v6721_v49  ;;  %v19238_v18 = vpop.eup %19237  ;;  %v18341_v59 = vld [vmem:[#allocation15 + $0x424] ss:$16 sps:$4 sm:$0xff]   ;;  %9685 = vmatpush1.bf16.msra.mxu0 %v18327_v53 }
 0x433   : > { %v5856_v56 = vadd.f32 %v5806_v44, %v5604_v22  ;;  %v6094_v2 = vadd.f32 %v6031_v23, %v5868_v63  ;;  %v21271_v37 = vor.u32 %v7588_v6, %v7585_v32  ;;  %19245 = vrcp.f32 %v5138_v55  ;;  %v19240_v51 = vpop.eup %19239  ;;  %v6578_v23 = vld [vmem:[#allocation2 + $0x20] sm:$0x3c]  ;;  %v5251_v32 = vld [vmem:[#allocation2 + $0x90] sm:$0x1]  ;;  %9686 = vmatprep.subr.bf16.mxu0 %v18335_v19 }
 0x434   : > { %v5137_v20 = vadd.f32 1.0, %v19236_v27  ;;  %v21274_v0 = vadd.f32 %v21038_v57, %v6875_v35  ;;  %v5139_v50 = vadd.f32 1.0, %v19238_v18  ;;  %v21277_v15 = vadd.f32 %v21038_v57, %v6887_v9  ;;  %v6730_v49 = vld [vmem:[#allocation2 + $0x20] sm:$0x78]  ;;  %v19242_v17 = vpop.eup %19241  ;;  %v5417_v6 = vld [vmem:[#allocation2 + $0x90] sm:$0x3] }
 0x435   : > { %v6082_v43 = vadd.f32 %v6032_v39, %v5856_v56  ;;  %v6210_v22 = vrot.slane %v6186_v58, 3  ;;  %9668 = vmatmul.mubr.bf16.vlgmr.msra.gmra.mxu1 %v21271_v37  ;;  %v7057_v1 = vadd.f32 1.0, %v19240_v51  ;;  %v22962_v63 = vrot.slane %v20465_v33, %v20345_v31  ;;  %v18320_v55 = vld [vmem:[#allocation15 + $0x6a4] ss:$16 sps:$4 sm:$0xff]   ;;  %v18339_v56 = vld [vmem:[#allocation15 + $0x420] ss:$16 sps:$4 sm:$0xff]  }
 0x436   : > { %19247 = vrcp.f32 %v5137_v20  ;;  %v16207_v44 = vmul.f32 -1.442695, %v21274_v0  ;;  %9718 = vmatpush1.bf16.msra.mxu1 %v18306_v34  ;;  %v7069_v57 = vadd.f32 1.0, %v19242_v17  ;;  %v16219_v58 = vmul.f32 -1.442695, %v21277_v15  ;;  %9687 = vmatpush1.bf16.msra.mxu0 %v18333_v45 }
 0x437   : > { %v6338_v11 = vmul.f32 %v22962_v63, %v6258_v5  ;;  %19249 = vrcp.f32 %v5139_v50  ;;  %v6234_v39 = vadd.f32 %v6210_v22, %v6082_v43  ;;  %9719 = vmatprep.subr.bf16.mxu1 %v18314_v10  ;;  %v6246_v53 = vadd.f32 %v6210_v22, %v6094_v2  ;;  %v22966_v10 = vld [vmem:[#allocation101_spill] sm:$0xff]  ;;  %v22967_v43 = vld [vmem:[#allocation102_spill] sm:$0xff]  ;;  %9688 = vmatprep.subr.bf16.mxu0 %v18341_v59 }
 0x438   : > { %19251 = vrcp.f32 %v7057_v1  ;;  %v22963_v27 = vrot.slane %v20473_v7, %v20345_v31  ;;  %v22964_v34 = vrot.slane %v20482_v16, %v20345_v31  ;;  %v22965_v18 = vrot.slane %v20490_v38, %v20345_v31  ;;  %v6108_v17 = vld [vmem:[#allocation2 + $0x90] sm:$0xf]  ;;  %v18347_v63 = vld [vmem:[#allocation15 + $0x404] ss:$16 sps:$4 sm:$0xff]  }
 0x439   : > { %v6352_v35 = vmul.f32 %v20362_v46, %v6338_v11  ;;  %19253 = vrcp.f32 %v7069_v57  ;;  %v5342_v51 = vmul.f32 %v22966_v10, %v5251_v32  ;;  %v5509_v22 = vmul.f32 %v22967_v43, %v5417_v6  ;;  %v18318_v1 = vld [vmem:[#allocation15 + $0x6a0] ss:$16 sps:$4 sm:$0xff]   ;;  %v18326_v45 = vld [vmem:[#allocation15 + $0x684] ss:$16 sps:$4 sm:$0xff]   ;;  %v22968_v6 = vld [vmem:[#allocation103_spill] sm:$0xff] }
 0x43a   : > { %v6492_v9 = vmul.f32 %v22963_v27, %v6258_v5  ;;  %v6658_v19 = vmul.f32 %v22964_v34, %v6578_v23  ;;  %v6810_v20 = vmul.f32 %v22965_v18, %v6730_v49  ;;  %19255 = vpow2.f32 %v16207_v44  ;;  %v5642_v5 = vld [vmem:[#allocation2 + $0x90] sm:$0x7]  ;;  %9720 = vmatpush1.bf16.msra.mxu1 %v18312_v61  ;;  %9689 = vmatpush1.bf16.msra.mxu0 %v18339_v56 }
 0x43b   : > { %v6376_v2 = vrot.slane %v6352_v35, 4  ;;  %19257 = vpow2.f32 %v16219_v58  ;;  %v5369_v49 = vmul.f32 %v20356_v40, %v5342_v51  ;;  %9721 = vmatprep.subr.bf16.mxu1 %v18320_v55  ;;  %v5559_v35 = vrot.slane %v5509_v22, 1  ;;  %v6260_v34 = vld [vmem:[#allocation2 + $0x90] sm:$0x1e]  ;;  %9690 = vmatprep.subr.bf16.mxu0 %v18347_v63 }
 0x43c   : > { %v6506_v50 = vmul.f32 %v20364_v48, %v6492_v9  ;;  %v6682_v23 = vrot.slane %v6658_v19, 5  ;;  %v6824_v11 = vmul.f32 %v20372_v4, %v6810_v20  ;;  %v5734_v9 = vmul.f32 %v22968_v6, %v5642_v5  ;;  %v18345_v19 = vld [vmem:[#allocation15 + $0x400] ss:$16 sps:$4 sm:$0xff]   ;;  %v18332_v22 = vld [vmem:[#allocation15 + $0x664] ss:$16 sps:$4 sm:$0xff]  }
 0x43d   : > { %v6400_v44 = vadd.f32 %v6376_v2, %v6234_v39  ;;  %v6412_v32 = vadd.f32 %v6376_v2, %v6246_v53  ;;  %v5962_v61 = vmul.f32 %v21062_v62, %v5642_v5  ;;  %v22969_v59 = vrot.slane %v20463_v29, %v20351_v36  ;;  %v6580_v10 = vld [vmem:[#allocation2 + $0x90] sm:$0x3c] }
 0x43e   : > { %v6530_v57 = vrot.slane %v6506_v50, 4  ;;  %v6848_v27 = vrot.slane %v6824_v11, 6  ;;  %v22970_v39 = vrot.slane %v20795_v47, 1  ;;  %v5618_v20 = vadd.f32 %v5559_v35, %v5369_v49  ;;  %9722 = vmatpush1.bf16.msra.mxu1 %v18318_v1  ;;  %v18324_v51 = vld [vmem:[#allocation15 + $0x680] ss:$16 sps:$4 sm:$0xff]   ;;  %9691 = vmatpush1.bf16.msra.mxu0 %v18345_v19 }
 0x43f   : > { %v21305_v58 = vmul.f32 %v22969_v59, %v6108_v17  ;;  %v18353_v62 = vld [vmem:[#allocation15 + $0x5e4] ss:$16 sps:$4 sm:$0xff]   ;;  %v5761_v29 = vmul.f32 %v20358_v41, %v5734_v9  ;;  %v5988_v50 = vmul.f32 %v20360_v42, %v5962_v61  ;;  %v19244_v43 = vpop.eup %19243  ;;  %9723 = vmatprep.subr.bf16.mxu1 %v18326_v45  ;;  %v22971_v17 = vrot.slane %v20465_v33, %v20351_v36  ;;  %v18330_v61 = vld [vmem:[#allocation15 + $0x660] ss:$16 sps:$4 sm:$0xff]  }
 0x440   : > { %v6554_v18 = vadd.f32 %v6530_v57, %v6400_v44  ;;  %v6566_v55 = vadd.f32 %v6530_v57, %v6412_v32  ;;  %v5560_v53 = vsel %vm5539_vm2, %v22970_v39, %v5559_v35  ;;  %v22972_v63 = vrot.slane %v20473_v7, %v20351_v36  ;;  %v18351_v35 = vld [vmem:[#allocation15 + $0x5e0] ss:$16 sps:$4 sm:$0xff]   ;;  %9692 = vmatprep.subr.bf16.mxu0 %v18353_v62 }
 0x441   : > { %v5606_v2 = vadd.f32 %v5560_v53, %v21051_v12  ;;  %v6212_v56 = vrot.slane %v21305_v58, 3  ;;  %v6340_v1 = vmul.f32 %v22971_v17, %v6260_v34  ;;  %v19246_v12 = vpop.eup %19245  ;;  %v5172_v49 = vmul.f32 %v19244_v43, %v21189_v28  ;;  %v18359_v28 = vld [vmem:[#allocation15 + $0x5c4] ss:$16 sps:$4 sm:$0xff]  }
 0x442   : > { %v6706_v47 = vadd.f32 %v6682_v23, %v6554_v18  ;;  %v6718_v5 = vadd.f32 %v6682_v23, %v6566_v55  ;;  %v6494_v11 = vmul.f32 %v22972_v63, %v6260_v34  ;;  %v5811_v44 = vrot.slane %v5761_v29, 2  ;;  %9724 = vmatpush1.bf16.msra.mxu1 %v18324_v51  ;;  %v22975_v18 = vld [vmem:[#allocation57_spill] sm:$0xff]  ;;  %v18338_v53 = vld [vmem:[#allocation15 + $0x644] ss:$16 sps:$4 sm:$0xff]   ;;  %9693 = vmatpush2.bf16.msra.mxu0 %v18351_v35 }
 0x443   : > { %v6037_v32 = vrot.slane %v5988_v50, 2  ;;  %v22973_v57 = vrot.slane %v20482_v16, %v20351_v36  ;;  %v5174_v23 = vmul.f32 %v19246_v12, %v21194_v14  ;;  %v6354_v9 = vmul.f32 %v20362_v46, %v6340_v1  ;;  %v19248_v7 = vpop.eup %19247  ;;  %5220 = vst [vmem:[#allocation2 + $0x70] sm:$0xf] %v5172_v49  ;;  %9725 = vmatprep.subr.bf16.mxu1 %v18332_v22  ;;  %v5242_v17 = vld [vmem:[#allocation2 + $0x110] sm:$0xe0] }
 0x444   : > { %v6872_v33 = vadd.f32 %v6848_v27, %v6706_v47  ;;  %v6884_v6 = vadd.f32 %v6848_v27, %v6718_v5  ;;  %v22974_v59 = vrot.slane %v21057_v54, 2  ;;  %v5870_v34 = vadd.f32 %v5811_v44, %v5618_v20  ;;  %v19250_v27 = vpop.eup %19249  ;;  %v6732_v20 = vld [vmem:[#allocation2 + $0x90] sm:$0x78]  ;;  %9694 = vmatprep.subr.bf16.mxu0 %v18359_v28 }
 0x445   : > { %v21324_v45 = vmul.f32 %v22973_v57, %v6580_v10  ;;  %v22976_v55 = vrot.slane %v22975_v18, 2  ;;  %5222 = vst [vmem:[#allocation2 + $0xe0] sm:$0xf] %v5174_v23  ;;  %v5173_v39 = vmul.f32 %v19248_v7, %v21207_v8  ;;  %v22977_v10 = vld [vmem:[#allocation58_spill] sm:$0xff]  ;;  %v19252_v29 = vpop.eup %19251  ;;  %v5175_v50 = vmul.f32 %v19250_v27, %v21212_v60  ;;  %v22979_v7 = vld [vmem:[#allocation59_spill] sm:$0xff] }
 0x446   : > { %v5812_v16 = vsel %vm5791_vm3, %v22974_v59, %v5811_v44  ;;  %v21337_v51 = vadd.f32 %v22977_v10, %v6872_v33  ;;  %v21340_v54 = vadd.f32 %v22977_v10, %v6884_v6  ;;  %v6096_v43 = vadd.f32 %v6037_v32, %v5870_v34  ;;  %v19254_v1 = vpop.eup %19253  ;;  %v18357_v8 = vld [vmem:[#allocation15 + $0x5c0] ss:$16 sps:$4 sm:$0xff]   ;;  %9726 = vmatpush1.bf16.msra.mxu1 %v18330_v61  ;;  %v18365_v44 = vld [vmem:[#allocation15 + $0x5a4] ss:$16 sps:$4 sm:$0xff]  }
 0x447   : > { %v6038_v14 = vsel %vm5791_vm3, %v22976_v55, %v6037_v32  ;;  %v6684_v19 = vrot.slane %v21324_v45, 5  ;;  %v5858_v62 = vadd.f32 %v5812_v16, %v5606_v2  ;;  %v6378_v47 = vrot.slane %v6354_v9, 4  ;;  %5221 = vst [vmem:[#allocation2 + $0x58] sm:$0xf] %v5173_v39  ;;  %v19256_v49 = vpop.eup %19255  ;;  %5223 = vst [vmem:[#allocation2 + $0x60] sm:$0xf] %v5175_v50  ;;  %9727 = vmatprep.subr.bf16.mxu1 %v18338_v53 }
 0x448   : > { %v6508_v5 = vmul.f32 %v20364_v48, %v6494_v11  ;;  %v7129_v22 = vmul.f32 %v19252_v29, %v21225_v13  ;;  %v16204_v63 = vmul.f32 -1.442695, %v21337_v51  ;;  %v16216_v12 = vmul.f32 -1.442695, %v21340_v54  ;;  %v18336_v60 = vld [vmem:[#allocation15 + $0x640] ss:$16 sps:$4 sm:$0xff]   ;;  %v19258_v35 = vpop.eup %19257  ;;  %9695 = vmatpush2.bf16.msra.mxu0 %v18357_v8 }
 0x449   : > { %v6084_v2 = vadd.f32 %v6038_v14, %v5858_v62  ;;  %v7141_v11 = vmul.f32 %v19254_v1, %v21215_v25  ;;  %v6248_v32 = vadd.f32 %v6212_v56, %v6096_v43  ;;  %v22978_v13 = vrot.slane %v20490_v38, %v20351_v36  ;;  %v18344_v33 = vld [vmem:[#allocation15 + $0x624] ss:$16 sps:$4 sm:$0xff]   ;;  %v18363_v34 = vld [vmem:[#allocation15 + $0x5a0] ss:$16 sps:$4 sm:$0xff]   ;;  %9696 = vmatprep.subr.bf16.mxu0 %v18365_v44  ;;  %v22981_v50 = vld [vmem:[#allocation61_spill] sm:$0xff] }
 0x44a   : > { %v6532_v57 = vrot.slane %v6508_v5, 4  ;;  %v7059_v6 = vadd.f32 1.0, %v19256_v49  ;;  %19259 = vpow2.f32 %v16204_v63  ;;  %v5333_v61 = vmul.f32 %v22979_v7, %v5242_v17  ;;  %v5633_v16 = vld [vmem:[#allocation2 + $0x110] sm:$0x80]  ;;  %9728 = vmatpush1.bf16.msra.mxu1 %v18336_v60  ;;  %v18342_v14 = vld [vmem:[#allocation15 + $0x620] ss:$16 sps:$4 sm:$0xff]  }
 0x44b   : > { %v6812_v23 = vmul.f32 %v22978_v13, %v6732_v20  ;;  %v6236_v9 = vadd.f32 %v6212_v56, %v6084_v2  ;;  %v7153_v28 = vpack.c.bf16 %v7141_v11, %v7129_v22  ;;  %v7071_v25 = vadd.f32 1.0, %v19258_v35  ;;  %v18371_v58 = vld [vmem:[#allocation15 + $0x584] ss:$16 sps:$4 sm:$0xff]   ;;  %9729 = vmatprep.subr.bf16.mxu1 %v18344_v33 }
 0x44c   : > { %19261 = vpow2.f32 %v16216_v12  ;;  %v6414_v59 = vadd.f32 %v6378_v47, %v6248_v32  ;;  %v5360_v55 = vmul.f32 %v20356_v40, %v5333_v61  ;;  %v18350_v53 = vld [vmem:[#allocation15 + $0x604] ss:$16 sps:$4 sm:$0xff]   ;;  %v5725_v43 = vmul.f32 %v22981_v50, %v5633_v16  ;;  %9697 = vmatpush2.bf16.msra.mxu0 %v18363_v34  ;;  %v18369_v12 = vld [vmem:[#allocation15 + $0x580] ss:$16 sps:$4 sm:$0xff]  }
 0x44d   : > { %19263 = vrcp.f32 %v7059_v6  ;;  %v6402_v38 = vadd.f32 %v6378_v47, %v6236_v9  ;;  %v6826_v18 = vmul.f32 %v20372_v4, %v6812_v23  ;;  %v7607_v56 = vshrl.u32 %v7153_v28, 16  ;;  %v22980_v20 = vld [vmem:[#allocation38_spill] sm:$0xff]  ;;  %v22983_v60 = vld [vmem:[#allocation60_spill] sm:$0xff]  ;;  %9698 = vmatprep.subr.bf16.mxu0 %v18371_v58 }
 0x44e   : > { %v7610_v27 = vshll.u32 %v7153_v28, 16  ;;  %19265 = vrcp.f32 %v7071_v25  ;;  %v6568_v39 = vadd.f32 %v6532_v57, %v6414_v59  ;;  %v5567_v29 = vrot.slane %v22980_v20, 1  ;;  %v5254_v1 = vld [vmem:[#allocation2 + $0x58] sm:$0x1]  ;;  %v22982_v22 = vld [vmem:[#allocation62_spill] sm:$0xff]  ;;  %9730 = vmatpush1.bf16.msra.mxu1 %v18342_v14  ;;  %v22984_v28 = vld [vmem:[#allocation56_spill] sm:$0xff] }
 0x44f   : > { %v6556_v10 = vadd.f32 %v6532_v57, %v6402_v38  ;;  %v6850_v62 = vrot.slane %v6826_v18, 6  ;;  %v7609_v47 = vrot.slane %v7607_v56, 2  ;;  %v5420_v8 = vld [vmem:[#allocation2 + $0x58] sm:$0x3]  ;;  %v5953_v63 = vmul.f32 %v22982_v22, %v5633_v16  ;;  %v18348_v57 = vld [vmem:[#allocation15 + $0x600] ss:$16 sps:$4 sm:$0xff]   ;;  %9731 = vmatprep.subr.bf16.mxu1 %v18350_v53 }
 0x450   : > { %v7612_v5 = vrot.slane %v7610_v27, 3  ;;  %v6720_v17 = vadd.f32 %v6684_v19, %v6568_v39  ;;  %v5345_v49 = vmul.f32 %v22979_v7, %v5254_v1  ;;  %v5512_v44 = vmul.f32 %v22983_v60, %v5420_v8  ;;  %v5645_v11 = vld [vmem:[#allocation2 + $0x58] sm:$0x7]  ;;  %v18377_v13 = vld [vmem:[#allocation15 + $0x564] ss:$16 sps:$4 sm:$0xff]   ;;  %9699 = vmatpush2.bf16.msra.mxu0 %v18369_v12 }
 0x451   : > { %v6708_v2 = vadd.f32 %v6684_v19, %v6556_v10  ;;  %v5752_v32 = vmul.f32 %v20358_v41, %v5725_v43  ;;  %v5737_v33 = vmul.f32 %v22981_v50, %v5645_v11  ;;  %v18356_v6 = vld [vmem:[#allocation15 + $0x7e4] ss:$16 sps:$4 sm:$0xff]   ;;  %v18354_v61 = vld [vmem:[#allocation15 + $0x7e0] ss:$16 sps:$4 sm:$0xff]   ;;  %v5965_v16 = vmul.f32 %v22982_v22, %v5645_v11  ;;  %v6111_v38 = vld [vmem:[#allocation2 + $0x58] sm:$0xf]  ;;  %9700 = vmatprep.subr.bf16.mxu0 %v18377_v13 }
 0x452   : > { %v21368_v23 = vor.u32 %v7612_v5, %v7609_v47  ;;  %v6886_v35 = vadd.f32 %v6850_v62, %v6720_v17  ;;  %v5372_v19 = vmul.f32 %v20356_v40, %v5345_v49  ;;  %v5568_v9 = vrot.slane %v5512_v44, 1  ;;  %v21379_v18 = vld [vmem:[#allocation12 + $0x44] ss:$8 sm:$0xf]  ;;  %v18362_v14 = vld [vmem:[#allocation15 + $0x7c4] ss:$16 sps:$4 sm:$0xff]   ;;  %9732 = vmatpush1.bf16.msra.mxu1 %v18348_v57 }
 0x453   : > { %v6874_v45 = vadd.f32 %v6850_v62, %v6708_v2  ;;  %v5819_v7 = vrot.slane %v5752_v32, 2  ;;  %v5764_v59 = vmul.f32 %v20358_v41, %v5737_v33  ;;  %v5979_v34 = vmul.f32 %v20360_v42, %v5953_v63  ;;  %v18375_v58 = vld [vmem:[#allocation15 + $0x560] ss:$16 sps:$4 sm:$0xff]   ;;  %v18383_v56 = vld [vmem:[#allocation15 + $0x544] ss:$16 sps:$4 sm:$0xff]   ;;  %9733 = vmatprep.subr.bf16.mxu1 %v18356_v6 }
 0x454   : > { %9708 = vmatprep.mubr.bf16.mxu0 %v21368_v23  ;;  %v21374_v25 = vadd.f32 %v22984_v28, %v6886_v35  ;;  %v5569_v39 = vsel %vm5539_vm2, %v5567_v29, %v5568_v9  ;;  %v5621_v53 = vadd.f32 %v5568_v9, %v5372_v19  ;;  %v6161_v10 = vrot.slane %v21379_v18, %v20336_v52  ;;  %v21389_v47 = vld [vmem:[#allocation12 + $0x45] ss:$8 sm:$0xf]  ;;  %v18368_v60 = vld [vmem:[#allocation15 + $0x7a4] ss:$16 sps:$4 sm:$0xff]  }
 0x455   : > { %v21382_v27 = vadd.f32 %v22984_v28, %v6874_v45  ;;  %v5609_v20 = vadd.f32 %v5569_v39, %v5360_v55  ;;  %v5820_v50 = vrot.slane %v5764_v59, 2  ;;  %v5991_v43 = vmul.f32 %v20360_v42, %v5965_v16  ;;  %v6263_v29 = vld [vmem:[#allocation2 + $0x58] sm:$0x1e]  ;;  %v18360_v63 = vld [vmem:[#allocation15 + $0x7c0] ss:$16 sps:$4 sm:$0xff]   ;;  %9701 = vmatpush2.bf16.msra.mxu0 %v18375_v58 }
 0x456   : > { %v16218_v62 = vmul.f32 -1.442695, %v21374_v25  ;;  %v6045_v17 = vrot.slane %v5979_v34, 2  ;;  %v6191_v1 = vmul.f32 %v6161_v10, %v6111_v38  ;;  %v6313_v8 = vrot.slane %v21389_v47, %v20336_v52  ;;  %v18381_v44 = vld [vmem:[#allocation15 + $0x540] ss:$16 sps:$4 sm:$0xff]   ;;  %9734 = vmatpush2.bf16.msra.mxu1 %v18354_v61  ;;  %9702 = vmatprep.subr.bf16.mxu0 %v18383_v56 }
 0x457   : > { %v16206_v5 = vmul.f32 -1.442695, %v21382_v27  ;;  %v19260_v22 = vpop.eup %19259  ;;  %v5821_v12 = vsel %vm5791_vm3, %v5819_v7, %v5820_v50  ;;  %v5873_v55 = vadd.f32 %v5820_v50, %v5621_v53  ;;  %v6046_v2 = vrot.slane %v5991_v43, 2  ;;  %v18389_v35 = vld [vmem:[#allocation15 + $0x524] ss:$16 sps:$4 sm:$0xff]   ;;  %9735 = vmatprep.subr.bf16.mxu1 %v18362_v14 }
 0x458   : > { %19267 = vpow2.f32 %v16218_v62  ;;  %v7056_v11 = vadd.f32 1.0, %v19260_v22  ;;  %v5861_v32 = vadd.f32 %v5821_v12, %v5609_v20  ;;  %v6215_v57 = vrot.slane %v6191_v1, 3  ;;  %v21396_v9 = vld [vmem:[#allocation12 + $0x46] ss:$8 sm:$0xf] }
 0x459   : > { %v19262_v49 = vpop.eup %19261  ;;  %19269 = vpow2.f32 %v16206_v5  ;;  %v6047_v6 = vsel %vm5791_vm3, %v6045_v17, %v6046_v2  ;;  %v6099_v45 = vadd.f32 %v6046_v2, %v5873_v55  ;;  %v6343_v19 = vmul.f32 %v6313_v8, %v6263_v29  ;;  %v21401_v34 = vld [vmem:[#allocation12 + $0x47] ss:$8 sm:$0xf]  ;;  %v21403_v61 = vld [vmem:[#allocation12 + $0xa0] ss:$8 sm:$0xf]  ;;  %9703 = vmatpush2.bf16.msra.mxu0 %v18381_v44 }
 0x45a   : > { %v19264_v13 = vpop.eup %19263  ;;  %v7068_v33 = vadd.f32 1.0, %v19262_v49  ;;  %19271 = vrcp.f32 %v7056_v11  ;;  %v6087_v59 = vadd.f32 %v6047_v6, %v5861_v32  ;;  %v6467_v16 = vrot.slane %v21396_v9, %v20336_v52  ;;  %v6583_v39 = vld [vmem:[#allocation2 + $0x58] sm:$0x3c]  ;;  %v18366_v14 = vld [vmem:[#allocation15 + $0x7a0] ss:$16 sps:$4 sm:$0xff]   ;;  %9736 = vmatpush2.bf16.msra.mxu1 %v18360_v63  ;;  %9704 = vmatprep.subr.bf16.mxu0 %v18389_v35 }
 0x45b   : > { %v19266_v7 = vpop.eup %19265  ;;  %v7131_v28 = vmul.f32 %v19264_v13, %v21274_v0  ;;  %v6251_v58 = vadd.f32 %v6215_v57, %v6099_v45  ;;  %v6357_v56 = vmul.f32 %v20362_v46, %v6343_v19  ;;  %v6735_v53 = vld [vmem:[#allocation2 + $0x58] sm:$0x78]  ;;  %v18387_v0 = vld [vmem:[#allocation15 + $0x520] ss:$16 sps:$4 sm:$0xff]   ;;  %v6633_v20 = vrot.slane %v21401_v34, %v20336_v52  ;;  %9737 = vmatprep.subr.bf16.mxu1 %v18368_v60  ;;  %v18374_v12 = vld [vmem:[#allocation15 + $0x784] ss:$16 sps:$4 sm:$0xff]  }
 0x45c   : > { %v7143_v38 = vmul.f32 %v19266_v7, %v21277_v15  ;;  %19273 = vrcp.f32 %v7068_v33  ;;  %v6239_v10 = vadd.f32 %v6215_v57, %v6087_v59  ;;  %v6497_v62 = vmul.f32 %v6467_v16, %v6263_v29  ;;  %v21411_v43 = vld [vmem:[#allocation13 + $0x8] sm:$0xf]  ;;  %v18395_v15 = vld [vmem:[#allocation15 + $0x504] ss:$16 sps:$4 sm:$0xff]   ;;  %v5256_v49 = vld [vmem:[#allocation2 + $0x60] sm:$0x1] }
 0x45d   : > { %v6785_v50 = vrot.slane %v21403_v61, %v20336_v52  ;;  %v6381_v17 = vrot.slane %v6357_v56, 4  ;;  %v21415_v1 = vrot.slane %v21411_v43, %v20336_v52  ;;  %v5244_v8 = vld [vmem:[#allocation2 + $0x98] sm:$0xe0]  ;;  %v21417_v22 = vld [vmem:[#allocation12 + $0x40] ss:$8 sm:$0xf]  ;;  %v6663_v2 = vmul.f32 %v6633_v20, %v6583_v39  ;;  %9705 = vmatpush2.bf16.msra.mxu0 %v18387_v0 }
 0x45e   : > { %v7155_v5 = vpack.c.bf16 %v7143_v38, %v7131_v28  ;;  %v5311_v29 = vrot.slane %v21417_v22, %v20342_v30  ;;  %v6511_v55 = vmul.f32 %v20364_v48, %v6497_v62  ;;  %v5410_v44 = vld [vmem:[#allocation2 + $0x98] sm:$0xc0]  ;;  %v21422_v11 = vld [vmem:[#allocation12 + $0x41] ss:$8 sm:$0xf]  ;;  %9738 = vmatpush2.bf16.msra.mxu1 %v18366_v14  ;;  %9706 = vmatprep.subr.bf16.mxu0 %v18395_v15 }
 0x45f   : > { %v6815_v63 = vmul.f32 %v6785_v50, %v6735_v53  ;;  %v5478_v32 = vrot.slane %v21422_v11, %v20342_v30  ;;  %v6405_v35 = vadd.f32 %v6381_v17, %v6239_v10  ;;  %v6417_v33 = vadd.f32 %v6381_v17, %v6251_v58  ;;  %v18393_v6 = vld [vmem:[#allocation15 + $0x500] ss:$16 sps:$4 sm:$0xff]   ;;  %9739 = vmatprep.subr.bf16.mxu1 %v18374_v12  ;;  %v18380_v53 = vld [vmem:[#allocation15 + $0x764] ss:$16 sps:$4 sm:$0xff]  }
 0x460   : > { %v7623_v57 = vshrl.u32 %v7155_v5, 16  ;;  %v7626_v13 = vshll.u32 %v7155_v5, 16  ;;  %v6535_v45 = vrot.slane %v6511_v55, 4  ;;  %v6687_v60 = vrot.slane %v6663_v2, 5  ;;  %v5422_v28 = vld [vmem:[#allocation2 + $0x60] sm:$0x3] }
 0x461   : > { %v6829_v19 = vmul.f32 %v20372_v4, %v6815_v63  ;;  %v5335_v7 = vmul.f32 %v5311_v29, %v5244_v8  ;;  %v18372_v59 = vld [vmem:[#allocation15 + $0x780] ss:$16 sps:$4 sm:$0xff]   ;;  %v5347_v56 = vmul.f32 %v5311_v29, %v5256_v49  ;;  %v5502_v39 = vmul.f32 %v5478_v32, %v5410_v44  ;;  %v18401_v62 = vld [vmem:[#allocation15 + $0x8e4] ss:$16 sps:$4 sm:$0xff]   ;;  %v5635_v8 = vld [vmem:[#allocation2 + $0x98] sm:$0x80]  ;;  %9707 = vmatpush2.bf16.msra.mxu0 %v18393_v6 }
 0x462   : > { %v7625_v16 = vrot.slane %v7623_v57, 2  ;;  %v7628_v38 = vrot.slane %v7626_v13, 3  ;;  %v6559_v10 = vadd.f32 %v6535_v45, %v6405_v35  ;;  %v6571_v58 = vadd.f32 %v6535_v45, %v6417_v33  ;;  %v5647_v2 = vld [vmem:[#allocation2 + $0x60] sm:$0x7]  ;;  %9740 = vmatpush2.bf16.msra.mxu1 %v18372_v59  ;;  %v18386_v45 = vld [vmem:[#allocation15 + $0x744] ss:$16 sps:$4 sm:$0xff]   ;;  %9758 = vmatprep.subr.bf16.mxu0 %v18401_v62 }
 0x463   : > { %v6853_v0 = vrot.slane %v6829_v19, 6  ;;  %v5362_v20 = vmul.f32 %v20356_v40, %v5335_v7  ;;  %v5374_v5 = vmul.f32 %v20356_v40, %v5347_v56  ;;  %v5514_v17 = vmul.f32 %v5478_v32, %v5422_v28  ;;  %v21431_v12 = vld [vmem:[#allocation12 + $0x42] ss:$8 sm:$0xf]  ;;  %v18378_v32 = vld [vmem:[#allocation15 + $0x760] ss:$16 sps:$4 sm:$0xff]   ;;  %9741 = vmatprep.subr.bf16.mxu1 %v18380_v53 }
 0x464   : > { %v21428_v50 = vor.u32 %v7628_v38, %v7625_v16  ;;  %v5573_v14 = vrot.slane %v5502_v39, 1  ;;  %v6711_v55 = vadd.f32 %v6687_v60, %v6559_v10  ;;  %v6723_v29 = vadd.f32 %v6687_v60, %v6571_v58  ;;  %v21435_v49 = vld [vmem:[#allocation12 + $0x43] ss:$8 sm:$0xf]  ;;  %v6113_v62 = vld [vmem:[#allocation2 + $0x60] sm:$0xf] }
 0x465   : > { %v19268_v15 = vpop.eup %19267  ;;  %v5703_v63 = vrot.slane %v21431_v12, %v20342_v30  ;;  %v5931_v44 = vrot.slane %v21435_v49, %v20342_v30  ;;  %v5574_v35 = vrot.slane %v5514_v17, 1  ;;  %v6169_v33 = vrot.slane %v21379_v18, %v20342_v30 }
 0x466   : > { %v19270_v57 = vpop.eup %19269  ;;  %9749 = vmatprep.mubr.bf16.mxu1 %v21428_v50  ;;  %v7070_v13 = vadd.f32 1.0, %v19268_v15  ;;  %v6321_v6 = vrot.slane %v21389_v47, %v20342_v30  ;;  %v6877_v19 = vadd.f32 %v6853_v0, %v6711_v55  ;;  %v6889_v7 = vadd.f32 %v6853_v0, %v6723_v29  ;;  %9742 = vmatpush2.bf16.msra.mxu1 %v18378_v32  ;;  %v18384_v0 = vld [vmem:[#allocation15 + $0x740] ss:$16 sps:$4 sm:$0xff]  }
 0x467   : > { %v7058_v60 = vadd.f32 1.0, %v19270_v57  ;;  %v5727_v28 = vmul.f32 %v5703_v63, %v5635_v8  ;;  %v19272_v16 = vpop.eup %19271  ;;  %v5575_v59 = vsel %vm5539_vm2, %v5573_v14, %v5574_v35  ;;  %v5623_v38 = vadd.f32 %v5574_v35, %v5374_v5  ;;  %v6265_v55 = vld [vmem:[#allocation2 + $0x60] sm:$0x1e]  ;;  %9743 = vmatprep.subr.bf16.mxu1 %v18386_v45 }
 0x468   : > { %19275 = vrcp.f32 %v7070_v13  ;;  %v5739_v56 = vmul.f32 %v5703_v63, %v5647_v2  ;;  %v7128_v10 = vmul.f32 %v19272_v16, %v21337_v51  ;;  %v21447_v58 = vadd.f32 %v21415_v1, %v6877_v19  ;;  %v18392_v51 = vld [vmem:[#allocation15 + $0x724] ss:$16 sps:$4 sm:$0xff]  }
 0x469   : > { %v19274_v39 = vpop.eup %19273  ;;  %19277 = vrcp.f32 %v7058_v60  ;;  %v21450_v53 = vadd.f32 %v21415_v1, %v6889_v7  ;;  %v5611_v15 = vadd.f32 %v5575_v59, %v5362_v20  ;;  %v5754_v14 = vmul.f32 %v20358_v41, %v5727_v28  ;;  %v18390_v7 = vld [vmem:[#allocation15 + $0x720] ss:$16 sps:$4 sm:$0xff]  }
 0x46a   : > { %v7140_v17 = vmul.f32 %v19274_v39, %v21340_v54  ;;  %v5766_v5 = vmul.f32 %v20358_v41, %v5739_v56  ;;  %v16209_v29 = vmul.f32 -1.442695, %v21447_v58  ;;  %v5955_v57 = vmul.f32 %v5931_v44, %v5635_v8  ;;  %9744 = vmatpush2.bf16.msra.mxu1 %v18384_v0  ;;  %v18398_v8 = vld [vmem:[#allocation15 + $0x704] ss:$16 sps:$4 sm:$0xff]  }
 0x46b   : > { %v16221_v63 = vmul.f32 -1.442695, %v21450_v53  ;;  %v5967_v1 = vmul.f32 %v5931_v44, %v5647_v2  ;;  %v5825_v35 = vrot.slane %v5754_v14, 2  ;;  %v6193_v60 = vmul.f32 %v6169_v33, %v6113_v62  ;;  %9745 = vmatprep.subr.bf16.mxu1 %v18392_v51 }
 0x46c   : > { %v7152_v13 = vpack.c.bf16 %v7140_v17, %v7128_v10  ;;  %v5826_v32 = vrot.slane %v5766_v5, 2  ;;  %19279 = vpow2.f32 %v16209_v29  ;;  %v5981_v54 = vmul.f32 %v20360_v42, %v5955_v57  ;;  %v6585_v17 = vld [vmem:[#allocation2 + $0x60] sm:$0x3c] }
 0x46d   : > { %v5993_v20 = vmul.f32 %v20360_v42, %v5967_v1  ;;  %v6345_v19 = vmul.f32 %v6321_v6, %v6265_v55  ;;  %19281 = vpow2.f32 %v16221_v63  ;;  %v6217_v10 = vrot.slane %v6193_v60, 3  ;;  %v18399_v6 = vld [vmem:[#allocation15 + $0x8e0] ss:$16 sps:$4 sm:$0xff]   ;;  %v18407_v63 = vld [vmem:[#allocation15 + $0x8c4] ss:$16 sps:$4 sm:$0xff]  }
 0x46e   : > { %v7599_v45 = vshrl.u32 %v7152_v13, 16  ;;  %v7602_v28 = vshll.u32 %v7152_v13, 16  ;;  %v5827_v16 = vsel %vm5791_vm3, %v5825_v35, %v5826_v32  ;;  %v5875_v44 = vadd.f32 %v5826_v32, %v5623_v38  ;;  %9746 = vmatpush2.bf16.msra.mxu1 %v18390_v7  ;;  %v18396_v38 = vld [vmem:[#allocation15 + $0x700] ss:$16 sps:$4 sm:$0xff]   ;;  %v18404_v13 = vld [vmem:[#allocation15 + $0xae4] ss:$16 sps:$4 sm:$0xff]  }
 0x46f   : > { %v5863_v2 = vadd.f32 %v5827_v16, %v5611_v15  ;;  %v6051_v59 = vrot.slane %v5981_v54, 2  ;;  %v6052_v56 = vrot.slane %v5993_v20, 2  ;;  %v6359_v62 = vmul.f32 %v20362_v46, %v6345_v19  ;;  %v6737_v15 = vld [vmem:[#allocation2 + $0x60] sm:$0x78]  ;;  %9747 = vmatprep.subr.bf16.mxu1 %v18398_v8 }
 0x470   : > { %v7601_v33 = vrot.slane %v7599_v45, 2  ;;  %v7604_v39 = vrot.slane %v7602_v28, 3  ;;  %v6475_v5 = vrot.slane %v21396_v9, %v20342_v30  ;;  %v6641_v51 = vrot.slane %v21401_v34, %v20342_v30  ;;  %v18405_v20 = vld [vmem:[#allocation15 + $0x8c0] ss:$16 sps:$4 sm:$0xff]   ;;  %v5241_v7 = vld [vmem:[#allocation2 + $0x80] sm:$0xe0] }
 0x471   : > { %v6053_v0 = vsel %vm5791_vm3, %v6051_v59, %v6052_v56  ;;  %v6101_v14 = vadd.f32 %v6052_v56, %v5875_v44  ;;  %v6793_v1 = vrot.slane %v21403_v61, %v20342_v30  ;;  %v6383_v32 = vrot.slane %v6359_v62, 4  ;;  %v5253_v28 = vld [vmem:[#allocation2 + $0x70] sm:$0x1]  ;;  %v5407_v56 = vld [vmem:[#allocation2 + $0x80] sm:$0xc0] }
 0x472   : > { %v21466_v29 = vor.u32 %v7604_v39, %v7601_v33  ;;  %v6089_v57 = vadd.f32 %v6053_v0, %v5863_v2  ;;  %v6499_v60 = vmul.f32 %v6475_v5, %v6265_v55  ;;  %v6665_v54 = vmul.f32 %v6641_v51, %v6585_v17  ;;  %v5419_v33 = vld [vmem:[#allocation2 + $0x70] sm:$0x3]  ;;  %v21480_v39 = vld [vmem:[#allocation2 + $0x80] sm:$0x80]  ;;  %9748 = vmatpush2.bf16.msra.mxu1 %v18396_v38 }
 0x473   : > { %v6253_v35 = vadd.f32 %v6217_v10, %v6101_v14  ;;  %v6817_v45 = vmul.f32 %v6793_v1, %v6737_v15  ;;  %v5299_v16 = vrot.slane %v21417_v22, %v20333_v24  ;;  %v5466_v2 = vrot.slane %v21422_v11, %v20333_v24  ;;  %9799 = vmatprep.subr.bf16.mxu1 %v18404_v13  ;;  %v18419_v13 = vld [vmem:[#allocation15 + $0x884] ss:$16 sps:$4 sm:$0xff]  }
 0x474   : > { %9709 = vmatmul.mubr.bf16.vlgmr.msra.gmra.mxu0 %v21466_v29  ;;  %v6241_v19 = vadd.f32 %v6217_v10, %v6089_v57  ;;  %v6513_v59 = vmul.f32 %v20364_v48, %v6499_v60  ;;  %v21478_v55 = vrot.slane %v21411_v43, %v20342_v30  ;;  %v5691_v10 = vrot.slane %v21431_v12, %v20333_v24 }
 0x475   : > { %v19276_v44 = vpop.eup %19275  ;;  %9759 = vmatpush1.bf16.msra.mxu0 %v18399_v6  ;;  %v6419_v8 = vadd.f32 %v6383_v32, %v6253_v35  ;;  %v18413_v6 = vld [vmem:[#allocation15 + $0x8a4] ss:$16 sps:$4 sm:$0xff]   ;;  %v6689_v14 = vrot.slane %v6665_v54, 5  ;;  %v6831_v5 = vmul.f32 %v20372_v4, %v6817_v45  ;;  %v5332_v57 = vmul.f32 %v5299_v16, %v5241_v7  ;;  %v5644_v35 = vld [vmem:[#allocation2 + $0x70] sm:$0x7] }
 0x476   : > { %v19278_v62 = vpop.eup %19277  ;;  %v7142_v17 = vmul.f32 %v19276_v44, %v21374_v25  ;;  %9760 = vmatprep.subr.bf16.mxu0 %v18407_v63  ;;  %v6407_v0 = vadd.f32 %v6383_v32, %v6241_v19  ;;  %v6537_v15 = vrot.slane %v6513_v59, 4  ;;  %v5344_v1 = vmul.f32 %v5299_v16, %v5253_v28  ;;  %v18411_v25 = vld [vmem:[#allocation15 + $0x8a0] ss:$16 sps:$4 sm:$0xff]  }
 0x477   : > { %v7130_v51 = vmul.f32 %v19278_v62, %v21382_v27  ;;  %v6855_v60 = vrot.slane %v6831_v5, 6  ;;  %v5499_v3 = vmul.f32 %v5466_v2, %v5407_v56  ;;  %v5511_v36 = vmul.f32 %v5466_v2, %v5419_v33 }
 0x478   : > { %v5724_v38 = vmul.f32 %v5691_v10, %v21480_v39  ;;  %v6561_v63 = vadd.f32 %v6537_v15, %v6407_v0  ;;  %v6573_v32 = vadd.f32 %v6537_v15, %v6419_v8  ;;  %v5359_v54 = vmul.f32 %v20356_v40, %v5332_v57 }
 0x479   : > { %v7154_v31 = vpack.c.bf16 %v7142_v17, %v7130_v51  ;;  %9761 = vmatpush1.bf16.msra.mxu0 %v18405_v20  ;;  %v19280_v19 = vpop.eup %19279  ;;  %v5371_v27 = vmul.f32 %v20356_v40, %v5344_v1  ;;  %v5564_v45 = vrot.slane %v5499_v3, 1  ;;  %v5565_v7 = vrot.slane %v5511_v36, 1  ;;  %v18402_v51 = vld [vmem:[#allocation15 + $0xae0] ss:$16 sps:$4 sm:$0xff]   ;;  %v18425_v36 = vld [vmem:[#allocation15 + $0x864] ss:$16 sps:$4 sm:$0xff]  }
 0x47a   : > { %9762 = vmatprep.subr.bf16.mxu0 %v18413_v6  ;;  %v5736_v28 = vmul.f32 %v5691_v10, %v5644_v35  ;;  %v19282_v16 = vpop.eup %19281  ;;  %v7061_v59 = vadd.f32 1.0, %v19280_v19  ;;  %v6713_v56 = vadd.f32 %v6689_v14, %v6561_v63  ;;  %v6725_v20 = vadd.f32 %v6689_v14, %v6573_v32  ;;  %v18417_v6 = vld [vmem:[#allocation15 + $0x880] ss:$16 sps:$4 sm:$0xff]   ;;  %v18410_v14 = vld [vmem:[#allocation15 + $0xac4] ss:$16 sps:$4 sm:$0xff]  }
 0x47b   : > { %v7615_v44 = vshrl.u32 %v7154_v31, 16  ;;  %v7618_v2 = vshll.u32 %v7154_v31, 16  ;;  %v7073_v33 = vadd.f32 1.0, %v19282_v16  ;;  %v5566_v62 = vsel %vm5539_vm2, %v5564_v45, %v5565_v7  ;;  %v6110_v63 = vld [vmem:[#allocation2 + $0x70] sm:$0xf] }
 0x47c   : > { %v5620_v8 = vadd.f32 %v5565_v7, %v5371_v27  ;;  %19283 = vrcp.f32 %v7061_v59  ;;  %v6879_v5 = vadd.f32 %v6855_v60, %v6713_v56  ;;  %v6891_v3 = vadd.f32 %v6855_v60, %v6725_v20  ;;  %v6262_v32 = vld [vmem:[#allocation2 + $0x70] sm:$0x1e] }
 0x47d   : > { %v7617_v17 = vrot.slane %v7615_v44, 2  ;;  %v7620_v0 = vrot.slane %v7618_v2, 3  ;;  %9763 = vmatpush1.bf16.msra.mxu0 %v18411_v25  ;;  %19285 = vrcp.f32 %v7073_v33  ;;  %v5608_v10 = vadd.f32 %v5566_v62, %v5359_v54  ;;  %v18431_v16 = vld [vmem:[#allocation15 + $0x844] ss:$16 sps:$4 sm:$0xff]  }
 0x47e   : > { %9764 = vmatprep.subr.bf16.mxu0 %v18419_v13  ;;  %v5751_v31 = vmul.f32 %v20358_v41, %v5724_v38  ;;  %v21495_v57 = vadd.f32 %v21478_v55, %v6879_v5  ;;  %v5763_v1 = vmul.f32 %v20358_v41, %v5736_v28  ;;  %v5919_v25 = vrot.slane %v21435_v49, %v20333_v24  ;;  %v18423_v13 = vld [vmem:[#allocation15 + $0x860] ss:$16 sps:$4 sm:$0xff]   ;;  %v18416_v33 = vld [vmem:[#allocation15 + $0xaa4] ss:$16 sps:$4 sm:$0xff]  }
 0x47f   : > { %v21492_v15 = vor.u32 %v7620_v0, %v7617_v17  ;;  %v21501_v19 = vadd.f32 %v21478_v55, %v6891_v3  ;;  %v6157_v38 = vrot.slane %v21379_v18, %v20333_v24  ;;  %v6309_v54 = vrot.slane %v21389_v47, %v20333_v24  ;;  %v18408_v55 = vld [vmem:[#allocation15 + $0xac0] ss:$16 sps:$4 sm:$0xff]  }
 0x480   : > { %v5816_v60 = vrot.slane %v5751_v31, 2  ;;  %v16211_v27 = vmul.f32 -1.442695, %v21495_v57  ;;  %v5817_v45 = vrot.slane %v5763_v1, 2  ;;  %v5952_v7 = vmul.f32 %v5919_v25, %v21480_v39  ;;  %v18414_v39 = vld [vmem:[#allocation15 + $0xaa0] ss:$16 sps:$4 sm:$0xff]  }
 0x481   : > { %9750 = vmatmul.mubr.bf16.vlgmr.msra.gmra.mxu1 %v21492_v15  ;;  %9765 = vmatpush1.bf16.msra.mxu0 %v18417_v6  ;;  %v5964_v28 = vmul.f32 %v5919_v25, %v5644_v35  ;;  %v16223_v44 = vmul.f32 -1.442695, %v21501_v19  ;;  %v6190_v2 = vmul.f32 %v6157_v38, %v6110_v63  ;;  %v6342_v59 = vmul.f32 %v6309_v54, %v6262_v32  ;;  %v18429_v35 = vld [vmem:[#allocation15 + $0x840] ss:$16 sps:$4 sm:$0xff]   ;;  %v5243_v1 = vld [vmem:[#allocation2 + $0x118] sm:$0xe0] }
 0x482   : > { %9800 = vmatpush1.bf16.msra.mxu1 %v18402_v51  ;;  %9766 = vmatprep.subr.bf16.mxu0 %v18425_v36  ;;  %v6463_v56 = vrot.slane %v21396_v9, %v20333_v24  ;;  %19287 = vpow2.f32 %v16211_v27  ;;  %v5818_v20 = vsel %vm5791_vm3, %v5816_v60, %v5817_v45  ;;  %v5978_v62 = vmul.f32 %v20360_v42, %v5952_v7  ;;  %v6582_v5 = vld [vmem:[#allocation2 + $0x70] sm:$0x3c] }
 0x483   : > { %9801 = vmatprep.subr.bf16.mxu1 %v18410_v14  ;;  %19289 = vpow2.f32 %v16223_v44  ;;  %v5860_v17 = vadd.f32 %v5818_v20, %v5608_v10  ;;  %v5872_v0 = vadd.f32 %v5817_v45, %v5620_v8  ;;  %v5990_v6 = vmul.f32 %v20360_v42, %v5964_v28  ;;  %v6734_v14 = vld [vmem:[#allocation2 + $0x70] sm:$0x78]  ;;  %v5255_v10 = vld [vmem:[#allocation2 + $0xe0] sm:$0x1]  ;;  %v5409_v44 = vld [vmem:[#allocation2 + $0x118] sm:$0xc0] }
 0x484   : > { %v6042_v51 = vrot.slane %v5978_v62, 2  ;;  %v6356_v36 = vmul.f32 %v20362_v46, %v6342_v59  ;;  %v6496_v3 = vmul.f32 %v6463_v56, %v6262_v32  ;;  %v6629_v31 = vrot.slane %v21401_v34, %v20333_v24  ;;  %v18437_v25 = vld [vmem:[#allocation15 + $0x824] ss:$16 sps:$4 sm:$0xff]   ;;  %v5421_v20 = vld [vmem:[#allocation2 + $0xe0] sm:$0x3] }
 0x485   : > { %9767 = vmatpush1.bf16.msra.mxu0 %v18423_v13  ;;  %v6043_v63 = vrot.slane %v5990_v6, 2  ;;  %v6214_v60 = vrot.slane %v6190_v2, 3  ;;  %v6781_v8 = vrot.slane %v21403_v61, %v20333_v24  ;;  %v5307_v38 = vrot.slane %v21417_v22, %v20339_v26  ;;  %v18422_v54 = vld [vmem:[#allocation15 + $0xa84] ss:$16 sps:$4 sm:$0xff]   ;;  %v18435_v22 = vld [vmem:[#allocation15 + $0x820] ss:$16 sps:$4 sm:$0xff]  }
 0x486   : > { %9802 = vmatpush1.bf16.msra.mxu1 %v18408_v55  ;;  %9768 = vmatprep.subr.bf16.mxu0 %v18431_v16  ;;  %v6510_v32 = vmul.f32 %v20364_v48, %v6496_v3  ;;  %v21524_v13 = vmul.f32 %v6629_v31, %v6582_v5  ;;  %v21528_v27 = vrot.slane %v21411_v43, %v20333_v24  ;;  %v6380_v59 = vrot.slane %v6356_v36, 4  ;;  %v18420_v6 = vld [vmem:[#allocation15 + $0xa80] ss:$16 sps:$4 sm:$0xff]   ;;  %v18443_v5 = vld [vmem:[#allocation15 + $0x804] ss:$16 sps:$4 sm:$0xff]  }
 0x487   : > { %9803 = vmatprep.subr.bf16.mxu1 %v18416_v33  ;;  %v5474_v45 = vrot.slane %v21422_v11, %v20339_v26  ;;  %v6044_v7 = vsel %vm5791_vm3, %v6042_v51, %v6043_v63  ;;  %v6098_v28 = vadd.f32 %v6043_v63, %v5872_v0  ;;  %v6814_v55 = vmul.f32 %v6781_v8, %v6734_v14 }
 0x488   : > { %v5334_v16 = vmul.f32 %v5307_v38, %v5243_v1  ;;  %v6086_v2 = vadd.f32 %v6044_v7, %v5860_v17  ;;  %v6534_v56 = vrot.slane %v6510_v32, 4  ;;  %v5346_v33 = vmul.f32 %v5307_v38, %v5255_v10  ;;  %v5634_v10 = vld [vmem:[#allocation2 + $0x118] sm:$0x80]  ;;  %v5646_v38 = vld [vmem:[#allocation2 + $0xe0] sm:$0x7] }
 0x489   : > { %9769 = vmatpush1.bf16.msra.mxu0 %v18429_v35  ;;  %v19284_v62 = vpop.eup %19283  ;;  %v6250_v3 = vadd.f32 %v6214_v60, %v6098_v28  ;;  %v6686_v11 = vrot.slane %v21524_v13, 5  ;;  %v6828_v0 = vmul.f32 %v20372_v4, %v6814_v55  ;;  %v18428_v35 = vld [vmem:[#allocation15 + $0xa64] ss:$16 sps:$4 sm:$0xff]   ;;  %v5501_v1 = vmul.f32 %v5474_v45, %v5409_v44  ;;  %v18441_v32 = vld [vmem:[#allocation15 + $0x800] ss:$16 sps:$4 sm:$0xff]  }
 0x48a   : > { %9804 = vmatpush1.bf16.msra.mxu1 %v18414_v39  ;;  %9770 = vmatprep.subr.bf16.mxu0 %v18437_v25  ;;  %v5361_v51 = vmul.f32 %v20356_v40, %v5334_v16  ;;  %v19286_v31 = vpop.eup %19285  ;;  %v7133_v17 = vmul.f32 %v19284_v62, %v21447_v58  ;;  %v6238_v36 = vadd.f32 %v6214_v60, %v6086_v2  ;;  %v18426_v60 = vld [vmem:[#allocation15 + $0xa60] ss:$16 sps:$4 sm:$0xff]   ;;  %v18449_v28 = vld [vmem:[#allocation15 + $0x9e4] ss:$16 sps:$4 sm:$0xff]  }
 0x48b   : > { %9805 = vmatprep.subr.bf16.mxu1 %v18422_v54  ;;  %v5373_v14 = vmul.f32 %v20356_v40, %v5346_v33  ;;  %v7145_v39 = vmul.f32 %v19286_v31, %v21450_v53  ;;  %v6416_v25 = vadd.f32 %v6380_v59, %v6250_v3  ;;  %v6852_v63 = vrot.slane %v6828_v0, 6  ;;  %v18434_v44 = vld [vmem:[#allocation15 + $0xa44] ss:$16 sps:$4 sm:$0xff]   ;;  %v18432_v3 = vld [vmem:[#allocation15 + $0xa40] ss:$16 sps:$4 sm:$0xff]  }
 0x48c   : > { %v5513_v8 = vmul.f32 %v5474_v45, %v5421_v20  ;;  %v6404_v13 = vadd.f32 %v6380_v59, %v6238_v36  ;;  %v5570_v7 = vrot.slane %v5501_v1, 1  ;;  %v5699_v54 = vrot.slane %v21431_v12, %v20339_v26  ;;  %v18447_v0 = vld [vmem:[#allocation15 + $0x9e0] ss:$16 sps:$4 sm:$0xff]  }
 0x48d   : > { %9771 = vmatpush1.bf16.msra.mxu0 %v18435_v22  ;;  %v5927_v58 = vrot.slane %v21435_v49, %v20339_v26  ;;  %v7157_v53 = vpack.c.bf16 %v7145_v39, %v7133_v17  ;;  %v6570_v55 = vadd.f32 %v6534_v56, %v6416_v25  ;;  %v6165_v45 = vrot.slane %v21379_v18, %v20339_v26 }
 0x48e   : > { %9806 = vmatpush1.bf16.msra.mxu1 %v18420_v6  ;;  %9772 = vmatprep.subr.bf16.mxu0 %v18443_v5  ;;  %v5571_v16 = vrot.slane %v5513_v8, 1  ;;  %v6558_v22 = vadd.f32 %v6534_v56, %v6404_v13  ;;  %v5726_v2 = vmul.f32 %v5699_v54, %v5634_v10  ;;  %v5738_v59 = vmul.f32 %v5699_v54, %v5646_v38  ;;  %v18455_v56 = vld [vmem:[#allocation15 + $0x9c4] ss:$16 sps:$4 sm:$0xff]  }
 0x48f   : > { %9807 = vmatprep.subr.bf16.mxu1 %v18428_v35  ;;  %v5954_v33 = vmul.f32 %v5927_v58, %v5634_v10  ;;  %v19288_v12 = vpop.eup %19287  ;;  %v7639_v20 = vshrl.u32 %v7157_v53, 16  ;;  %v7642_v62 = vshll.u32 %v7157_v53, 16  ;;  %v6722_v49 = vadd.f32 %v6686_v11, %v6570_v55  ;;  %v18440_v8 = vld [vmem:[#allocation15 + $0xa24] ss:$16 sps:$4 sm:$0xff]  }
 0x490   : > { %v5572_v6 = vsel %vm5539_vm2, %v5570_v7, %v5571_v16  ;;  %v19290_v5 = vpop.eup %19289  ;;  %v7063_v31 = vadd.f32 1.0, %v19288_v12  ;;  %v6710_v17 = vadd.f32 %v6686_v11, %v6558_v22  ;;  %v5622_v18 = vadd.f32 %v5571_v16, %v5373_v14  ;;  %v6112_v7 = vld [vmem:[#allocation2 + $0xe0] sm:$0xf]  ;;  %v18461_v16 = vld [vmem:[#allocation15 + $0x9a4] ss:$16 sps:$4 sm:$0xff]  }
 0x491   : > { %9773 = vmatpush1.bf16.msra.mxu0 %v18441_v32  ;;  %v5610_v36 = vadd.f32 %v5572_v6, %v5361_v51  ;;  %v7641_v35 = vrot.slane %v7639_v20, 2  ;;  %v7644_v1 = vrot.slane %v7642_v62, 3  ;;  %v7075_v39 = vadd.f32 1.0, %v19290_v5  ;;  %v18438_v14 = vld [vmem:[#allocation15 + $0xa20] ss:$16 sps:$4 sm:$0xff]  }
 0x492   : > { %9808 = vmatpush1.bf16.msra.mxu1 %v18426_v60  ;;  %9774 = vmatprep.subr.bf16.mxu0 %v18449_v28  ;;  %v6888_v25 = vadd.f32 %v6852_v63, %v6722_v49  ;;  %19291 = vrcp.f32 %v7063_v31  ;;  %v6876_v10 = vadd.f32 %v6852_v63, %v6710_v17  ;;  %v5753_v13 = vmul.f32 %v20358_v41, %v5726_v2  ;;  %v18453_v60 = vld [vmem:[#allocation15 + $0x9c0] ss:$16 sps:$4 sm:$0xff]   ;;  %v18467_v31 = vld [vmem:[#allocation15 + $0x984] ss:$16 sps:$4 sm:$0xff]  }
 0x493   : > { %9809 = vmatprep.subr.bf16.mxu1 %v18434_v44  ;;  %v5765_v32 = vmul.f32 %v20358_v41, %v5738_v59  ;;  %v21548_v54 = vor.u32 %v7644_v1, %v7641_v35  ;;  %19293 = vrcp.f32 %v7075_v39  ;;  %v5966_v51 = vmul.f32 %v5927_v58, %v5646_v38  ;;  %v6264_v59 = vld [vmem:[#allocation2 + $0xe0] sm:$0x1e] }
 0x494   : > { %v21551_v11 = vadd.f32 %v21528_v27, %v6888_v25  ;;  %v21554_v28 = vadd.f32 %v21528_v27, %v6876_v10  ;;  %v5822_v53 = vrot.slane %v5753_v13, 2  ;;  %v5980_v55 = vmul.f32 %v20360_v42, %v5954_v33  ;;  %v18446_v58 = vld [vmem:[#allocation15 + $0xa04] ss:$16 sps:$4 sm:$0xff]   ;;  %v18444_v6 = vld [vmem:[#allocation15 + $0xa00] ss:$16 sps:$4 sm:$0xff]  }
 0x495   : > { %9775 = vmatpush2.bf16.msra.mxu0 %v18447_v0  ;;  %v5823_v63 = vrot.slane %v5765_v32, 2  ;;  %v5992_v22 = vmul.f32 %v20360_v42, %v5966_v51  ;;  %v6192_v2 = vmul.f32 %v6165_v45, %v6112_v7  ;;  %v6317_v38 = vrot.slane %v21389_v47, %v20339_v26  ;;  %9790 = vmatprep.mubr.bf16.mxu0 %v21548_v54  ;;  %v18459_v45 = vld [vmem:[#allocation15 + $0x9a0] ss:$16 sps:$4 sm:$0xff]   ;;  %v18452_v1 = vld [vmem:[#allocation15 + $0xbe4] ss:$16 sps:$4 sm:$0xff]  }
 0x496   : > { %9810 = vmatpush1.bf16.msra.mxu1 %v18432_v3  ;;  %9776 = vmatprep.subr.bf16.mxu0 %v18455_v56  ;;  %v16220_v44 = vmul.f32 -1.442695, %v21551_v11  ;;  %v16208_v27 = vmul.f32 -1.442695, %v21554_v28  ;;  %v6048_v20 = vrot.slane %v5980_v55, 2  ;;  %v6471_v47 = vrot.slane %v21396_v9, %v20339_v26 }
 0x497   : > { %9811 = vmatprep.subr.bf16.mxu1 %v18440_v8  ;;  %v5824_v33 = vsel %vm5791_vm3, %v5822_v53, %v5823_v63  ;;  %v5874_v12 = vadd.f32 %v5823_v63, %v5622_v18  ;;  %v6049_v49 = vrot.slane %v5992_v22, 2  ;;  %v6344_v5 = vmul.f32 %v6317_v38, %v6264_v59  ;;  %v6736_v0 = vld [vmem:[#allocation2 + $0xe0] sm:$0x78] }
 0x498   : > { %19295 = vpow2.f32 %v16220_v44  ;;  %v5862_v62 = vadd.f32 %v5824_v33, %v5610_v36  ;;  %v6637_v3 = vrot.slane %v21401_v34, %v20339_v26  ;;  %v6216_v36 = vrot.slane %v6192_v2, 3  ;;  %v6584_v56 = vld [vmem:[#allocation2 + $0xe0] sm:$0x3c] }
 0x499   : > { %9777 = vmatpush2.bf16.msra.mxu0 %v18453_v60  ;;  %19297 = vpow2.f32 %v16208_v27  ;;  %v6050_v17 = vsel %vm5791_vm3, %v6048_v20, %v6049_v49  ;;  %v6100_v18 = vadd.f32 %v6049_v49, %v5874_v12  ;;  %v6789_v35 = vrot.slane %v21403_v61, %v20339_v26  ;;  %v18465_v10 = vld [vmem:[#allocation15 + $0x980] ss:$16 sps:$4 sm:$0xff]   ;;  %v18473_v60 = vld [vmem:[#allocation15 + $0x964] ss:$16 sps:$4 sm:$0xff]  }
 0x49a   : > { %9812 = vmatpush1.bf16.msra.mxu1 %v18438_v14  ;;  %9778 = vmatprep.subr.bf16.mxu0 %v18461_v16  ;;  %v6088_v39 = vadd.f32 %v6050_v17, %v5862_v62  ;;  %v6358_v9 = vmul.f32 %v20362_v46, %v6344_v5  ;;  %v6498_v25 = vmul.f32 %v6471_v47, %v6264_v59  ;;  %v18450_v14 = vld [vmem:[#allocation15 + $0xbe0] ss:$16 sps:$4 sm:$0xff]   ;;  %v18458_v61 = vld [vmem:[#allocation15 + $0xbc4] ss:$16 sps:$4 sm:$0xff]  }
 0x49b   : > { %9813 = vmatprep.subr.bf16.mxu1 %v18446_v58  ;;  %v6252_v8 = vadd.f32 %v6216_v36, %v6100_v18  ;;  %v6816_v34 = vmul.f32 %v6789_v35, %v6736_v0  ;;  %v6664_v51 = vmul.f32 %v6637_v3, %v6584_v56  ;;  %v18471_v2 = vld [vmem:[#allocation15 + $0x960] ss:$16 sps:$4 sm:$0xff]   ;;  %v18479_v12 = vld [vmem:[#allocation15 + $0x944] ss:$16 sps:$4 sm:$0xff]   ;;  %v6939_v5 = vrot.slane %v21411_v43, %v20339_v26 }
 0x49c   : > { %v6240_v13 = vadd.f32 %v6216_v36, %v6088_v39  ;;  %v6382_v32 = vrot.slane %v6358_v9, 4  ;;  %v6512_v7 = vmul.f32 %v20364_v48, %v6498_v25  ;;  %v18456_v33 = vld [vmem:[#allocation15 + $0xbc0] ss:$16 sps:$4 sm:$0xff]   ;;  %v18464_v62 = vld [vmem:[#allocation15 + $0xba4] ss:$16 sps:$4 sm:$0xff]  }
 0x49d   : > { %9779 = vmatpush2.bf16.msra.mxu0 %v18459_v45  ;;  %v6830_v16 = vmul.f32 %v20372_v4, %v6816_v34  ;;  %v6688_v27 = vrot.slane %v6664_v51, 5  ;;  %v18477_v0 = vld [vmem:[#allocation15 + $0x940] ss:$16 sps:$4 sm:$0xff]   ;;  %v18485_v36 = vld [vmem:[#allocation15 + $0x924] ss:$16 sps:$4 sm:$0xff]  }
 0x49e   : > { %9814 = vmatpush1.bf16.msra.mxu1 %v18444_v6  ;;  %9780 = vmatprep.subr.bf16.mxu0 %v18467_v31  ;;  %v6406_v53 = vadd.f32 %v6382_v32, %v6240_v13  ;;  %v6418_v63 = vadd.f32 %v6382_v32, %v6252_v8  ;;  %v6536_v55 = vrot.slane %v6512_v7, 4  ;;  %v18483_v34 = vld [vmem:[#allocation15 + $0x920] ss:$16 sps:$4 sm:$0xff]   ;;  %v18491_v7 = vld [vmem:[#allocation15 + $0x904] ss:$16 sps:$4 sm:$0xff]  }
 0x49f   : > { %9815 = vmatprep.subr.bf16.mxu1 %v18452_v1  ;;  %v19292_v44 = vpop.eup %19291  ;;  %v6854_v45 = vrot.slane %v6830_v16, 6  ;;  %v18470_v1 = vld [vmem:[#allocation15 + $0xb84] ss:$16 sps:$4 sm:$0xff]   ;;  %v18468_v32 = vld [vmem:[#allocation15 + $0xb80] ss:$16 sps:$4 sm:$0xff]  }
 0x4a0   : > { %v19294_v22 = vpop.eup %19293  ;;  %v7135_v59 = vmul.f32 %v19292_v44, %v21495_v57  ;;  %v6560_v38 = vadd.f32 %v6536_v55, %v6406_v53  ;;  %v6572_v58 = vadd.f32 %v6536_v55, %v6418_v63  ;;  %v18462_v57 = vld [vmem:[#allocation15 + $0xba0] ss:$16 sps:$4 sm:$0xff]   ;;  %v18497_v53 = vld [vmem:[#allocation15 + $0xec] ss:$16 sps:$4 sm:$0xff]   ;;  %v18482_v63 = vld [vmem:[#allocation15 + $0xb44] ss:$16 sps:$4 sm:$0xff]  }
 0x4a1   : > { %9781 = vmatpush2.bf16.msra.mxu0 %v18465_v10  ;;  %v7147_v20 = vmul.f32 %v19294_v22, %v21501_v19  ;;  %v18480_v55 = vld [vmem:[#allocation15 + $0xb40] ss:$16 sps:$4 sm:$0xff]   ;;  %v18488_v16 = vld [vmem:[#allocation15 + $0xb24] ss:$16 sps:$4 sm:$0xff]  }
 0x4a2   : > { %9816 = vmatpush2.bf16.msra.mxu1 %v18450_v14  ;;  %9782 = vmatprep.subr.bf16.mxu0 %v18473_v60  ;;  %v6712_v49 = vadd.f32 %v6688_v27, %v6560_v38  ;;  %v6724_v6 = vadd.f32 %v6688_v27, %v6572_v58  ;;  %v18476_v14 = vld [vmem:[#allocation15 + $0xb64] ss:$16 sps:$4 sm:$0xff]   ;;  %v18489_v60 = vld [vmem:[#allocation15 + $0x900] ss:$16 sps:$4 sm:$0xff]  }
 0x4a3   : > { %9817 = vmatprep.subr.bf16.mxu1 %v18458_v61  ;;  %v7159_v47 = vpack.c.bf16 %v7147_v20, %v7135_v59  ;;  %v18474_v61 = vld [vmem:[#allocation15 + $0xb60] ss:$16 sps:$4 sm:$0xff]   ;;  %v18494_v38 = vld [vmem:[#allocation15 + $0xb04] ss:$16 sps:$4 sm:$0xff]  }
 0x4a4   : > { %v6878_v31 = vadd.f32 %v6854_v45, %v6712_v49  ;;  %v6890_v17 = vadd.f32 %v6854_v45, %v6724_v6  ;;  %v18500_v6 = vld [vmem:[#allocation15 + $0x2ec] ss:$16 sps:$4 sm:$0xff]  }
 0x4a5   : > { %v19296_v3 = vpop.eup %19295  ;;  %9783 = vmatpush2.bf16.msra.mxu0 %v18471_v2  ;;  %v7655_v19 = vshrl.u32 %v7159_v47, 16  ;;  %v7658_v56 = vshll.u32 %v7159_v47, 16  ;;  %v18486_v2 = vld [vmem:[#allocation15 + $0xb20] ss:$16 sps:$4 sm:$0xff]  }
 0x4a6   : > { %v19298_v18 = vpop.eup %19297  ;;  %9818 = vmatpush2.bf16.msra.mxu1 %v18456_v33  ;;  %9784 = vmatprep.subr.bf16.mxu0 %v18479_v12  ;;  %v7072_v35 = vadd.f32 1.0, %v19296_v3  ;;  %v21578_v9 = vadd.f32 %v6939_v5, %v6878_v31  ;;  %v21580_v43 = vadd.f32 %v6939_v5, %v6890_v17  ;;  %v18501_v31 = vld [vmem:[#allocation15 + $0xc8] ss:$16 sps:$4 sm:$0xff]   ;;  %v18509_v17 = vld [vmem:[#allocation15 + $0xac] ss:$16 sps:$4 sm:$0xff]  }
 0x4a7   : > { %9819 = vmatprep.subr.bf16.mxu1 %v18464_v62  ;;  %v7060_v39 = vadd.f32 1.0, %v19298_v18  ;;  %v7657_v25 = vrot.slane %v7655_v19, 2  ;;  %v7660_v8 = vrot.slane %v7658_v56, 3  ;;  %v18492_v62 = vld [vmem:[#allocation15 + $0xb00] ss:$16 sps:$4 sm:$0xff]  }
 0x4a8   : > { %19299 = vrcp.f32 %v7072_v35  ;;  %v16210_v10 = vmul.f32 -1.442695, %v21578_v9  ;;  %v16222_v13 = vmul.f32 -1.442695, %v21580_v43  ;;  %v18507_v18 = vld [vmem:[#allocation15 + $0xa8] ss:$16 sps:$4 sm:$0xff]  }
 0x4a9   : > { %9785 = vmatpush2.bf16.msra.mxu0 %v18477_v0  ;;  %19301 = vrcp.f32 %v7060_v39  ;;  %v21584_v51 = vor.u32 %v7660_v8, %v7657_v25  ;;  %v22985_v0 = vld [vmem:[#allocation40_spill] sm:$0xff]  ;;  %v18513_v39 = vld [vmem:[#allocation15 + $0x88] ss:$16 sps:$4 sm:$0xff]   ;;  %v18521_v25 = vld [vmem:[#allocation15 + $0x6c] ss:$16 sps:$4 sm:$0xff]  }
 0x4aa   : > { %9820 = vmatpush2.bf16.msra.mxu1 %v18462_v57  ;;  %9786 = vmatprep.subr.bf16.mxu0 %v18485_v36  ;;  %19303 = vpow2.f32 %v16210_v10  ;;  %v18515_v36 = vld [vmem:[#allocation15 + $0x8c] ss:$16 sps:$4 sm:$0xff]  }
 0x4ab   : > { %9821 = vmatprep.subr.bf16.mxu1 %v18470_v1  ;;  %9831 = vmatprep.mubr.bf16.mxu1 %v21584_v51  ;;  %19305 = vpow2.f32 %v16222_v13  ;;  %v18519_v13 = vld [vmem:[#allocation15 + $0x68] ss:$16 sps:$4 sm:$0xff]  }
 0x4ad   : > { %9787 = vmatpush2.bf16.msra.mxu0 %v18483_v34 }
 0x4ae   : > { %9822 = vmatpush2.bf16.msra.mxu1 %v18468_v32  ;;  %9788 = vmatprep.subr.bf16.mxu0 %v18491_v7  ;;  %v18527_v32 = vld [vmem:[#allocation15 + $0x4c] ss:$16 sps:$4 sm:$0xff]  }
 0x4af   : > { %9823 = vmatprep.subr.bf16.mxu1 %v18476_v14 }
 0x4b1   : > { %9789 = vmatpush2.bf16.msra.mxu0 %v18489_v60  ;;  %v18498_v60 = vld [vmem:[#allocation15 + $0x2e8] ss:$16 sps:$4 sm:$0xff]  }
 0x4b2   : > { %9824 = vmatpush2.bf16.msra.mxu1 %v18474_v61  ;;  %9840 = vmatprep.subr.bf16.mxu0 %v18497_v53  ;;  %v18506_v53 = vld [vmem:[#allocation15 + $0x2cc] ss:$16 sps:$4 sm:$0xff]  }
 0x4b3   : > { %9825 = vmatprep.subr.bf16.mxu1 %v18482_v63  ;;  %v22986_v63 = vld [vmem:[#allocation54_spill] sm:$0xff] }
 0x4b5   : > { %v19300_v44 = vpop.eup %19299 }
 0x4b6   : > { %v19302_v22 = vpop.eup %19301  ;;  %9826 = vmatpush2.bf16.msra.mxu1 %v18480_v55  ;;  %v7144_v59 = vmul.f32 %v19300_v44, %v21551_v11  ;;  %v18495_v11 = vld [vmem:[#allocation15 + $0xe8] ss:$16 sps:$4 sm:$0xff]  }
 0x4b7   : > { %9827 = vmatprep.subr.bf16.mxu1 %v18488_v16  ;;  %v7132_v58 = vmul.f32 %v19302_v22, %v21554_v28  ;;  %v19304_v27 = vpop.eup %19303  ;;  %v18503_v28 = vld [vmem:[#allocation15 + $0xcc] ss:$16 sps:$4 sm:$0xff]   ;;  %v18504_v55 = vld [vmem:[#allocation15 + $0x2c8] ss:$16 sps:$4 sm:$0xff]  }
 0x4b8   : > { %v19306_v33 = vpop.eup %19305  ;;  %v7062_v20 = vadd.f32 1.0, %v19304_v27  ;;  %v18512_v16 = vld [vmem:[#allocation15 + $0x2ac] ss:$16 sps:$4 sm:$0xff]   ;;  %v18531_v44 = vld [vmem:[#allocation15 + $0x28] ss:$16 sps:$4 sm:$0xff]  }
 0x4b9   : > { %v7156_v12 = vpack.c.bf16 %v7144_v59, %v7132_v58  ;;  %v7074_v49 = vadd.f32 1.0, %v19306_v33  ;;  %v18539_v22 = vld [vmem:[#allocation15 + $0xc] ss:$16 sps:$4 sm:$0xff]   ;;  %v18516_v27 = vld [vmem:[#allocation15 + $0x288] ss:$16 sps:$4 sm:$0xff]  }
 0x4ba   : > { %9828 = vmatpush2.bf16.msra.mxu1 %v18486_v2  ;;  %19307 = vrcp.f32 %v7062_v20  ;;  %v18510_v2 = vld [vmem:[#allocation15 + $0x2a8] ss:$16 sps:$4 sm:$0xff]   ;;  %v18518_v59 = vld [vmem:[#allocation15 + $0x28c] ss:$16 sps:$4 sm:$0xff]  }
 0x4bb   : > { %9829 = vmatprep.subr.bf16.mxu1 %v18494_v38  ;;  %v7631_v45 = vshrl.u32 %v7156_v12, 16  ;;  %v7634_v5 = vshll.u32 %v7156_v12, 16  ;;  %19309 = vrcp.f32 %v7074_v49  ;;  %v18537_v38 = vld [vmem:[#allocation15 + $0x8] ss:$16 sps:$4 sm:$0xff]   ;;  %v18545_v58 = vld [vmem:[#allocation15 + $0x1ec] ss:$16 sps:$4 sm:$0xff]  }
 0x4bc   : > { %v18524_v33 = vld [vmem:[#allocation15 + $0x26c] ss:$16 sps:$4 sm:$0xff]   ;;  %v18543_v12 = vld [vmem:[#allocation15 + $0x1e8] ss:$16 sps:$4 sm:$0xff]  }
 0x4bd   : > { %v7633_v47 = vrot.slane %v7631_v45, 2  ;;  %v7636_v3 = vrot.slane %v7634_v5, 3  ;;  %v18551_v20 = vld [vmem:[#allocation15 + $0x1cc] ss:$16 sps:$4 sm:$0xff]   ;;  %v18528_v5 = vld [vmem:[#allocation15 + $0x248] ss:$16 sps:$4 sm:$0xff]  }
 0x4be   : > { %9830 = vmatpush2.bf16.msra.mxu1 %v18492_v62  ;;  %v18522_v62 = vld [vmem:[#allocation15 + $0x268] ss:$16 sps:$4 sm:$0xff]   ;;  %v18530_v49 = vld [vmem:[#allocation15 + $0x24c] ss:$16 sps:$4 sm:$0xff]  }
 0x4bf   : > { %9881 = vmatprep.subr.bf16.mxu1 %v18500_v6  ;;  %v21589_v57 = vor.u32 %v7636_v3, %v7633_v47  ;;  %v18549_v6 = vld [vmem:[#allocation15 + $0x1c8] ss:$16 sps:$4 sm:$0xff]   ;;  %v18557_v45 = vld [vmem:[#allocation15 + $0x1ac] ss:$16 sps:$4 sm:$0xff]  }
 0x4c0   : > { %v18536_v47 = vld [vmem:[#allocation15 + $0x22c] ss:$16 sps:$4 sm:$0xff]   ;;  %v18555_v3 = vld [vmem:[#allocation15 + $0x1a8] ss:$16 sps:$4 sm:$0xff]  }
 0x4c1   : > { %9791 = vmatmul.mubr.bf16.vlgmr.msra.gmra.mxu0 %v21589_v57 }
 0x4c2   : > { %9841 = vmatpush1.bf16.msra.mxu0 %v18495_v11  ;;  %9872 = vmatprep.mubr.bf16.mxu0 %v22985_v0  ;;  %v18563_v11 = vld [vmem:[#allocation15 + $0x18c] ss:$16 sps:$4 sm:$0xff]   ;;  %v18534_v0 = vld [vmem:[#allocation15 + $0x228] ss:$16 sps:$4 sm:$0xff]  }
 0x4c3   : > { %9842 = vmatprep.subr.bf16.mxu0 %v18503_v28 }
 0x4c6   : > { %9843 = vmatpush1.bf16.msra.mxu0 %v18501_v31  ;;  %v18542_v31 = vld [vmem:[#allocation15 + $0x20c] ss:$16 sps:$4 sm:$0xff]  }
 0x4c7   : > { %9844 = vmatprep.subr.bf16.mxu0 %v18509_v17  ;;  %v19308_v19 = vpop.eup %19307  ;;  %v18561_v17 = vld [vmem:[#allocation15 + $0x188] ss:$16 sps:$4 sm:$0xff]  }
 0x4c8   : > { %v19310_v56 = vpop.eup %19309  ;;  %v7134_v35 = vmul.f32 %v19308_v19, %v21578_v9  ;;  %v18525_v9 = vld [vmem:[#allocation15 + $0x48] ss:$16 sps:$4 sm:$0xff]  }
 0x4c9   : > { %v7146_v1 = vmul.f32 %v19310_v56, %v21580_v43  ;;  %v18533_v43 = vld [vmem:[#allocation15 + $0x2c] ss:$16 sps:$4 sm:$0xff]   ;;  %v18540_v56 = vld [vmem:[#allocation15 + $0x208] ss:$16 sps:$4 sm:$0xff]  }
 0x4ca   : > { %9845 = vmatpush1.bf16.msra.mxu0 %v18507_v18 }
 0x4cb   : > { %9846 = vmatprep.subr.bf16.mxu0 %v18515_v36  ;;  %v7158_v8 = vpack.c.bf16 %v7146_v1, %v7134_v35  ;;  %v18569_v36 = vld [vmem:[#allocation15 + $0x16c] ss:$16 sps:$4 sm:$0xff]   ;;  %v18567_v1 = vld [vmem:[#allocation15 + $0x168] ss:$16 sps:$4 sm:$0xff]  }
 0x4cc   : > { %v18548_v35 = vld [vmem:[#allocation15 + $0x3ec] ss:$16 sps:$4 sm:$0xff]  }
 0x4cd   : > { %v7647_v34 = vshrl.u32 %v7158_v8, 16  ;;  %v7650_v10 = vshll.u32 %v7158_v8, 16  ;;  %v7544_v8 = vld [vmem:[#allocation16] sm:$0xf] }
 0x4ce   : > { %9847 = vmatpush1.bf16.msra.mxu0 %v18513_v39 }
 0x4cf   : > { %9848 = vmatprep.subr.bf16.mxu0 %v18521_v25  ;;  %v7649_v7 = vrot.slane %v7647_v34, 2  ;;  %v7652_v14 = vrot.slane %v7650_v10, 3  ;;  %v18575_v25 = vld [vmem:[#allocation15 + $0x14c] ss:$16 sps:$4 sm:$0xff]   ;;  %v18546_v34 = vld [vmem:[#allocation15 + $0x3e8] ss:$16 sps:$4 sm:$0xff]  }
 0x4d0   : > { %v18554_v10 = vld [vmem:[#allocation15 + $0x3cc] ss:$16 sps:$4 sm:$0xff]  }
 0x4d1   : > { %v21595_v61 = vor.u32 %v7652_v14, %v7649_v7  ;;  %v18581_v7 = vld [vmem:[#allocation15 + $0x12c] ss:$16 sps:$4 sm:$0xff]   ;;  %v7553_v14 = vrot.slane %v7544_v8, %v20336_v52 }
 0x4d2   : > { %9849 = vmatpush1.bf16.msra.mxu0 %v18519_v13  ;;  %v18573_v13 = vld [vmem:[#allocation15 + $0x148] ss:$16 sps:$4 sm:$0xff]  }
 0x4d3   : > { %9850 = vmatprep.subr.bf16.mxu0 %v18527_v32  ;;  %9832 = vmatmul.mubr.bf16.vlgmr.msra.gmra.mxu1 %v21595_v61  ;;  %v7549_v32 = vrot.slane %v7544_v8, %v20333_v24  ;;  %v18629_v8 = vld [vmem:[#allocation15 + $0x42c] ss:$16 sps:$4 sm:$0xff]  }
 0x4d4   : > { %9882 = vmatpush1.bf16.msra.mxu1 %v18498_v60  ;;  %9913 = vmatprep.mubr.bf16.mxu1 %v22986_v63  ;;  %v18552_v60 = vld [vmem:[#allocation15 + $0x3c8] ss:$16 sps:$4 sm:$0xff]   ;;  %v18587_v63 = vld [vmem:[#allocation15 + $0x10c] ss:$16 sps:$4 sm:$0xff]  }
 0x4d5   : > { %9883 = vmatprep.subr.bf16.mxu1 %v18506_v53  ;;  %v18560_v53 = vld [vmem:[#allocation15 + $0x3ac] ss:$16 sps:$4 sm:$0xff]  }
 0x4d6   : > { %9851 = vmatpush1.bf16.msra.mxu0 %v18525_v9  ;;  %v18579_v9 = vld [vmem:[#allocation15 + $0x128] ss:$16 sps:$4 sm:$0xff]  }
 0x4d7   : > { %9852 = vmatprep.subr.bf16.mxu0 %v18533_v43 }
 0x4d8   : > { %9884 = vmatpush1.bf16.msra.mxu1 %v18504_v55 }
 0x4d9   : > { %9885 = vmatprep.subr.bf16.mxu1 %v18512_v16  ;;  %v18558_v16 = vld [vmem:[#allocation15 + $0x3a8] ss:$16 sps:$4 sm:$0xff]  }
 0x4da   : > { %9853 = vmatpush1.bf16.msra.mxu0 %v18531_v44 }
 0x4db   : > { %9854 = vmatprep.subr.bf16.mxu0 %v18539_v22  ;;  %v18566_v22 = vld [vmem:[#allocation15 + $0x38c] ss:$16 sps:$4 sm:$0xff]  }
 0x4dc   : > { %9886 = vmatpush1.bf16.msra.mxu1 %v18510_v2  ;;  %v18585_v2 = vld [vmem:[#allocation15 + $0x108] ss:$16 sps:$4 sm:$0xff]  }
 0x4dd   : > { %9887 = vmatprep.subr.bf16.mxu1 %v18518_v59 }
 0x4de   : > { %9855 = vmatpush1.bf16.msra.mxu0 %v18537_v38  ;;  %v18593_v38 = vld [vmem:[#allocation15 + $0x4ec] ss:$16 sps:$4 sm:$0xff]  }
 0x4df   : > { %9856 = vmatprep.subr.bf16.mxu0 %v18545_v58 }
 0x4e0   : > { %9888 = vmatpush1.bf16.msra.mxu1 %v18516_v27 }
 0x4e1   : > { %9889 = vmatprep.subr.bf16.mxu1 %v18524_v33  ;;  %v9628_v28 = vpop.f32.mrf.mxu0  ;;  %v18564_v33 = vld [vmem:[#allocation15 + $0x388] ss:$16 sps:$4 sm:$0xff]  }
 0x4e2   : > { %9857 = vmatpush2.bf16.msra.mxu0 %v18543_v12  ;;  %v9629_v43 = vadd.f32 %v9628_v28, %v7549_v32  ;;  %v18584_v28 = vld [vmem:[#allocation15 + $0x32c] ss:$16 sps:$4 sm:$0xff]  }
 0x4e3   : > { %9858 = vmatprep.subr.bf16.mxu0 %v18551_v20  ;;  %v9630_v18 = vpop.f32.mrf.mxu0  ;;  %v18572_v20 = vld [vmem:[#allocation15 + $0x36c] ss:$16 sps:$4 sm:$0xff]  }
 0x4e4   : > { %9890 = vmatpush1.bf16.msra.mxu1 %v18522_v62  ;;  %v9631_v55 = vadd.f32 %v9630_v18, %v7553_v14  ;;  %v18591_v62 = vld [vmem:[#allocation15 + $0x4e8] ss:$16 sps:$4 sm:$0xff]   ;;  %v18635_v32 = vld [vmem:[#allocation15 + $0x40c] ss:$16 sps:$4 sm:$0xff]  }
 0x4e5   : > { %9891 = vmatprep.subr.bf16.mxu1 %v18530_v49  ;;  %v9632_v19 = vpop.f32.mrf.mxu0  ;;  %v18599_v49 = vld [vmem:[#allocation15 + $0x4cc] ss:$16 sps:$4 sm:$0xff]   ;;  %v18609_v18 = vld [vmem:[#allocation15 + $0x488] ss:$16 sps:$4 sm:$0xff]  }
 0x4e6   : > { %9859 = vmatpush2.bf16.msra.mxu0 %v18549_v6  ;;  %v18596_v19 = vld [vmem:[#allocation15 + $0x6ec] ss:$16 sps:$4 sm:$0xff]  }
 0x4e7   : > { %9860 = vmatprep.subr.bf16.mxu0 %v18557_v45  ;;  %v9633_v39 = vpop.f32.mrf.mxu0  ;;  %v18570_v45 = vld [vmem:[#allocation15 + $0x368] ss:$16 sps:$4 sm:$0xff]   ;;  %v18614_v14 = vld [vmem:[#allocation15 + $0x68c] ss:$16 sps:$4 sm:$0xff]  }
 0x4e8   : > { %9892 = vmatpush1.bf16.msra.mxu1 %v18528_v5  ;;  %v18578_v5 = vld [vmem:[#allocation15 + $0x34c] ss:$16 sps:$4 sm:$0xff]  }
 0x4e9   : > { %9893 = vmatprep.subr.bf16.mxu1 %v18536_v47  ;;  %v18597_v47 = vld [vmem:[#allocation15 + $0x4c8] ss:$16 sps:$4 sm:$0xff]   ;;  %v18602_v39 = vld [vmem:[#allocation15 + $0x6cc] ss:$16 sps:$4 sm:$0xff]  }
 0x4ea   : > { %9861 = vmatpush2.bf16.msra.mxu0 %v18555_v3  ;;  %v18605_v3 = vld [vmem:[#allocation15 + $0x4ac] ss:$16 sps:$4 sm:$0xff]  }
 0x4eb   : > { %9862 = vmatprep.subr.bf16.mxu0 %v18563_v11  ;;  %v18576_v11 = vld [vmem:[#allocation15 + $0x348] ss:$16 sps:$4 sm:$0xff]  }
 0x4ec   : > { %9894 = vmatpush1.bf16.msra.mxu1 %v18534_v0  ;;  %v18603_v0 = vld [vmem:[#allocation15 + $0x4a8] ss:$16 sps:$4 sm:$0xff]  }
 0x4ed   : > { %9895 = vmatprep.subr.bf16.mxu1 %v18542_v31  ;;  %v18611_v31 = vld [vmem:[#allocation15 + $0x48c] ss:$16 sps:$4 sm:$0xff]  }
 0x4ee   : > { %9863 = vmatpush2.bf16.msra.mxu0 %v18561_v17  ;;  %v18582_v17 = vld [vmem:[#allocation15 + $0x328] ss:$16 sps:$4 sm:$0xff]  }
 0x4ef   : > { %9864 = vmatprep.subr.bf16.mxu0 %v18569_v36  ;;  %v18617_v36 = vld [vmem:[#allocation15 + $0x46c] ss:$16 sps:$4 sm:$0xff]  }
 0x4f0   : > { %9896 = vmatpush1.bf16.msra.mxu1 %v18540_v56  ;;  %v18615_v56 = vld [vmem:[#allocation15 + $0x468] ss:$16 sps:$4 sm:$0xff]  }
 0x4f1   : > { %9897 = vmatprep.subr.bf16.mxu1 %v18548_v35  ;;  %v18623_v35 = vld [vmem:[#allocation15 + $0x44c] ss:$16 sps:$4 sm:$0xff]  }
 0x4f2   : > { %9865 = vmatpush2.bf16.msra.mxu0 %v18567_v1  ;;  %v18594_v1 = vld [vmem:[#allocation15 + $0x6e8] ss:$16 sps:$4 sm:$0xff]  }
 0x4f3   : > { %9866 = vmatprep.subr.bf16.mxu0 %v18575_v25  ;;  %v18621_v25 = vld [vmem:[#allocation15 + $0x448] ss:$16 sps:$4 sm:$0xff]  }
 0x4f4   : > { %9898 = vmatpush2.bf16.msra.mxu1 %v18546_v34  ;;  %v18600_v34 = vld [vmem:[#allocation15 + $0x6c8] ss:$16 sps:$4 sm:$0xff]  }
 0x4f5   : > { %9899 = vmatprep.subr.bf16.mxu1 %v18554_v10  ;;  %v9669_v44 = vpop.f32.mrf.mxu1  ;;  %v18608_v10 = vld [vmem:[#allocation15 + $0x6ac] ss:$16 sps:$4 sm:$0xff]  }
 0x4f6   : > { %9867 = vmatpush2.bf16.msra.mxu0 %v18573_v13  ;;  %v21601_v59 = vadd.f32 %v9669_v44, %v9629_v43  ;;  %v18627_v13 = vld [vmem:[#allocation15 + $0x428] ss:$16 sps:$4 sm:$0xff]   ;;  %v18647_v43 = vld [vmem:[#allocation15 + $0x5cc] ss:$16 sps:$4 sm:$0xff]  }
 0x4f7   : > { %9868 = vmatprep.subr.bf16.mxu0 %v18581_v7  ;;  %v9671_v58 = vpop.f32.mrf.mxu1  ;;  %v18606_v7 = vld [vmem:[#allocation15 + $0x6a8] ss:$16 sps:$4 sm:$0xff]   ;;  %v18653_v44 = vld [vmem:[#allocation15 + $0x5ac] ss:$16 sps:$4 sm:$0xff]  }
 0x4f8   : > { %9900 = vmatpush2.bf16.msra.mxu1 %v18552_v60  ;;  %v21603_v27 = vadd.f32 %v9671_v58, %v9631_v55  ;;  %v18633_v60 = vld [vmem:[#allocation15 + $0x408] ss:$16 sps:$4 sm:$0xff]   ;;  %v18626_v55 = vld [vmem:[#allocation15 + $0x64c] ss:$16 sps:$4 sm:$0xff]  }
 0x4f9   : > { %9901 = vmatprep.subr.bf16.mxu1 %v18560_v53  ;;  %v9673_v12 = vpop.f32.mrf.mxu1  ;;  %v18641_v53 = vld [vmem:[#allocation15 + $0x5ec] ss:$16 sps:$4 sm:$0xff]  }
 0x4fa   : > { %9869 = vmatpush2.bf16.msra.mxu0 %v18579_v9  ;;  %v18620_v9 = vld [vmem:[#allocation15 + $0x66c] ss:$16 sps:$4 sm:$0xff]  }
 0x4fb   : > { %9870 = vmatprep.subr.bf16.mxu0 %v18587_v63  ;;  %v9674_v6 = vpop.f32.mrf.mxu1  ;;  %v18618_v63 = vld [vmem:[#allocation15 + $0x668] ss:$16 sps:$4 sm:$0xff]   ;;  %v18659_v58 = vld [vmem:[#allocation15 + $0x58c] ss:$16 sps:$4 sm:$0xff]  }
 0x4fc   : > { %9902 = vmatpush2.bf16.msra.mxu1 %v18558_v16  ;;  %v18645_v16 = vld [vmem:[#allocation15 + $0x5c8] ss:$16 sps:$4 sm:$0xff]   ;;  %v18638_v12 = vld [vmem:[#allocation15 + $0x60c] ss:$16 sps:$4 sm:$0xff]  }
 0x4fd   : > { %9903 = vmatprep.subr.bf16.mxu1 %v18566_v22  ;;  %v18624_v22 = vld [vmem:[#allocation15 + $0x648] ss:$16 sps:$4 sm:$0xff]   ;;  %v18644_v6 = vld [vmem:[#allocation15 + $0x7ec] ss:$16 sps:$4 sm:$0xff]  }
 0x4fe   : > { %9871 = vmatpush2.bf16.msra.mxu0 %v18585_v2  ;;  %v18632_v2 = vld [vmem:[#allocation15 + $0x62c] ss:$16 sps:$4 sm:$0xff]  }
 0x4ff   : > { %9922 = vmatprep.subr.bf16.mxu0 %v18593_v38  ;;  %v18651_v38 = vld [vmem:[#allocation15 + $0x5a8] ss:$16 sps:$4 sm:$0xff]  }
 0x500   : > { %9904 = vmatpush2.bf16.msra.mxu1 %v18564_v33  ;;  %v18630_v33 = vld [vmem:[#allocation15 + $0x628] ss:$16 sps:$4 sm:$0xff]  }
 0x501   : > { %9873 = vmatmul.mubr.bf16.vlgmr.msra.gmra.mxu0 %v21217_v21  ;;  %9905 = vmatprep.subr.bf16.mxu1 %v18572_v20  ;;  %v18590_v21 = vld [vmem:[#allocation15 + $0x30c] ss:$16 sps:$4 sm:$0xff]   ;;  %v18657_v20 = vld [vmem:[#allocation15 + $0x588] ss:$16 sps:$4 sm:$0xff]  }
 0x502   : > { %9923 = vmatpush1.bf16.msra.mxu0 %v18591_v62  ;;  %9954 = vmatprep.mubr.bf16.mxu0 %v21368_v23  ;;  %v18588_v23 = vld [vmem:[#allocation15 + $0x308] ss:$16 sps:$4 sm:$0xff]   ;;  %v18665_v62 = vld [vmem:[#allocation15 + $0x56c] ss:$16 sps:$4 sm:$0xff]  }
 0x503   : > { %9924 = vmatprep.subr.bf16.mxu0 %v18599_v49  ;;  %v18636_v49 = vld [vmem:[#allocation15 + $0x608] ss:$16 sps:$4 sm:$0xff]  }
 0x504   : > { %9906 = vmatpush2.bf16.msra.mxu1 %v18570_v45  ;;  %v18663_v45 = vld [vmem:[#allocation15 + $0x568] ss:$16 sps:$4 sm:$0xff]  }
 0x505   : > { %9907 = vmatprep.subr.bf16.mxu1 %v18578_v5  ;;  %v18671_v5 = vld [vmem:[#allocation15 + $0x54c] ss:$16 sps:$4 sm:$0xff]  }
 0x506   : > { %9925 = vmatpush1.bf16.msra.mxu0 %v18597_v47  ;;  %v18642_v47 = vld [vmem:[#allocation15 + $0x7e8] ss:$16 sps:$4 sm:$0xff]  }
 0x507   : > { %9926 = vmatprep.subr.bf16.mxu0 %v18605_v3  ;;  %v18650_v3 = vld [vmem:[#allocation15 + $0x7cc] ss:$16 sps:$4 sm:$0xff]  }
 0x508   : > { %9908 = vmatpush2.bf16.msra.mxu1 %v18576_v11  ;;  %v18669_v11 = vld [vmem:[#allocation15 + $0x548] ss:$16 sps:$4 sm:$0xff]  }
 0x509   : > { %9909 = vmatprep.subr.bf16.mxu1 %v18584_v28  ;;  %v18677_v28 = vld [vmem:[#allocation15 + $0x52c] ss:$16 sps:$4 sm:$0xff]  }
 0x50a   : > { %9927 = vmatpush1.bf16.msra.mxu0 %v18603_v0 }
 0x50b   : > { %9928 = vmatprep.subr.bf16.mxu0 %v18611_v31  ;;  %v18648_v31 = vld [vmem:[#allocation15 + $0x7c8] ss:$16 sps:$4 sm:$0xff]  }
 0x50c   : > { %9910 = vmatpush2.bf16.msra.mxu1 %v18582_v17 }
 0x50d   : > { %9911 = vmatprep.subr.bf16.mxu1 %v18590_v21  ;;  %v18656_v21 = vld [vmem:[#allocation15 + $0x7ac] ss:$16 sps:$4 sm:$0xff]  }
 0x50e   : > { %9929 = vmatpush1.bf16.msra.mxu0 %v18609_v18  ;;  %v18675_v18 = vld [vmem:[#allocation15 + $0x528] ss:$16 sps:$4 sm:$0xff]  }
 0x50f   : > { %9930 = vmatprep.subr.bf16.mxu0 %v18617_v36 }
 0x510   : > { %9912 = vmatpush2.bf16.msra.mxu1 %v18588_v23  ;;  %v18683_v23 = vld [vmem:[#allocation15 + $0x50c] ss:$16 sps:$4 sm:$0xff]  }
 0x511   : > { %9963 = vmatprep.subr.bf16.mxu1 %v18596_v19 }
 0x512   : > { %9931 = vmatpush1.bf16.msra.mxu0 %v18615_v56 }
 0x513   : > { %9932 = vmatprep.subr.bf16.mxu0 %v18623_v35  ;;  %9914 = vmatmul.mubr.bf16.vlgmr.msra.gmra.mxu1 %v21271_v37  ;;  %v18612_v37 = vld [vmem:[#allocation15 + $0x688] ss:$16 sps:$4 sm:$0xff]  }
 0x514   : > { %9964 = vmatpush1.bf16.msra.mxu1 %v18594_v1  ;;  %9995 = vmatprep.mubr.bf16.mxu1 %v21428_v50  ;;  %v18639_v50 = vld [vmem:[#allocation15 + $0x5e8] ss:$16 sps:$4 sm:$0xff]   ;;  %v18662_v1 = vld [vmem:[#allocation15 + $0x78c] ss:$16 sps:$4 sm:$0xff]  }
 0x515   : > { %9965 = vmatprep.subr.bf16.mxu1 %v18602_v39  ;;  %v18654_v35 = vld [vmem:[#allocation15 + $0x7a8] ss:$16 sps:$4 sm:$0xff]  }
 0x516   : > { %9933 = vmatpush1.bf16.msra.mxu0 %v18621_v25  ;;  %v18681_v39 = vld [vmem:[#allocation15 + $0x508] ss:$16 sps:$4 sm:$0xff]  }
 0x517   : > { %9934 = vmatprep.subr.bf16.mxu0 %v18629_v8  ;;  %v18689_v8 = vld [vmem:[#allocation15 + $0x8ec] ss:$16 sps:$4 sm:$0xff]  }
 0x518   : > { %9966 = vmatpush1.bf16.msra.mxu1 %v18600_v34  ;;  %v18668_v34 = vld [vmem:[#allocation15 + $0x76c] ss:$16 sps:$4 sm:$0xff]  }
 0x519   : > { %9967 = vmatprep.subr.bf16.mxu1 %v18608_v10  ;;  %v18687_v10 = vld [vmem:[#allocation15 + $0x8e8] ss:$16 sps:$4 sm:$0xff]  }
 0x51a   : > { %9935 = vmatpush1.bf16.msra.mxu0 %v18627_v13  ;;  %v18695_v13 = vld [vmem:[#allocation15 + $0x8cc] ss:$16 sps:$4 sm:$0xff]  }
 0x51b   : > { %9936 = vmatprep.subr.bf16.mxu0 %v18635_v32 }
 0x51c   : > { %9968 = vmatpush1.bf16.msra.mxu1 %v18606_v7  ;;  %v18674_v7 = vld [vmem:[#allocation15 + $0x74c] ss:$16 sps:$4 sm:$0xff]  }
 0x51d   : > { %9969 = vmatprep.subr.bf16.mxu1 %v18614_v14 }
 0x51e   : > { %9937 = vmatpush1.bf16.msra.mxu0 %v18633_v60  ;;  %v18693_v60 = vld [vmem:[#allocation15 + $0x8c8] ss:$16 sps:$4 sm:$0xff]  }
 0x51f   : > { %9938 = vmatprep.subr.bf16.mxu0 %v18641_v53 }
 0x520   : > { %9970 = vmatpush1.bf16.msra.mxu1 %v18612_v37  ;;  %v18701_v37 = vld [vmem:[#allocation15 + $0x8ac] ss:$16 sps:$4 sm:$0xff]  }
 0x521   : > { %9971 = vmatprep.subr.bf16.mxu1 %v18620_v9 }
 0x522   : > { %9939 = vmatpush2.bf16.msra.mxu0 %v18639_v50  ;;  %v18672_v50 = vld [vmem:[#allocation15 + $0x748] ss:$16 sps:$4 sm:$0xff]  }
 0x523   : > { %9940 = vmatprep.subr.bf16.mxu0 %v18647_v43 }
 0x524   : > { %9972 = vmatpush1.bf16.msra.mxu1 %v18618_v63  ;;  %v18680_v63 = vld [vmem:[#allocation15 + $0x72c] ss:$16 sps:$4 sm:$0xff]  }
 0x525   : > { %9973 = vmatprep.subr.bf16.mxu1 %v18626_v55 }
 0x526   : > { %9941 = vmatpush2.bf16.msra.mxu0 %v18645_v16  ;;  %v18707_v16 = vld [vmem:[#allocation15 + $0x88c] ss:$16 sps:$4 sm:$0xff]  }
 0x527   : > { %9942 = vmatprep.subr.bf16.mxu0 %v18653_v44  ;;  %v18678_v44 = vld [vmem:[#allocation15 + $0x728] ss:$16 sps:$4 sm:$0xff]  }
 0x528   : > { %9974 = vmatpush1.bf16.msra.mxu1 %v18624_v22  ;;  %v18686_v22 = vld [vmem:[#allocation15 + $0x70c] ss:$16 sps:$4 sm:$0xff]  }
 0x529   : > { %9975 = vmatprep.subr.bf16.mxu1 %v18632_v2  ;;  %v18713_v2 = vld [vmem:[#allocation15 + $0x86c] ss:$16 sps:$4 sm:$0xff]  }
 0x52a   : > { %9943 = vmatpush2.bf16.msra.mxu0 %v18651_v38  ;;  %v18684_v38 = vld [vmem:[#allocation15 + $0x708] ss:$16 sps:$4 sm:$0xff]  }
 0x52b   : > { %9944 = vmatprep.subr.bf16.mxu0 %v18659_v58  ;;  %v18692_v58 = vld [vmem:[#allocation15 + $0xaec] ss:$16 sps:$4 sm:$0xff]  }
 0x52c   : > { %9976 = vmatpush1.bf16.msra.mxu1 %v18630_v33  ;;  %v18711_v33 = vld [vmem:[#allocation15 + $0x868] ss:$16 sps:$4 sm:$0xff]  }
 0x52d   : > { %9977 = vmatprep.subr.bf16.mxu1 %v18638_v12  ;;  %v18719_v12 = vld [vmem:[#allocation15 + $0x84c] ss:$16 sps:$4 sm:$0xff]  }
 0x52e   : > { %9945 = vmatpush2.bf16.msra.mxu0 %v18657_v20  ;;  %v18690_v20 = vld [vmem:[#allocation15 + $0xae8] ss:$16 sps:$4 sm:$0xff]  }
 0x52f   : > { %9946 = vmatprep.subr.bf16.mxu0 %v18665_v62  ;;  %v18698_v62 = vld [vmem:[#allocation15 + $0xacc] ss:$16 sps:$4 sm:$0xff]  }
 0x530   : > { %9978 = vmatpush1.bf16.msra.mxu1 %v18636_v49  ;;  %v18717_v49 = vld [vmem:[#allocation15 + $0x848] ss:$16 sps:$4 sm:$0xff]  }
 0x531   : > { %9979 = vmatprep.subr.bf16.mxu1 %v18644_v6  ;;  %v18725_v6 = vld [vmem:[#allocation15 + $0x82c] ss:$16 sps:$4 sm:$0xff]  }
 0x532   : > { %9947 = vmatpush2.bf16.msra.mxu0 %v18663_v45  ;;  %v18696_v45 = vld [vmem:[#allocation15 + $0xac8] ss:$16 sps:$4 sm:$0xff]  }
 0x533   : > { %9948 = vmatprep.subr.bf16.mxu0 %v18671_v5  ;;  %v18704_v5 = vld [vmem:[#allocation15 + $0xaac] ss:$16 sps:$4 sm:$0xff]  }
 0x534   : > { %v9710_v0 = vpop.f32.mrf.mxu0  ;;  %9980 = vmatpush2.bf16.msra.mxu1 %v18642_v47  ;;  %v18723_v47 = vld [vmem:[#allocation15 + $0x828] ss:$16 sps:$4 sm:$0xff]  }
 0x535   : > { %v9711_v17 = vadd.f32 %v9710_v0, %v21601_v59  ;;  %9981 = vmatprep.subr.bf16.mxu1 %v18650_v3  ;;  %v18660_v59 = vld [vmem:[#allocation15 + $0x788] ss:$16 sps:$4 sm:$0xff]   ;;  %v18731_v3 = vld [vmem:[#allocation15 + $0x80c] ss:$16 sps:$4 sm:$0xff]  }
 0x536   : > { %9949 = vmatpush2.bf16.msra.mxu0 %v18669_v11  ;;  %v9712_v36 = vpop.f32.mrf.mxu0  ;;  %v18702_v11 = vld [vmem:[#allocation15 + $0xaa8] ss:$16 sps:$4 sm:$0xff]  }
 0x537   : > { %9950 = vmatprep.subr.bf16.mxu0 %v18677_v28  ;;  %v9713_v19 = vadd.f32 %v9712_v36, %v21603_v27  ;;  %v18666_v27 = vld [vmem:[#allocation15 + $0x768] ss:$16 sps:$4 sm:$0xff]   ;;  %v18710_v28 = vld [vmem:[#allocation15 + $0xa8c] ss:$16 sps:$4 sm:$0xff]  }
 0x538   : > { %v9714_v56 = vpop.f32.mrf.mxu0  ;;  %9982 = vmatpush2.bf16.msra.mxu1 %v18648_v31  ;;  %v18729_v0 = vld [vmem:[#allocation15 + $0x808] ss:$16 sps:$4 sm:$0xff]   ;;  %v18737_v31 = vld [vmem:[#allocation15 + $0x9ec] ss:$16 sps:$4 sm:$0xff]  }
 0x539   : > { %9983 = vmatprep.subr.bf16.mxu1 %v18656_v21  ;;  %v18743_v21 = vld [vmem:[#allocation15 + $0x9cc] ss:$16 sps:$4 sm:$0xff]   ;;  %v18720_v56 = vld [vmem:[#allocation15 + $0xa48] ss:$16 sps:$4 sm:$0xff]  }
 0x53a   : > { %9951 = vmatpush2.bf16.msra.mxu0 %v18675_v18  ;;  %v9715_v25 = vpop.f32.mrf.mxu0  ;;  %v18714_v18 = vld [vmem:[#allocation15 + $0xa68] ss:$16 sps:$4 sm:$0xff]   ;;  %v18722_v36 = vld [vmem:[#allocation15 + $0xa4c] ss:$16 sps:$4 sm:$0xff]  }
 0x53b   : > { %9952 = vmatprep.subr.bf16.mxu0 %v18683_v23  ;;  %v18741_v23 = vld [vmem:[#allocation15 + $0x9c8] ss:$16 sps:$4 sm:$0xff]  }
 0x53c   : > { %9984 = vmatpush2.bf16.msra.mxu1 %v18654_v35  ;;  %v18728_v35 = vld [vmem:[#allocation15 + $0xa2c] ss:$16 sps:$4 sm:$0xff]   ;;  %v18726_v25 = vld [vmem:[#allocation15 + $0xa28] ss:$16 sps:$4 sm:$0xff]  }
 0x53d   : > { %9985 = vmatprep.subr.bf16.mxu1 %v18662_v1  ;;  %v18747_v1 = vld [vmem:[#allocation15 + $0x9a8] ss:$16 sps:$4 sm:$0xff]  }
 0x53e   : > { %9953 = vmatpush2.bf16.msra.mxu0 %v18681_v39  ;;  %v18755_v39 = vld [vmem:[#allocation15 + $0x98c] ss:$16 sps:$4 sm:$0xff]  }
 0x53f   : > { %10004 = vmatprep.subr.bf16.mxu0 %v18689_v8  ;;  %v18734_v8 = vld [vmem:[#allocation15 + $0xa0c] ss:$16 sps:$4 sm:$0xff]  }
 0x540   : > { %9986 = vmatpush2.bf16.msra.mxu1 %v18660_v59  ;;  %v18753_v59 = vld [vmem:[#allocation15 + $0x988] ss:$16 sps:$4 sm:$0xff]  }
 0x541   : > { %9955 = vmatmul.mubr.bf16.vlgmr.msra.gmra.mxu0 %v21466_v29  ;;  %v9751_v32 = vpop.f32.mrf.mxu1  ;;  %9987 = vmatprep.subr.bf16.mxu1 %v18668_v34  ;;  %v18699_v29 = vld [vmem:[#allocation15 + $0x8a8] ss:$16 sps:$4 sm:$0xff]   ;;  %v18761_v34 = vld [vmem:[#allocation15 + $0x96c] ss:$16 sps:$4 sm:$0xff]  }
 0x542   : > { %v21612_v14 = vadd.f32 %v9751_v32, %v9711_v17  ;;  %10005 = vmatpush1.bf16.msra.mxu0 %v18687_v10  ;;  %10036 = vmatprep.mubr.bf16.mxu0 %v21548_v54  ;;  %v18705_v54 = vld [vmem:[#allocation15 + $0x888] ss:$16 sps:$4 sm:$0xff]   ;;  %v18716_v17 = vld [vmem:[#allocation15 + $0xa6c] ss:$16 sps:$4 sm:$0xff]  }
 0x543   : > { %v9753_v53 = vpop.f32.mrf.mxu1  ;;  %10006 = vmatprep.subr.bf16.mxu0 %v18695_v13  ;;  %v18732_v10 = vld [vmem:[#allocation15 + $0xa08] ss:$16 sps:$4 sm:$0xff]   ;;  %v18740_v13 = vld [vmem:[#allocation15 + $0xbec] ss:$16 sps:$4 sm:$0xff]  }
 0x544   : > { %v21615_v9 = vadd.f32 %v9753_v53, %v9713_v19  ;;  %9988 = vmatpush2.bf16.msra.mxu1 %v18666_v27  ;;  %v18749_v19 = vld [vmem:[#allocation15 + $0x9ac] ss:$16 sps:$4 sm:$0xff]   ;;  %v18759_v27 = vld [vmem:[#allocation15 + $0x968] ss:$16 sps:$4 sm:$0xff]  }
 0x545   : > { %v9755_v43 = vpop.f32.mrf.mxu1  ;;  %9989 = vmatprep.subr.bf16.mxu1 %v18674_v7  ;;  %v18767_v32 = vld [vmem:[#allocation15 + $0x94c] ss:$16 sps:$4 sm:$0xff]   ;;  %v18738_v7 = vld [vmem:[#allocation15 + $0xbe8] ss:$16 sps:$4 sm:$0xff]  }
 0x546   : > { %10007 = vmatpush1.bf16.msra.mxu0 %v18693_v60  ;;  %v18746_v60 = vld [vmem:[#allocation15 + $0xbcc] ss:$16 sps:$4 sm:$0xff]   ;;  %v18765_v53 = vld [vmem:[#allocation15 + $0x948] ss:$16 sps:$4 sm:$0xff]  }
 0x547   : > { %v9756_v55 = vpop.f32.mrf.mxu1  ;;  %10008 = vmatprep.subr.bf16.mxu0 %v18701_v37  ;;  %v18773_v37 = vld [vmem:[#allocation15 + $0x92c] ss:$16 sps:$4 sm:$0xff]  }
 0x548   : > { %9990 = vmatpush2.bf16.msra.mxu1 %v18672_v50  ;;  %v18744_v50 = vld [vmem:[#allocation15 + $0xbc8] ss:$16 sps:$4 sm:$0xff]   ;;  %v18752_v43 = vld [vmem:[#allocation15 + $0xbac] ss:$16 sps:$4 sm:$0xff]  }
 0x549   : > { %9991 = vmatprep.subr.bf16.mxu1 %v18680_v63  ;;  %v18771_v63 = vld [vmem:[#allocation15 + $0x928] ss:$16 sps:$4 sm:$0xff]  }
 0x54a   : > { %10009 = vmatpush1.bf16.msra.mxu0 %v18699_v29  ;;  %v18779_v29 = vld [vmem:[#allocation15 + $0x90c] ss:$16 sps:$4 sm:$0xff]   ;;  %v10150_v55 = vld [vmem:[#allocation18 + $0x1c0] sm:$0xff] }
 0x54b   : > { %10010 = vmatprep.subr.bf16.mxu0 %v18707_v16  ;;  %v10154_v16 = vld [vmem:[#allocation18 + $0x1e0] sm:$0xff] }
 0x54c   : > { %9992 = vmatpush2.bf16.msra.mxu1 %v18678_v44  ;;  %v18750_v44 = vld [vmem:[#allocation15 + $0xba8] ss:$16 sps:$4 sm:$0xff]  }
 0x54d   : > { %9993 = vmatprep.subr.bf16.mxu1 %v18686_v22  ;;  %v18758_v22 = vld [vmem:[#allocation15 + $0xb8c] ss:$16 sps:$4 sm:$0xff]  }
 0x54e   : > { %10011 = vmatpush1.bf16.msra.mxu0 %v18705_v54  ;;  %v18777_v54 = vld [vmem:[#allocation15 + $0x908] ss:$16 sps:$4 sm:$0xff]  }
 0x54f   : > { %10012 = vmatprep.subr.bf16.mxu0 %v18713_v2  ;;  %v16665_v2 = vcombine.high %v10150_v55, %v10154_v16 }
 0x550   : > { %9994 = vmatpush2.bf16.msra.mxu1 %v18684_v38  ;;  %v10142_v38 = vld [vmem:[#allocation18 + $0x180] sm:$0xff] }
 0x551   : > { %10045 = vmatprep.subr.bf16.mxu1 %v18692_v58  ;;  %v10146_v58 = vld [vmem:[#allocation18 + $0x1a0] sm:$0xff] }
 0x552   : > { %10013 = vmatpush1.bf16.msra.mxu0 %v18711_v33  ;;  %v18756_v33 = vld [vmem:[#allocation15 + $0xb88] ss:$16 sps:$4 sm:$0xff]  }
 0x553   : > { %10014 = vmatprep.subr.bf16.mxu0 %v18719_v12  ;;  %9996 = vmatmul.mubr.bf16.vlgmr.msra.gmra.mxu1 %v21492_v15  ;;  %v18708_v15 = vld [vmem:[#allocation15 + $0xa88] ss:$16 sps:$4 sm:$0xff]   ;;  %v18764_v12 = vld [vmem:[#allocation15 + $0xb6c] ss:$16 sps:$4 sm:$0xff]  }
 0x554   : > { %10046 = vmatpush1.bf16.msra.mxu1 %v18690_v20  ;;  %10077 = vmatprep.mubr.bf16.mxu1 %v21584_v51  ;;  %v18735_v51 = vld [vmem:[#allocation15 + $0x9e8] ss:$16 sps:$4 sm:$0xff]   ;;  %v16664_v20 = vcombine.low %v10150_v55, %v10154_v16 }
 0x555   : > { %10047 = vmatprep.subr.bf16.mxu1 %v18698_v62  ;;  %v16657_v62 = vcombine.high %v10142_v38, %v10146_v58  ;;  %v10214_v16 = vld [vmem:[#allocation18 + $0x3c0] sm:$0xff] }
 0x556   : > { %10015 = vmatpush1.bf16.msra.mxu0 %v18717_v49  ;;  %v10134_v49 = vld [vmem:[#allocation18 + $0x140] sm:$0xff] }
 0x557   : > { %10016 = vmatprep.subr.bf16.mxu0 %v18725_v6  ;;  %v10138_v6 = vld [vmem:[#allocation18 + $0x160] sm:$0xff] }
 0x558   : > { %10048 = vmatpush1.bf16.msra.mxu1 %v18696_v45  ;;  %v18762_v45 = vld [vmem:[#allocation15 + $0xb68] ss:$16 sps:$4 sm:$0xff]  }
 0x559   : > { %10049 = vmatprep.subr.bf16.mxu1 %v18704_v5 }
 0x55a   : > { %10017 = vmatpush1.bf16.msra.mxu0 %v18723_v47  ;;  %v18770_v47 = vld [vmem:[#allocation15 + $0xb4c] ss:$16 sps:$4 sm:$0xff]  }
 0x55b   : > { %10018 = vmatprep.subr.bf16.mxu0 %v18731_v3  ;;  %v16656_v3 = vcombine.low %v10142_v38, %v10146_v58  ;;  %v10206_v58 = vld [vmem:[#allocation18 + $0x380] sm:$0xff] }
 0x55c   : > { %10050 = vmatpush1.bf16.msra.mxu1 %v18702_v11 }
 0x55d   : > { %10051 = vmatprep.subr.bf16.mxu1 %v18710_v28  ;;  %v16649_v28 = vcombine.high %v10134_v49, %v10138_v6 }
 0x55e   : > { %10019 = vmatpush1.bf16.msra.mxu0 %v18729_v0  ;;  %v10126_v0 = vld [vmem:[#allocation18 + $0x100] sm:$0xff] }
 0x55f   : > { %10020 = vmatprep.subr.bf16.mxu0 %v18737_v31  ;;  %v10130_v31 = vld [vmem:[#allocation18 + $0x120] sm:$0xff] }
 0x560   : > { %10052 = vmatpush1.bf16.msra.mxu1 %v18708_v15  ;;  %v18768_v15 = vld [vmem:[#allocation15 + $0xb48] ss:$16 sps:$4 sm:$0xff]  }
 0x561   : > { %10053 = vmatprep.subr.bf16.mxu1 %v18716_v17 }
 0x562   : > { %10021 = vmatpush2.bf16.msra.mxu0 %v18735_v51  ;;  %v18776_v51 = vld [vmem:[#allocation15 + $0xb2c] ss:$16 sps:$4 sm:$0xff]  }
 0x563   : > { %10022 = vmatprep.subr.bf16.mxu0 %v18743_v21  ;;  %v16648_v21 = vcombine.low %v10134_v49, %v10138_v6  ;;  %v10270_v49 = vld [vmem:[#allocation18 + $0x580] sm:$0xff] }
 0x564   : > { %10054 = vmatpush1.bf16.msra.mxu1 %v18714_v18  ;;  %v10274_v6 = vld [vmem:[#allocation18 + $0x5a0] sm:$0xff] }
 0x565   : > { %10055 = vmatprep.subr.bf16.mxu1 %v18722_v36  ;;  %v10118_v36 = vld [vmem:[#allocation18 + $0xc0] sm:$0xff] }
 0x566   : > { %10023 = vmatpush2.bf16.msra.mxu0 %v18741_v23  ;;  %v10122_v23 = vld [vmem:[#allocation18 + $0xe0] sm:$0xff] }
 0x567   : > { %10024 = vmatprep.subr.bf16.mxu0 %v18749_v19  ;;  %v18774_v19 = vld [vmem:[#allocation15 + $0xb28] ss:$16 sps:$4 sm:$0xff]  }
 0x568   : > { %10056 = vmatpush1.bf16.msra.mxu1 %v18720_v56  ;;  %v18782_v56 = vld [vmem:[#allocation15 + $0xb0c] ss:$16 sps:$4 sm:$0xff]  }
 0x569   : > { %10057 = vmatprep.subr.bf16.mxu1 %v18728_v35  ;;  %v16640_v35 = vcombine.low %v10126_v0, %v10130_v31 }
 0x56a   : > { %10025 = vmatpush2.bf16.msra.mxu0 %v18747_v1  ;;  %v16633_v1 = vcombine.high %v10118_v36, %v10122_v23 }
 0x56b   : > { %10026 = vmatprep.subr.bf16.mxu0 %v18755_v39  ;;  %v10110_v39 = vld [vmem:[#allocation18 + $0x80] sm:$0xff] }
 0x56c   : > { %10058 = vmatpush1.bf16.msra.mxu1 %v18726_v25  ;;  %v10114_v25 = vld [vmem:[#allocation18 + $0xa0] sm:$0xff] }
 0x56d   : > { %10059 = vmatprep.subr.bf16.mxu1 %v18734_v8  ;;  %v18780_v8 = vld [vmem:[#allocation15 + $0xb08] ss:$16 sps:$4 sm:$0xff]  }
 0x56e   : > { %10027 = vmatpush2.bf16.msra.mxu0 %v18753_v59  ;;  %v16632_v59 = vcombine.low %v10118_v36, %v10122_v23  ;;  %v10190_v23 = vld [vmem:[#allocation18 + $0x300] sm:$0xff] }
 0x56f   : > { %10028 = vmatprep.subr.bf16.mxu0 %v18761_v34  ;;  %v16625_v34 = vcombine.high %v10110_v39, %v10114_v25 }
 0x570   : > { %10060 = vmatpush1.bf16.msra.mxu1 %v18732_v10  ;;  %v10102_v10 = vld [vmem:[#allocation18 + $0x40] sm:$0xff] }
 0x571   : > { %10061 = vmatprep.subr.bf16.mxu1 %v18740_v13  ;;  %v10106_v13 = vld [vmem:[#allocation18 + $0x60] sm:$0xff] }
 0x572   : > { %10029 = vmatpush2.bf16.msra.mxu0 %v18759_v27  ;;  %v16624_v27 = vcombine.low %v10110_v39, %v10114_v25 }
 0x573   : > { %10030 = vmatprep.subr.bf16.mxu0 %v18767_v32 }
 0x574   : > { %10062 = vmatpush2.bf16.msra.mxu1 %v18738_v7  ;;  %v16617_v7 = vcombine.high %v10102_v10, %v10106_v13 }
 0x575   : > { %10063 = vmatprep.subr.bf16.mxu1 %v18746_v60 }
 0x576   : > { %10031 = vmatpush2.bf16.msra.mxu0 %v18765_v53  ;;  %v10094_v53 = vld [vmem:[#allocation18] sm:$0xff] }
 0x577   : > { %10032 = vmatprep.subr.bf16.mxu0 %v18773_v37  ;;  %v10098_v37 = vld [vmem:[#allocation18 + $0x20] sm:$0xff] }
 0x578   : > { %10064 = vmatpush2.bf16.msra.mxu1 %v18744_v50 }
 0x579   : > { %10065 = vmatprep.subr.bf16.mxu1 %v18752_v43  ;;  %v16616_v43 = vcombine.low %v10102_v10, %v10106_v13  ;;  %v10238_v13 = vld [vmem:[#allocation18 + $0x480] sm:$0xff] }
 0x57a   : > { %10033 = vmatpush2.bf16.msra.mxu0 %v18771_v63 }
 0x57b   : > { %10034 = vmatprep.subr.bf16.mxu0 %v18779_v29  ;;  %v16609_v29 = vcombine.high %v10094_v53, %v10098_v37 }
 0x57c   : > { %10066 = vmatpush2.bf16.msra.mxu1 %v18750_v44  ;;  %v10218_v44 = vld [vmem:[#allocation18 + $0x3e0] sm:$0xff] }
 0x57d   : > { %10067 = vmatprep.subr.bf16.mxu1 %v18758_v22  ;;  %v16729_v38 = vcombine.high %v10214_v16, %v10218_v44 }
 0x57e   : > { %10035 = vmatpush2.bf16.msra.mxu0 %v18777_v54  ;;  %v16608_v54 = vcombine.low %v10094_v53, %v10098_v37  ;;  %v10174_v37 = vld [vmem:[#allocation18 + $0x280] sm:$0xff] }
 0x57f   : > { %11672 = vmatprep.subr.bf16.mxu0 %v16665_v2  ;;  %v10278_v2 = vld [vmem:[#allocation18 + $0x5c0] sm:$0xff] }
 0x580   : > { %10068 = vmatpush2.bf16.msra.mxu1 %v18756_v33  ;;  %v10282_v33 = vld [vmem:[#allocation18 + $0x5e0] sm:$0xff] }
 0x581   : > { %10037 = vmatmul.mubr.bf16.vlgmr.msra.gmra.mxu0 %v21589_v57  ;;  %v21620_v5 = vpop.f32.mrf.mxu0  ;;  %10069 = vmatprep.subr.bf16.mxu1 %v18764_v12  ;;  %v16641_v57 = vcombine.high %v10126_v0, %v10130_v31  ;;  %v10210_v12 = vld [vmem:[#allocation18 + $0x3a0] sm:$0xff]  ;;  %v16784_v0 = vcombine.low %v10270_v49, %v10274_v6 }
 0x582   : > { %11673 = vmatpush1.bf16.msra.mxu0 %v16664_v20  ;;  %v16792_v20 = vcombine.low %v10278_v2, %v10282_v33  ;;  %v10198_v31 = vld [vmem:[#allocation18 + $0x340] sm:$0xff] }
 0x583   : > { %v9794_v11 = vpop.f32.mrf.mxu0  ;;  %11674 = vmatprep.subr.bf16.mxu0 %v16657_v62  ;;  %v16793_v62 = vcombine.high %v10278_v2, %v10282_v33 }
 0x584   : > { %10070 = vmatpush2.bf16.msra.mxu1 %v18762_v45  ;;  %v9795_v32 = vadd.f32 %v9794_v11, %v21615_v9  ;;  %v16785_v45 = vcombine.high %v10270_v49, %v10274_v6  ;;  %v16728_v11 = vcombine.low %v10214_v16, %v10218_v44  ;;  %v10158_v49 = vld [vmem:[#allocation18 + $0x200] sm:$0xff] }
 0x585   : > { %v9796_v17 = vpop.f32.mrf.mxu0  ;;  %10071 = vmatprep.subr.bf16.mxu1 %v18770_v47  ;;  %v10262_v47 = vld [vmem:[#allocation18 + $0x540] sm:$0xff] }
 0x586   : > { %11675 = vmatpush1.bf16.msra.mxu0 %v16656_v3  ;;  %v10266_v3 = vld [vmem:[#allocation18 + $0x560] sm:$0xff] }
 0x587   : > { %v9797_v18 = vpop.f32.mrf.mxu0  ;;  %11676 = vmatprep.subr.bf16.mxu0 %v16649_v28  ;;  %v16721_v28 = vcombine.high %v10206_v58, %v10210_v12  ;;  %v16777_v17 = vcombine.high %v10262_v47, %v10266_v3  ;;  %v16776_v36 = vcombine.low %v10262_v47, %v10266_v3  ;;  %v10162_v6 = vld [vmem:[#allocation18 + $0x220] sm:$0xff] }
 0x588   : > { %10072 = vmatpush2.bf16.msra.mxu1 %v18768_v15  ;;  %v10202_v15 = vld [vmem:[#allocation18 + $0x360] sm:$0xff]  ;;  %v16720_v18 = vcombine.low %v10206_v58, %v10210_v12  ;;  %v9793_v12 = vadd.f32 %v21620_v5, %v21612_v14  ;;  %v10155_v14 = vld [vmem:[#allocation18 + $0x1e8] sm:$0xff] }
 0x589   : > { %10073 = vmatprep.subr.bf16.mxu1 %v18776_v51  ;;  %v10254_v51 = vld [vmem:[#allocation18 + $0x500] sm:$0xff]  ;;  %v16712_v39 = vcombine.low %v10198_v31, %v10202_v15 }
 0x58a   : > { %11677 = vmatpush1.bf16.msra.mxu0 %v16648_v21  ;;  %v10258_v21 = vld [vmem:[#allocation18 + $0x520] sm:$0xff] }
 0x58b   : > { %11678 = vmatprep.subr.bf16.mxu0 %v16641_v57  ;;  %v16713_v57 = vcombine.high %v10198_v31, %v10202_v15  ;;  %v10226_v58 = vld [vmem:[#allocation18 + $0x420] sm:$0xff]  ;;  %v10151_v15 = vld [vmem:[#allocation18 + $0x1c8] sm:$0xff] }
 0x58c   : > { %10074 = vmatpush2.bf16.msra.mxu1 %v18774_v19  ;;  %v10194_v19 = vld [vmem:[#allocation18 + $0x320] sm:$0xff] }
 0x58d   : > { %10075 = vmatprep.subr.bf16.mxu1 %v18782_v56  ;;  %v16769_v56 = vcombine.high %v10254_v51, %v10258_v21  ;;  %v16705_v25 = vcombine.high %v10190_v23, %v10194_v19  ;;  %v10342_v47 = vld [vmem:[#allocation18 + $0x7c0] sm:$0xff] }
 0x58e   : > { %11679 = vmatpush1.bf16.msra.mxu0 %v16640_v35  ;;  %v10246_v35 = vld [vmem:[#allocation18 + $0x4c0] sm:$0xff] }
 0x58f   : > { %11680 = vmatprep.subr.bf16.mxu0 %v16633_v1  ;;  %v10250_v1 = vld [vmem:[#allocation18 + $0x4e0] sm:$0xff] }
 0x590   : > { %10076 = vmatpush2.bf16.msra.mxu1 %v18780_v8  ;;  %v16768_v8 = vcombine.low %v10254_v51, %v10258_v21  ;;  %v16761_v10 = vcombine.high %v10246_v35, %v10250_v1  ;;  %v16760_v53 = vcombine.low %v10246_v35, %v10250_v1  ;;  %v10346_v3 = vld [vmem:[#allocation18 + $0x7e0] sm:$0xff]  ;;  %v16672_v21 = vcombine.low %v10158_v49, %v10162_v6 }
 0x591   : > { %11713 = vmatprep.subr.bf16.mxu1 %v16793_v62  ;;  %v16857_v5 = vcombine.high %v10342_v47, %v10346_v3  ;;  %v10338_v51 = vld [vmem:[#allocation18 + $0x7a0] sm:$0xff]  ;;  %v16666_v1 = vcombine.low %v10151_v15, %v10155_v14 }
 0x592   : > { %11681 = vmatpush1.bf16.msra.mxu0 %v16632_v59  ;;  %v10182_v59 = vld [vmem:[#allocation18 + $0x2c0] sm:$0xff] }
 0x593   : > { %11682 = vmatprep.subr.bf16.mxu0 %v16625_v34  ;;  %10078 = vmatmul.mubr.bf16.vlgmr.msra.gmra.mxu1 %v21595_v61  ;;  %v21624_v60 = vpop.f32.mrf.mxu1  ;;  %v10186_v34 = vld [vmem:[#allocation18 + $0x2e0] sm:$0xff] }
 0x594   : > { %11714 = vmatpush1.bf16.msra.mxu1 %v16792_v20  ;;  %v10330_v35 = vld [vmem:[#allocation18 + $0x760] sm:$0xff] }
 0x595   : > { %v9835_v50 = vpop.f32.mrf.mxu1  ;;  %11715 = vmatprep.subr.bf16.mxu1 %v16785_v45 }
 0x596   : > { %11683 = vmatpush1.bf16.msra.mxu0 %v16624_v27  ;;  %v9836_v63 = vadd.f32 %v9835_v50, %v9795_v32  ;;  %v10242_v27 = vld [vmem:[#allocation18 + $0x4a0] sm:$0xff]  ;;  %v16704_v32 = vcombine.low %v10190_v23, %v10194_v19  ;;  %v10143_v23 = vld [vmem:[#allocation18 + $0x188] sm:$0xff] }
 0x597   : > { %11684 = vmatprep.subr.bf16.mxu0 %v16617_v7  ;;  %v9837_v55 = vpop.f32.mrf.mxu1  ;;  %v16697_v7 = vcombine.high %v10182_v59, %v10186_v34  ;;  %v10178_v50 = vld [vmem:[#allocation18 + $0x2a0] sm:$0xff]  ;;  %v16752_v44 = vcombine.low %v10238_v13, %v10242_v27 }
 0x598   : > { %v21626_v22 = vmax.f32 %v9836_v63, 0.0  ;;  %11716 = vmatpush1.bf16.msra.mxu1 %v16784_v0  ;;  %v10230_v63 = vld [vmem:[#allocation18 + $0x440] sm:$0xff]  ;;  %v16696_v55 = vcombine.low %v10182_v59, %v10186_v34  ;;  %v16689_v16 = vcombine.high %v10174_v37, %v10178_v50  ;;  %v16688_v33 = vcombine.low %v10174_v37, %v10178_v50  ;;  %v10135_v59 = vld [vmem:[#allocation18 + $0x148] sm:$0xff] }
 0x599   : > { %v9838_v9 = vpop.f32.mrf.mxu1  ;;  %11717 = vmatprep.subr.bf16.mxu1 %v16777_v17  ;;  %v16673_v0 = vcombine.high %v10158_v49, %v10162_v6  ;;  %v10334_v17 = vld [vmem:[#allocation18 + $0x780] sm:$0xff]  ;;  %v10139_v34 = vld [vmem:[#allocation18 + $0x168] sm:$0xff] }
 0x59a   : > { %22987 = vst [vmem:[#allocation39_spill] sm:$0xff] %v21626_v22  ;;  %11685 = vmatpush1.bf16.msra.mxu0 %v16616_v43  ;;  %v21630_v61 = vpack.c.bf16 %v21626_v22, %v21626_v22  ;;  %v16753_v43 = vcombine.high %v10238_v13, %v10242_v27  ;;  %v10166_v9 = vld [vmem:[#allocation18 + $0x240] sm:$0xff]  ;;  %v16849_v19 = vcombine.high %v10334_v17, %v10338_v51 }
 0x59b   : > { %11686 = vmatprep.subr.bf16.mxu0 %v16609_v29  ;;  %v10234_v29 = vld [vmem:[#allocation18 + $0x460] sm:$0xff]  ;;  %v16651_v37 = vcombine.high %v10135_v59, %v10139_v34 }
 0x59c   : > { %11704 = vmatprep.mubr.bf16.mxu0 %v21630_v61  ;;  %11718 = vmatpush1.bf16.msra.mxu1 %v16776_v36  ;;  %v16745_v2 = vcombine.high %v10230_v63, %v10234_v29  ;;  %v16744_v62 = vcombine.low %v10230_v63, %v10234_v29  ;;  %v16856_v36 = vcombine.low %v10342_v47, %v10346_v3  ;;  %v10318_v27 = vld [vmem:[#allocation18 + $0x700] sm:$0xff]  ;;  %v10131_v63 = vld [vmem:[#allocation18 + $0x128] sm:$0xff] }
 0x59d   : > { %11719 = vmatprep.subr.bf16.mxu1 %v16769_v56  ;;  %v10326_v56 = vld [vmem:[#allocation18 + $0x740] sm:$0xff]  ;;  %v10111_v47 = vld [vmem:[#allocation18 + $0x88] sm:$0xff] }
 0x59e   : > { %11687 = vmatpush1.bf16.msra.mxu0 %v16608_v54  ;;  %v10170_v54 = vld [vmem:[#allocation18 + $0x260] sm:$0xff]  ;;  %v16840_v50 = vcombine.low %v10326_v56, %v10330_v35  ;;  %v10115_v3 = vld [vmem:[#allocation18 + $0xa8] sm:$0xff] }
 0x59f   : > { %11688 = vmatprep.subr.bf16.mxu0 %v16729_v38  ;;  %v10222_v38 = vld [vmem:[#allocation18 + $0x400] sm:$0xff]  ;;  %v16681_v20 = vcombine.high %v10166_v9, %v10170_v54 }
 0x5a0   : > { %11720 = vmatpush1.bf16.msra.mxu1 %v16768_v8  ;;  %v16737_v45 = vcombine.high %v10222_v38, %v10226_v58  ;;  %v16736_v31 = vcombine.low %v10222_v38, %v10226_v58  ;;  %v16848_v8 = vcombine.low %v10334_v17, %v10338_v51  ;;  %v10119_v58 = vld [vmem:[#allocation18 + $0xc8] sm:$0xff] }
 0x5a1   : > { %11721 = vmatprep.subr.bf16.mxu1 %v16761_v10  ;;  %v16841_v10 = vcombine.high %v10326_v56, %v10330_v35  ;;  %v10103_v17 = vld [vmem:[#allocation18 + $0x48] sm:$0xff] }
 0x5a2   : > { %11689 = vmatpush2.bf16.msra.mxu0 %v16728_v11  ;;  %v16680_v11 = vcombine.low %v10166_v9, %v10170_v54  ;;  %v16650_v9 = vcombine.low %v10135_v59, %v10139_v34  ;;  %v10107_v51 = vld [vmem:[#allocation18 + $0x68] sm:$0xff] }
 0x5a3   : > { %11690 = vmatprep.subr.bf16.mxu0 %v16721_v28  ;;  %v9834_v28 = vadd.f32 %v21624_v60, %v9793_v12  ;;  %v10147_v60 = vld [vmem:[#allocation18 + $0x1a8] sm:$0xff] }
 0x5a4   : > { %11722 = vmatpush1.bf16.msra.mxu1 %v16760_v53  ;;  %v10099_v56 = vld [vmem:[#allocation18 + $0x28] sm:$0xff] }
 0x5a5   : > { %11723 = vmatprep.subr.bf16.mxu1 %v16753_v43  ;;  %v10127_v43 = vld [vmem:[#allocation18 + $0x108] sm:$0xff] }
 0x5a6   : > { %11691 = vmatpush2.bf16.msra.mxu0 %v16720_v18  ;;  %v21636_v18 = vmax.f32 %v9834_v28, 0.0  ;;  %v16642_v49 = vcombine.low %v10127_v43, %v10131_v63  ;;  %v19413_v28 = vld [vmem:[#allocation16] sm:$0xf] }
 0x5a7   : > { %11692 = vmatprep.subr.bf16.mxu0 %v16713_v57  ;;  %v16667_v57 = vcombine.high %v10151_v15, %v10155_v14  ;;  %v7561_v15 = vrot.slane %v19413_v28, %v20342_v30  ;;  %v16627_v14 = vcombine.high %v10111_v47, %v10115_v3 }
 0x5a8   : > { %11724 = vmatpush1.bf16.msra.mxu1 %v16752_v44  ;;  %22988 = vst [vmem:[#allocation41_spill] sm:$0xff] %v21636_v18  ;;  %v10314_v44 = vld [vmem:[#allocation18 + $0x6e0] sm:$0xff] }
 0x5a9   : > { %11725 = vmatprep.subr.bf16.mxu1 %v16745_v2  ;;  %v16643_v2 = vcombine.high %v10127_v43, %v10131_v63  ;;  %v10211_v43 = vld [vmem:[#allocation18 + $0x3a8] sm:$0xff] }
 0x5aa   : > { %11693 = vmatpush2.bf16.msra.mxu0 %v16712_v39  ;;  %v21640_v39 = vpack.c.bf16 %v21636_v18, %v21636_v18 }
 0x5ab   : > { %11694 = vmatprep.subr.bf16.mxu0 %v16705_v25  ;;  %v16659_v25 = vcombine.high %v10143_v23, %v10147_v60 }
 0x5ac   : > { %11726 = vmatpush1.bf16.msra.mxu1 %v16744_v62  ;;  %v10306_v62 = vld [vmem:[#allocation18 + $0x6a0] sm:$0xff] }
 0x5ad   : > { %11727 = vmatprep.subr.bf16.mxu1 %v16737_v45 }
 0x5ae   : > { %11695 = vmatpush2.bf16.msra.mxu0 %v16704_v32  ;;  %v10322_v32 = vld [vmem:[#allocation18 + $0x720] sm:$0xff] }
 0x5af   : > { %11696 = vmatprep.subr.bf16.mxu0 %v16697_v7  ;;  %v16658_v7 = vcombine.low %v10143_v23, %v10147_v60  ;;  %v16833_v29 = vcombine.high %v10318_v27, %v10322_v32  ;;  %v16832_v38 = vcombine.low %v10318_v27, %v10322_v32  ;;  %v16619_v23 = vcombine.high %v10103_v17, %v10107_v51 }
 0x5b0   : > { %11728 = vmatpush1.bf16.msra.mxu1 %v16736_v31 }
 0x5b1   : > { %11729 = vmatprep.subr.bf16.mxu1 %v16857_v5 }
 0x5b2   : > { %11697 = vmatpush2.bf16.msra.mxu0 %v16696_v55 }
 0x5b3   : > { %11698 = vmatprep.subr.bf16.mxu0 %v16689_v16  ;;  %v10310_v16 = vld [vmem:[#allocation18 + $0x6c0] sm:$0xff] }
 0x5b4   : > { %11730 = vmatpush2.bf16.msra.mxu1 %v16856_v36  ;;  %v16825_v12 = vcombine.high %v10310_v16, %v10314_v44  ;;  %v16824_v45 = vcombine.low %v10310_v16, %v10314_v44  ;;  %v10290_v16 = vld [vmem:[#allocation18 + $0x620] sm:$0xff] }
 0x5b5   : > { %11731 = vmatprep.subr.bf16.mxu1 %v16849_v19  ;;  %v10095_v19 = vld [vmem:[#allocation18 + $0x8] sm:$0xff] }
 0x5b6   : > { %11699 = vmatpush2.bf16.msra.mxu0 %v16688_v33  ;;  %v10123_v33 = vld [vmem:[#allocation18 + $0xe8] sm:$0xff]  ;;  %v16611_v59 = vcombine.high %v10095_v19, %v10099_v56  ;;  %v16610_v32 = vcombine.low %v10095_v19, %v10099_v56 }
 0x5b7   : > { %11700 = vmatprep.subr.bf16.mxu0 %v16681_v20  ;;  %v10302_v20 = vld [vmem:[#allocation18 + $0x680] sm:$0xff]  ;;  %v16635_v6 = vcombine.high %v10119_v58, %v10123_v33  ;;  %v16634_v31 = vcombine.low %v10119_v58, %v10123_v33  ;;  %v10163_v19 = vld [vmem:[#allocation18 + $0x228] sm:$0xff] }
 0x5b8   : > { %11732 = vmatpush2.bf16.msra.mxu1 %v16848_v8  ;;  %v16816_v5 = vcombine.low %v10302_v20, %v10306_v62 }
 0x5b9   : > { %11733 = vmatprep.subr.bf16.mxu1 %v16841_v10  ;;  %v10215_v10 = vld [vmem:[#allocation18 + $0x3c8] sm:$0xff] }
 0x5ba   : > { %11701 = vmatpush2.bf16.msra.mxu0 %v16680_v11  ;;  %v16817_v11 = vcombine.high %v10302_v20, %v10306_v62  ;;  %v10203_v20 = vld [vmem:[#allocation18 + $0x368] sm:$0xff] }
 0x5bb   : > { %11702 = vmatprep.subr.bf16.mxu0 %v16673_v0  ;;  %v7557_v0 = vrot.slane %v19413_v28, %v20339_v26  ;;  %v10183_v28 = vld [vmem:[#allocation18 + $0x2c8] sm:$0xff] }
 0x5bc   : > { %11734 = vmatpush2.bf16.msra.mxu1 %v16840_v50  ;;  %v10298_v50 = vld [vmem:[#allocation18 + $0x660] sm:$0xff] }
 0x5bd   : > { %11735 = vmatprep.subr.bf16.mxu1 %v16833_v29 }
 0x5be   : > { %11703 = vmatpush2.bf16.msra.mxu0 %v16672_v21 }
 0x5bf   : > { %11754 = vmatprep.subr.bf16.mxu0 %v16667_v57  ;;  %v16626_v57 = vcombine.low %v10111_v47, %v10115_v3  ;;  %v10195_v47 = vld [vmem:[#allocation18 + $0x328] sm:$0xff] }
 0x5c0   : > { %11736 = vmatpush2.bf16.msra.mxu1 %v16832_v38 }
 0x5c1   : > { %v9874_v13 = vpop.f32.mrf.mxu0  ;;  %11705 = vmatmul.mubr.bf16.vlgmr.msra.gmra.mxu0 %v21640_v39  ;;  %11737 = vmatprep.subr.bf16.mxu1 %v16825_v12  ;;  %v10199_v12 = vld [vmem:[#allocation18 + $0x348] sm:$0xff] }
 0x5c2   : > { %11755 = vmatpush1.bf16.msra.mxu0 %v16666_v1  ;;  %11786 = vmatprep.mubr.bf16.mxu0 %v21630_v61  ;;  %v9875_v21 = vadd.f32 %v9874_v13, %v7557_v0  ;;  %v10219_v13 = vld [vmem:[#allocation18 + $0x3e8] sm:$0xff]  ;;  %v16714_v3 = vcombine.low %v10199_v12, %v10203_v20 }
 0x5c3   : > { %v9876_v53 = vpop.f32.mrf.mxu0  ;;  %11756 = vmatprep.subr.bf16.mxu0 %v16659_v25  ;;  %v16618_v25 = vcombine.low %v10103_v17, %v10107_v51  ;;  %v10187_v0 = vld [vmem:[#allocation18 + $0x2e8] sm:$0xff] }
 0x5c4   : > { %11738 = vmatpush2.bf16.msra.mxu1 %v16824_v45  ;;  %v9877_v36 = vadd.f32 %v9876_v53, %v7561_v15  ;;  %v10207_v53 = vld [vmem:[#allocation18 + $0x388] sm:$0xff]  ;;  %v16699_v15 = vcombine.high %v10183_v28, %v10187_v0  ;;  %v16698_v17 = vcombine.low %v10183_v28, %v10187_v0  ;;  %v10108_v28 = vld [vmem:[#allocation18 + $0x70] sm:$0xff] }
 0x5c5   : > { %v9878_v55 = vpop.f32.mrf.mxu0  ;;  %11739 = vmatprep.subr.bf16.mxu1 %v16817_v11  ;;  %v16723_v38 = vcombine.high %v10207_v53, %v10211_v43  ;;  %v10191_v45 = vld [vmem:[#allocation18 + $0x308] sm:$0xff] }
 0x5c6   : > { %11757 = vmatpush1.bf16.msra.mxu0 %v16658_v7  ;;  %v16731_v7 = vcombine.high %v10215_v10, %v10219_v13  ;;  %v10286_v55 = vld [vmem:[#allocation18 + $0x600] sm:$0xff]  ;;  %v16707_v11 = vcombine.high %v10191_v45, %v10195_v47 }
 0x5c7   : > { %v9879_v54 = vpop.f32.mrf.mxu0  ;;  %11758 = vmatprep.subr.bf16.mxu0 %v16651_v37  ;;  %v10294_v37 = vld [vmem:[#allocation18 + $0x640] sm:$0xff]  ;;  %v16801_v44 = vcombine.high %v10286_v55, %v10290_v16  ;;  %v16800_v58 = vcombine.low %v10286_v55, %v10290_v16 }
 0x5c8   : > { %11740 = vmatpush2.bf16.msra.mxu1 %v16816_v5  ;;  %v16808_v63 = vcombine.low %v10294_v37, %v10298_v50  ;;  %v16809_v29 = vcombine.high %v10294_v37, %v10298_v50  ;;  %v16730_v54 = vcombine.low %v10215_v10, %v10219_v13  ;;  %v10179_v5 = vld [vmem:[#allocation18 + $0x2a8] sm:$0xff]  ;;  %v10144_v13 = vld [vmem:[#allocation18 + $0x190] sm:$0xff] }
 0x5c9   : > { %v10140_v37 = vld [vmem:[#allocation18 + $0x170] sm:$0xff] }
 0x5ca   : > { %11759 = vmatpush1.bf16.msra.mxu0 %v16650_v9  ;;  %v21650_v9 = vld [vmem:[#allocation18 + $0x5c8] sm:$0xff]  ;;  %11741 = vmatprep.subr.bf16.mxu1 %v16809_v29 }
 0x5cb   : > { %11760 = vmatprep.subr.bf16.mxu0 %v16643_v2  ;;  %v21652_v2 = vld [vmem:[#allocation18 + $0x5e8] sm:$0xff] }
 0x5cc   : > { %11742 = vmatpush2.bf16.msra.mxu1 %v16808_v63  ;;  %v16794_v33 = vcombine.low %v21650_v9, %v21652_v2  ;;  %v16795_v62 = vcombine.high %v21650_v9, %v21652_v2  ;;  %v10193_v2 = vld [vmem:[#allocation18 + $0x318] sm:$0xff] }
 0x5cd   : > { %11743 = vmatprep.subr.bf16.mxu1 %v16801_v44  ;;  %v10128_v44 = vld [vmem:[#allocation18 + $0x110] sm:$0xff] }
 0x5ce   : > { %11761 = vmatpush1.bf16.msra.mxu0 %v16642_v49  ;;  %v16722_v49 = vcombine.low %v10207_v53, %v10211_v43  ;;  %v10136_v53 = vld [vmem:[#allocation18 + $0x150] sm:$0xff] }
 0x5cf   : > { %11762 = vmatprep.subr.bf16.mxu0 %v16635_v6  ;;  %v16715_v6 = vcombine.high %v10199_v12, %v10203_v20  ;;  %v16653_v55 = vcombine.high %v10136_v53, %v10140_v37 }
 0x5d0   : > { %11744 = vmatpush2.bf16.msra.mxu1 %v16800_v58  ;;  %v16652_v58 = vcombine.low %v10136_v53, %v10140_v37  ;;  %v10196_v53 = vld [vmem:[#allocation18 + $0x330] sm:$0xff] }
 0x5d1   : > { %11795 = vmatprep.subr.bf16.mxu1 %v16795_v62  ;;  %v10124_v62 = vld [vmem:[#allocation18 + $0xf0] sm:$0xff] }
 0x5d2   : > { %11763 = vmatpush1.bf16.msra.mxu0 %v16634_v31  ;;  %v16706_v31 = vcombine.low %v10191_v45, %v10195_v47  ;;  %v10112_v45 = vld [vmem:[#allocation18 + $0x90] sm:$0xff] }
 0x5d3   : > { %11764 = vmatprep.subr.bf16.mxu0 %v16627_v14  ;;  %v9915_v60 = vpop.f32.mrf.mxu1  ;;  %v10175_v14 = vld [vmem:[#allocation18 + $0x288] sm:$0xff]  ;;  %v10116_v47 = vld [vmem:[#allocation18 + $0xb0] sm:$0xff] }
 0x5d4   : > { %v21646_v35 = vadd.f32 %v9915_v60, %v9875_v21  ;;  %v16691_v51 = vcombine.high %v10175_v14, %v10179_v5  ;;  %v10167_v21 = vld [vmem:[#allocation18 + $0x248] sm:$0xff]  ;;  %v16628_v0 = vcombine.low %v10112_v45, %v10116_v47 }
 0x5d5   : > { %v9917_v1 = vpop.f32.mrf.mxu1  ;;  %v10159_v60 = vld [vmem:[#allocation18 + $0x208] sm:$0xff] }
 0x5d6   : > { %11765 = vmatpush1.bf16.msra.mxu0 %v16626_v57  ;;  %v21648_v8 = vadd.f32 %v9917_v1, %v9877_v36  ;;  %v10171_v57 = vld [vmem:[#allocation18 + $0x268] sm:$0xff]  ;;  %v16690_v36 = vcombine.low %v10175_v14, %v10179_v5  ;;  %v16675_v1 = vcombine.high %v10159_v60, %v10163_v19  ;;  %v10096_v14 = vld [vmem:[#allocation18 + $0x10] sm:$0xff] }
 0x5d7   : > { %11766 = vmatprep.subr.bf16.mxu0 %v16619_v23  ;;  %v9919_v34 = vpop.f32.mrf.mxu1  ;;  %v16683_v23 = vcombine.high %v10167_v21, %v10171_v57  ;;  %v16682_v56 = vcombine.low %v10167_v21, %v10171_v57  ;;  %v10100_v5 = vld [vmem:[#allocation18 + $0x30] sm:$0xff] }
 0x5d8   : > { %v16674_v34 = vcombine.low %v10159_v60, %v10163_v19  ;;  %v16613_v21 = vcombine.high %v10096_v14, %v10100_v5  ;;  %v16612_v19 = vcombine.low %v10096_v14, %v10100_v5  ;;  %v10149_v14 = vld [vmem:[#allocation18 + $0x1b8] sm:$0xff] }
 0x5d9   : > { %v9920_v27 = vpop.f32.mrf.mxu1 }
 0x5da   : > { %11767 = vmatpush1.bf16.msra.mxu0 %v16618_v25  ;;  %v10152_v25 = vld [vmem:[#allocation18 + $0x1d0] sm:$0xff] }
 0x5db   : > { %11768 = vmatprep.subr.bf16.mxu0 %v16611_v59  ;;  %v10156_v59 = vld [vmem:[#allocation18 + $0x1f0] sm:$0xff] }
 0x5dc   : > { %v16669_v10 = vcombine.high %v10152_v25, %v10156_v59  ;;  %v10148_v27 = vld [vmem:[#allocation18 + $0x1b0] sm:$0xff] }
 0x5dd   : > { %v16660_v63 = vcombine.low %v10144_v13, %v10148_v27 }
 0x5de   : > { %11769 = vmatpush1.bf16.msra.mxu0 %v16610_v32  ;;  %v16668_v32 = vcombine.low %v10152_v25, %v10156_v59  ;;  %v10212_v25 = vld [vmem:[#allocation18 + $0x3b0] sm:$0xff] }
 0x5df   : > { %11770 = vmatprep.subr.bf16.mxu0 %v16731_v7  ;;  %v16661_v7 = vcombine.high %v10144_v13, %v10148_v27  ;;  %v10204_v13 = vld [vmem:[#allocation18 + $0x370] sm:$0xff] }
 0x5e2   : > { %11771 = vmatpush2.bf16.msra.mxu0 %v16730_v54  ;;  %v10132_v54 = vld [vmem:[#allocation18 + $0x130] sm:$0xff] }
 0x5e3   : > { %11772 = vmatprep.subr.bf16.mxu0 %v16723_v38  ;;  %v16645_v20 = vcombine.high %v10128_v44, %v10132_v54 }
 0x5e6   : > { %11773 = vmatpush2.bf16.msra.mxu0 %v16722_v49  ;;  %v16644_v49 = vcombine.low %v10128_v44, %v10132_v54  ;;  %v10176_v54 = vld [vmem:[#allocation18 + $0x290] sm:$0xff] }
 0x5e7   : > { %11774 = vmatprep.subr.bf16.mxu0 %v16715_v6 }
 0x5ea   : > { %11775 = vmatpush2.bf16.msra.mxu0 %v16714_v3 }
 0x5eb   : > { %11776 = vmatprep.subr.bf16.mxu0 %v16707_v11  ;;  %v10104_v11 = vld [vmem:[#allocation18 + $0x50] sm:$0xff] }
 0x5ee   : > { %11777 = vmatpush2.bf16.msra.mxu0 %v16706_v31  ;;  %v16621_v31 = vcombine.high %v10104_v11, %v10108_v28 }
 0x5ef   : > { %11778 = vmatprep.subr.bf16.mxu0 %v16699_v15 }
 0x5f2   : > { %11779 = vmatpush2.bf16.msra.mxu0 %v16698_v17 }
 0x5f3   : > { %11780 = vmatprep.subr.bf16.mxu0 %v16691_v51  ;;  %v16620_v51 = vcombine.low %v10104_v11, %v10108_v28  ;;  %v10157_v11 = vld [vmem:[#allocation18 + $0x1f8] sm:$0xff] }
 0x5f6   : > { %11781 = vmatpush2.bf16.msra.mxu0 %v16690_v36  ;;  %v10216_v36 = vld [vmem:[#allocation18 + $0x3d0] sm:$0xff] }
 0x5f7   : > { %11782 = vmatprep.subr.bf16.mxu0 %v16683_v23  ;;  %v10220_v23 = vld [vmem:[#allocation18 + $0x3f0] sm:$0xff] }
 0x5f8   : > { %v16732_v59 = vcombine.low %v10216_v36, %v10220_v23 }
 0x5fa   : > { %11783 = vmatpush2.bf16.msra.mxu0 %v16682_v56  ;;  %v16733_v56 = vcombine.high %v10216_v36, %v10220_v23 }
 0x5fb   : > { %11784 = vmatprep.subr.bf16.mxu0 %v16675_v1  ;;  %v10208_v1 = vld [vmem:[#allocation18 + $0x390] sm:$0xff] }
 0x5fc   : > { %v16724_v27 = vcombine.low %v10208_v1, %v10212_v25 }
 0x5fe   : > { %11785 = vmatpush2.bf16.msra.mxu0 %v16674_v34  ;;  %v16725_v34 = vcombine.high %v10208_v1, %v10212_v25  ;;  %v10133_v1 = vld [vmem:[#allocation18 + $0x138] sm:$0xff] }
 0x5ff   : > { %11836 = vmatprep.subr.bf16.mxu0 %v16669_v10  ;;  %v10200_v10 = vld [vmem:[#allocation18 + $0x350] sm:$0xff] }
 0x600   : > { %v16716_v37 = vcombine.low %v10200_v10, %v10204_v13 }
 0x601   : > { %v9956_v50 = vpop.f32.mrf.mxu0  ;;  %11787 = vmatmul.mubr.bf16.vlgmr.msra.gmra.mxu0 %v21640_v39 }
 0x602   : > { %v21660_v43 = vadd.f32 %v9956_v50, %v21646_v35  ;;  %11837 = vmatpush1.bf16.msra.mxu0 %v16668_v32  ;;  %11868 = vmatprep.mubr.bf16.mxu0 %v21630_v61  ;;  %v10120_v35 = vld [vmem:[#allocation18 + $0xd0] sm:$0xff]  ;;  %v16717_v32 = vcombine.high %v10200_v10, %v10204_v13  ;;  %v10121_v13 = vld [vmem:[#allocation18 + $0xd8] sm:$0xff] }
 0x603   : > { %v9958_v29 = vpop.f32.mrf.mxu0  ;;  %11838 = vmatprep.subr.bf16.mxu0 %v16661_v7  ;;  %v16637_v6 = vcombine.high %v10120_v35, %v10124_v62  ;;  %v16636_v3 = vcombine.low %v10120_v35, %v10124_v62  ;;  %v10192_v7 = vld [vmem:[#allocation18 + $0x310] sm:$0xff] }
 0x604   : > { %v21664_v16 = vadd.f32 %v9958_v29, %v21648_v8  ;;  %v16629_v8 = vcombine.high %v10112_v45, %v10116_v47  ;;  %v16709_v50 = vcombine.high %v10192_v7, %v10196_v53  ;;  %v10188_v29 = vld [vmem:[#allocation18 + $0x2f0] sm:$0xff] }
 0x605   : > { %v9960_v38 = vpop.f32.mrf.mxu0  ;;  %v10172_v35 = vld [vmem:[#allocation18 + $0x270] sm:$0xff] }
 0x606   : > { %11839 = vmatpush1.bf16.msra.mxu0 %v16660_v63  ;;  %v10184_v63 = vld [vmem:[#allocation18 + $0x2d0] sm:$0xff] }
 0x607   : > { %v9961_v12 = vpop.f32.mrf.mxu0  ;;  %11840 = vmatprep.subr.bf16.mxu0 %v16653_v55  ;;  %v16708_v55 = vcombine.low %v10192_v7, %v10196_v53  ;;  %v16701_v44 = vcombine.high %v10184_v63, %v10188_v29  ;;  %v10180_v38 = vld [vmem:[#allocation18 + $0x2b0] sm:$0xff]  ;;  %v10113_v53 = vld [vmem:[#allocation18 + $0x98] sm:$0xff] }
 0x608   : > { %v16693_v12 = vcombine.high %v10176_v54, %v10180_v38  ;;  %v16692_v62 = vcombine.low %v10176_v54, %v10180_v38  ;;  %v10164_v45 = vld [vmem:[#allocation18 + $0x230] sm:$0xff] }
 0x60a   : > { %11841 = vmatpush1.bf16.msra.mxu0 %v16652_v58  ;;  %v16700_v58 = vcombine.low %v10184_v63, %v10188_v29  ;;  %v10105_v29 = vld [vmem:[#allocation18 + $0x58] sm:$0xff] }
 0x60b   : > { %11842 = vmatprep.subr.bf16.mxu0 %v16645_v20  ;;  %v10168_v20 = vld [vmem:[#allocation18 + $0x250] sm:$0xff] }
 0x60c   : > { %v16684_v47 = vcombine.low %v10168_v20, %v10172_v35 }
 0x60e   : > { %11843 = vmatpush1.bf16.msra.mxu0 %v16644_v49  ;;  %v16685_v49 = vcombine.high %v10168_v20, %v10172_v35  ;;  %v10097_v35 = vld [vmem:[#allocation18 + $0x18] sm:$0xff] }
 0x60f   : > { %11844 = vmatprep.subr.bf16.mxu0 %v16637_v6  ;;  %v10160_v6 = vld [vmem:[#allocation18 + $0x210] sm:$0xff] }
 0x610   : > { %v16676_v28 = vcombine.low %v10160_v6, %v10164_v45 }
 0x612   : > { %11845 = vmatpush1.bf16.msra.mxu0 %v16636_v3  ;;  %v16677_v3 = vcombine.high %v10160_v6, %v10164_v45 }
 0x613   : > { %11846 = vmatprep.subr.bf16.mxu0 %v16629_v8  ;;  %v21666_v15 = vpop.f32.mrf.mxu1  ;;  %v10153_v8 = vld [vmem:[#allocation18 + $0x1d8] sm:$0xff] }
 0x614   : > { %v16670_v5 = vcombine.low %v10153_v8, %v10157_v11 }
 0x615   : > { %v21668_v17 = vpop.f32.mrf.mxu1 }
 0x616   : > { %11847 = vmatpush1.bf16.msra.mxu0 %v16628_v0  ;;  %v16671_v0 = vcombine.high %v10153_v8, %v10157_v11  ;;  %v10275_v8 = vld [vmem:[#allocation18 + $0x5a8] sm:$0xff]  ;;  %v10217_v11 = vld [vmem:[#allocation18 + $0x3d8] sm:$0xff] }
 0x617   : > { %11848 = vmatprep.subr.bf16.mxu0 %v16621_v31  ;;  %v10001_v57 = vpop.f32.mrf.mxu1  ;;  %v10145_v31 = vld [vmem:[#allocation18 + $0x198] sm:$0xff] }
 0x618   : > { %v10141_v57 = vld [vmem:[#allocation18 + $0x178] sm:$0xff]  ;;  %v16662_v23 = vcombine.low %v10145_v31, %v10149_v14 }
 0x619   : > { %v10002_v60 = vpop.f32.mrf.mxu1 }
 0x61a   : > { %11849 = vmatpush1.bf16.msra.mxu0 %v16620_v51  ;;  %v16663_v51 = vcombine.high %v10145_v31, %v10149_v14 }
 0x61b   : > { %11850 = vmatprep.subr.bf16.mxu0 %v16613_v21  ;;  %v10137_v21 = vld [vmem:[#allocation18 + $0x158] sm:$0xff] }
 0x61e   : > { %11851 = vmatpush1.bf16.msra.mxu0 %v16612_v19  ;;  %v16655_v19 = vcombine.high %v10137_v21, %v10141_v57 }
 0x61f   : > { %11852 = vmatprep.subr.bf16.mxu0 %v16733_v56  ;;  %v10129_v56 = vld [vmem:[#allocation18 + $0x118] sm:$0xff] }
 0x620   : > { %v16647_v10 = vcombine.high %v10129_v56, %v10133_v1 }
 0x622   : > { %11853 = vmatpush2.bf16.msra.mxu0 %v16732_v59  ;;  %v16654_v59 = vcombine.low %v10137_v21, %v10141_v57  ;;  %v10209_v57 = vld [vmem:[#allocation18 + $0x398] sm:$0xff] }
 0x623   : > { %11854 = vmatprep.subr.bf16.mxu0 %v16725_v34 }
 0x626   : > { %11855 = vmatpush2.bf16.msra.mxu0 %v16724_v27  ;;  %v10125_v27 = vld [vmem:[#allocation18 + $0xf8] sm:$0xff] }
 0x627   : > { %11856 = vmatprep.subr.bf16.mxu0 %v16717_v32  ;;  %v16646_v32 = vcombine.low %v10129_v56, %v10133_v1  ;;  %v16639_v7 = vcombine.high %v10121_v13, %v10125_v27 }
 0x62a   : > { %11857 = vmatpush2.bf16.msra.mxu0 %v16716_v37  ;;  %v16638_v37 = vcombine.low %v10121_v13, %v10125_v27  ;;  %v10259_v13 = vld [vmem:[#allocation18 + $0x528] sm:$0xff] }
 0x62b   : > { %11858 = vmatprep.subr.bf16.mxu0 %v16709_v50  ;;  %v9998_v50 = vadd.f32 %v21666_v15, %v21660_v43 }
 0x62e   : > { %11859 = vmatpush2.bf16.msra.mxu0 %v16708_v55  ;;  %v10109_v55 = vld [vmem:[#allocation18 + $0x78] sm:$0xff] }
 0x62f   : > { %11860 = vmatprep.subr.bf16.mxu0 %v16701_v44  ;;  %v10000_v44 = vadd.f32 %v21668_v17, %v21664_v16  ;;  %v16622_v43 = vcombine.low %v10105_v29, %v10109_v55  ;;  %v10271_v16 = vld [vmem:[#allocation18 + $0x588] sm:$0xff] }
 0x630   : > { %v16786_v56 = vcombine.low %v10271_v16, %v10275_v8 }
 0x632   : > { %11861 = vmatpush2.bf16.msra.mxu0 %v16700_v58 }
 0x633   : > { %11862 = vmatprep.subr.bf16.mxu0 %v16693_v12  ;;  %v16623_v12 = vcombine.high %v10105_v29, %v10109_v55  ;;  %v10185_v55 = vld [vmem:[#allocation18 + $0x2d8] sm:$0xff] }
 0x636   : > { %11863 = vmatpush2.bf16.msra.mxu0 %v16692_v62  ;;  %v10101_v62 = vld [vmem:[#allocation18 + $0x38] sm:$0xff] }
 0x637   : > { %11864 = vmatprep.subr.bf16.mxu0 %v16685_v49  ;;  %v16615_v45 = vcombine.high %v10097_v35, %v10101_v62  ;;  %v16614_v31 = vcombine.low %v10097_v35, %v10101_v62  ;;  %v10177_v62 = vld [vmem:[#allocation18 + $0x298] sm:$0xff] }
 0x63a   : > { %11865 = vmatpush2.bf16.msra.mxu0 %v16684_v47 }
 0x63b   : > { %11866 = vmatprep.subr.bf16.mxu0 %v16677_v3 }
 0x63e   : > { %11867 = vmatpush2.bf16.msra.mxu0 %v16676_v28  ;;  %v10221_v28 = vld [vmem:[#allocation18 + $0x3f8] sm:$0xff] }
 0x63f   : > { %11918 = vmatprep.subr.bf16.mxu0 %v16671_v0  ;;  %v16735_v21 = vcombine.high %v10217_v11, %v10221_v28 }
 0x641   : > { %v10038_v36 = vpop.f32.mrf.mxu0  ;;  %11869 = vmatmul.mubr.bf16.vlgmr.msra.gmra.mxu0 %v21640_v39 }
 0x642   : > { %11919 = vmatpush1.bf16.msra.mxu0 %v16670_v5  ;;  %11950 = vmatprep.mubr.bf16.mxu0 %v21630_v61  ;;  %v10117_v61 = vld [vmem:[#allocation18 + $0xb8] sm:$0xff]  ;;  %v10039_v54 = vadd.f32 %v10038_v36, %v9998_v50 }
 0x643   : > { %v10040_v60 = vpop.f32.mrf.mxu0  ;;  %11920 = vmatprep.subr.bf16.mxu0 %v16663_v51  ;;  %v16631_v63 = vcombine.high %v10113_v53, %v10117_v61  ;;  %v16630_v38 = vcombine.low %v10113_v53, %v10117_v61  ;;  %v16787_v51 = vcombine.high %v10271_v16, %v10275_v8  ;;  %v10213_v36 = vld [vmem:[#allocation18 + $0x3b8] sm:$0xff]  ;;  %v10247_v53 = vld [vmem:[#allocation18 + $0x4c8] sm:$0xff] }
 0x644   : > { %v10041_v58 = vadd.f32 %v10040_v60, %v10000_v44  ;;  %v10267_v60 = vld [vmem:[#allocation18 + $0x568] sm:$0xff]  ;;  %v16727_v1 = vcombine.high %v10209_v57, %v10213_v36  ;;  %v16726_v27 = vcombine.low %v10209_v57, %v10213_v36  ;;  %v10189_v44 = vld [vmem:[#allocation18 + $0x2f8] sm:$0xff] }
 0x645   : > { %v10042_v25 = vpop.f32.mrf.mxu0  ;;  %v10251_v61 = vld [vmem:[#allocation18 + $0x4e8] sm:$0xff]  ;;  %v10169_v8 = vld [vmem:[#allocation18 + $0x258] sm:$0xff] }
 0x646   : > { %11921 = vmatpush1.bf16.msra.mxu0 %v16662_v23  ;;  %v10263_v23 = vld [vmem:[#allocation18 + $0x548] sm:$0xff]  ;;  %v16763_v29 = vcombine.high %v10247_v53, %v10251_v61  ;;  %v10161_v36 = vld [vmem:[#allocation18 + $0x218] sm:$0xff] }
 0x647   : > { %v10043_v34 = vpop.f32.mrf.mxu0  ;;  %11922 = vmatprep.subr.bf16.mxu0 %v16655_v19  ;;  %v16734_v19 = vcombine.low %v10217_v11, %v10221_v28  ;;  %v16779_v25 = vcombine.high %v10263_v23, %v10267_v60  ;;  %v10173_v11 = vld [vmem:[#allocation18 + $0x278] sm:$0xff]  ;;  %v10223_v28 = vld [vmem:[#allocation18 + $0x408] sm:$0xff] }
 0x648   : > { %v10205_v34 = vld [vmem:[#allocation18 + $0x378] sm:$0xff] }
 0x64a   : > { %11923 = vmatpush1.bf16.msra.mxu0 %v16654_v59  ;;  %v10201_v59 = vld [vmem:[#allocation18 + $0x358] sm:$0xff] }
 0x64b   : > { %11924 = vmatprep.subr.bf16.mxu0 %v16647_v10  ;;  %v10255_v10 = vld [vmem:[#allocation18 + $0x508] sm:$0xff] }
 0x64c   : > { %v16771_v9 = vcombine.high %v10255_v10, %v10259_v13  ;;  %v16770_v50 = vcombine.low %v10255_v10, %v10259_v13  ;;  %v10339_v10 = vld [vmem:[#allocation18 + $0x7a8] sm:$0xff] }
 0x64e   : > { %11925 = vmatpush1.bf16.msra.mxu0 %v16646_v32  ;;  %v16778_v32 = vcombine.low %v10263_v23, %v10267_v60  ;;  %v10165_v23 = vld [vmem:[#allocation18 + $0x238] sm:$0xff]  ;;  %v10343_v60 = vld [vmem:[#allocation18 + $0x7c8] sm:$0xff] }
 0x64f   : > { %11926 = vmatprep.subr.bf16.mxu0 %v16639_v7  ;;  %v16719_v7 = vcombine.high %v10201_v59, %v10205_v34  ;;  %v16678_v13 = vcombine.low %v10161_v36, %v10165_v23 }
 0x652   : > { %11927 = vmatpush1.bf16.msra.mxu0 %v16638_v37  ;;  %v16718_v37 = vcombine.low %v10201_v59, %v10205_v34  ;;  %v10335_v34 = vld [vmem:[#allocation18 + $0x788] sm:$0xff] }
 0x653   : > { %11928 = vmatprep.subr.bf16.mxu0 %v16631_v63  ;;  %v10079_v20 = vpop.f32.mrf.mxu1 }
 0x654   : > { %v10080_v49 = vadd.f32 %v10079_v20, %v10039_v54  ;;  %v10239_v54 = vld [vmem:[#allocation18 + $0x488] sm:$0xff]  ;;  %v16703_v20 = vcombine.high %v10185_v55, %v10189_v44 }
 0x655   : > { %v10081_v6 = vpop.f32.mrf.mxu1 }
 0x656   : > { %11929 = vmatpush1.bf16.msra.mxu0 %v16630_v38  ;;  %v10082_v15 = vadd.f32 %v10081_v6, %v10041_v58  ;;  %v21676_v47 = vmax.f32 %v10080_v49, 0.0  ;;  %v10243_v38 = vld [vmem:[#allocation18 + $0x4a8] sm:$0xff]  ;;  %v10181_v49 = vld [vmem:[#allocation18 + $0x2b8] sm:$0xff] }
 0x657   : > { %11930 = vmatprep.subr.bf16.mxu0 %v16623_v12  ;;  %v10083_v3 = vpop.f32.mrf.mxu1  ;;  %v16762_v12 = vcombine.low %v10247_v53, %v10251_v61  ;;  %v16755_v35 = vcombine.high %v10239_v54, %v10243_v38  ;;  %v10231_v6 = vld [vmem:[#allocation18 + $0x448] sm:$0xff] }
 0x658   : > { %22989 = vst [vmem:[#allocation68_spill] sm:$0xff] %v21676_v47  ;;  %v21678_v17 = vmax.f32 %v10082_v15, 0.0  ;;  %v21686_v5 = vpack.c.bf16 %v21676_v47, %v21676_v47  ;;  %v16702_v15 = vcombine.low %v10185_v55, %v10189_v44  ;;  %v16695_v3 = vcombine.high %v10177_v62, %v10181_v49  ;;  %v10319_v53 = vld [vmem:[#allocation18 + $0x708] sm:$0xff] }
 0x659   : > { %v10084_v0 = vpop.f32.mrf.mxu1  ;;  %v10323_v61 = vld [vmem:[#allocation18 + $0x728] sm:$0xff] }
 0x65a   : > { %22990 = vst [vmem:[#allocation69_spill] sm:$0xff] %v21678_v17  ;;  %11931 = vmatpush1.bf16.msra.mxu0 %v16622_v43  ;;  %v21682_v14 = vpack.c.bf16 %v21678_v17, %v21678_v17  ;;  %v10235_v43 = vld [vmem:[#allocation18 + $0x468] sm:$0xff] }
 0x65b   : > { %11932 = vmatprep.subr.bf16.mxu0 %v16615_v45  ;;  %v16754_v45 = vcombine.low %v10239_v54, %v10243_v38  ;;  %v16747_v16 = vcombine.high %v10231_v6, %v10235_v43  ;;  %v10227_v0 = vld [vmem:[#allocation18 + $0x428] sm:$0xff]  ;;  %v16834_v38 = vcombine.low %v10319_v53, %v10323_v61 }
 0x65c   : > { %11745 = vmatprep.mubr.bf16.mxu1 %v21682_v14  ;;  %v16739_v57 = vcombine.high %v10223_v28, %v10227_v0  ;;  %v10311_v55 = vld [vmem:[#allocation18 + $0x6c8] sm:$0xff] }
 0x65d   : > { %11746 = vmatmul.mubr.bf16.vlgmr.msra.gmra.mxu1 %v21686_v5  ;;  %v10315_v44 = vld [vmem:[#allocation18 + $0x6e8] sm:$0xff] }
 0x65e   : > { %11933 = vmatpush1.bf16.msra.mxu0 %v16614_v31  ;;  %11796 = vmatpush1.bf16.msra.mxu1 %v16794_v33  ;;  %v10197_v33 = vld [vmem:[#allocation18 + $0x338] sm:$0xff]  ;;  %v16694_v31 = vcombine.low %v10177_v62, %v10181_v49  ;;  %v16826_v62 = vcombine.low %v10311_v55, %v10315_v44  ;;  %v10295_v49 = vld [vmem:[#allocation18 + $0x648] sm:$0xff] }
 0x65f   : > { %11827 = vmatprep.mubr.bf16.mxu1 %v21682_v14  ;;  %11797 = vmatprep.subr.bf16.mxu1 %v16787_v51  ;;  %v16711_v63 = vcombine.high %v10193_v2, %v10197_v33  ;;  %v16710_v58 = vcombine.low %v10193_v2, %v10197_v33  ;;  %v16746_v51 = vcombine.low %v10231_v6, %v10235_v43  ;;  %v10299_v6 = vld [vmem:[#allocation18 + $0x668] sm:$0xff] }
 0x660   : > { %11934 = vmatprep.subr.bf16.mxu0 %v16735_v21  ;;  %v16687_v21 = vcombine.high %v10169_v8, %v10173_v11  ;;  %v16850_v2 = vcombine.low %v10335_v34, %v10339_v10 }
 0x662   : > { %11935 = vmatpush2.bf16.msra.mxu0 %v16734_v19  ;;  %11798 = vmatpush1.bf16.msra.mxu1 %v16786_v56  ;;  %v10347_v19 = vld [vmem:[#allocation18 + $0x7e8] sm:$0xff]  ;;  %v16686_v56 = vcombine.low %v10169_v8, %v10173_v11  ;;  %v10280_v11 = vld [vmem:[#allocation18 + $0x5d0] sm:$0xff] }
 0x663   : > { %11936 = vmatprep.subr.bf16.mxu0 %v16727_v1  ;;  %11799 = vmatprep.subr.bf16.mxu1 %v16779_v25  ;;  %v16738_v1 = vcombine.low %v10223_v28, %v10227_v0  ;;  %v16679_v25 = vcombine.high %v10161_v36, %v10165_v23  ;;  %v16859_v59 = vcombine.high %v10343_v60, %v10347_v19  ;;  %v10284_v28 = vld [vmem:[#allocation18 + $0x5f0] sm:$0xff] }
 0x664   : > { %v10264_v23 = vld [vmem:[#allocation18 + $0x550] sm:$0xff] }
 0x666   : > { %11937 = vmatpush2.bf16.msra.mxu0 %v16726_v27  ;;  %11800 = vmatpush1.bf16.msra.mxu1 %v16778_v32  ;;  %v16858_v27 = vcombine.low %v10343_v60, %v10347_v19  ;;  %v16851_v32 = vcombine.high %v10335_v34, %v10339_v10  ;;  %v10268_v60 = vld [vmem:[#allocation18 + $0x570] sm:$0xff] }
 0x667   : > { %11938 = vmatprep.subr.bf16.mxu0 %v16719_v7  ;;  %11801 = vmatprep.subr.bf16.mxu1 %v16771_v9  ;;  %v10327_v7 = vld [vmem:[#allocation18 + $0x748] sm:$0xff]  ;;  %v10248_v10 = vld [vmem:[#allocation18 + $0x4d0] sm:$0xff] }
 0x668   : > { %v10331_v9 = vld [vmem:[#allocation18 + $0x768] sm:$0xff] }
 0x669   : > { %v16843_v33 = vcombine.high %v10327_v7, %v10331_v9 }
 0x66a   : > { %11939 = vmatpush2.bf16.msra.mxu0 %v16718_v37  ;;  %11802 = vmatpush1.bf16.msra.mxu1 %v16770_v50  ;;  %v16842_v50 = vcombine.low %v10327_v7, %v10331_v9  ;;  %v10240_v7 = vld [vmem:[#allocation18 + $0x490] sm:$0xff] }
 0x66b   : > { %11940 = vmatprep.subr.bf16.mxu0 %v16711_v63  ;;  %11803 = vmatprep.subr.bf16.mxu1 %v16763_v29  ;;  %v16835_v29 = vcombine.high %v10319_v53, %v10323_v61  ;;  %v10244_v9 = vld [vmem:[#allocation18 + $0x4b0] sm:$0xff] }
 0x66c   : > { %v10232_v53 = vld [vmem:[#allocation18 + $0x450] sm:$0xff] }
 0x66d   : > { %v10236_v61 = vld [vmem:[#allocation18 + $0x470] sm:$0xff] }
 0x66e   : > { %11941 = vmatpush2.bf16.msra.mxu0 %v16710_v58  ;;  %11804 = vmatpush1.bf16.msra.mxu1 %v16762_v12  ;;  %v16827_v12 = vcombine.high %v10311_v55, %v10315_v44  ;;  %v10224_v55 = vld [vmem:[#allocation18 + $0x410] sm:$0xff] }
 0x66f   : > { %11942 = vmatprep.subr.bf16.mxu0 %v16703_v20  ;;  %11805 = vmatprep.subr.bf16.mxu1 %v16755_v35  ;;  %v10303_v20 = vld [vmem:[#allocation18 + $0x688] sm:$0xff]  ;;  %v10228_v44 = vld [vmem:[#allocation18 + $0x430] sm:$0xff] }
 0x670   : > { %v10307_v35 = vld [vmem:[#allocation18 + $0x6a8] sm:$0xff] }
 0x671   : > { %v16818_v43 = vcombine.low %v10303_v20, %v10307_v35 }
 0x672   : > { %11943 = vmatpush2.bf16.msra.mxu0 %v16702_v15  ;;  %11806 = vmatpush1.bf16.msra.mxu1 %v16754_v45  ;;  %v16811_v15 = vcombine.high %v10295_v49, %v10299_v6  ;;  %v10287_v45 = vld [vmem:[#allocation18 + $0x608] sm:$0xff] }
 0x673   : > { %11944 = vmatprep.subr.bf16.mxu0 %v16695_v3  ;;  %11807 = vmatprep.subr.bf16.mxu1 %v16747_v16  ;;  %v10291_v3 = vld [vmem:[#allocation18 + $0x628] sm:$0xff]  ;;  %v16810_v16 = vcombine.low %v10295_v49, %v10299_v6 }
 0x674   : > { %v16803_v8 = vcombine.high %v10287_v45, %v10291_v3  ;;  %v16802_v0 = vcombine.low %v10287_v45, %v10291_v3 }
 0x676   : > { %11945 = vmatpush2.bf16.msra.mxu0 %v16694_v31  ;;  %11808 = vmatpush1.bf16.msra.mxu1 %v16746_v51  ;;  %v16797_v31 = vcombine.high %v10280_v11, %v10284_v28  ;;  %v10272_v51 = vld [vmem:[#allocation18 + $0x590] sm:$0xff] }
 0x677   : > { %11946 = vmatprep.subr.bf16.mxu0 %v16687_v21  ;;  %11809 = vmatprep.subr.bf16.mxu1 %v16739_v57  ;;  %v10276_v21 = vld [vmem:[#allocation18 + $0x5b0] sm:$0xff]  ;;  %v16796_v57 = vcombine.low %v10280_v11, %v10284_v28 }
 0x678   : > { %v16789_v36 = vcombine.high %v10272_v51, %v10276_v21  ;;  %v16788_v19 = vcombine.low %v10272_v51, %v10276_v21  ;;  %v10312_v51 = vld [vmem:[#allocation18 + $0x6d0] sm:$0xff] }
 0x679   : > { %v10316_v21 = vld [vmem:[#allocation18 + $0x6f0] sm:$0xff] }
 0x67a   : > { %11947 = vmatpush2.bf16.msra.mxu0 %v16686_v56  ;;  %11810 = vmatpush1.bf16.msra.mxu1 %v16738_v1  ;;  %v16781_v56 = vcombine.high %v10264_v23, %v10268_v60  ;;  %v10256_v1 = vld [vmem:[#allocation18 + $0x510] sm:$0xff] }
 0x67b   : > { %11948 = vmatprep.subr.bf16.mxu0 %v16679_v25  ;;  %11811 = vmatprep.subr.bf16.mxu1 %v16859_v59  ;;  %v10260_v25 = vld [vmem:[#allocation18 + $0x530] sm:$0xff]  ;;  %v16780_v59 = vcombine.low %v10264_v23, %v10268_v60  ;;  %v16829_v60 = vcombine.high %v10312_v51, %v10316_v21 }
 0x67c   : > { %v16773_v34 = vcombine.high %v10256_v1, %v10260_v25 }
 0x67e   : > { %11949 = vmatpush2.bf16.msra.mxu0 %v16678_v13  ;;  %11812 = vmatpush2.bf16.msra.mxu1 %v16858_v27  ;;  %v10252_v13 = vld [vmem:[#allocation18 + $0x4f0] sm:$0xff]  ;;  %v16772_v27 = vcombine.low %v10256_v1, %v10260_v25 }
 0x67f   : > { %11813 = vmatprep.subr.bf16.mxu1 %v16851_v32  ;;  %v16765_v32 = vcombine.high %v10248_v10, %v10252_v13  ;;  %v18783_v1 = vld [vmem:[#allocation24 + $0xe0] ss:$16 sps:$4 sm:$0xff]   ;;  %v18785_v25 = vld [vmem:[#allocation24 + $0xe4] ss:$16 sps:$4 sm:$0xff]  }
 0x680   : > { %14988 = vmatprep.subr.bf16.mxu0 %v18785_v25  ;;  %v18800_v25 = vld [vmem:[#allocation24 + $0x44] ss:$16 sps:$4 sm:$0xff]  }
 0x681   : > { %v21694_v37 = vpop.f32.mrf.mxu0  ;;  %11951 = vmatmul.mubr.bf16.vlgmr.msra.gmra.mxu0 %v21640_v39  ;;  %v16819_v39 = vcombine.high %v10303_v20, %v10307_v35  ;;  %v16740_v20 = vcombine.low %v10224_v55, %v10228_v44 }
 0x682   : > { %11814 = vmatpush2.bf16.msra.mxu1 %v16850_v2  ;;  %v16764_v2 = vcombine.low %v10248_v10, %v10252_v13  ;;  %v10296_v13 = vld [vmem:[#allocation18 + $0x650] sm:$0xff]  ;;  %14989 = vmatpush1.bf16.msra.mxu0 %v18783_v1  ;;  %v10237_v1 = vld [vmem:[#allocation18 + $0x478] sm:$0xff] }
 0x683   : > { %v21697_v63 = vpop.f32.mrf.mxu0  ;;  %11815 = vmatprep.subr.bf16.mxu1 %v16843_v33  ;;  %v16757_v33 = vcombine.high %v10240_v7, %v10244_v9 }
 0x685   : > { %v11710_v54 = vpop.f32.mrf.mxu0 }
 0x686   : > { %11816 = vmatpush2.bf16.msra.mxu1 %v16842_v50  ;;  %v16756_v50 = vcombine.low %v10240_v7, %v10244_v9  ;;  %v16748_v54 = vcombine.low %v10232_v53, %v10236_v61  ;;  %v18791_v7 = vld [vmem:[#allocation24 + $0xa4] ss:$16 sps:$4 sm:$0xff]  }
 0x687   : > { %v11711_v58 = vpop.f32.mrf.mxu0  ;;  %11817 = vmatprep.subr.bf16.mxu1 %v16835_v29  ;;  %v16749_v29 = vcombine.high %v10232_v53, %v10236_v61  ;;  %v10292_v53 = vld [vmem:[#allocation18 + $0x630] sm:$0xff] }
 0x688   : > { %v10344_v58 = vld [vmem:[#allocation18 + $0x7d0] sm:$0xff] }
 0x689   : > { %v18789_v61 = vld [vmem:[#allocation24 + $0xa0] ss:$16 sps:$4 sm:$0xff]  }
 0x68a   : > { %11818 = vmatpush2.bf16.msra.mxu1 %v16834_v38  ;;  %v16741_v38 = vcombine.high %v10224_v55, %v10228_v44  ;;  %v10281_v44 = vld [vmem:[#allocation18 + $0x5d8] sm:$0xff] }
 0x68b   : > { %11819 = vmatprep.subr.bf16.mxu1 %v16827_v12  ;;  %v10348_v12 = vld [vmem:[#allocation18 + $0x7f0] sm:$0xff] }
 0x68c   : > { %v16861_v35 = vcombine.high %v10344_v58, %v10348_v12  ;;  %v16860_v49 = vcombine.low %v10344_v58, %v10348_v12 }
 0x68e   : > { %11820 = vmatpush2.bf16.msra.mxu1 %v16826_v62  ;;  %v10336_v62 = vld [vmem:[#allocation18 + $0x790] sm:$0xff] }
 0x68f   : > { %11821 = vmatprep.subr.bf16.mxu1 %v16819_v39  ;;  %v10340_v39 = vld [vmem:[#allocation18 + $0x7b0] sm:$0xff] }
 0x690   : > { %v16853_v6 = vcombine.high %v10336_v62, %v10340_v39  ;;  %v16852_v45 = vcombine.low %v10336_v62, %v10340_v39 }
 0x692   : > { %11822 = vmatpush2.bf16.msra.mxu1 %v16818_v43  ;;  %v10328_v43 = vld [vmem:[#allocation18 + $0x750] sm:$0xff] }
 0x693   : > { %11823 = vmatprep.subr.bf16.mxu1 %v16811_v15  ;;  %v10332_v15 = vld [vmem:[#allocation18 + $0x770] sm:$0xff] }
 0x694   : > { %v16845_v3 = vcombine.high %v10328_v43, %v10332_v15  ;;  %v16844_v28 = vcombine.low %v10328_v43, %v10332_v15 }
 0x696   : > { %11824 = vmatpush2.bf16.msra.mxu1 %v16810_v16  ;;  %v10320_v16 = vld [vmem:[#allocation18 + $0x710] sm:$0xff] }
 0x697   : > { %11825 = vmatprep.subr.bf16.mxu1 %v16803_v8  ;;  %v10324_v8 = vld [vmem:[#allocation18 + $0x730] sm:$0xff] }
 0x69a   : > { %11826 = vmatpush2.bf16.msra.mxu1 %v16802_v0 }
 0x69b   : > { %11877 = vmatprep.subr.bf16.mxu1 %v16797_v31  ;;  %v16837_v31 = vcombine.high %v10320_v16, %v10324_v8 }
 0x69d   : > { %11828 = vmatmul.mubr.bf16.vlgmr.msra.gmra.mxu1 %v21686_v5 }
 0x69e   : > { %11878 = vmatpush1.bf16.msra.mxu1 %v16796_v57  ;;  %11909 = vmatprep.mubr.bf16.mxu1 %v21682_v14 }
 0x69f   : > { %11879 = vmatprep.subr.bf16.mxu1 %v16789_v36  ;;  %v16836_v36 = vcombine.low %v10320_v16, %v10324_v8 }
 0x6a2   : > { %11880 = vmatpush1.bf16.msra.mxu1 %v16788_v19  ;;  %v10304_v19 = vld [vmem:[#allocation18 + $0x690] sm:$0xff] }
 0x6a3   : > { %11881 = vmatprep.subr.bf16.mxu1 %v16781_v56  ;;  %v10308_v56 = vld [vmem:[#allocation18 + $0x6b0] sm:$0xff] }
 0x6a4   : > { %v16821_v10 = vcombine.high %v10304_v19, %v10308_v56  ;;  %v16820_v9 = vcombine.low %v10304_v19, %v10308_v56  ;;  %v10233_v56 = vld [vmem:[#allocation18 + $0x458] sm:$0xff] }
 0x6a6   : > { %11882 = vmatpush1.bf16.msra.mxu1 %v16780_v59  ;;  %v16828_v59 = vcombine.low %v10312_v51, %v10316_v21 }
 0x6a7   : > { %11883 = vmatprep.subr.bf16.mxu1 %v16773_v34  ;;  %v18788_v34 = vld [vmem:[#allocation24 + $0xc4] ss:$16 sps:$4 sm:$0xff]  }
 0x6a8   : > { %14990 = vmatprep.subr.bf16.mxu0 %v18788_v34  ;;  %v18798_v34 = vld [vmem:[#allocation24 + $0x40] ss:$16 sps:$4 sm:$0xff]  }
 0x6aa   : > { %11884 = vmatpush1.bf16.msra.mxu1 %v16772_v27  ;;  %v10300_v27 = vld [vmem:[#allocation18 + $0x670] sm:$0xff] }
 0x6ab   : > { %11885 = vmatprep.subr.bf16.mxu1 %v16765_v32  ;;  %v18786_v32 = vld [vmem:[#allocation24 + $0xc0] ss:$16 sps:$4 sm:$0xff]  }
 0x6ac   : > { %14991 = vmatpush1.bf16.msra.mxu0 %v18786_v32  ;;  %v18803_v32 = vld [vmem:[#allocation24 + $0x24] ss:$16 sps:$4 sm:$0xff]  }
 0x6ad   : > { %14992 = vmatprep.subr.bf16.mxu0 %v18791_v7  ;;  %v16750_v7 = vcombine.low %v10233_v56, %v10237_v1 }
 0x6ae   : > { %11886 = vmatpush1.bf16.msra.mxu1 %v16764_v2  ;;  %v16813_v2 = vcombine.high %v10296_v13, %v10300_v27 }
 0x6af   : > { %11887 = vmatprep.subr.bf16.mxu1 %v16757_v33  ;;  %v10288_v33 = vld [vmem:[#allocation18 + $0x610] sm:$0xff] }
 0x6b0   : > { %v16805_v55 = vcombine.high %v10288_v33, %v10292_v53  ;;  %14993 = vmatpush1.bf16.msra.mxu0 %v18789_v61  ;;  %v16804_v58 = vcombine.low %v10288_v33, %v10292_v53  ;;  %v10345_v33 = vld [vmem:[#allocation18 + $0x7d8] sm:$0xff]  ;;  %v18806_v61 = vld [vmem:[#allocation24 + $0x4] ss:$16 sps:$4 sm:$0xff]  }
 0x6b1   : > { %v10349_v53 = vld [vmem:[#allocation18 + $0x7f8] sm:$0xff] }
 0x6b2   : > { %11888 = vmatpush1.bf16.msra.mxu1 %v16756_v50  ;;  %v18794_v50 = vld [vmem:[#allocation24 + $0x84] ss:$16 sps:$4 sm:$0xff]  }
 0x6b3   : > { %11889 = vmatprep.subr.bf16.mxu1 %v16749_v29  ;;  %v16812_v29 = vcombine.low %v10296_v13, %v10300_v27  ;;  %14994 = vmatprep.subr.bf16.mxu0 %v18794_v50  ;;  %v10225_v13 = vld [vmem:[#allocation18 + $0x418] sm:$0xff] }
 0x6b4   : > { %v10229_v27 = vld [vmem:[#allocation18 + $0x438] sm:$0xff] }
 0x6b5   : > { %v16742_v50 = vcombine.low %v10225_v13, %v10229_v27 }
 0x6b6   : > { %11890 = vmatpush1.bf16.msra.mxu1 %v16748_v54  ;;  %v10285_v54 = vld [vmem:[#allocation18 + $0x5f8] sm:$0xff] }
 0x6b7   : > { %11891 = vmatprep.subr.bf16.mxu1 %v16741_v38  ;;  %v18792_v38 = vld [vmem:[#allocation24 + $0x80] ss:$16 sps:$4 sm:$0xff]   ;;  %v16799_v12 = vcombine.high %v10281_v44, %v10285_v54  ;;  %v16798_v62 = vcombine.low %v10281_v44, %v10285_v54  ;;  %v10337_v44 = vld [vmem:[#allocation18 + $0x798] sm:$0xff] }
 0x6b8   : > { %14995 = vmatpush1.bf16.msra.mxu0 %v18792_v38  ;;  %v10341_v54 = vld [vmem:[#allocation18 + $0x7b8] sm:$0xff]  ;;  %v18809_v38 = vld [vmem:[#allocation24 + $0x1e4] ss:$16 sps:$4 sm:$0xff]  }
 0x6ba   : > { %11892 = vmatpush1.bf16.msra.mxu1 %v16740_v20  ;;  %v10273_v20 = vld [vmem:[#allocation18 + $0x598] sm:$0xff] }
 0x6bb   : > { %11893 = vmatprep.subr.bf16.mxu1 %v16861_v35  ;;  %v10277_v35 = vld [vmem:[#allocation18 + $0x5b8] sm:$0xff] }
 0x6bc   : > { %v16791_v39 = vcombine.high %v10273_v20, %v10277_v35  ;;  %v16790_v43 = vcombine.low %v10273_v20, %v10277_v35  ;;  %v16855_v20 = vcombine.high %v10337_v44, %v10341_v54  ;;  %v10329_v35 = vld [vmem:[#allocation18 + $0x758] sm:$0xff] }
 0x6be   : > { %11894 = vmatpush2.bf16.msra.mxu1 %v16860_v49  ;;  %v10265_v49 = vld [vmem:[#allocation18 + $0x558] sm:$0xff] }
 0x6bf   : > { %11895 = vmatprep.subr.bf16.mxu1 %v16853_v6  ;;  %v10269_v6 = vld [vmem:[#allocation18 + $0x578] sm:$0xff] }
 0x6c0   : > { %v16783_v15 = vcombine.high %v10265_v49, %v10269_v6  ;;  %v16782_v16 = vcombine.low %v10265_v49, %v10269_v6  ;;  %v16854_v49 = vcombine.low %v10337_v44, %v10341_v54  ;;  %v18810_v6 = vld [vmem:[#allocation24 + $0x1c0] ss:$16 sps:$4 sm:$0xff]  }
 0x6c1   : > { %v21701_v11 = vpop.f32.mrf.mxu0 }
 0x6c2   : > { %11896 = vmatpush2.bf16.msra.mxu1 %v16852_v45  ;;  %v10257_v45 = vld [vmem:[#allocation18 + $0x518] sm:$0xff] }
 0x6c3   : > { %v21703_v0 = vpop.f32.mrf.mxu0  ;;  %11897 = vmatprep.subr.bf16.mxu1 %v16845_v3  ;;  %v10261_v3 = vld [vmem:[#allocation18 + $0x538] sm:$0xff] }
 0x6c4   : > { %v16775_v8 = vcombine.high %v10257_v45, %v10261_v3  ;;  %v16774_v51 = vcombine.low %v10257_v45, %v10261_v3  ;;  %v10325_v45 = vld [vmem:[#allocation18 + $0x738] sm:$0xff] }
 0x6c5   : > { %v11792_v57 = vpop.f32.mrf.mxu0 }
 0x6c6   : > { %11898 = vmatpush2.bf16.msra.mxu1 %v16844_v28  ;;  %v10249_v28 = vld [vmem:[#allocation18 + $0x4d8] sm:$0xff] }
 0x6c7   : > { %v11793_v23 = vpop.f32.mrf.mxu0  ;;  %11899 = vmatprep.subr.bf16.mxu1 %v16837_v31  ;;  %v10253_v31 = vld [vmem:[#allocation18 + $0x4f8] sm:$0xff] }
 0x6c8   : > { %v16767_v21 = vcombine.high %v10249_v28, %v10253_v31  ;;  %v10241_v57 = vld [vmem:[#allocation18 + $0x498] sm:$0xff]  ;;  %v18797_v23 = vld [vmem:[#allocation24 + $0x64] ss:$16 sps:$4 sm:$0xff]  }
 0x6c9   : > { %14996 = vmatprep.subr.bf16.mxu0 %v18797_v23  ;;  %v18818_v23 = vld [vmem:[#allocation24 + $0x184] ss:$16 sps:$4 sm:$0xff]  }
 0x6ca   : > { %11900 = vmatpush2.bf16.msra.mxu1 %v16836_v36  ;;  %v10245_v36 = vld [vmem:[#allocation18 + $0x4b8] sm:$0xff] }
 0x6cb   : > { %11901 = vmatprep.subr.bf16.mxu1 %v16829_v60  ;;  %v18795_v60 = vld [vmem:[#allocation24 + $0x60] ss:$16 sps:$4 sm:$0xff]   ;;  %v16759_v19 = vcombine.high %v10241_v57, %v10245_v36 }
 0x6cc   : > { %14997 = vmatpush1.bf16.msra.mxu0 %v18795_v60 }
 0x6cd   : > { %14998 = vmatprep.subr.bf16.mxu0 %v18800_v25  ;;  %v10309_v25 = vld [vmem:[#allocation18 + $0x6b8] sm:$0xff] }
 0x6ce   : > { %11902 = vmatpush2.bf16.msra.mxu1 %v16828_v59  ;;  %v16758_v59 = vcombine.low %v10241_v57, %v10245_v36  ;;  %v10317_v57 = vld [vmem:[#allocation18 + $0x6f8] sm:$0xff] }
 0x6cf   : > { %11903 = vmatprep.subr.bf16.mxu1 %v16821_v10  ;;  %v16751_v10 = vcombine.high %v10233_v56, %v10237_v1  ;;  %v10305_v1 = vld [vmem:[#allocation18 + $0x698] sm:$0xff] }
 0x6d0   : > { %14999 = vmatpush1.bf16.msra.mxu0 %v18798_v34  ;;  %v18821_v34 = vld [vmem:[#allocation24 + $0x164] ss:$16 sps:$4 sm:$0xff]  }
 0x6d1   : > { %15000 = vmatprep.subr.bf16.mxu0 %v18803_v32  ;;  %v10297_v32 = vld [vmem:[#allocation18 + $0x658] sm:$0xff] }
 0x6d2   : > { %11904 = vmatpush2.bf16.msra.mxu1 %v16820_v9  ;;  %v18801_v9 = vld [vmem:[#allocation24 + $0x20] ss:$16 sps:$4 sm:$0xff]  }
 0x6d3   : > { %11905 = vmatprep.subr.bf16.mxu1 %v16813_v2  ;;  %v16743_v2 = vcombine.high %v10225_v13, %v10229_v27  ;;  %v18824_v13 = vld [vmem:[#allocation24 + $0x144] ss:$16 sps:$4 sm:$0xff]   ;;  %v16823_v27 = vcombine.high %v10305_v1, %v10309_v25 }
 0x6d4   : > { %15001 = vmatpush1.bf16.msra.mxu0 %v18801_v9  ;;  %v18822_v9 = vld [vmem:[#allocation24 + $0x140] ss:$16 sps:$4 sm:$0xff]  }
 0x6d5   : > { %15002 = vmatprep.subr.bf16.mxu0 %v18806_v61  ;;  %v10289_v61 = vld [vmem:[#allocation18 + $0x618] sm:$0xff] }
 0x6d6   : > { %11906 = vmatpush2.bf16.msra.mxu1 %v16812_v29  ;;  %v18804_v29 = vld [vmem:[#allocation24] ss:$16 sps:$4 sm:$0xff]  }
 0x6d7   : > { %11907 = vmatprep.subr.bf16.mxu1 %v16805_v55  ;;  %v16863_v55 = vcombine.high %v10345_v33, %v10349_v53 }
 0x6d8   : > { %15003 = vmatpush1.bf16.msra.mxu0 %v18804_v29  ;;  %v18825_v29 = vld [vmem:[#allocation24 + $0x120] ss:$16 sps:$4 sm:$0xff]  }
 0x6d9   : > { %15004 = vmatprep.subr.bf16.mxu0 %v18809_v38  ;;  %v18828_v38 = vld [vmem:[#allocation24 + $0x100] ss:$16 sps:$4 sm:$0xff]  }
 0x6da   : > { %11908 = vmatpush2.bf16.msra.mxu1 %v16804_v58  ;;  %v16862_v58 = vcombine.low %v10345_v33, %v10349_v53  ;;  %v16822_v33 = vcombine.low %v10305_v1, %v10309_v25  ;;  %v18846_v1 = vld [vmem:[#allocation24 + $0x240] ss:$16 sps:$4 sm:$0xff]  }
 0x6db   : > { %11959 = vmatprep.subr.bf16.mxu1 %v16799_v12  ;;  %v18807_v12 = vld [vmem:[#allocation24 + $0x1e0] ss:$16 sps:$4 sm:$0xff]  }
 0x6dc   : > { %15005 = vmatpush2.bf16.msra.mxu0 %v18807_v12 }
 0x6dd   : > { %11910 = vmatmul.mubr.bf16.vlgmr.msra.gmra.mxu1 %v21686_v5 }
 0x6de   : > { %11960 = vmatpush1.bf16.msra.mxu1 %v16798_v62  ;;  %11991 = vmatprep.mubr.bf16.mxu1 %v21682_v14  ;;  %v16766_v14 = vcombine.low %v10249_v28, %v10253_v31  ;;  %v10333_v62 = vld [vmem:[#allocation18 + $0x778] sm:$0xff]  ;;  %v18813_v31 = vld [vmem:[#allocation24 + $0x1a0] ss:$16 sps:$4 sm:$0xff]  }
 0x6df   : > { %11961 = vmatprep.subr.bf16.mxu1 %v16791_v39  ;;  %v18812_v39 = vld [vmem:[#allocation24 + $0x1c4] ss:$16 sps:$4 sm:$0xff]  }
 0x6e0   : > { %15006 = vmatprep.subr.bf16.mxu0 %v18812_v39  ;;  %v18831_v39 = vld [vmem:[#allocation24 + $0x2e0] ss:$16 sps:$4 sm:$0xff]  }
 0x6e1   : > { %15007 = vmatpush2.bf16.msra.mxu0 %v18810_v6 }
 0x6e2   : > { %11962 = vmatpush1.bf16.msra.mxu1 %v16790_v43  ;;  %v16847_v43 = vcombine.high %v10329_v35, %v10333_v62 }
 0x6e3   : > { %11963 = vmatprep.subr.bf16.mxu1 %v16783_v15  ;;  %v10321_v15 = vld [vmem:[#allocation18 + $0x718] sm:$0xff] }
 0x6e6   : > { %11964 = vmatpush1.bf16.msra.mxu1 %v16782_v16  ;;  %v18815_v16 = vld [vmem:[#allocation24 + $0x1a4] ss:$16 sps:$4 sm:$0xff]  }
 0x6e7   : > { %11965 = vmatprep.subr.bf16.mxu1 %v16775_v8  ;;  %v16846_v8 = vcombine.low %v10329_v35, %v10333_v62  ;;  %15008 = vmatprep.subr.bf16.mxu0 %v18815_v16  ;;  %v18834_v16 = vld [vmem:[#allocation24 + $0x2c0] ss:$16 sps:$4 sm:$0xff]  }
 0x6e8   : > { %15009 = vmatpush2.bf16.msra.mxu0 %v18813_v31  ;;  %v18839_v31 = vld [vmem:[#allocation24 + $0x2a4] ss:$16 sps:$4 sm:$0xff]  }
 0x6e9   : > { %15010 = vmatprep.subr.bf16.mxu0 %v18818_v23  ;;  %v18840_v23 = vld [vmem:[#allocation24 + $0x280] ss:$16 sps:$4 sm:$0xff]  }
 0x6ea   : > { %11966 = vmatpush1.bf16.msra.mxu1 %v16774_v51  ;;  %v16839_v51 = vcombine.high %v10321_v15, %v10325_v45 }
 0x6eb   : > { %11967 = vmatprep.subr.bf16.mxu1 %v16767_v21  ;;  %v10313_v21 = vld [vmem:[#allocation18 + $0x6d8] sm:$0xff] }
 0x6ec   : > { %v16831_v56 = vcombine.high %v10313_v21, %v10317_v57 }
 0x6ee   : > { %11968 = vmatpush1.bf16.msra.mxu1 %v16766_v14  ;;  %v16838_v14 = vcombine.low %v10321_v15, %v10325_v45 }
 0x6ef   : > { %11969 = vmatprep.subr.bf16.mxu1 %v16759_v19  ;;  %v18816_v19 = vld [vmem:[#allocation24 + $0x180] ss:$16 sps:$4 sm:$0xff]  }
 0x6f0   : > { %15011 = vmatpush2.bf16.msra.mxu0 %v18816_v19  ;;  %v18848_v19 = vld [vmem:[#allocation24 + $0x244] ss:$16 sps:$4 sm:$0xff]  }
 0x6f1   : > { %15012 = vmatprep.subr.bf16.mxu0 %v18821_v34 }
 0x6f2   : > { %11970 = vmatpush1.bf16.msra.mxu1 %v16758_v59  ;;  %v18819_v59 = vld [vmem:[#allocation24 + $0x160] ss:$16 sps:$4 sm:$0xff]  }
 0x6f3   : > { %11971 = vmatprep.subr.bf16.mxu1 %v16751_v10  ;;  %v16830_v10 = vcombine.low %v10313_v21, %v10317_v57 }
 0x6f4   : > { %15013 = vmatpush2.bf16.msra.mxu0 %v18819_v59 }
 0x6f5   : > { %15014 = vmatprep.subr.bf16.mxu0 %v18824_v13  ;;  %v18849_v13 = vld [vmem:[#allocation24 + $0x220] ss:$16 sps:$4 sm:$0xff]  }
 0x6f6   : > { %11972 = vmatpush1.bf16.msra.mxu1 %v16750_v7  ;;  %v10301_v7 = vld [vmem:[#allocation18 + $0x678] sm:$0xff] }
 0x6f7   : > { %11973 = vmatprep.subr.bf16.mxu1 %v16743_v2  ;;  %v18827_v2 = vld [vmem:[#allocation24 + $0x124] ss:$16 sps:$4 sm:$0xff]   ;;  %v16815_v53 = vcombine.high %v10297_v32, %v10301_v7  ;;  %v16814_v44 = vcombine.low %v10297_v32, %v10301_v7  ;;  %v12363_v32 = vld [vmem:[#allocation21 + $0x2] ss:$8 sm:$0xf0] }
 0x6f8   : > { %15015 = vmatpush2.bf16.msra.mxu0 %v18822_v9  ;;  %v12511_v7 = vld [vmem:[#allocation21 + $0x3] ss:$8 sm:$0xf] }
 0x6f9   : > { %15016 = vmatprep.subr.bf16.mxu0 %v18827_v2  ;;  %v12512_v9 = vld [vmem:[#allocation21 + $0x3] ss:$8 sm:$0xf0]  ;;  %v18854_v2 = vld [vmem:[#allocation24 + $0x204] ss:$16 sps:$4 sm:$0xff]  }
 0x6fa   : > { %11974 = vmatpush1.bf16.msra.mxu1 %v16742_v50  ;;  %v10293_v50 = vld [vmem:[#allocation18 + $0x638] sm:$0xff] }
 0x6fb   : > { %11975 = vmatprep.subr.bf16.mxu1 %v16863_v55  ;;  %v18830_v55 = vld [vmem:[#allocation24 + $0x104] ss:$16 sps:$4 sm:$0xff]   ;;  %v16807_v54 = vcombine.high %v10289_v61, %v10293_v50  ;;  %v16806_v12 = vcombine.low %v10289_v61, %v10293_v50  ;;  %v12105_v61 = vld [vmem:[#allocation21] ss:$8 sm:$0xf0] }
 0x6fc   : > { %15017 = vmatpush2.bf16.msra.mxu0 %v18825_v29  ;;  %v12213_v50 = vld [vmem:[#allocation21 + $0x1] ss:$8 sm:$0xf] }
 0x6fd   : > { %15018 = vmatprep.subr.bf16.mxu0 %v18830_v55  ;;  %v21728_v55 = vor.u32 %v12512_v9, %v12511_v7  ;;  %v12089_v7 = vld [vmem:[#allocation3 + $0x68] sm:$0xe0] }
 0x6fe   : > { %11976 = vmatpush2.bf16.msra.mxu1 %v16862_v58  ;;  %v21711_v58 = vld [vmem:[#allocation19] sm:$0xff] }
 0x6ff   : > { %11977 = vmatprep.subr.bf16.mxu1 %v16855_v20  ;;  %v18833_v20 = vld [vmem:[#allocation24 + $0x2e4] ss:$16 sps:$4 sm:$0xff]   ;;  %v10355_v35 = vrot.slane %v21711_v58, %v20333_v24  ;;  %v10359_v62 = vrot.slane %v21711_v58, %v20336_v52 }
 0x700   : > { %15019 = vmatpush2.bf16.msra.mxu0 %v18828_v38  ;;  %v18855_v38 = vld [vmem:[#allocation24 + $0x3e0] ss:$16 sps:$4 sm:$0xff]  }
 0x701   : > { %v21707_v3 = vpop.f32.mrf.mxu0  ;;  %v11707_v6 = vadd.f32 %v21694_v37, %v10355_v35  ;;  %v11709_v15 = vadd.f32 %v21697_v63, %v10359_v62  ;;  %v18842_v63 = vld [vmem:[#allocation24 + $0x284] ss:$16 sps:$4 sm:$0xff]   ;;  %v12346_v62 = vld [vmem:[#allocation3 + $0x68] sm:$0x80] }
 0x702   : > { %11978 = vmatpush2.bf16.msra.mxu1 %v16854_v49  ;;  %v18836_v49 = vld [vmem:[#allocation24 + $0x2c4] ss:$16 sps:$4 sm:$0xff]  }
 0x703   : > { %v21709_v28 = vpop.f32.mrf.mxu0  ;;  %11979 = vmatprep.subr.bf16.mxu1 %v16847_v43 }
 0x704   : > { %22991 = vst [vmem:[#allocation74_spill] sm:$0xff] %v21709_v28 }
 0x705   : > { %v11874_v36 = vpop.f32.mrf.mxu0 }
 0x706   : > { %11980 = vmatpush2.bf16.msra.mxu1 %v16846_v8 }
 0x707   : > { %v11875_v60 = vpop.f32.mrf.mxu0  ;;  %11981 = vmatprep.subr.bf16.mxu1 %v16839_v51 }
 0x708   : > { %v18843_v60 = vld [vmem:[#allocation24 + $0x260] ss:$16 sps:$4 sm:$0xff]  }
 0x70a   : > { %11982 = vmatpush2.bf16.msra.mxu1 %v16838_v14  ;;  %v18845_v14 = vld [vmem:[#allocation24 + $0x264] ss:$16 sps:$4 sm:$0xff]  }
 0x70b   : > { %11983 = vmatprep.subr.bf16.mxu1 %v16831_v56 }
 0x70e   : > { %11984 = vmatpush2.bf16.msra.mxu1 %v16830_v10  ;;  %v18851_v10 = vld [vmem:[#allocation24 + $0x224] ss:$16 sps:$4 sm:$0xff]  }
 0x70f   : > { %11985 = vmatprep.subr.bf16.mxu1 %v16823_v27  ;;  %v12362_v27 = vld [vmem:[#allocation21 + $0x2] ss:$8 sm:$0xf] }
 0x710   : > { %v21726_v29 = vor.u32 %v12363_v32, %v12362_v27 }
 0x712   : > { %11986 = vmatpush2.bf16.msra.mxu1 %v16822_v33  ;;  %v18852_v33 = vld [vmem:[#allocation24 + $0x200] ss:$16 sps:$4 sm:$0xff]  }
 0x713   : > { %11987 = vmatprep.subr.bf16.mxu1 %v16815_v53  ;;  %v12104_v53 = vld [vmem:[#allocation21] ss:$8 sm:$0xf] }
 0x716   : > { %11988 = vmatpush2.bf16.msra.mxu1 %v16814_v44  ;;  %v12214_v44 = vld [vmem:[#allocation21 + $0x1] ss:$8 sm:$0xf0] }
 0x717   : > { %11989 = vmatprep.subr.bf16.mxu1 %v16807_v54  ;;  %v18857_v54 = vld [vmem:[#allocation24 + $0x3e4] ss:$16 sps:$4 sm:$0xff]   ;;  %v21736_v35 = vor.u32 %v12214_v44, %v12213_v50 }
 0x718   : > { %v12980_v44 = vld [vmem:[#allocation21 + $0x7] ss:$8 sm:$0xf0] }
 0x71a   : > { %11990 = vmatpush2.bf16.msra.mxu1 %v16806_v12  ;;  %v21730_v12 = vor.u32 %v12105_v61, %v12104_v53  ;;  %v18863_v53 = vld [vmem:[#allocation24 + $0x3a4] ss:$16 sps:$4 sm:$0xff]  }
 0x71b   : > { %15029 = vmatprep.subr.bf16.mxu1 %v18833_v20  ;;  %v21734_v20 = vrot.slane %v21726_v29, %v20336_v52 }
 0x71c   : > { %22992 = vst [vmem:[#allocation70_spill] sm:$0xff] %v21730_v12  ;;  %v12115_v9 = vrot.slane %v21730_v12, %v20336_v52 }
 0x71d   : > { %11992 = vmatmul.mubr.bf16.vlgmr.msra.gmra.mxu1 %v21686_v5  ;;  %v11747_v43 = vpop.f32.mrf.mxu1  ;;  %v18837_v5 = vld [vmem:[#allocation24 + $0x2a0] ss:$16 sps:$4 sm:$0xff]  }
 0x71e   : > { %v21720_v45 = vadd.f32 %v11747_v43, %v11707_v6  ;;  %15030 = vmatpush1.bf16.msra.mxu1 %v18831_v39  ;;  %v21740_v39 = vrot.slane %v21728_v55, %v20336_v52  ;;  %v21748_v6 = vrot.slane %v21728_v55, %v20333_v24  ;;  %v12668_v43 = vld [vmem:[#allocation21 + $0x4] ss:$8 sm:$0xf] }
 0x71f   : > { %v11749_v8 = vpop.f32.mrf.mxu1  ;;  %15031 = vmatprep.subr.bf16.mxu1 %v18836_v49  ;;  %v21744_v49 = vrot.slane %v21726_v29, %v20333_v24 }
 0x720   : > { %v16864_v51 = vmul.f32 -1.442695, %v21720_v45  ;;  %v21723_v21 = vadd.f32 %v11749_v8, %v11709_v15  ;;  %v12669_v15 = vld [vmem:[#allocation21 + $0x4] ss:$8 sm:$0xf0] }
 0x721   : > { %v11751_v57 = vpop.f32.mrf.mxu1  ;;  %v18860_v8 = vld [vmem:[#allocation24 + $0x3c4] ss:$16 sps:$4 sm:$0xff]   ;;  %v21778_v50 = vor.u32 %v12669_v15, %v12668_v43 }
 0x722   : > { %19311 = vpow2.f32 %v16864_v51  ;;  %v16865_v37 = vmul.f32 -1.442695, %v21723_v21  ;;  %15032 = vmatpush1.bf16.msra.mxu1 %v18834_v16  ;;  %v12345_v16 = vld [vmem:[#allocation3 + $0x80] sm:$0x80] }
 0x723   : > { %v11752_v36 = vpop.f32.mrf.mxu1  ;;  %15033 = vmatprep.subr.bf16.mxu1 %v18839_v31  ;;  %v12769_v51 = vld [vmem:[#allocation21 + $0x5] ss:$8 sm:$0xf]  ;;  %22995 = vst [vmem:[#allocation65_spill] sm:$0xff] %v21778_v50 }
 0x724   : > { %19313 = vpow2.f32 %v16865_v37  ;;  %v12770_v57 = vld [vmem:[#allocation21 + $0x5] ss:$8 sm:$0xf0]  ;;  %v18858_v37 = vld [vmem:[#allocation24 + $0x3c0] ss:$16 sps:$4 sm:$0xff]  }
 0x726   : > { %15034 = vmatpush1.bf16.msra.mxu1 %v18837_v5 }
 0x727   : > { %15035 = vmatprep.subr.bf16.mxu1 %v18842_v63  ;;  %v12197_v63 = vld [vmem:[#allocation3 + $0x68] sm:$0xc0] }
 0x72a   : > { %15036 = vmatpush1.bf16.msra.mxu1 %v18840_v23  ;;  %v21755_v23 = vrot.slane %v21736_v35, %v20336_v52 }
 0x72b   : > { %15037 = vmatprep.subr.bf16.mxu1 %v18845_v14  ;;  %v12407_v14 = vmul.f32 %v21734_v20, %v12346_v62 }
 0x72e   : > { %15038 = vmatpush1.bf16.msra.mxu1 %v18843_v60  ;;  %v12088_v60 = vld [vmem:[#allocation3 + $0x80] sm:$0xe0] }
 0x72f   : > { %v19312_v56 = vpop.eup %19311  ;;  %15039 = vmatprep.subr.bf16.mxu1 %v18848_v19  ;;  %v21760_v19 = vrot.slane %v21730_v12, %v20333_v24 }
 0x730   : > { %v12024_v25 = vadd.f32 1.0, %v19312_v56 }
 0x731   : > { %v19314_v59 = vpop.eup %19313 }
 0x732   : > { %19315 = vrcp.f32 %v12024_v25  ;;  %v12025_v34 = vadd.f32 1.0, %v19314_v59  ;;  %15040 = vmatpush1.bf16.msra.mxu1 %v18846_v1  ;;  %v12556_v1 = vmul.f32 %v21740_v39, %v12346_v62  ;;  %v12870_v25 = vld [vmem:[#allocation21 + $0x6] ss:$8 sm:$0xf]  ;;  %v21765_v59 = vrot.slane %v21736_v35, %v20333_v24 }
 0x733   : > { %15041 = vmatprep.subr.bf16.mxu1 %v18851_v10  ;;  %v12555_v10 = vmul.f32 %v21748_v6, %v12345_v16  ;;  %v21784_v62 = vmul.f32 %v12407_v14, %v20358_v41  ;;  %v12149_v14 = vmul.f32 %v12115_v9, %v12089_v7 }
 0x734   : > { %19317 = vrcp.f32 %v12025_v34  ;;  %v12406_v34 = vmul.f32 %v21744_v49, %v12345_v16  ;;  %v21786_v16 = vor.u32 %v12770_v57, %v12769_v51  ;;  %v21790_v43 = vmul.f32 %v12556_v1, %v20360_v42  ;;  %v18866_v1 = vld [vmem:[#allocation24 + $0x384] ss:$16 sps:$4 sm:$0xff]  }
 0x735   : > { %v12457_v7 = vrot.slane %v21784_v62, 2 }
 0x736   : > { %15042 = vmatpush1.bf16.msra.mxu1 %v18849_v13  ;;  %v10363_v13 = vrot.slane %v21711_v58, %v20339_v26  ;;  %22996 = vst [vmem:[#allocation66_spill] sm:$0xff] %v21786_v16 }
 0x737   : > { %15043 = vmatprep.subr.bf16.mxu1 %v18854_v2  ;;  %v12979_v2 = vld [vmem:[#allocation21 + $0x7] ss:$8 sm:$0xf] }
 0x738   : > { %v21802_v51 = vadd.f32 %v21701_v11, %v10363_v13  ;;  %v12675_v11 = vrot.slane %v21778_v50, %v20333_v24 }
 0x73a   : > { %15044 = vmatpush1.bf16.msra.mxu1 %v18852_v33  ;;  %v12196_v33 = vld [vmem:[#allocation3 + $0x80] sm:$0xc0] }
 0x73b   : > { %15045 = vmatprep.subr.bf16.mxu1 %v18857_v54  ;;  %v18861_v54 = vld [vmem:[#allocation24 + $0x3a0] ss:$16 sps:$4 sm:$0xff]   ;;  %v21793_v15 = vmul.f32 %v21765_v59, %v12196_v33 }
 0x73e   : > { %15046 = vmatpush2.bf16.msra.mxu1 %v18855_v38 }
 0x73f   : > { %v19316_v31 = vpop.eup %19315  ;;  %15047 = vmatprep.subr.bf16.mxu1 %v18860_v8  ;;  %v13080_v8 = vld [vmem:[#allocation21 + $0x40] ss:$8 sm:$0xf] }
 0x740   : > { %v12048_v5 = vmul.f32 %v19316_v31, %v21720_v45  ;;  %v12871_v45 = vld [vmem:[#allocation21 + $0x6] ss:$8 sm:$0xf0]  ;;  %v13081_v31 = vld [vmem:[#allocation21 + $0x40] ss:$8 sm:$0xf0] }
 0x741   : > { %v21751_v36 = vpop.f32.mrf.mxu0  ;;  %v19318_v56 = vpop.eup %19317  ;;  %v21812_v33 = vor.u32 %v13081_v31, %v13080_v8 }
 0x742   : > { %22993 = vst [vmem:[#allocation77_spill] sm:$0xff] %v21751_v36  ;;  %12080 = vst [vmem:[#allocation3 + $0x10] sm:$0xf] %v12048_v5  ;;  %v12049_v27 = vmul.f32 %v19318_v56, %v21723_v21  ;;  %15048 = vmatpush2.bf16.msra.mxu1 %v18858_v37  ;;  %v21781_v21 = vmul.f32 %v21755_v23, %v12197_v63  ;;  %v12148_v37 = vmul.f32 %v21760_v19, %v12088_v60 }
 0x743   : > { %v21772_v32 = vpop.f32.mrf.mxu0  ;;  %15049 = vmatprep.subr.bf16.mxu1 %v18863_v53  ;;  %v21796_v5 = vmul.f32 %v12406_v34, %v20358_v41  ;;  %v21799_v63 = vmul.f32 %v12555_v10, %v20360_v42  ;;  %v12679_v60 = vrot.slane %v21778_v50, %v20336_v52  ;;  %v21806_v56 = vor.u32 %v12871_v45, %v12870_v25  ;;  %v18864_v10 = vld [vmem:[#allocation24 + $0x380] ss:$16 sps:$4 sm:$0xff]  }
 0x744   : > { %22994 = vst [vmem:[#allocation71_spill] sm:$0xff] %v21772_v32  ;;  %12081 = vst [vmem:[#allocation3 + $0x20] sm:$0xf] %v12049_v27  ;;  %v12780_v27 = vrot.slane %v21786_v16, %v20336_v52  ;;  %v21810_v34 = vor.u32 %v12980_v44, %v12979_v2  ;;  %v12292_v13 = vrot.slane %v21781_v21, 1  ;;  %v21821_v45 = vmul.f32 %v12148_v37, %v20356_v40  ;;  %v18867_v2 = vld [vmem:[#allocation24 + $0x360] ss:$16 sps:$4 sm:$0xff]  }
 0x745   : > { %v11956_v38 = vpop.f32.mrf.mxu0  ;;  %22997 = vst [vmem:[#allocation63_spill] sm:$0xff] %v21806_v56  ;;  %v12881_v25 = vrot.slane %v21806_v56, %v20336_v52  ;;  %v12165_v21 = vmul.f32 %v12149_v14, %v20356_v40  ;;  %v13091_v8 = vrot.slane %v21812_v33, %v20336_v52  ;;  %v12877_v14 = vrot.slane %v21806_v56, %v20333_v24 }
 0x746   : > { %15050 = vmatpush2.bf16.msra.mxu1 %v18861_v54  ;;  %v12990_v62 = vrot.slane %v21810_v34, %v20336_v52 }
 0x747   : > { %v11957_v57 = vpop.f32.mrf.mxu0  ;;  %15051 = vmatprep.subr.bf16.mxu1 %v18866_v1  ;;  %v12776_v1 = vrot.slane %v21786_v16, %v20333_v24 }
 0x749   : > { %v12096_v53 = vld [vmem:[#allocation3 + $0x10] sm:$0x1]  ;;  %v12760_v28 = vld [vmem:[#allocation3 + $0x10] sm:$0x1e] }
 0x74a   : > { %v12204_v31 = vld [vmem:[#allocation3 + $0x10] sm:$0x3]  ;;  %15052 = vmatpush2.bf16.msra.mxu1 %v18864_v10  ;;  %v12156_v38 = vmul.f32 %v21760_v19, %v12096_v53  ;;  %v12914_v12 = vmul.f32 %v12877_v14, %v12760_v28 }
 0x74b   : > { %v12353_v37 = vld [vmem:[#allocation3 + $0x10] sm:$0x7]  ;;  %v12097_v61 = vld [vmem:[#allocation3 + $0x20] sm:$0x1]  ;;  %v12761_v36 = vld [vmem:[#allocation3 + $0x20] sm:$0x1e]  ;;  %v12265_v56 = vmul.f32 %v21765_v59, %v12204_v31 }
 0x74c   : > { %v12659_v57 = vld [vmem:[#allocation3 + $0x10] sm:$0xf]  ;;  %v12205_v44 = vld [vmem:[#allocation3 + $0x20] sm:$0x3]  ;;  %v12157_v47 = vmul.f32 %v12115_v9, %v12097_v61  ;;  %v12814_v19 = vmul.f32 %v12780_v27, %v12761_v36  ;;  %v12915_v53 = vmul.f32 %v12881_v25, %v12761_v36  ;;  %v12414_v16 = vmul.f32 %v21744_v49, %v12353_v37  ;;  %v18869_v61 = vld [vmem:[#allocation24 + $0x364] ss:$16 sps:$4 sm:$0xff]  }
 0x74d   : > { %v12354_v54 = vld [vmem:[#allocation3 + $0x20] sm:$0x7]  ;;  %v12266_v22 = vmul.f32 %v21755_v23, %v12205_v44  ;;  %v12563_v44 = vmul.f32 %v21748_v6, %v12353_v37  ;;  %v12813_v36 = vmul.f32 %v12776_v1, %v12760_v28  ;;  %v18872_v27 = vld [vmem:[#allocation24 + $0x344] ss:$16 sps:$4 sm:$0xff]   ;;  %15053 = vmatprep.subr.bf16.mxu1 %v18869_v61  ;;  %v13071_v61 = vld [vmem:[#allocation3 + $0x10] sm:$0x78] }
 0x74e   : > { %v12415_v18 = vmul.f32 %v21734_v20, %v12354_v54  ;;  %v12564_v10 = vmul.f32 %v21740_v39, %v12354_v54  ;;  %v12660_v32 = vld [vmem:[#allocation3 + $0x20] sm:$0xf]  ;;  %v12173_v50 = vmul.f32 %v12157_v47, %v20356_v40  ;;  %v21850_v54 = vmul.f32 %v12675_v11, %v12659_v57  ;;  %15054 = vmatpush2.bf16.msra.mxu1 %v18867_v2 }
 0x74f   : > { %v12293_v17 = vrot.slane %v12266_v22, 1  ;;  %v12971_v20 = vld [vmem:[#allocation3 + $0x20] sm:$0x3c]  ;;  %v12713_v39 = vmul.f32 %v12679_v60, %v12660_v32  ;;  %v12923_v11 = vmul.f32 %v12915_v53, %v20364_v48  ;;  %15055 = vmatprep.subr.bf16.mxu1 %v18872_v27  ;;  %v12430_v1 = vmul.f32 %v12414_v16, %v20358_v41 }
 0x750   : > { %v12431_v9 = vmul.f32 %v12415_v18, %v20358_v41  ;;  %v12580_v23 = vmul.f32 %v12564_v10, %v20360_v42  ;;  %v13072_v47 = vld [vmem:[#allocation3 + $0x20] sm:$0x78]  ;;  %v12822_v18 = vmul.f32 %v12814_v19, %v20362_v46  ;;  %v21854_v10 = vmul.f32 %v12990_v62, %v12971_v20 }
 0x751   : > { %v12294_v59 = vsel %vm5539_vm2, %v12292_v13, %v12293_v17  ;;  %v12338_v49 = vadd.f32 %v12293_v17, %v12173_v50  ;;  %v18870_v32 = vld [vmem:[#allocation24 + $0x340] ss:$16 sps:$4 sm:$0xff]   ;;  %v12172_v13 = vmul.f32 %v12156_v38, %v20356_v40  ;;  %v18875_v17 = vld [vmem:[#allocation24 + $0x324] ss:$16 sps:$4 sm:$0xff]   ;;  %v13125_v57 = vmul.f32 %v13091_v8, %v13072_v47 }
 0x752   : > { %v12458_v25 = vrot.slane %v12431_v9, 2  ;;  %v12607_v31 = vrot.slane %v12580_v23, 2  ;;  %v12330_v22 = vadd.f32 %v12294_v59, %v12165_v21  ;;  %v18881_v50 = vld [vmem:[#allocation24 + $0x4e4] ss:$16 sps:$4 sm:$0xff]   ;;  %v12290_v21 = vrot.slane %v12265_v56, 1  ;;  %15056 = vmatpush2.bf16.msra.mxu1 %v18870_v32 }
 0x753   : > { %v22998_v62 = vrot.slane %v21790_v43, 2  ;;  %v12729_v14 = vrot.slane %v12713_v39, 3  ;;  %15070 = vmatprep.subr.bf16.mxu0 %v18881_v50  ;;  %v12838_v53 = vrot.slane %v12822_v18, 4  ;;  %v22999_v38 = vrot.slane %v21793_v15, 1  ;;  %v18873_v56 = vld [vmem:[#allocation24 + $0x320] ss:$16 sps:$4 sm:$0xff]   ;;  %15057 = vmatprep.subr.bf16.mxu1 %v18875_v17 }
 0x754   : > { %v12459_v6 = vsel %vm5791_vm3, %v12457_v7, %v12458_v25  ;;  %v12503_v60 = vadd.f32 %v12458_v25, %v12338_v49  ;;  %v12579_v7 = vmul.f32 %v12563_v44, %v20360_v42  ;;  %v12337_v23 = vadd.f32 %v12290_v21, %v12172_v13  ;;  %v18878_v39 = vld [vmem:[#allocation24 + $0x304] ss:$16 sps:$4 sm:$0xff]   ;;  %v21878_v17 = vld [vmem:[#allocation22] sm:$0xff] }
 0x755   : > { %v12495_v37 = vadd.f32 %v12459_v6, %v12330_v22  ;;  %v12608_v28 = vsel %vm5791_vm3, %v22998_v62, %v12607_v31  ;;  %v12291_v9 = vsel %vm5539_vm2, %v22999_v38, %v12290_v21  ;;  %v12455_v43 = vrot.slane %v12430_v1, 2 }
 0x756   : > { %v12652_v2 = vadd.f32 %v12607_v31, %v12503_v60  ;;  %v12329_v16 = vadd.f32 %v12291_v9, %v21821_v45  ;;  %v12604_v20 = vrot.slane %v12579_v7, 2  ;;  %v12939_v44 = vrot.slane %v12923_v11, 4  ;;  %v12970_v45 = vld [vmem:[#allocation3 + $0x10] sm:$0x3c]  ;;  %15058 = vmatpush2.bf16.msra.mxu1 %v18873_v56 }
 0x757   : > { %v12644_v19 = vadd.f32 %v12608_v28, %v12495_v37  ;;  %v13040_v59 = vrot.slane %v21854_v10, 5  ;;  %v13133_v49 = vmul.f32 %v13125_v57, %v20372_v4  ;;  %v23000_v25 = vrot.slane %v21796_v5, 2  ;;  %v18876_v10 = vld [vmem:[#allocation24 + $0x300] ss:$16 sps:$4 sm:$0xff]   ;;  %15059 = vmatprep.subr.bf16.mxu1 %v18878_v39 }
 0x758   : > { %v12753_v8 = vadd.f32 %v12729_v14, %v12652_v2  ;;  %v12502_v47 = vadd.f32 %v12455_v43, %v12337_v23  ;;  %v12821_v22 = vmul.f32 %v12813_v36, %v20362_v46  ;;  %v12728_v6 = vrot.slane %v21850_v54, 3 }
 0x759   : > { %v12745_v27 = vadd.f32 %v12729_v14, %v12644_v19  ;;  %v12456_v31 = vsel %vm5791_vm3, %v23000_v25, %v12455_v43  ;;  %v23001_v60 = vrot.slane %v21812_v33, %v20333_v24  ;;  %v23002_v5 = vrot.slane %v21799_v63, 2 }
 0x75a   : > { %v12862_v15 = vadd.f32 %v12838_v53, %v12753_v8  ;;  %v12494_v32 = vadd.f32 %v12456_v31, %v12329_v16  ;;  %v12651_v37 = vadd.f32 %v12604_v20, %v12502_v47  ;;  %v12922_v36 = vmul.f32 %v12914_v12, %v20364_v48  ;;  %15060 = vmatpush2.bf16.msra.mxu1 %v18876_v10 }
 0x75b   : > { %v12854_v18 = vadd.f32 %v12838_v53, %v12745_v27  ;;  %v13124_v11 = vmul.f32 %v23001_v60, %v13071_v61  ;;  %v12605_v50 = vsel %vm5791_vm3, %v23002_v5, %v12604_v20  ;;  %v13189_v54 = vrot.slane %v21878_v17, %v20336_v52 }
 0x75c   : > { %v12963_v13 = vadd.f32 %v12939_v44, %v12862_v15  ;;  %v12643_v21 = vadd.f32 %v12605_v50, %v12494_v32  ;;  %v23003_v1 = vrot.slane %v21810_v34, %v20333_v24  ;;  %v13149_v2 = vrot.slane %v13133_v49, 6 }
 0x75d   : > { %v12955_v57 = vadd.f32 %v12939_v44, %v12854_v18  ;;  %v12752_v14 = vadd.f32 %v12728_v6, %v12651_v37  ;;  %v12837_v7 = vrot.slane %v12821_v22, 4  ;;  %v23004_v63 = vrot.slane %v21711_v58, %v20342_v30  ;;  %v11829_v12 = vpop.f32.mrf.mxu1 }
 0x75e   : > { %v13023_v62 = vmul.f32 %v23003_v1, %v12970_v45  ;;  %v13064_v28 = vadd.f32 %v13040_v59, %v12963_v13  ;;  %v12744_v38 = vadd.f32 %v12728_v6, %v12643_v21  ;;  %v13132_v9 = vmul.f32 %v13124_v11, %v20372_v4 }
 0x75f   : > { %v11791_v19 = vadd.f32 %v21703_v0, %v23004_v63  ;;  %v13056_v53 = vadd.f32 %v13040_v59, %v12955_v57  ;;  %v21895_v23 = vadd.f32 %v11829_v12, %v21802_v51  ;;  %v12861_v8 = vadd.f32 %v12837_v7, %v12752_v14  ;;  %v11831_v43 = vpop.f32.mrf.mxu1 }
 0x760   : > { %v13173_v56 = vadd.f32 %v13149_v2, %v13064_v28  ;;  %v12938_v16 = vrot.slane %v12922_v36, 4  ;;  %v12853_v61 = vadd.f32 %v12837_v7, %v12744_v38  ;;  %v13039_v39 = vrot.slane %v13023_v62, 5 }
 0x761   : > { %v13165_v20 = vadd.f32 %v13149_v2, %v13056_v53  ;;  %v16866_v27 = vmul.f32 -1.442695, %v21895_v23  ;;  %v21898_v44 = vadd.f32 %v11831_v43, %v11791_v19  ;;  %v11833_v49 = vpop.f32.mrf.mxu1  ;;  %v13148_v51 = vrot.slane %v13132_v9, 6  ;;  %v23005_v53 = vld [vmem:[#allocation50_spill] sm:$0xff]  ;;  %v12348_v9 = vld [vmem:[#allocation3] sm:$0x80] }
 0x762   : > { %v21900_v0 = vadd.f32 %v13189_v54, %v13173_v56  ;;  %v12962_v59 = vadd.f32 %v12938_v16, %v12861_v8  ;;  %v12954_v25 = vadd.f32 %v12938_v16, %v12853_v61  ;;  %v13185_v31 = vrot.slane %v21878_v17, %v20333_v24  ;;  %v12347_v8 = vld [vmem:[#allocation3 + $0xb8] sm:$0x80]  ;;  %v12199_v61 = vld [vmem:[#allocation3] sm:$0xc0] }
 0x763   : > { %v21902_v15 = vadd.f32 %v13189_v54, %v13165_v20  ;;  %19319 = vpow2.f32 %v16866_v27  ;;  %v16867_v47 = vmul.f32 -1.442695, %v21898_v44  ;;  %v11834_v18 = vpop.f32.mrf.mxu1  ;;  %v21917_v19 = vrot.slane %v21726_v29, %v20342_v30 }
 0x764   : > { %v16881_v22 = vmul.f32 -1.442695, %v21900_v0  ;;  %v13063_v45 = vadd.f32 %v13039_v39, %v12962_v59  ;;  %v13055_v6 = vadd.f32 %v13039_v39, %v12954_v25  ;;  %v21921_v12 = vrot.slane %v21728_v55, %v20342_v30  ;;  %v23006_v25 = vld [vmem:[#allocation51_spill] sm:$0xff]  ;;  %v23007_v18 = vld [vmem:[#allocation70_spill] sm:$0xff] }
 0x765   : > { %v16873_v32 = vmul.f32 -1.442695, %v21902_v15  ;;  %19321 = vpow2.f32 %v16867_v47  ;;  %v10371_v38 = vrot.slane %v21711_v58, %v23005_v53  ;;  %v21927_v56 = vrot.slane %v21726_v29, %v20339_v26  ;;  %v12198_v47 = vld [vmem:[#allocation3 + $0xb8] sm:$0xc0] }
 0x766   : > { %v13172_v60 = vadd.f32 %v13148_v51, %v13063_v45  ;;  %v13164_v11 = vadd.f32 %v13148_v51, %v13055_v6  ;;  %v21931_v16 = vrot.slane %v21736_v35, %v20342_v30  ;;  %v21935_v43 = vrot.slane %v21728_v55, %v20339_v26 }
 0x767   : > { %19323 = vpow2.f32 %v16873_v32  ;;  %v12409_v39 = vmul.f32 %v21917_v19, %v12348_v9  ;;  %v12558_v27 = vmul.f32 %v21921_v12, %v12348_v9  ;;  %v21941_v59 = vrot.slane %v21736_v35, %v20339_v26 }
 0x768   : > { %19325 = vpow2.f32 %v16881_v22  ;;  %v21909_v10 = vadd.f32 %v13185_v31, %v13172_v60  ;;  %v21911_v13 = vadd.f32 %v13185_v31, %v13164_v11  ;;  %v21944_v49 = vadd.f32 %v21707_v3, %v10371_v38  ;;  %v23008_v60 = vld [vmem:[#allocation65_spill] sm:$0xff]  ;;  %v23009_v3 = vld [vmem:[#allocation66_spill] sm:$0xff] }
 0x769   : > { %v12408_v22 = vmul.f32 %v21927_v56, %v12347_v8  ;;  %v12123_v32 = vrot.slane %v23007_v18, %v20342_v30  ;;  %v12119_v6 = vrot.slane %v23007_v18, %v20339_v26 }
 0x76a   : > { %v16880_v5 = vmul.f32 -1.442695, %v21909_v10  ;;  %v16872_v50 = vmul.f32 -1.442695, %v21911_v13 }
 0x76b   : > { %v21979_v38 = vmul.f32 %v12408_v22, %v20358_v41 }
 0x76c   : > { %19327 = vpow2.f32 %v16880_v5 }
 0x76d   : > { %19329 = vpow2.f32 %v16872_v50 }
 0x770   : > { %v19320_v37 = vpop.eup %19319 }
 0x771   : > { %v12026_v36 = vadd.f32 1.0, %v19320_v37  ;;  %v12091_v37 = vld [vmem:[#allocation3] sm:$0xe0] }
 0x772   : > { %v19322_v57 = vpop.eup %19321  ;;  %v12151_v9 = vmul.f32 %v12123_v32, %v12091_v37 }
 0x773   : > { %19331 = vrcp.f32 %v12026_v36  ;;  %v12027_v21 = vadd.f32 1.0, %v19322_v57  ;;  %v21960_v36 = vmul.f32 %v21931_v16, %v12199_v61  ;;  %v12090_v57 = vld [vmem:[#allocation3 + $0xb8] sm:$0xe0] }
 0x774   : > { %v19324_v54 = vpop.eup %19323  ;;  %v12150_v61 = vmul.f32 %v12119_v6, %v12090_v57 }
 0x775   : > { %v19326_v1 = vpop.eup %19325  ;;  %v13287_v62 = vadd.f32 1.0, %v19324_v54  ;;  %19333 = vrcp.f32 %v12027_v21  ;;  %v12557_v54 = vmul.f32 %v21935_v43, %v12347_v8  ;;  %v23010_v21 = vld [vmem:[#allocation63_spill] sm:$0xff]  ;;  %v12788_v8 = vrot.slane %v23009_v3, %v20342_v30 }
 0x776   : > { %v13295_v28 = vadd.f32 1.0, %v19326_v1  ;;  %v12298_v22 = vrot.slane %v21960_v36, 1  ;;  %v22003_v36 = vmul.f32 %v12150_v61, %v20356_v40 }
 0x777   : > { %19335 = vrcp.f32 %v13287_v62 }
 0x778   : > { %19337 = vrcp.f32 %v13295_v28 }
 0x779   : > { %v19328_v2 = vpop.eup %19327 }
 0x77a   : > { %v19330_v14 = vpop.eup %19329  ;;  %v13294_v7 = vadd.f32 1.0, %v19328_v2  ;;  %v21967_v2 = vmul.f32 %v12409_v39, %v20358_v41 }
 0x77b   : > { %v13286_v63 = vadd.f32 1.0, %v19330_v14  ;;  %v21970_v14 = vmul.f32 %v12558_v27, %v20360_v42 }
 0x77c   : > { %19339 = vrcp.f32 %v13294_v7 }
 0x77d   : > { %19341 = vrcp.f32 %v13286_v63  ;;  %v12687_v63 = vrot.slane %v23008_v60, %v20342_v30 }
 0x780   : > { %v19332_v20 = vpop.eup %19331 }
 0x781   : > { %v12050_v31 = vmul.f32 %v19332_v20, %v21895_v23 }
 0x782   : > { %v19334_v45 = vpop.eup %19333 }
 0x783   : > { %12082 = vst [vmem:[#allocation3 + $0x8] sm:$0xf] %v12050_v31  ;;  %v12051_v23 = vmul.f32 %v19334_v45, %v21898_v44  ;;  %v21973_v44 = vmul.f32 %v21941_v59, %v12198_v47  ;;  %v21992_v31 = vmul.f32 %v12557_v54, %v20360_v42  ;;  %v12463_v45 = vrot.slane %v21967_v2, 2 }
 0x784   : > { %v19336_v50 = vpop.eup %19335 }
 0x785   : > { %v19338_v62 = vpop.eup %19337  ;;  %v13335_v28 = vmul.f32 %v19336_v50, %v21902_v15  ;;  %12083 = vst [vmem:[#allocation3 + $0x88] sm:$0xf] %v12051_v23  ;;  %v12167_v15 = vmul.f32 %v12151_v9, %v20356_v40 }
 0x786   : > { %v13343_v7 = vmul.f32 %v19338_v62, %v21900_v0 }
 0x788   : > { %v13351_v39 = vpack.c.bf16 %v13343_v7, %v13335_v28 }
 0x789   : > { %v19340_v47 = vpop.eup %19339 }
 0x78a   : > { %v19342_v37 = vpop.eup %19341  ;;  %v13645_v57 = vshrl.u32 %v13351_v39, 16  ;;  %v13648_v62 = vshll.u32 %v13351_v39, 16  ;;  %v13342_v28 = vmul.f32 %v19340_v47, %v21909_v10  ;;  %v12098_v51 = vld [vmem:[#allocation3 + $0x8] sm:$0x1]  ;;  %v22009_v10 = vrot.slane %v21878_v17, %v20342_v30 }
 0x78b   : > { %v13334_v54 = vmul.f32 %v19342_v37, %v21911_v13  ;;  %v12206_v2 = vld [vmem:[#allocation3 + $0x8] sm:$0x3]  ;;  %v12158_v7 = vmul.f32 %v12119_v6, %v12098_v51 }
 0x78c   : > { %v12355_v1 = vld [vmem:[#allocation3 + $0x8] sm:$0x7]  ;;  %v13647_v23 = vrot.slane %v13645_v57, 2  ;;  %v13650_v27 = vrot.slane %v13648_v62, 3  ;;  %v12267_v61 = vmul.f32 %v21941_v59, %v12206_v2 }
 0x78d   : > { %v13350_v47 = vpack.c.bf16 %v13342_v28, %v13334_v54  ;;  %v12099_v13 = vld [vmem:[#allocation3 + $0x88] sm:$0x1]  ;;  %v12416_v50 = vmul.f32 %v21927_v56, %v12355_v1  ;;  %v12763_v20 = vld [vmem:[#allocation3 + $0x88] sm:$0x1e]  ;;  %v12565_v54 = vmul.f32 %v21935_v43, %v12355_v1  ;;  %v18879_v1 = vld [vmem:[#allocation24 + $0x4e0] ss:$16 sps:$4 sm:$0xff]  }
 0x78e   : > { %v12207_v37 = vld [vmem:[#allocation3 + $0x88] sm:$0x3]  ;;  %v22014_v11 = vor.u32 %v13650_v27, %v13647_v23  ;;  %v12159_v5 = vmul.f32 %v12123_v32, %v12099_v13  ;;  %v12816_v32 = vmul.f32 %v12788_v8, %v12763_v20  ;;  %v12973_v23 = vld [vmem:[#allocation3 + $0x88] sm:$0x3c] }
 0x78f   : > { %v12356_v9 = vld [vmem:[#allocation3 + $0x88] sm:$0x7]  ;;  %v12268_v57 = vmul.f32 %v21931_v16, %v12207_v37  ;;  %v13637_v52 = vshrl.u32 %v13350_v47, 16  ;;  %v13640_v39 = vshll.u32 %v13350_v47, 16 }
 0x790   : > { %23011 = vst [vmem:[#allocation64_spill] sm:$0xff] %v22014_v11  ;;  %v12417_v62 = vmul.f32 %v21917_v19, %v12356_v9  ;;  %v12662_v0 = vld [vmem:[#allocation3 + $0x88] sm:$0xf]  ;;  %v12566_v28 = vmul.f32 %v21921_v12, %v12356_v9  ;;  %15020 = vmatprep.mubr.bf16.mxu0 %v22014_v11  ;;  %v12175_v59 = vmul.f32 %v12159_v5, %v20356_v40 }
 0x791   : > { %v12299_v56 = vrot.slane %v12268_v57, 1  ;;  %v13639_v6 = vrot.slane %v13637_v52, 2  ;;  %v13642_v16 = vrot.slane %v13640_v39, 3  ;;  %v12715_v27 = vmul.f32 %v12687_v63, %v12662_v0  ;;  %v12661_v2 = vld [vmem:[#allocation3 + $0x8] sm:$0xf] }
 0x792   : > { %v12433_v51 = vmul.f32 %v12417_v62, %v20358_v41  ;;  %v12582_v19 = vmul.f32 %v12566_v28, %v20360_v42  ;;  %v12824_v43 = vmul.f32 %v12816_v32, %v20362_v46  ;;  %v23013_v52 = vrot.slane %v23010_v21, %v20342_v30  ;;  %v13074_v39 = vld [vmem:[#allocation3 + $0x88] sm:$0x78] }
 0x793   : > { %v12300_v47 = vsel %vm5539_vm2, %v12298_v22, %v12299_v56  ;;  %v12340_v12 = vadd.f32 %v12299_v56, %v12175_v59  ;;  %v22026_v37 = vor.u32 %v13642_v16, %v13639_v6  ;;  %v18884_v57 = vld [vmem:[#allocation24 + $0x4c4] ss:$16 sps:$4 sm:$0xff]   ;;  %v23014_v22 = vrot.slane %v21810_v34, %v20342_v30 }
 0x794   : > { %v12464_v13 = vrot.slane %v12433_v51, 2  ;;  %v12332_v5 = vadd.f32 %v12300_v47, %v12167_v15  ;;  %v12613_v9 = vrot.slane %v12582_v19, 2  ;;  %v12917_v8 = vmul.f32 %v23013_v52, %v12763_v20  ;;  %v18929_v47 = vld [vmem:[#allocation24 + $0x6e4] ss:$16 sps:$4 sm:$0xff]  }
 0x795   : > { %23012 = vst [vmem:[#allocation72_spill] sm:$0xff] %v22026_v37  ;;  %v13026_v62 = vmul.f32 %v23014_v22, %v12973_v23  ;;  %v23015_v28 = vrot.slane %v23008_v60, %v20339_v26  ;;  %15021 = vmatmul.mubr.bf16.vlgmr.msra.gmra.mxu0 %v22026_v37  ;;  %v23016_v56 = vrot.slane %v21970_v14, 2  ;;  %v12731_v51 = vrot.slane %v12715_v27, 3  ;;  %v12762_v52 = vld [vmem:[#allocation3 + $0x8] sm:$0x1e]  ;;  %15111 = vmatprep.subr.bf16.mxu1 %v18929_v47 }
 0x796   : > { %v12465_v63 = vsel %vm5791_vm3, %v12463_v45, %v12464_v13  ;;  %v12505_v0 = vadd.f32 %v12464_v13, %v12340_v12  ;;  %v12925_v45 = vmul.f32 %v12917_v8, %v20364_v48  ;;  %v23017_v6 = vrot.slane %v21812_v33, %v20342_v30  ;;  %15071 = vmatpush1.bf16.msra.mxu0 %v18879_v1  ;;  %v18887_v27 = vld [vmem:[#allocation24 + $0x4a4] ss:$16 sps:$4 sm:$0xff]  }
 0x797   : > { %v22038_v59 = vmul.f32 %v23015_v28, %v12661_v2  ;;  %v12497_v15 = vadd.f32 %v12465_v63, %v12332_v5  ;;  %v12614_v20 = vsel %vm5791_vm3, %v23016_v56, %v12613_v9  ;;  %v12174_v19 = vmul.f32 %v12158_v7, %v20356_v40  ;;  %v18882_v2 = vld [vmem:[#allocation24 + $0x4c0] ss:$16 sps:$4 sm:$0xff]   ;;  %15072 = vmatprep.subr.bf16.mxu0 %v18884_v57 }
 0x798   : > { %v12654_v32 = vadd.f32 %v12613_v9, %v12505_v0  ;;  %v13127_v16 = vmul.f32 %v23017_v6, %v13074_v39  ;;  %v12296_v23 = vrot.slane %v12267_v61, 1  ;;  %v12840_v13 = vrot.slane %v12824_v43, 4 }
 0x799   : > { %v12646_v12 = vadd.f32 %v12614_v20, %v12497_v15  ;;  %v13042_v5 = vrot.slane %v13026_v62, 5  ;;  %v12432_v14 = vmul.f32 %v12416_v50, %v20358_v41  ;;  %v23018_v9 = vrot.slane %v21973_v44, 1  ;;  %v18885_v44 = vld [vmem:[#allocation24 + $0x4a0] ss:$16 sps:$4 sm:$0xff]  }
 0x79a   : > { %v12755_v8 = vadd.f32 %v12731_v51, %v12654_v32  ;;  %v12339_v39 = vadd.f32 %v12296_v23, %v12174_v19  ;;  %v12581_v7 = vmul.f32 %v12565_v54, %v20360_v42  ;;  %v12941_v1 = vrot.slane %v12925_v45, 4  ;;  %15073 = vmatpush1.bf16.msra.mxu0 %v18882_v2  ;;  %v13073_v45 = vld [vmem:[#allocation3 + $0x8] sm:$0x78] }
 0x79b   : > { %v12297_v63 = vsel %vm5539_vm2, %v23018_v9, %v12296_v23  ;;  %v12747_v61 = vadd.f32 %v12731_v51, %v12646_v12  ;;  %v12461_v43 = vrot.slane %v12432_v14, 2  ;;  %v13135_v50 = vmul.f32 %v13127_v16, %v20372_v4  ;;  %15074 = vmatprep.subr.bf16.mxu0 %v18887_v27  ;;  %v18890_v32 = vld [vmem:[#allocation24 + $0x484] ss:$16 sps:$4 sm:$0xff]  }
 0x79c   : > { %v12331_v0 = vadd.f32 %v12297_v63, %v22003_v36  ;;  %v12864_v22 = vadd.f32 %v12840_v13, %v12755_v8  ;;  %v12610_v62 = vrot.slane %v12581_v7, 2  ;;  %v23019_v57 = vrot.slane %v23009_v3, %v20339_v26  ;;  %v12972_v2 = vld [vmem:[#allocation3 + $0x8] sm:$0x3c] }
 0x79d   : > { %v12856_v15 = vadd.f32 %v12840_v13, %v12747_v61  ;;  %v23020_v56 = vrot.slane %v21979_v38, 2  ;;  %v12504_v20 = vadd.f32 %v12461_v43, %v12339_v39  ;;  %v23021_v36 = vrot.slane %v23010_v21, %v20339_v26  ;;  %v11911_v39 = vpop.f32.mrf.mxu1 }
 0x79e   : > { %v12815_v28 = vmul.f32 %v23019_v57, %v12762_v52  ;;  %v12965_v6 = vadd.f32 %v12941_v1, %v12864_v22  ;;  %v12730_v19 = vrot.slane %v22038_v59, 3  ;;  %v23022_v38 = vrot.slane %v21992_v31, 2  ;;  %15075 = vmatpush1.bf16.msra.mxu0 %v18885_v44  ;;  %v18888_v59 = vld [vmem:[#allocation24 + $0x480] ss:$16 sps:$4 sm:$0xff]  }
 0x79f   : > { %v12462_v54 = vsel %vm5791_vm3, %v23020_v56, %v12461_v43  ;;  %v12916_v51 = vmul.f32 %v23021_v36, %v12762_v52  ;;  %v12957_v47 = vadd.f32 %v12941_v1, %v12856_v15  ;;  %v12653_v13 = vadd.f32 %v12610_v62, %v12504_v20  ;;  %15076 = vmatprep.subr.bf16.mxu0 %v18890_v32  ;;  %v18893_v43 = vld [vmem:[#allocation24 + $0x464] ss:$16 sps:$4 sm:$0xff]   ;;  %v11913_v15 = vpop.f32.mrf.mxu1  ;;  %v18891_v32 = vld [vmem:[#allocation24 + $0x460] ss:$16 sps:$4 sm:$0xff]  }
 0x7a0   : > { %v12496_v16 = vadd.f32 %v12462_v54, %v12331_v0  ;;  %v12823_v23 = vmul.f32 %v12815_v28, %v20362_v46  ;;  %v12611_v12 = vsel %vm5791_vm3, %v23022_v38, %v12610_v62  ;;  %v13066_v8 = vadd.f32 %v13042_v5, %v12965_v6 }
 0x7a1   : > { %v12924_v14 = vmul.f32 %v12916_v51, %v20364_v48  ;;  %v13151_v52 = vrot.slane %v13135_v50, 6  ;;  %v23023_v27 = vrot.slane %v21812_v33, %v20339_v26  ;;  %v13058_v7 = vadd.f32 %v13042_v5, %v12957_v47  ;;  %v23026_v50 = vld [vmem:[#allocation74_spill] sm:$0xff] }
 0x7a2   : > { %v12645_v9 = vadd.f32 %v12611_v12, %v12496_v16  ;;  %v12754_v61 = vadd.f32 %v12730_v19, %v12653_v13  ;;  %v12839_v1 = vrot.slane %v12823_v23, 4  ;;  %v23024_v31 = vrot.slane %v21810_v34, %v20339_v26  ;;  %15077 = vmatpush1.bf16.msra.mxu0 %v18888_v59  ;;  %v18896_v23 = vld [vmem:[#allocation24 + $0x444] ss:$16 sps:$4 sm:$0xff]  }
 0x7a3   : > { %v13126_v63 = vmul.f32 %v23023_v27, %v13073_v45  ;;  %v23025_v22 = vrot.slane %v21711_v58, %v23006_v25  ;;  %v22082_v57 = vadd.f32 %v11911_v39, %v21944_v49  ;;  %v13175_v28 = vadd.f32 %v13151_v52, %v13066_v8  ;;  %v11915_v49 = vpop.f32.mrf.mxu1  ;;  %15078 = vmatprep.subr.bf16.mxu0 %v18893_v43  ;;  %v18900_v43 = vld [vmem:[#allocation24 + $0x400] ss:$16 sps:$4 sm:$0xff]  }
 0x7a4   : > { %v13025_v0 = vmul.f32 %v23024_v31, %v12972_v2  ;;  %v12746_v44 = vadd.f32 %v12730_v19, %v12645_v9  ;;  %v13167_v5 = vadd.f32 %v13151_v52, %v13058_v7  ;;  %v12863_v56 = vadd.f32 %v12839_v1, %v12754_v61  ;;  %v18894_v9 = vld [vmem:[#allocation24 + $0x440] ss:$16 sps:$4 sm:$0xff]   ;;  %v18902_v31 = vld [vmem:[#allocation24 + $0x404] ss:$16 sps:$4 sm:$0xff]  }
 0x7a5   : > { %v11873_v62 = vadd.f32 %v23026_v50, %v23025_v22  ;;  %v12940_v54 = vrot.slane %v12924_v14, 4  ;;  %v13134_v20 = vmul.f32 %v13126_v63, %v20372_v4  ;;  %v16868_v36 = vmul.f32 -1.442695, %v22082_v57  ;;  %v11916_v12 = vpop.f32.mrf.mxu1  ;;  %v18899_v63 = vld [vmem:[#allocation24 + $0x424] ss:$16 sps:$4 sm:$0xff]  }
 0x7a6   : > { %v22089_v45 = vadd.f32 %v22009_v10, %v13175_v28  ;;  %v12855_v58 = vadd.f32 %v12839_v1, %v12746_v44  ;;  %v22092_v6 = vadd.f32 %v22009_v10, %v13167_v5  ;;  %v13041_v19 = vrot.slane %v13025_v0, 5  ;;  %15079 = vmatpush1.bf16.msra.mxu0 %v18891_v32  ;;  %v18897_v61 = vld [vmem:[#allocation24 + $0x420] ss:$16 sps:$4 sm:$0xff]   ;;  %v18905_v22 = vld [vmem:[#allocation24 + $0x5e4] ss:$16 sps:$4 sm:$0xff]  }
 0x7a7   : > { %v22086_v51 = vadd.f32 %v11913_v15, %v11873_v62  ;;  %v12964_v16 = vadd.f32 %v12940_v54, %v12863_v56  ;;  %19343 = vpow2.f32 %v16868_v36  ;;  %v13150_v8 = vrot.slane %v13134_v20, 6  ;;  %15080 = vmatprep.subr.bf16.mxu0 %v18896_v23  ;;  %v18903_v28 = vld [vmem:[#allocation24 + $0x5e0] ss:$16 sps:$4 sm:$0xff]   ;;  %v18908_v15 = vld [vmem:[#allocation24 + $0x5c4] ss:$16 sps:$4 sm:$0xff]  }
 0x7a8   : > { %v16883_v47 = vmul.f32 -1.442695, %v22089_v45  ;;  %v12956_v38 = vadd.f32 %v12940_v54, %v12855_v58  ;;  %v16875_v13 = vmul.f32 -1.442695, %v22092_v6  ;;  %v13193_v52 = vrot.slane %v21878_v17, %v20339_v26  ;;  %v18906_v58 = vld [vmem:[#allocation24 + $0x5c0] ss:$16 sps:$4 sm:$0xff]  }
 0x7a9   : > { %v16869_v2 = vmul.f32 -1.442695, %v22086_v51  ;;  %v13065_v14 = vadd.f32 %v13041_v19, %v12964_v16  ;;  %v18911_v32 = vld [vmem:[#allocation24 + $0x5a4] ss:$16 sps:$4 sm:$0xff]   ;;  %v18909_v16 = vld [vmem:[#allocation24 + $0x5a0] ss:$16 sps:$4 sm:$0xff]   ;;  %v22111_v12 = vrot.slane %v21728_v55, %v23006_v25 }
 0x7aa   : > { %v13057_v10 = vadd.f32 %v13041_v19, %v12956_v38  ;;  %15081 = vmatpush1.bf16.msra.mxu0 %v18894_v9  ;;  %v22107_v38 = vrot.slane %v21726_v29, %v23006_v25  ;;  %v12349_v9 = vld [vmem:[#allocation3 + $0x48] sm:$0x80] }
 0x7ab   : > { %19345 = vpow2.f32 %v16869_v2  ;;  %v13174_v27 = vadd.f32 %v13150_v8, %v13065_v14  ;;  %15082 = vmatprep.subr.bf16.mxu0 %v18899_v63  ;;  %v18914_v2 = vld [vmem:[#allocation24 + $0x584] ss:$16 sps:$4 sm:$0xff]   ;;  %v22115_v14 = vrot.slane %v21726_v29, %v23005_v53  ;;  %v12093_v63 = vld [vmem:[#allocation3 + $0x98] sm:$0xe0] }
 0x7ac   : > { %19347 = vpow2.f32 %v16875_v13  ;;  %v13166_v59 = vadd.f32 %v13150_v8, %v13057_v10  ;;  %v12350_v13 = vld [vmem:[#allocation3 + $0x98] sm:$0x80]  ;;  %v18912_v8 = vld [vmem:[#allocation24 + $0x580] ss:$16 sps:$4 sm:$0xff]   ;;  %v22123_v10 = vrot.slane %v21736_v35, %v23006_v25 }
 0x7ad   : > { %19349 = vpow2.f32 %v16883_v47  ;;  %v22099_v39 = vadd.f32 %v13193_v52, %v13174_v27  ;;  %v18917_v27 = vld [vmem:[#allocation24 + $0x564] ss:$16 sps:$4 sm:$0xff]  }
 0x7ae   : > { %v22101_v7 = vadd.f32 %v13193_v52, %v13166_v59  ;;  %15083 = vmatpush1.bf16.msra.mxu0 %v18897_v61  ;;  %v22119_v52 = vrot.slane %v23007_v18, %v23006_v25  ;;  %v12201_v59 = vld [vmem:[#allocation3 + $0x98] sm:$0xc0]  ;;  %v12411_v61 = vmul.f32 %v22107_v38, %v12350_v13 }
 0x7af   : > { %v16882_v1 = vmul.f32 -1.442695, %v22099_v39  ;;  %15084 = vmatprep.subr.bf16.mxu0 %v18902_v31  ;;  %v22129_v31 = vrot.slane %v21728_v55, %v23005_v53 }
 0x7b0   : > { %v16874_v0 = vmul.f32 -1.442695, %v22101_v7 }
 0x7b1   : > { %19351 = vpow2.f32 %v16882_v1  ;;  %v12560_v1 = vmul.f32 %v22111_v12, %v12350_v13 }
 0x7b2   : > { %19353 = vpow2.f32 %v16874_v0  ;;  %15085 = vmatpush1.bf16.msra.mxu0 %v18900_v43  ;;  %v22133_v43 = vrot.slane %v23007_v18, %v23005_v53 }
 0x7b3   : > { %15086 = vmatprep.subr.bf16.mxu0 %v18905_v22  ;;  %v22137_v22 = vrot.slane %v21736_v35, %v23005_v53 }
 0x7b4   : > { %v19344_v50 = vpop.eup %19343 }
 0x7b5   : > { %v12028_v62 = vadd.f32 1.0, %v19344_v50  ;;  %v12410_v50 = vmul.f32 %v22115_v14, %v12349_v9 }
 0x7b6   : > { %15087 = vmatpush2.bf16.msra.mxu0 %v18903_v28  ;;  %v23027_v28 = vld [vmem:[#allocation52_spill] sm:$0xff] }
 0x7b7   : > { %19355 = vrcp.f32 %v12028_v62  ;;  %15088 = vmatprep.subr.bf16.mxu0 %v18908_v15  ;;  %v22140_v62 = vld [vmem:[#allocation19] sm:$0xff] }
 0x7b8   : > { %v19346_v44 = vpop.eup %19345 }
 0x7b9   : > { %v19348_v5 = vpop.eup %19347  ;;  %v12029_v56 = vadd.f32 1.0, %v19346_v44  ;;  %v10379_v44 = vrot.slane %v22140_v62, %v23027_v28 }
 0x7ba   : > { %v19350_v54 = vpop.eup %19349  ;;  %v13289_v20 = vadd.f32 1.0, %v19348_v5  ;;  %15089 = vmatpush2.bf16.msra.mxu0 %v18906_v58  ;;  %v18915_v5 = vld [vmem:[#allocation24 + $0x560] ss:$16 sps:$4 sm:$0xff]  }
 0x7bb   : > { %19357 = vrcp.f32 %v12029_v56  ;;  %v13297_v36 = vadd.f32 1.0, %v19350_v54  ;;  %15090 = vmatprep.subr.bf16.mxu0 %v18911_v32  ;;  %v12153_v56 = vmul.f32 %v22119_v52, %v12093_v63  ;;  %v22147_v54 = vmul.f32 %v22123_v10, %v12201_v59  ;;  %v23028_v32 = vld [vmem:[#allocation53_spill] sm:$0xff] }
 0x7bc   : > { %19359 = vrcp.f32 %v13289_v20  ;;  %v12092_v20 = vld [vmem:[#allocation3 + $0x48] sm:$0xe0]  ;;  %v22165_v59 = vmul.f32 %v12410_v50, %v20358_v41  ;;  %v12796_v50 = vrot.slane %v23009_v3, %v23006_v25 }
 0x7bd   : > { %19361 = vrcp.f32 %v13297_v36  ;;  %v12200_v36 = vld [vmem:[#allocation3 + $0x48] sm:$0xc0]  ;;  %v12152_v63 = vmul.f32 %v22133_v43, %v12092_v20  ;;  %v12695_v20 = vrot.slane %v23008_v60, %v23006_v25 }
 0x7be   : > { %v19352_v49 = vpop.eup %19351  ;;  %15091 = vmatpush2.bf16.msra.mxu0 %v18909_v16  ;;  %v18920_v16 = vld [vmem:[#allocation24 + $0x544] ss:$16 sps:$4 sm:$0xff]  }
 0x7bf   : > { %v19354_v19 = vpop.eup %19353  ;;  %v13296_v23 = vadd.f32 1.0, %v19352_v49  ;;  %15092 = vmatprep.subr.bf16.mxu0 %v18914_v2  ;;  %v22156_v2 = vmul.f32 %v12560_v1, %v20360_v42  ;;  %v18918_v1 = vld [vmem:[#allocation24 + $0x540] ss:$16 sps:$4 sm:$0xff]  }
 0x7c0   : > { %v13288_v47 = vadd.f32 1.0, %v19354_v19 }
 0x7c1   : > { %19363 = vrcp.f32 %v13296_v23 }
 0x7c2   : > { %19365 = vrcp.f32 %v13288_v47  ;;  %15093 = vmatpush2.bf16.msra.mxu0 %v18912_v8  ;;  %v12559_v47 = vmul.f32 %v22129_v31, %v12349_v9  ;;  %v22172_v9 = vmul.f32 %v12153_v56, %v20356_v40  ;;  %v18926_v56 = vld [vmem:[#allocation24 + $0x504] ss:$16 sps:$4 sm:$0xff]  }
 0x7c3   : > { %15094 = vmatprep.subr.bf16.mxu0 %v18917_v27  ;;  %v22162_v27 = vmul.f32 %v22137_v22, %v12200_v36  ;;  %v12691_v36 = vrot.slane %v23008_v60, %v23005_v53 }
 0x7c4   : > { %v19356_v0 = vpop.eup %19355 }
 0x7c5   : > { %v12052_v15 = vmul.f32 %v19356_v0, %v22082_v57  ;;  %v22153_v57 = vmul.f32 %v12411_v61, %v20358_v41 }
 0x7c6   : > { %15095 = vmatpush2.bf16.msra.mxu0 %v18915_v5 }
 0x7c7   : > { %12084 = vst [vmem:[#allocation3 + $0x30] sm:$0xf] %v12052_v15  ;;  %15096 = vmatprep.subr.bf16.mxu0 %v18920_v16  ;;  %v18923_v15 = vld [vmem:[#allocation24 + $0x524] ss:$16 sps:$4 sm:$0xff]  }
 0x7c8   : > { %v19358_v58 = vpop.eup %19357 }
 0x7c9   : > { %v19360_v19 = vpop.eup %19359  ;;  %v12053_v23 = vmul.f32 %v19358_v58, %v22086_v51  ;;  %v23029_v51 = vld [vmem:[#allocation77_spill] sm:$0xff]  ;;  %v22187_v58 = vmul.f32 %v12559_v47, %v20360_v42 }
 0x7ca   : > { %v19362_v13 = vpop.eup %19361  ;;  %v13337_v8 = vmul.f32 %v19360_v19, %v22092_v6  ;;  %v22168_v0 = vadd.f32 %v23029_v51, %v10379_v44  ;;  %v22191_v19 = vmul.f32 %v12152_v63, %v20356_v40  ;;  %15097 = vmatpush2.bf16.msra.mxu0 %v18918_v1 }
 0x7cb   : > { %12085 = vst [vmem:[#allocation3 + $0x38] sm:$0xf] %v12053_v23  ;;  %v13345_v61 = vmul.f32 %v19362_v13, %v22089_v45  ;;  %15098 = vmatprep.subr.bf16.mxu0 %v18923_v15 }
 0x7cd   : > { %v13353_v5 = vpack.c.bf16 %v13345_v61, %v13337_v8  ;;  %v18921_v61 = vld [vmem:[#allocation24 + $0x520] ss:$16 sps:$4 sm:$0xff]  }
 0x7ce   : > { %v19364_v51 = vpop.eup %19363  ;;  %v12100_v45 = vld [vmem:[#allocation3 + $0x30] sm:$0x1]  ;;  %15099 = vmatpush2.bf16.msra.mxu0 %v18921_v61 }
 0x7cf   : > { %v13661_v49 = vshrl.u32 %v13353_v5, 16  ;;  %v13664_v8 = vshll.u32 %v13353_v5, 16  ;;  %v19366_v16 = vpop.eup %19365  ;;  %v13344_v63 = vmul.f32 %v19364_v51, %v22099_v39  ;;  %v12208_v23 = vld [vmem:[#allocation3 + $0x30] sm:$0x3]  ;;  %v22210_v51 = vrot.slane %v21878_v17, %v23006_v25  ;;  %15100 = vmatprep.subr.bf16.mxu0 %v18926_v56 }
 0x7d0   : > { %v12357_v44 = vld [vmem:[#allocation3 + $0x30] sm:$0x7]  ;;  %v13336_v47 = vmul.f32 %v19366_v16, %v22101_v7  ;;  %v12160_v13 = vmul.f32 %v22133_v43, %v12100_v45  ;;  %v22214_v1 = vmul.f32 %v22137_v22, %v12208_v23  ;;  %v18924_v7 = vld [vmem:[#allocation24 + $0x500] ss:$16 sps:$4 sm:$0xff]  }
 0x7d1   : > { %v13663_v6 = vrot.slane %v13661_v49, 2  ;;  %v13666_v30 = vrot.slane %v13664_v8, 3  ;;  %v12418_v5 = vmul.f32 %v22115_v14, %v12357_v44  ;;  %v18932_v45 = vld [vmem:[#allocation24 + $0xec] ss:$16 sps:$4 sm:$0xff]   ;;  %v12567_v14 = vmul.f32 %v22129_v31, %v12357_v44 }
 0x7d2   : > { %v12101_v24 = vld [vmem:[#allocation3 + $0x38] sm:$0x1]  ;;  %v13352_v8 = vpack.c.bf16 %v13344_v63, %v13336_v47  ;;  %v12765_v11 = vld [vmem:[#allocation3 + $0x38] sm:$0x1e]  ;;  %15101 = vmatpush2.bf16.msra.mxu0 %v18924_v7  ;;  %v23030_v31 = vrot.slane %v22147_v54, 1  ;;  %v23032_v54 = vrot.slane %v21810_v34, %v23006_v25 }
 0x7d3   : > { %v12209_v39 = vld [vmem:[#allocation3 + $0x38] sm:$0x3]  ;;  %v22217_v49 = vor.u32 %v13666_v30, %v13663_v6  ;;  %v12161_v16 = vmul.f32 %v22119_v52, %v12101_v24  ;;  %v12818_v22 = vmul.f32 %v12796_v50, %v12765_v11  ;;  %v12663_v52 = vld [vmem:[#allocation3 + $0x30] sm:$0xf]  ;;  %v13076_v50 = vld [vmem:[#allocation3 + $0x38] sm:$0x78]  ;;  %15152 = vmatprep.subr.bf16.mxu0 %v18932_v45 }
 0x7d4   : > { %v12358_v15 = vld [vmem:[#allocation3 + $0x38] sm:$0x7]  ;;  %v12270_v26 = vmul.f32 %v22123_v10, %v12209_v39  ;;  %v13653_v30 = vshrl.u32 %v13352_v8, 16  ;;  %v13656_v6 = vshll.u32 %v13352_v8, 16  ;;  %v23034_v45 = vrot.slane %v22153_v57, 2 }
 0x7d5   : > { %v12664_v37 = vld [vmem:[#allocation3 + $0x38] sm:$0xf]  ;;  %v12419_v17 = vmul.f32 %v22107_v38, %v12358_v15  ;;  %v12568_v43 = vmul.f32 %v22111_v12, %v12358_v15  ;;  %15061 = vmatprep.mubr.bf16.mxu1 %v22217_v49  ;;  %v12177_v23 = vmul.f32 %v12161_v16, %v20356_v40  ;;  %v12826_v38 = vmul.f32 %v12818_v22, %v20362_v46  ;;  %v18927_v16 = vld [vmem:[#allocation24 + $0x6e0] ss:$16 sps:$4 sm:$0xff]  }
 0x7d6   : > { %v12305_v24 = vrot.slane %v12270_v26, 1  ;;  %v12717_v61 = vmul.f32 %v12695_v20, %v12664_v37  ;;  %v12975_v12 = vld [vmem:[#allocation3 + $0x38] sm:$0x3c]  ;;  %v13655_v47 = vrot.slane %v13653_v30, 2  ;;  %v13658_v63 = vrot.slane %v13656_v6, 3 }
 0x7d7   : > { %v12435_v10 = vmul.f32 %v12419_v17, %v20358_v41  ;;  %v12584_v56 = vmul.f32 %v12568_v43, %v20360_v42  ;;  %v22233_v17 = vmul.f32 %v12691_v36, %v12663_v52  ;;  %v23031_v20 = vrot.slane %v23010_v21, %v23006_v25  ;;  %v18935_v30 = vld [vmem:[#allocation24 + $0x6c4] ss:$16 sps:$4 sm:$0xff]  }
 0x7d8   : > { %v12306_v44 = vsel %vm5539_vm2, %v23030_v31, %v12305_v24  ;;  %v12342_v39 = vadd.f32 %v12305_v24, %v12177_v23  ;;  %v22235_v37 = vor.u32 %v13658_v63, %v13655_v47  ;;  %v22243_v7 = vmul.f32 %v23032_v54, %v12975_v12 }
 0x7d9   : > { %v12334_v26 = vadd.f32 %v12306_v44, %v22172_v9  ;;  %v12470_v15 = vrot.slane %v12435_v10, 2  ;;  %v12619_v8 = vrot.slane %v12584_v56, 2  ;;  %v12919_v43 = vmul.f32 %v23031_v20, %v12765_v11 }
 0x7da   : > { %v23033_v9 = vrot.slane %v21812_v33, %v23006_v25  ;;  %v12733_v23 = vrot.slane %v12717_v61, 3  ;;  %v12176_v24 = vmul.f32 %v12160_v13, %v20356_v40  ;;  %15062 = vmatmul.mubr.bf16.vlgmr.msra.gmra.mxu1 %v22235_v37  ;;  %v23035_v52 = vrot.slane %v22156_v2, 2  ;;  %v12764_v61 = vld [vmem:[#allocation3 + $0x30] sm:$0x1e] }
 0x7db   : > { %v12471_v36 = vsel %vm5791_vm3, %v23034_v45, %v12470_v15  ;;  %v12507_v6 = vadd.f32 %v12470_v15, %v12342_v39  ;;  %v12842_v56 = vrot.slane %v12826_v38, 4  ;;  %v12927_v25 = vmul.f32 %v12919_v43, %v20364_v48  ;;  %15112 = vmatpush1.bf16.msra.mxu1 %v18927_v16  ;;  %v18933_v13 = vld [vmem:[#allocation24 + $0x6c0] ss:$16 sps:$4 sm:$0xff]   ;;  %v18941_v38 = vld [vmem:[#allocation24 + $0x6a4] ss:$16 sps:$4 sm:$0xff]  }
 0x7dc   : > { %v13129_v22 = vmul.f32 %v23033_v9, %v13076_v50  ;;  %v12499_v11 = vadd.f32 %v12471_v36, %v12334_v26  ;;  %v12620_v10 = vsel %vm5791_vm3, %v23035_v52, %v12619_v8  ;;  %v12302_v50 = vrot.slane %v22214_v1, 1  ;;  %15113 = vmatprep.subr.bf16.mxu1 %v18935_v30  ;;  %v13075_v45 = vld [vmem:[#allocation3 + $0x30] sm:$0x78]  ;;  %v18947_v52 = vld [vmem:[#allocation24 + $0x684] ss:$16 sps:$4 sm:$0xff]  }
 0x7dd   : > { %v12656_v12 = vadd.f32 %v12619_v8, %v12507_v6  ;;  %v12434_v57 = vmul.f32 %v12418_v5, %v20358_v41  ;;  %v12583_v47 = vmul.f32 %v12567_v14, %v20360_v42  ;;  %v12943_v31 = vrot.slane %v12927_v25, 4  ;;  %v18939_v36 = vld [vmem:[#allocation24 + $0x6a0] ss:$16 sps:$4 sm:$0xff]  }
 0x7de   : > { %v12648_v63 = vadd.f32 %v12620_v10, %v12499_v11  ;;  %v13044_v44 = vrot.slane %v22243_v7, 5  ;;  %v13137_v2 = vmul.f32 %v13129_v22, %v20372_v4  ;;  %v23036_v26 = vrot.slane %v22162_v27, 1  ;;  %v12974_v11 = vld [vmem:[#allocation3 + $0x30] sm:$0x3c] }
 0x7df   : > { %v12757_v39 = vadd.f32 %v12733_v23, %v12656_v12  ;;  %v12341_v15 = vadd.f32 %v12302_v50, %v12176_v24  ;;  %v12467_v5 = vrot.slane %v12434_v57, 2  ;;  %v12616_v16 = vrot.slane %v12583_v47, 2  ;;  %15114 = vmatpush1.bf16.msra.mxu1 %v18933_v13  ;;  %v11993_v13 = vpop.f32.mrf.mxu1 }
 0x7e0   : > { %v12303_v1 = vsel %vm5539_vm2, %v23036_v26, %v12302_v50  ;;  %v12749_v8 = vadd.f32 %v12733_v23, %v12648_v63  ;;  %v23037_v20 = vrot.slane %v23009_v3, %v23005_v53  ;;  %v23038_v7 = vrot.slane %v22165_v59, 2  ;;  %15115 = vmatprep.subr.bf16.mxu1 %v18941_v38 }
 0x7e1   : > { %v12333_v14 = vadd.f32 %v12303_v1, %v22191_v19  ;;  %v12866_v54 = vadd.f32 %v12842_v56, %v12757_v39  ;;  %v12506_v22 = vadd.f32 %v12467_v5, %v12341_v15  ;;  %v23039_v27 = vrot.slane %v23010_v21, %v23005_v53  ;;  %v18945_v1 = vld [vmem:[#allocation24 + $0x680] ss:$16 sps:$4 sm:$0xff]  }
 0x7e2   : > { %v12817_v43 = vmul.f32 %v23037_v20, %v12764_v61  ;;  %v12468_v9 = vsel %vm5791_vm3, %v23038_v7, %v12467_v5  ;;  %v12858_v6 = vadd.f32 %v12842_v56, %v12749_v8  ;;  %v12732_v23 = vrot.slane %v22233_v17, 3  ;;  %v11995_v20 = vpop.f32.mrf.mxu1 }
 0x7e3   : > { %v12918_v30 = vmul.f32 %v23039_v27, %v12764_v61  ;;  %v12498_v19 = vadd.f32 %v12468_v9, %v12333_v14  ;;  %v12967_v59 = vadd.f32 %v12943_v31, %v12866_v54  ;;  %v23040_v10 = vrot.slane %v22187_v58, 2  ;;  %15116 = vmatpush1.bf16.msra.mxu1 %v18939_v36 }
 0x7e4   : > { %v12825_v24 = vmul.f32 %v12817_v43, %v20362_v46  ;;  %v12655_v12 = vadd.f32 %v12616_v16, %v12506_v22  ;;  %v12959_v57 = vadd.f32 %v12943_v31, %v12858_v6  ;;  %v13153_v47 = vrot.slane %v13137_v2, 6  ;;  %v23044_v31 = vld [vmem:[#allocation71_spill] sm:$0xff]  ;;  %15117 = vmatprep.subr.bf16.mxu1 %v18947_v52  ;;  %v18951_v6 = vld [vmem:[#allocation24 + $0x660] ss:$16 sps:$4 sm:$0xff]  }
 0x7e5   : > { %v12617_v25 = vsel %vm5791_vm3, %v23040_v10, %v12616_v16  ;;  %v12926_v50 = vmul.f32 %v12918_v30, %v20364_v48  ;;  %v23041_v56 = vrot.slane %v21812_v33, %v23005_v53  ;;  %v13068_v63 = vadd.f32 %v13044_v44, %v12967_v59  ;;  %v18953_v16 = vld [vmem:[#allocation24 + $0x664] ss:$16 sps:$4 sm:$0xff]  }
 0x7e6   : > { %v12647_v61 = vadd.f32 %v12617_v25, %v12498_v19  ;;  %v12756_v39 = vadd.f32 %v12732_v23, %v12655_v12  ;;  %v12841_v38 = vrot.slane %v12825_v24, 4  ;;  %v23042_v26 = vrot.slane %v21810_v34, %v23005_v53  ;;  %v22306_v12 = vld [vmem:[#allocation22] sm:$0xff] }
 0x7e7   : > { %v13128_v17 = vmul.f32 %v23041_v56, %v13075_v45  ;;  %v23043_v15 = vrot.slane %v22140_v62, %v23028_v32  ;;  %v22292_v5 = vadd.f32 %v11993_v13, %v22168_v0  ;;  %v13060_v8 = vadd.f32 %v13044_v44, %v12959_v57  ;;  %v11997_v45 = vpop.f32.mrf.mxu1  ;;  %15118 = vmatpush1.bf16.msra.mxu1 %v18945_v1  ;;  %v18977_v1 = vld [vmem:[#allocation24 + $0x7e4] ss:$16 sps:$4 sm:$0xff]  }
 0x7e8   : > { %v13027_v58 = vmul.f32 %v23042_v26, %v12974_v11  ;;  %v12748_v14 = vadd.f32 %v12732_v23, %v12647_v61  ;;  %v13177_v43 = vadd.f32 %v13153_v47, %v13068_v63  ;;  %v12865_v54 = vadd.f32 %v12841_v38, %v12756_v39  ;;  %15119 = vmatprep.subr.bf16.mxu1 %v18953_v16  ;;  %v18959_v11 = vld [vmem:[#allocation24 + $0x644] ss:$16 sps:$4 sm:$0xff]   ;;  %v18957_v61 = vld [vmem:[#allocation24 + $0x640] ss:$16 sps:$4 sm:$0xff]  }
 0x7e9   : > { %v11955_v2 = vadd.f32 %v23044_v31, %v23043_v15  ;;  %v12942_v7 = vrot.slane %v12926_v50, 4  ;;  %v13136_v9 = vmul.f32 %v13128_v17, %v20372_v4  ;;  %v16870_v22 = vmul.f32 -1.442695, %v22292_v5  ;;  %v11998_v52 = vpop.f32.mrf.mxu1  ;;  %v18965_v17 = vld [vmem:[#allocation24 + $0x624] ss:$16 sps:$4 sm:$0xff]  }
 0x7ea   : > { %v13169_v62 = vadd.f32 %v13153_v47, %v13060_v8  ;;  %v12857_v30 = vadd.f32 %v12841_v38, %v12748_v14  ;;  %v22299_v0 = vadd.f32 %v22210_v51, %v13177_v43  ;;  %v13043_v36 = vrot.slane %v13027_v58, 5  ;;  %v18971_v26 = vld [vmem:[#allocation24 + $0x604] ss:$16 sps:$4 sm:$0xff]   ;;  %v18969_v58 = vld [vmem:[#allocation24 + $0x600] ss:$16 sps:$4 sm:$0xff]  }
 0x7eb   : > { %v22296_v27 = vadd.f32 %v11995_v20, %v11955_v2  ;;  %v12966_v44 = vadd.f32 %v12942_v7, %v12865_v54  ;;  %19367 = vpow2.f32 %v16870_v22  ;;  %v13152_v25 = vrot.slane %v13136_v9, 6  ;;  %15120 = vmatpush1.bf16.msra.mxu1 %v18951_v6  ;;  %v18975_v8 = vld [vmem:[#allocation24 + $0x7e0] ss:$16 sps:$4 sm:$0xff]   ;;  %v18983_v20 = vld [vmem:[#allocation24 + $0x7c4] ss:$16 sps:$4 sm:$0xff]  }
 0x7ec   : > { %v22303_v23 = vadd.f32 %v22210_v51, %v13169_v62  ;;  %v12958_v24 = vadd.f32 %v12942_v7, %v12857_v30  ;;  %v16885_v59 = vmul.f32 -1.442695, %v22299_v0  ;;  %v13201_v50 = vrot.slane %v22306_v12, %v23005_v53  ;;  %15121 = vmatprep.subr.bf16.mxu1 %v18959_v11  ;;  %v18963_v53 = vld [vmem:[#allocation24 + $0x620] ss:$16 sps:$4 sm:$0xff]   ;;  %v18989_v22 = vld [vmem:[#allocation24 + $0x7a4] ss:$16 sps:$4 sm:$0xff]  }
 0x7ed   : > { %v16871_v19 = vmul.f32 -1.442695, %v22296_v27  ;;  %v13067_v10 = vadd.f32 %v13043_v36, %v12966_v44  ;;  %v18981_v9 = vld [vmem:[#allocation24 + $0x7c0] ss:$16 sps:$4 sm:$0xff]   ;;  %v18995_v6 = vld [vmem:[#allocation24 + $0x784] ss:$16 sps:$4 sm:$0xff]   ;;  %v22323_v11 = vrot.slane %v21726_v29, %v23028_v32  ;;  %v22327_v52 = vrot.slane %v21728_v55, %v23028_v32 }
 0x7ee   : > { %v16877_v57 = vmul.f32 -1.442695, %v22303_v23  ;;  %v13059_v47 = vadd.f32 %v13043_v36, %v12958_v24  ;;  %v18987_v44 = vld [vmem:[#allocation24 + $0x7a0] ss:$16 sps:$4 sm:$0xff]  }
 0x7ef   : > { %19369 = vpow2.f32 %v16871_v19  ;;  %v13176_v51 = vadd.f32 %v13152_v25, %v13067_v10  ;;  %15122 = vmatpush1.bf16.msra.mxu1 %v18957_v61  ;;  %v22319_v19 = vrot.slane %v23007_v18, %v23028_v32  ;;  %v12095_v24 = vld [vmem:[#allocation3 + $0x90] sm:$0xe0]  ;;  %v22331_v10 = vrot.slane %v21726_v29, %v23027_v28 }
 0x7f0   : > { %19371 = vpow2.f32 %v16885_v59  ;;  %v13168_v56 = vadd.f32 %v13152_v25, %v13059_v47  ;;  %15123 = vmatprep.subr.bf16.mxu1 %v18965_v17  ;;  %v12352_v59 = vld [vmem:[#allocation3 + $0x90] sm:$0x80]  ;;  %v19001_v47 = vld [vmem:[#allocation24 + $0x764] ss:$16 sps:$4 sm:$0xff]  }
 0x7f1   : > { %19373 = vpow2.f32 %v16877_v57  ;;  %v22311_v13 = vadd.f32 %v13201_v50, %v13176_v51  ;;  %v18993_v25 = vld [vmem:[#allocation24 + $0x780] ss:$16 sps:$4 sm:$0xff]   ;;  %v12351_v57 = vld [vmem:[#allocation3 + $0x28] sm:$0x80]  ;;  %v12155_v51 = vmul.f32 %v22319_v19, %v12095_v24  ;;  %v12413_v29 = vmul.f32 %v22323_v11, %v12352_v59 }
 0x7f2   : > { %v22313_v63 = vadd.f32 %v13201_v50, %v13168_v56  ;;  %v22335_v50 = vrot.slane %v21736_v35, %v23028_v32  ;;  %v12203_v61 = vld [vmem:[#allocation3 + $0x90] sm:$0xc0]  ;;  %v22340_v56 = vrot.slane %v21728_v55, %v23027_v28  ;;  %v13115_v24 = vrot.slane %v21812_v33, %v23028_v32 }
 0x7f3   : > { %v16884_v39 = vmul.f32 -1.442695, %v22311_v13  ;;  %15124 = vmatpush1.bf16.msra.mxu1 %v18963_v53  ;;  %v22346_v53 = vrot.slane %v23007_v18, %v23027_v28 }
 0x7f4   : > { %v16876_v38 = vmul.f32 -1.442695, %v22313_v63  ;;  %15125 = vmatprep.subr.bf16.mxu1 %v18971_v26  ;;  %v12094_v26 = vld [vmem:[#allocation3 + $0x28] sm:$0xe0] }
 0x7f5   : > { %19375 = vpow2.f32 %v16884_v39  ;;  %v12562_v39 = vmul.f32 %v22327_v52, %v12352_v59 }
 0x7f6   : > { %19377 = vpow2.f32 %v16876_v38 }
 0x7f7   : > { %15126 = vmatpush1.bf16.msra.mxu1 %v18969_v58  ;;  %v22351_v58 = vrot.slane %v21736_v35, %v23027_v28  ;;  %v12561_v35 = vmul.f32 %v22340_v56, %v12351_v57 }
 0x7f8   : > { %v19368_v15 = vpop.eup %19367  ;;  %15127 = vmatprep.subr.bf16.mxu1 %v18977_v1  ;;  %v12412_v1 = vmul.f32 %v22331_v10, %v12351_v57 }
 0x7f9   : > { %v12030_v31 = vadd.f32 1.0, %v19368_v15  ;;  %v18999_v15 = vld [vmem:[#allocation24 + $0x760] ss:$16 sps:$4 sm:$0xff]   ;;  %v22389_v59 = vmul.f32 %v12561_v35, %v20360_v42 }
 0x7fb   : > { %19379 = vrcp.f32 %v12030_v31  ;;  %15128 = vmatpush2.bf16.msra.mxu1 %v18975_v8  ;;  %v22355_v31 = vmul.f32 %v22335_v50, %v12203_v61 }
 0x7fc   : > { %v19370_v2 = vpop.eup %19369  ;;  %15129 = vmatprep.subr.bf16.mxu1 %v18983_v20 }
 0x7fd   : > { %v19372_v14 = vpop.eup %19371  ;;  %v12031_v16 = vadd.f32 1.0, %v19370_v2  ;;  %v12202_v2 = vld [vmem:[#allocation3 + $0x28] sm:$0xc0] }
 0x7fe   : > { %v19374_v43 = vpop.eup %19373  ;;  %v13299_v54 = vadd.f32 1.0, %v19372_v14  ;;  %v22359_v14 = vmul.f32 %v12155_v51, %v20356_v40 }
 0x7ff   : > { %19381 = vrcp.f32 %v12031_v16  ;;  %v13291_v7 = vadd.f32 1.0, %v19374_v43  ;;  %15130 = vmatpush2.bf16.msra.mxu1 %v18981_v9  ;;  %v22364_v43 = vmul.f32 %v12413_v29, %v20358_v41  ;;  %v12703_v9 = vrot.slane %v23008_v60, %v23028_v32 }
 0x800   : > { %19383 = vrcp.f32 %v13299_v54  ;;  %15131 = vmatprep.subr.bf16.mxu1 %v18989_v22  ;;  %v22367_v54 = vmul.f32 %v12562_v39, %v20360_v42  ;;  %v22374_v22 = vmul.f32 %v22351_v58, %v12202_v2 }
 0x801   : > { %19385 = vrcp.f32 %v13291_v7  ;;  %v12154_v7 = vmul.f32 %v22346_v53, %v12094_v26  ;;  %v12475_v57 = vrot.slane %v22364_v43, 2  ;;  %v19017_v26 = vld [vmem:[#allocation24 + $0x700] ss:$16 sps:$4 sm:$0xff]   ;;  %v18936_v43 = vld [vmem:[#allocation24 + $0xc8] ss:$16 sps:$4 sm:$0xff]  }
 0x802   : > { %v19376_v62 = vpop.eup %19375 }
 0x803   : > { %v19378_v30 = vpop.eup %19377  ;;  %v13298_v45 = vadd.f32 1.0, %v19376_v62  ;;  %15132 = vmatpush2.bf16.msra.mxu1 %v18987_v44  ;;  %v22377_v62 = vmul.f32 %v12412_v1, %v20358_v41  ;;  %v12905_v44 = vrot.slane %v23010_v21, %v23028_v32  ;;  %v22396_v51 = vmul.f32 %v12154_v7, %v20356_v40 }
 0x804   : > { %v13290_v36 = vadd.f32 1.0, %v19378_v30  ;;  %15133 = vmatprep.subr.bf16.mxu1 %v18995_v6  ;;  %v12310_v30 = vrot.slane %v22355_v31, 1  ;;  %v19013_v6 = vld [vmem:[#allocation24 + $0x724] ss:$16 sps:$4 sm:$0xff]  }
 0x805   : > { %19387 = vrcp.f32 %v13298_v45  ;;  %v12804_v45 = vrot.slane %v23009_v3, %v23028_v32 }
 0x806   : > { %19389 = vrcp.f32 %v13290_v36 }
 0x807   : > { %15134 = vmatpush2.bf16.msra.mxu1 %v18993_v25  ;;  %v12699_v25 = vrot.slane %v23008_v60, %v23027_v28 }
 0x808   : > { %v19380_v17 = vpop.eup %19379  ;;  %15135 = vmatprep.subr.bf16.mxu1 %v19001_v47 }
 0x809   : > { %v12054_v38 = vmul.f32 %v19380_v17, %v22292_v5  ;;  %v19007_v5 = vld [vmem:[#allocation24 + $0x744] ss:$16 sps:$4 sm:$0xff]  }
 0x80b   : > { %12086 = vst [vmem:[#allocation3 + $0x78] sm:$0xf] %v12054_v38  ;;  %15136 = vmatpush2.bf16.msra.mxu1 %v18999_v15  ;;  %v19011_v38 = vld [vmem:[#allocation24 + $0x720] ss:$16 sps:$4 sm:$0xff]  }
 0x80c   : > { %v19382_v55 = vpop.eup %19381  ;;  %15137 = vmatprep.subr.bf16.mxu1 %v19007_v5  ;;  %v22413_v5 = vrot.slane %v22306_v12, %v23028_v32 }
 0x80d   : > { %v19384_v8 = vpop.eup %19383  ;;  %v12055_v18 = vmul.f32 %v19382_v55, %v22296_v27 }
 0x80e   : > { %v19386_v16 = vpop.eup %19385  ;;  %v13347_v20 = vmul.f32 %v19384_v8, %v22299_v0  ;;  %v19005_v0 = vld [vmem:[#allocation24 + $0x740] ss:$16 sps:$4 sm:$0xff]  }
 0x80f   : > { %12087 = vst [vmem:[#allocation3 + $0x50] sm:$0xf] %v12055_v18  ;;  %v13339_v27 = vmul.f32 %v19386_v16, %v22303_v23  ;;  %v13014_v23 = vrot.slane %v21810_v34, %v23028_v32  ;;  %15138 = vmatpush2.bf16.msra.mxu1 %v19005_v0 }
 0x810   : > { %15139 = vmatprep.subr.bf16.mxu1 %v19013_v6 }
 0x811   : > { %v13355_v36 = vpack.c.bf16 %v13347_v20, %v13339_v27 }
 0x812   : > { %v19388_v17 = vpop.eup %19387  ;;  %v12102_v15 = vld [vmem:[#allocation3 + $0x78] sm:$0x1] }
 0x813   : > { %v13677_v29 = vshrl.u32 %v13355_v36, 16  ;;  %v13680_v39 = vshll.u32 %v13355_v36, 16  ;;  %v19390_v55 = vpop.eup %19389  ;;  %v13346_v2 = vmul.f32 %v19388_v17, %v22311_v13  ;;  %v12210_v8 = vld [vmem:[#allocation3 + $0x78] sm:$0x3]  ;;  %v12162_v35 = vmul.f32 %v22346_v53, %v12102_v15  ;;  %15140 = vmatpush2.bf16.msra.mxu1 %v19011_v38 }
 0x814   : > { %v12359_v18 = vld [vmem:[#allocation3 + $0x78] sm:$0x7]  ;;  %v13338_v27 = vmul.f32 %v19390_v55, %v22313_v63  ;;  %v22417_v61 = vmul.f32 %v22351_v58, %v12210_v8  ;;  %v19025_v58 = vld [vmem:[#allocation24 + $0x2ec] ss:$16 sps:$4 sm:$0xff]  }
 0x815   : > { %v13679_v20 = vrot.slane %v13677_v29, 2  ;;  %v13682_v7 = vrot.slane %v13680_v39, 3  ;;  %v19019_v36 = vld [vmem:[#allocation24 + $0x704] ss:$16 sps:$4 sm:$0xff]   ;;  %v12420_v29 = vmul.f32 %v22331_v10, %v12359_v18  ;;  %v12569_v8 = vmul.f32 %v22340_v56, %v12359_v18 }
 0x816   : > { %v12103_v0 = vld [vmem:[#allocation3 + $0x50] sm:$0x1]  ;;  %v13354_v63 = vpack.c.bf16 %v13346_v2, %v13338_v27  ;;  %v12767_v13 = vld [vmem:[#allocation3 + $0x50] sm:$0x1e]  ;;  %15141 = vmatprep.subr.bf16.mxu1 %v19019_v36 }
 0x817   : > { %v12211_v17 = vld [vmem:[#allocation3 + $0x50] sm:$0x3]  ;;  %v22420_v39 = vor.u32 %v13682_v7, %v13679_v20  ;;  %v12163_v6 = vmul.f32 %v22319_v19, %v12103_v0  ;;  %v12820_v15 = vmul.f32 %v12804_v45, %v12767_v13  ;;  %v12665_v20 = vld [vmem:[#allocation3 + $0x78] sm:$0xf]  ;;  %v12977_v56 = vld [vmem:[#allocation3 + $0x50] sm:$0x3c]  ;;  %15142 = vmatpush2.bf16.msra.mxu1 %v19017_v26  ;;  %v12921_v31 = vmul.f32 %v12905_v44, %v12767_v13 }
 0x818   : > { %v12360_v1 = vld [vmem:[#allocation3 + $0x50] sm:$0x7]  ;;  %v12272_v55 = vmul.f32 %v22335_v50, %v12211_v17  ;;  %v13669_v10 = vshrl.u32 %v13354_v63, 16  ;;  %v13672_v2 = vshll.u32 %v13354_v63, 16  ;;  %v13078_v45 = vld [vmem:[#allocation3 + $0x50] sm:$0x78]  ;;  %15193 = vmatprep.subr.bf16.mxu1 %v19025_v58  ;;  %v12436_v58 = vmul.f32 %v12420_v29, %v20358_v41 }
 0x819   : > { %v12666_v16 = vld [vmem:[#allocation3 + $0x50] sm:$0xf]  ;;  %v12421_v47 = vmul.f32 %v22323_v11, %v12360_v1  ;;  %v12570_v53 = vmul.f32 %v22327_v52, %v12360_v1  ;;  %15102 = vmatprep.mubr.bf16.mxu0 %v22420_v39  ;;  %v12179_v19 = vmul.f32 %v12163_v6, %v20356_v40  ;;  %v12828_v52 = vmul.f32 %v12820_v15, %v20362_v46  ;;  %v18930_v0 = vld [vmem:[#allocation24 + $0xe8] ss:$16 sps:$4 sm:$0xff]  }
 0x81a   : > { %v12311_v50 = vrot.slane %v12272_v55, 1  ;;  %v12719_v11 = vmul.f32 %v12703_v9, %v12666_v16  ;;  %v13671_v1 = vrot.slane %v13669_v10, 2  ;;  %v13674_v18 = vrot.slane %v13672_v2, 3  ;;  %v18938_v6 = vld [vmem:[#allocation24 + $0xcc] ss:$16 sps:$4 sm:$0xff]  }
 0x81b   : > { %v12437_v38 = vmul.f32 %v12421_v47, %v20358_v41  ;;  %v12586_v7 = vmul.f32 %v12570_v53, %v20360_v42  ;;  %v22442_v9 = vmul.f32 %v12699_v25, %v12665_v20  ;;  %v12178_v55 = vmul.f32 %v12162_v35, %v20356_v40  ;;  %v12766_v35 = vld [vmem:[#allocation3 + $0x78] sm:$0x1e]  ;;  %v18944_v10 = vld [vmem:[#allocation24 + $0xac] ss:$16 sps:$4 sm:$0xff]  }
 0x81c   : > { %v12312_v27 = vsel %vm5539_vm2, %v12310_v30, %v12311_v50  ;;  %v12344_v36 = vadd.f32 %v12311_v50, %v12179_v19  ;;  %v22444_v16 = vor.u32 %v13674_v18, %v13671_v1  ;;  %v22452_v30 = vmul.f32 %v13014_v23, %v12977_v56  ;;  %v18942_v56 = vld [vmem:[#allocation24 + $0xa8] ss:$16 sps:$4 sm:$0xff]  }
 0x81d   : > { %v12336_v47 = vadd.f32 %v12312_v27, %v22359_v14  ;;  %v12476_v17 = vrot.slane %v12437_v38, 2  ;;  %v12625_v63 = vrot.slane %v12586_v7, 2  ;;  %v13131_v14 = vmul.f32 %v13115_v24, %v13078_v45  ;;  %v23046_v24 = vld [vmem:[#allocation64_spill] sm:$0xff] }
 0x81e   : > { %v12735_v26 = vrot.slane %v12719_v11, 3  ;;  %15103 = vmatmul.mubr.bf16.vlgmr.msra.gmra.mxu0 %v22444_v16  ;;  %v23045_v13 = vrot.slane %v22367_v54, 2  ;;  %v12844_v53 = vrot.slane %v12828_v52, 4  ;;  %v12929_v32 = vmul.f32 %v12921_v31, %v20364_v48 }
 0x81f   : > { %v12477_v60 = vsel %vm5791_vm3, %v12475_v57, %v12476_v17  ;;  %v12509_v25 = vadd.f32 %v12476_v17, %v12344_v36  ;;  %15153 = vmatpush1.bf16.msra.mxu0 %v18930_v0  ;;  %15184 = vmatprep.mubr.bf16.mxu0 %v23046_v24  ;;  %v12308_v57 = vrot.slane %v22417_v61, 1  ;;  %v12585_v40 = vmul.f32 %v12569_v8, %v20360_v42  ;;  %v13077_v0 = vld [vmem:[#allocation3 + $0x78] sm:$0x78] }
 0x820   : > { %v12501_v44 = vadd.f32 %v12477_v60, %v12336_v47  ;;  %v12626_v23 = vsel %vm5791_vm3, %v23045_v13, %v12625_v63  ;;  %15154 = vmatprep.subr.bf16.mxu0 %v18938_v6  ;;  %v12945_v2 = vrot.slane %v12929_v32, 4  ;;  %v13046_v19 = vrot.slane %v22452_v30, 5  ;;  %v12976_v6 = vld [vmem:[#allocation3 + $0x78] sm:$0x3c]  ;;  %v18956_v32 = vld [vmem:[#allocation24 + $0x6c] ss:$16 sps:$4 sm:$0xff]  }
 0x821   : > { %v12658_v15 = vadd.f32 %v12625_v63, %v12509_v25  ;;  %v13139_v50 = vmul.f32 %v13131_v14, %v20372_v4  ;;  %v23047_v38 = vrot.slane %v22374_v22, 1  ;;  %v12343_v11 = vadd.f32 %v12308_v57, %v12178_v55 }
 0x822   : > { %v12650_v54 = vadd.f32 %v12626_v23, %v12501_v44  ;;  %v12473_v61 = vrot.slane %v12436_v58, 2  ;;  %v12622_v42 = vrot.slane %v12585_v40, 2  ;;  %v23048_v29 = vrot.slane %v23009_v3, %v23027_v28 }
 0x823   : > { %v12759_v20 = vadd.f32 %v12735_v26, %v12658_v15  ;;  %v12309_v7 = vsel %vm5539_vm2, %v23047_v38, %v12308_v57  ;;  %15155 = vmatpush1.bf16.msra.mxu0 %v18936_v43  ;;  %v23049_v1 = vrot.slane %v22377_v62, 2  ;;  %v23050_v27 = vrot.slane %v23010_v21, %v23027_v28 }
 0x824   : > { %v12751_v52 = vadd.f32 %v12735_v26, %v12650_v54  ;;  %v12335_v41 = vadd.f32 %v12309_v7, %v22396_v51  ;;  %v12819_v8 = vmul.f32 %v23048_v29, %v12766_v35  ;;  %v12508_v22 = vadd.f32 %v12473_v61, %v12343_v11  ;;  %15156 = vmatprep.subr.bf16.mxu0 %v18944_v10  ;;  %v18950_v51 = vld [vmem:[#allocation24 + $0x8c] ss:$16 sps:$4 sm:$0xff]  }
 0x825   : > { %v12868_v45 = vadd.f32 %v12844_v53, %v12759_v20  ;;  %v12474_v18 = vsel %vm5791_vm3, %v23049_v1, %v12473_v61  ;;  %v12920_v36 = vmul.f32 %v23050_v27, %v12766_v35  ;;  %v12734_v3 = vrot.slane %v22442_v9, 3  ;;  %v18948_v9 = vld [vmem:[#allocation24 + $0x88] ss:$16 sps:$4 sm:$0xff]   ;;  %v18974_v1 = vld [vmem:[#allocation24 + $0xc] ss:$16 sps:$4 sm:$0xff]  }
 0x826   : > { %v12860_v47 = vadd.f32 %v12844_v53, %v12751_v52  ;;  %v12500_v17 = vadd.f32 %v12474_v18, %v12335_v41  ;;  %v12827_v63 = vmul.f32 %v12819_v8, %v20362_v46  ;;  %v23051_v62 = vrot.slane %v22389_v59, 2  ;;  %v18954_v35 = vld [vmem:[#allocation24 + $0x68] ss:$16 sps:$4 sm:$0xff]   ;;  %v18980_v18 = vld [vmem:[#allocation24 + $0x1ec] ss:$16 sps:$4 sm:$0xff]  }
 0x827   : > { %v12969_v31 = vadd.f32 %v12945_v2, %v12868_v45  ;;  %v12657_v14 = vadd.f32 %v12622_v42, %v12508_v22  ;;  %v12928_v60 = vmul.f32 %v12920_v36, %v20364_v48  ;;  %v13155_v25 = vrot.slane %v13139_v50, 6  ;;  %15157 = vmatpush1.bf16.msra.mxu0 %v18942_v56  ;;  %v18960_v52 = vld [vmem:[#allocation24 + $0x48] ss:$16 sps:$4 sm:$0xff]   ;;  %v18986_v36 = vld [vmem:[#allocation24 + $0x1cc] ss:$16 sps:$4 sm:$0xff]  }
 0x828   : > { %v12623_v30 = vsel %vm5791_vm3, %v23051_v62, %v12622_v42  ;;  %v12961_v21 = vadd.f32 %v12945_v2, %v12860_v47  ;;  %v23052_v55 = vrot.slane %v21812_v33, %v23027_v28  ;;  %v12843_v23 = vrot.slane %v12827_v63, 4  ;;  %15158 = vmatprep.subr.bf16.mxu0 %v18950_v51  ;;  %v18968_v42 = vld [vmem:[#allocation24 + $0x2c] ss:$16 sps:$4 sm:$0xff]   ;;  %v18966_v56 = vld [vmem:[#allocation24 + $0x28] ss:$16 sps:$4 sm:$0xff]  }
 0x829   : > { %v12649_v26 = vadd.f32 %v12623_v30, %v12500_v17  ;;  %v13070_v13 = vadd.f32 %v13046_v19, %v12969_v31  ;;  %v12758_v46 = vadd.f32 %v12734_v3, %v12657_v14  ;;  %v23053_v59 = vrot.slane %v21810_v34, %v23027_v28  ;;  %v18962_v34 = vld [vmem:[#allocation24 + $0x4c] ss:$16 sps:$4 sm:$0xff]   ;;  %v18978_v22 = vld [vmem:[#allocation24 + $0x1e8] ss:$16 sps:$4 sm:$0xff]  }
 0x82a   : > { %v13130_v44 = vmul.f32 %v23052_v55, %v13077_v0  ;;  %v13062_v24 = vadd.f32 %v13046_v19, %v12961_v21  ;;  %v12944_v57 = vrot.slane %v12928_v60, 4  ;;  %v18984_v17 = vld [vmem:[#allocation24 + $0x1c8] ss:$16 sps:$4 sm:$0xff]   ;;  %v18998_v30 = vld [vmem:[#allocation24 + $0x18c] ss:$16 sps:$4 sm:$0xff]  }
 0x82b   : > { %v13029_v53 = vmul.f32 %v23053_v59, %v12976_v6  ;;  %v12750_v48 = vadd.f32 %v12734_v3, %v12649_v26  ;;  %v13179_v43 = vadd.f32 %v13155_v25, %v13070_v13  ;;  %v12867_v15 = vadd.f32 %v12843_v23, %v12758_v46  ;;  %15159 = vmatpush1.bf16.msra.mxu0 %v18948_v9  ;;  %v18992_v3 = vld [vmem:[#allocation24 + $0x1ac] ss:$16 sps:$4 sm:$0xff]   ;;  %v18990_v31 = vld [vmem:[#allocation24 + $0x1a8] ss:$16 sps:$4 sm:$0xff]  }
 0x82c   : > { %v13138_v58 = vmul.f32 %v13130_v44, %v20372_v4  ;;  %v13171_v33 = vadd.f32 %v13155_v25, %v13062_v24  ;;  %15160 = vmatprep.subr.bf16.mxu0 %v18956_v32  ;;  %v13209_v4 = vrot.slane %v22306_v12, %v23027_v28  ;;  %v18972_v12 = vld [vmem:[#allocation24 + $0x8] ss:$16 sps:$4 sm:$0xff]   ;;  %v19004_v21 = vld [vmem:[#allocation24 + $0x16c] ss:$16 sps:$4 sm:$0xff]  }
 0x82d   : > { %v12859_v40 = vadd.f32 %v12843_v23, %v12750_v48  ;;  %v22499_v10 = vadd.f32 %v22413_v5, %v13179_v43  ;;  %v12968_v54 = vadd.f32 %v12944_v57, %v12867_v15  ;;  %v13045_v2 = vrot.slane %v13029_v53, 5  ;;  %v18996_v60 = vld [vmem:[#allocation24 + $0x188] ss:$16 sps:$4 sm:$0xff]   ;;  %v19010_v55 = vld [vmem:[#allocation24 + $0x14c] ss:$16 sps:$4 sm:$0xff]  }
 0x82e   : > { %v22502_v50 = vadd.f32 %v22413_v5, %v13171_v33  ;;  %v13154_v7 = vrot.slane %v13138_v58, 6  ;;  %v19002_v25 = vld [vmem:[#allocation24 + $0x168] ss:$16 sps:$4 sm:$0xff]   ;;  %v19016_v23 = vld [vmem:[#allocation24 + $0x12c] ss:$16 sps:$4 sm:$0xff]  }
 0x82f   : > { %v12960_v19 = vadd.f32 %v12944_v57, %v12859_v40  ;;  %v16887_v20 = vmul.f32 -1.442695, %v22499_v10  ;;  %v13069_v38 = vadd.f32 %v13045_v2, %v12968_v54  ;;  %15161 = vmatpush1.bf16.msra.mxu0 %v18954_v35  ;;  %v19008_v46 = vld [vmem:[#allocation24 + $0x148] ss:$16 sps:$4 sm:$0xff]   ;;  %v19022_v57 = vld [vmem:[#allocation24 + $0x10c] ss:$16 sps:$4 sm:$0xff]  }
 0x830   : > { %v16879_v11 = vmul.f32 -1.442695, %v22502_v50  ;;  %15162 = vmatprep.subr.bf16.mxu0 %v18962_v34  ;;  %v19014_v43 = vld [vmem:[#allocation24 + $0x128] ss:$16 sps:$4 sm:$0xff]  }
 0x831   : > { %v13061_v61 = vadd.f32 %v13045_v2, %v12960_v19  ;;  %19391 = vpow2.f32 %v16887_v20  ;;  %v13178_v41 = vadd.f32 %v13154_v7, %v13069_v38  ;;  %v19020_v54 = vld [vmem:[#allocation24 + $0x108] ss:$16 sps:$4 sm:$0xff]   ;;  %v19028_v2 = vld [vmem:[#allocation24 + $0x4ec] ss:$16 sps:$4 sm:$0xff]  }
 0x832   : > { %19393 = vpow2.f32 %v16879_v11  ;;  %v19023_v38 = vld [vmem:[#allocation24 + $0x2e8] ss:$16 sps:$4 sm:$0xff]  }
 0x833   : > { %v13170_v5 = vadd.f32 %v13154_v7, %v13061_v61  ;;  %v13236_v29 = vadd.f32 %v13209_v4, %v13178_v41  ;;  %15163 = vmatpush1.bf16.msra.mxu0 %v18960_v52  ;;  %v19026_v7 = vld [vmem:[#allocation24 + $0x4e8] ss:$16 sps:$4 sm:$0xff]   ;;  %v19031_v61 = vld [vmem:[#allocation24 + $0x2cc] ss:$16 sps:$4 sm:$0xff]  }
 0x834   : > { %15164 = vmatprep.subr.bf16.mxu0 %v18968_v42  ;;  %v19034_v52 = vld [vmem:[#allocation24 + $0x4cc] ss:$16 sps:$4 sm:$0xff]  }
 0x835   : > { %v22508_v8 = vadd.f32 %v13209_v4, %v13170_v5  ;;  %v16886_v45 = vmul.f32 -1.442695, %v13236_v29  ;;  %v23054_v41 = vld [vmem:[#allocation72_spill] sm:$0xff]  ;;  %v19029_v5 = vld [vmem:[#allocation24 + $0x2c8] ss:$16 sps:$4 sm:$0xff]  }
 0x837   : > { %v16878_v28 = vmul.f32 -1.442695, %v22508_v8  ;;  %19395 = vpow2.f32 %v16886_v45  ;;  %15165 = vmatpush1.bf16.msra.mxu0 %v18966_v56  ;;  %v19040_v56 = vld [vmem:[#allocation24 + $0x4ac] ss:$16 sps:$4 sm:$0xff]  }
 0x838   : > { %15166 = vmatprep.subr.bf16.mxu0 %v18974_v1 }
 0x839   : > { %19397 = vpow2.f32 %v16878_v28  ;;  %v19035_v28 = vld [vmem:[#allocation24 + $0x2a8] ss:$16 sps:$4 sm:$0xff]  }
 0x83b   : > { %15167 = vmatpush1.bf16.msra.mxu0 %v18972_v12  ;;  %v19038_v12 = vld [vmem:[#allocation24 + $0x4a8] ss:$16 sps:$4 sm:$0xff]  }
 0x83c   : > { %15168 = vmatprep.subr.bf16.mxu0 %v18980_v18  ;;  %v19043_v18 = vld [vmem:[#allocation24 + $0x28c] ss:$16 sps:$4 sm:$0xff]  }
 0x83e   : > { %v19392_v27 = vpop.eup %19391 }
 0x83f   : > { %v19394_v0 = vpop.eup %19393  ;;  %v13301_v51 = vadd.f32 1.0, %v19392_v27  ;;  %15169 = vmatpush2.bf16.msra.mxu0 %v18978_v22  ;;  %v19046_v22 = vld [vmem:[#allocation24 + $0x48c] ss:$16 sps:$4 sm:$0xff]   ;;  %v19041_v27 = vld [vmem:[#allocation24 + $0x288] ss:$16 sps:$4 sm:$0xff]  }
 0x840   : > { %v13293_v47 = vadd.f32 1.0, %v19394_v0  ;;  %15170 = vmatprep.subr.bf16.mxu0 %v18986_v36  ;;  %v19052_v36 = vld [vmem:[#allocation24 + $0x46c] ss:$16 sps:$4 sm:$0xff]   ;;  %v19047_v0 = vld [vmem:[#allocation24 + $0x268] ss:$16 sps:$4 sm:$0xff]  }
 0x841   : > { %19399 = vrcp.f32 %v13301_v51  ;;  %v19050_v51 = vld [vmem:[#allocation24 + $0x468] ss:$16 sps:$4 sm:$0xff]  }
 0x842   : > { %19401 = vrcp.f32 %v13293_v47  ;;  %v19055_v47 = vld [vmem:[#allocation24 + $0x24c] ss:$16 sps:$4 sm:$0xff]  }
 0x843   : > { %15171 = vmatpush2.bf16.msra.mxu0 %v18984_v17  ;;  %v19058_v17 = vld [vmem:[#allocation24 + $0x44c] ss:$16 sps:$4 sm:$0xff]  }
 0x844   : > { %v19396_v63 = vpop.eup %19395  ;;  %15172 = vmatprep.subr.bf16.mxu0 %v18992_v3  ;;  %v19053_v3 = vld [vmem:[#allocation24 + $0x248] ss:$16 sps:$4 sm:$0xff]  }
 0x845   : > { %v13300_v62 = vadd.f32 1.0, %v19396_v63  ;;  %v19056_v63 = vld [vmem:[#allocation24 + $0x448] ss:$16 sps:$4 sm:$0xff]  }
 0x846   : > { %v19398_v6 = vpop.eup %19397 }
 0x847   : > { %v13292_v14 = vadd.f32 1.0, %v19398_v6  ;;  %19403 = vrcp.f32 %v13300_v62  ;;  %15173 = vmatpush2.bf16.msra.mxu0 %v18990_v31  ;;  %v19061_v6 = vld [vmem:[#allocation24 + $0x22c] ss:$16 sps:$4 sm:$0xff]   ;;  %v19059_v62 = vld [vmem:[#allocation24 + $0x228] ss:$16 sps:$4 sm:$0xff]  }
 0x848   : > { %15174 = vmatprep.subr.bf16.mxu0 %v18998_v30  ;;  %v19064_v31 = vld [vmem:[#allocation24 + $0x42c] ss:$16 sps:$4 sm:$0xff]   ;;  %v19062_v30 = vld [vmem:[#allocation24 + $0x428] ss:$16 sps:$4 sm:$0xff]  }
 0x849   : > { %19405 = vrcp.f32 %v13292_v14  ;;  %v19067_v14 = vld [vmem:[#allocation24 + $0x20c] ss:$16 sps:$4 sm:$0xff]  }
 0x84b   : > { %15175 = vmatpush2.bf16.msra.mxu0 %v18996_v60  ;;  %v19070_v60 = vld [vmem:[#allocation24 + $0x40c] ss:$16 sps:$4 sm:$0xff]  }
 0x84c   : > { %15176 = vmatprep.subr.bf16.mxu0 %v19004_v21  ;;  %v19065_v21 = vld [vmem:[#allocation24 + $0x208] ss:$16 sps:$4 sm:$0xff]  }
 0x84e   : > { %v19400_v26 = vpop.eup %19399 }
 0x84f   : > { %v19402_v44 = vpop.eup %19401  ;;  %v13349_v9 = vmul.f32 %v19400_v26, %v22499_v10  ;;  %15177 = vmatpush2.bf16.msra.mxu0 %v19002_v25  ;;  %v19068_v25 = vld [vmem:[#allocation24 + $0x408] ss:$16 sps:$4 sm:$0xff]   ;;  %v19073_v26 = vld [vmem:[#allocation24 + $0x3ec] ss:$16 sps:$4 sm:$0xff]  }
 0x850   : > { %v13341_v13 = vmul.f32 %v19402_v44, %v22502_v50  ;;  %15178 = vmatprep.subr.bf16.mxu0 %v19010_v55  ;;  %v19076_v55 = vld [vmem:[#allocation24 + $0x5ec] ss:$16 sps:$4 sm:$0xff]   ;;  %v19071_v44 = vld [vmem:[#allocation24 + $0x3e8] ss:$16 sps:$4 sm:$0xff]  }
 0x852   : > { %v13357_v59 = vpack.c.bf16 %v13349_v9, %v13341_v13  ;;  %v19074_v9 = vld [vmem:[#allocation24 + $0x5e8] ss:$16 sps:$4 sm:$0xff]   ;;  %v19079_v13 = vld [vmem:[#allocation24 + $0x3cc] ss:$16 sps:$4 sm:$0xff]  }
 0x853   : > { %15179 = vmatpush2.bf16.msra.mxu0 %v19008_v46  ;;  %v19082_v46 = vld [vmem:[#allocation24 + $0x5cc] ss:$16 sps:$4 sm:$0xff]  }
 0x854   : > { %v19404_v53 = vpop.eup %19403  ;;  %v13693_v32 = vshrl.u32 %v13357_v59, 16  ;;  %v13696_v24 = vshll.u32 %v13357_v59, 16  ;;  %15180 = vmatprep.subr.bf16.mxu0 %v19016_v23  ;;  %v19077_v23 = vld [vmem:[#allocation24 + $0x3c8] ss:$16 sps:$4 sm:$0xff]  }
 0x855   : > { %v13348_v15 = vmul.f32 %v19404_v53, %v13236_v29  ;;  %v22519_v11 = vpop.f32.mrf.mxu0  ;;  %v19032_v29 = vld [vmem:[#allocation24 + $0x4c8] ss:$16 sps:$4 sm:$0xff]   ;;  %v19085_v53 = vld [vmem:[#allocation24 + $0x3ac] ss:$16 sps:$4 sm:$0xff]  }
 0x856   : > { %v19406_v48 = vpop.eup %19405  ;;  %v13695_v58 = vrot.slane %v13693_v32, 2  ;;  %v13698_v33 = vrot.slane %v13696_v24, 3  ;;  %v19080_v59 = vld [vmem:[#allocation24 + $0x5c8] ss:$16 sps:$4 sm:$0xff]   ;;  %v19088_v32 = vld [vmem:[#allocation24 + $0x5ac] ss:$16 sps:$4 sm:$0xff]  }
 0x857   : > { %v13340_v40 = vmul.f32 %v19406_v48, %v22508_v8  ;;  %15181 = vmatpush2.bf16.msra.mxu0 %v19014_v43  ;;  %v22523_v42 = vpop.f32.mrf.mxu0  ;;  %v19037_v8 = vld [vmem:[#allocation24 + $0x2ac] ss:$16 sps:$4 sm:$0xff]   ;;  %v19083_v24 = vld [vmem:[#allocation24 + $0x3a8] ss:$16 sps:$4 sm:$0xff]  }
 0x858   : > { %v22514_v35 = vor.u32 %v13698_v33, %v13695_v58  ;;  %15182 = vmatprep.subr.bf16.mxu0 %v19022_v57  ;;  %v19086_v48 = vld [vmem:[#allocation24 + $0x5a8] ss:$16 sps:$4 sm:$0xff]   ;;  %v19091_v43 = vld [vmem:[#allocation24 + $0x38c] ss:$16 sps:$4 sm:$0xff]  }
 0x859   : > { %v13356_v10 = vpack.c.bf16 %v13348_v15, %v13340_v40  ;;  %v15026_v45 = vpop.f32.mrf.mxu0  ;;  %v19094_v15 = vld [vmem:[#allocation24 + $0x58c] ss:$16 sps:$4 sm:$0xff]   ;;  %v19089_v57 = vld [vmem:[#allocation24 + $0x388] ss:$16 sps:$4 sm:$0xff]  }
 0x85a   : > { %15143 = vmatprep.mubr.bf16.mxu1 %v22514_v35  ;;  %v19092_v58 = vld [vmem:[#allocation24 + $0x588] ss:$16 sps:$4 sm:$0xff]   ;;  %v19097_v33 = vld [vmem:[#allocation24 + $0x36c] ss:$16 sps:$4 sm:$0xff]  }
 0x85b   : > { %v13685_v34 = vshrl.u32 %v13356_v10, 16  ;;  %v13688_v50 = vshll.u32 %v13356_v10, 16  ;;  %15183 = vmatpush2.bf16.msra.mxu0 %v19020_v54  ;;  %v15027_v1 = vpop.f32.mrf.mxu0  ;;  %v19100_v40 = vld [vmem:[#allocation24 + $0x56c] ss:$16 sps:$4 sm:$0xff]   ;;  %v19095_v10 = vld [vmem:[#allocation24 + $0x368] ss:$16 sps:$4 sm:$0xff]  }
 0x85c   : > { %15234 = vmatprep.subr.bf16.mxu0 %v19028_v2  ;;  %v19098_v54 = vld [vmem:[#allocation24 + $0x568] ss:$16 sps:$4 sm:$0xff]   ;;  %v19103_v2 = vld [vmem:[#allocation24 + $0x34c] ss:$16 sps:$4 sm:$0xff]  }
 0x85d   : > { %v13687_v19 = vrot.slane %v13685_v34, 2  ;;  %v13690_v20 = vrot.slane %v13688_v50, 3  ;;  %v19106_v34 = vld [vmem:[#allocation24 + $0x54c] ss:$16 sps:$4 sm:$0xff]   ;;  %v19101_v50 = vld [vmem:[#allocation24 + $0x348] ss:$16 sps:$4 sm:$0xff]  }
 0x85e   : > { %15185 = vmatmul.mubr.bf16.vlgmr.msra.gmra.mxu0 %v23054_v41  ;;  %v19118_v41 = vld [vmem:[#allocation24 + $0x50c] ss:$16 sps:$4 sm:$0xff]  }
 0x85f   : > { %v22517_v4 = vor.u32 %v13690_v20, %v13687_v19  ;;  %15235 = vmatpush1.bf16.msra.mxu0 %v19026_v7  ;;  %15266 = vmatprep.mubr.bf16.mxu0 %v22420_v39  ;;  %v19044_v39 = vld [vmem:[#allocation24 + $0x488] ss:$16 sps:$4 sm:$0xff]   ;;  %v19109_v20 = vld [vmem:[#allocation24 + $0x32c] ss:$16 sps:$4 sm:$0xff]  }
 0x860   : > { %15236 = vmatprep.subr.bf16.mxu0 %v19034_v52  ;;  %v19104_v19 = vld [vmem:[#allocation24 + $0x548] ss:$16 sps:$4 sm:$0xff]   ;;  %v19115_v52 = vld [vmem:[#allocation24 + $0x30c] ss:$16 sps:$4 sm:$0xff]  }
 0x861   : > { %15144 = vmatmul.mubr.bf16.vlgmr.msra.gmra.mxu1 %v22517_v4  ;;  %v19107_v7 = vld [vmem:[#allocation24 + $0x328] ss:$16 sps:$4 sm:$0xff]   ;;  %v23055_v45 = vld [vmem:[#allocation46_spill] sm:$0xff] }
 0x862   : > { %15194 = vmatpush1.bf16.msra.mxu1 %v19023_v38  ;;  %15225 = vmatprep.mubr.bf16.mxu1 %v22217_v49  ;;  %v19049_v49 = vld [vmem:[#allocation24 + $0x26c] ss:$16 sps:$4 sm:$0xff]  }
 0x863   : > { %15195 = vmatprep.subr.bf16.mxu1 %v19031_v61  ;;  %15237 = vmatpush1.bf16.msra.mxu0 %v19032_v29  ;;  %v19112_v38 = vld [vmem:[#allocation24 + $0x52c] ss:$16 sps:$4 sm:$0xff]   ;;  %v19110_v61 = vld [vmem:[#allocation24 + $0x528] ss:$16 sps:$4 sm:$0xff]  }
 0x864   : > { %15238 = vmatprep.subr.bf16.mxu0 %v19040_v56  ;;  %v19113_v29 = vld [vmem:[#allocation24 + $0x308] ss:$16 sps:$4 sm:$0xff]   ;;  %v19121_v56 = vld [vmem:[#allocation24 + $0x6ec] ss:$16 sps:$4 sm:$0xff]  }
 0x866   : > { %15196 = vmatpush1.bf16.msra.mxu1 %v19029_v5  ;;  %v22527_v5 = vld [vmem:[#allocation25] sm:$0xf] }
 0x867   : > { %15197 = vmatprep.subr.bf16.mxu1 %v19037_v8  ;;  %15239 = vmatpush1.bf16.msra.mxu0 %v19038_v12  ;;  %v19116_v8 = vld [vmem:[#allocation24 + $0x508] ss:$16 sps:$4 sm:$0xff]   ;;  %v13619_v1 = vrot.slane %v22527_v5, %v23055_v45 }
 0x868   : > { %15240 = vmatprep.subr.bf16.mxu0 %v19046_v22  ;;  %v19124_v22 = vld [vmem:[#allocation24 + $0x6cc] ss:$16 sps:$4 sm:$0xff]  }
 0x86a   : > { %15198 = vmatpush1.bf16.msra.mxu1 %v19035_v28  ;;  %v23056_v28 = vld [vmem:[#allocation47_spill] sm:$0xff] }
 0x86b   : > { %15199 = vmatprep.subr.bf16.mxu1 %v19043_v18  ;;  %15241 = vmatpush1.bf16.msra.mxu0 %v19044_v39  ;;  %v13623_v12 = vrot.slane %v22527_v5, %v23056_v28  ;;  %v19119_v18 = vld [vmem:[#allocation24 + $0x6e8] ss:$16 sps:$4 sm:$0xff]  }
 0x86c   : > { %15242 = vmatprep.subr.bf16.mxu0 %v19052_v36 }
 0x86e   : > { %15200 = vmatpush1.bf16.msra.mxu1 %v19041_v27  ;;  %v15023_v27 = vadd.f32 %v22519_v11, %v13619_v1  ;;  %v19125_v11 = vld [vmem:[#allocation24 + $0x6a8] ss:$16 sps:$4 sm:$0xff]  }
 0x86f   : > { %15201 = vmatprep.subr.bf16.mxu1 %v19049_v49  ;;  %15243 = vmatpush1.bf16.msra.mxu0 %v19050_v51  ;;  %v15025_v49 = vadd.f32 %v22523_v42, %v13623_v12  ;;  %v19133_v42 = vld [vmem:[#allocation24 + $0x66c] ss:$16 sps:$4 sm:$0xff]  }
 0x870   : > { %15244 = vmatprep.subr.bf16.mxu0 %v19058_v17  ;;  %v23059_v12 = vld [vmem:[#allocation48_spill] sm:$0xff] }
 0x872   : > { %15202 = vmatpush1.bf16.msra.mxu1 %v19047_v0  ;;  %v19122_v0 = vld [vmem:[#allocation24 + $0x6c8] ss:$16 sps:$4 sm:$0xff]  }
 0x873   : > { %15203 = vmatprep.subr.bf16.mxu1 %v19055_v47  ;;  %15245 = vmatpush1.bf16.msra.mxu0 %v19056_v63  ;;  %v19127_v47 = vld [vmem:[#allocation24 + $0x6ac] ss:$16 sps:$4 sm:$0xff]   ;;  %v19128_v63 = vld [vmem:[#allocation24 + $0x688] ss:$16 sps:$4 sm:$0xff]  }
 0x874   : > { %15246 = vmatprep.subr.bf16.mxu0 %v19064_v31  ;;  %v19134_v31 = vld [vmem:[#allocation24 + $0x648] ss:$16 sps:$4 sm:$0xff]  }
 0x876   : > { %15204 = vmatpush1.bf16.msra.mxu1 %v19053_v3 }
 0x877   : > { %15205 = vmatprep.subr.bf16.mxu1 %v19061_v6  ;;  %15247 = vmatpush1.bf16.msra.mxu0 %v19062_v30  ;;  %v19131_v6 = vld [vmem:[#allocation24 + $0x668] ss:$16 sps:$4 sm:$0xff]  }
 0x878   : > { %15248 = vmatprep.subr.bf16.mxu0 %v19070_v60  ;;  %v19137_v30 = vld [vmem:[#allocation24 + $0x628] ss:$16 sps:$4 sm:$0xff]  }
 0x879   : > { %v19140_v60 = vld [vmem:[#allocation24 + $0x608] ss:$16 sps:$4 sm:$0xff]  }
 0x87a   : > { %15206 = vmatpush1.bf16.msra.mxu1 %v19059_v62  ;;  %v19139_v62 = vld [vmem:[#allocation24 + $0x62c] ss:$16 sps:$4 sm:$0xff]  }
 0x87b   : > { %15207 = vmatprep.subr.bf16.mxu1 %v19067_v14  ;;  %15249 = vmatpush1.bf16.msra.mxu0 %v19068_v25  ;;  %v19142_v14 = vld [vmem:[#allocation24 + $0x60c] ss:$16 sps:$4 sm:$0xff]   ;;  %v19143_v25 = vld [vmem:[#allocation24 + $0x7e8] ss:$16 sps:$4 sm:$0xff]  }
 0x87c   : > { %15250 = vmatprep.subr.bf16.mxu0 %v19076_v55  ;;  %v19146_v55 = vld [vmem:[#allocation24 + $0x7c8] ss:$16 sps:$4 sm:$0xff]  }
 0x87e   : > { %15208 = vmatpush1.bf16.msra.mxu1 %v19065_v21  ;;  %v19145_v21 = vld [vmem:[#allocation24 + $0x7ec] ss:$16 sps:$4 sm:$0xff]  }
 0x87f   : > { %15209 = vmatprep.subr.bf16.mxu1 %v19073_v26  ;;  %15251 = vmatpush2.bf16.msra.mxu0 %v19074_v9  ;;  %v19148_v26 = vld [vmem:[#allocation24 + $0x7cc] ss:$16 sps:$4 sm:$0xff]   ;;  %v19149_v9 = vld [vmem:[#allocation24 + $0x7a8] ss:$16 sps:$4 sm:$0xff]  }
 0x880   : > { %15252 = vmatprep.subr.bf16.mxu0 %v19082_v46  ;;  %v19152_v46 = vld [vmem:[#allocation24 + $0x788] ss:$16 sps:$4 sm:$0xff]  }
 0x882   : > { %15210 = vmatpush2.bf16.msra.mxu1 %v19071_v44  ;;  %v19151_v44 = vld [vmem:[#allocation24 + $0x7ac] ss:$16 sps:$4 sm:$0xff]  }
 0x883   : > { %15211 = vmatprep.subr.bf16.mxu1 %v19079_v13  ;;  %15253 = vmatpush2.bf16.msra.mxu0 %v19080_v59  ;;  %v19154_v13 = vld [vmem:[#allocation24 + $0x78c] ss:$16 sps:$4 sm:$0xff]   ;;  %v19155_v59 = vld [vmem:[#allocation24 + $0x768] ss:$16 sps:$4 sm:$0xff]  }
 0x884   : > { %15254 = vmatprep.subr.bf16.mxu0 %v19088_v32  ;;  %v19158_v32 = vld [vmem:[#allocation24 + $0x748] ss:$16 sps:$4 sm:$0xff]  }
 0x886   : > { %15212 = vmatpush2.bf16.msra.mxu1 %v19077_v23  ;;  %v19157_v23 = vld [vmem:[#allocation24 + $0x76c] ss:$16 sps:$4 sm:$0xff]  }
 0x887   : > { %15213 = vmatprep.subr.bf16.mxu1 %v19085_v53  ;;  %15255 = vmatpush2.bf16.msra.mxu0 %v19086_v48  ;;  %v19160_v53 = vld [vmem:[#allocation24 + $0x74c] ss:$16 sps:$4 sm:$0xff]   ;;  %v19161_v48 = vld [vmem:[#allocation24 + $0x728] ss:$16 sps:$4 sm:$0xff]  }
 0x888   : > { %15256 = vmatprep.subr.bf16.mxu0 %v19094_v15  ;;  %v19164_v15 = vld [vmem:[#allocation24 + $0x708] ss:$16 sps:$4 sm:$0xff]  }
 0x88a   : > { %15214 = vmatpush2.bf16.msra.mxu1 %v19083_v24  ;;  %v19163_v24 = vld [vmem:[#allocation24 + $0x72c] ss:$16 sps:$4 sm:$0xff]  }
 0x88b   : > { %15215 = vmatprep.subr.bf16.mxu1 %v19091_v43  ;;  %15257 = vmatpush2.bf16.msra.mxu0 %v19092_v58  ;;  %v19166_v43 = vld [vmem:[#allocation24 + $0x70c] ss:$16 sps:$4 sm:$0xff]  }
 0x88c   : > { %15258 = vmatprep.subr.bf16.mxu0 %v19100_v40 }
 0x88e   : > { %15216 = vmatpush2.bf16.msra.mxu1 %v19089_v57 }
 0x88f   : > { %15217 = vmatprep.subr.bf16.mxu1 %v19097_v33  ;;  %15259 = vmatpush2.bf16.msra.mxu0 %v19098_v54 }
 0x890   : > { %15260 = vmatprep.subr.bf16.mxu0 %v19106_v34 }
 0x892   : > { %15218 = vmatpush2.bf16.msra.mxu1 %v19095_v10 }
 0x893   : > { %15219 = vmatprep.subr.bf16.mxu1 %v19103_v2  ;;  %15261 = vmatpush2.bf16.msra.mxu0 %v19104_v19 }
 0x894   : > { %15262 = vmatprep.subr.bf16.mxu0 %v19112_v38  ;;  %v23057_v38 = vld [vmem:[#allocation41_spill] sm:$0xff] }
 0x896   : > { %15220 = vmatpush2.bf16.msra.mxu1 %v19101_v50 }
 0x897   : > { %15221 = vmatprep.subr.bf16.mxu1 %v19109_v20  ;;  %15263 = vmatpush2.bf16.msra.mxu0 %v19110_v61 }
 0x898   : > { %15264 = vmatprep.subr.bf16.mxu0 %v19118_v41 }
 0x89a   : > { %15222 = vmatpush2.bf16.msra.mxu1 %v19107_v7  ;;  %v15063_v39 = vpop.f32.mrf.mxu1 }
 0x89b   : > { %15223 = vmatprep.subr.bf16.mxu1 %v19115_v52  ;;  %15265 = vmatpush2.bf16.msra.mxu0 %v19116_v8  ;;  %v22537_v36 = vadd.f32 %v15063_v39, %v15023_v27 }
 0x89c   : > { %v15065_v51 = vpop.f32.mrf.mxu1 }
 0x89d   : > { %v22540_v17 = vadd.f32 %v15065_v51, %v15025_v49 }
 0x89e   : > { %15224 = vmatpush2.bf16.msra.mxu1 %v19113_v29  ;;  %15267 = vmatmul.mubr.bf16.vlgmr.msra.gmra.mxu0 %v22444_v16  ;;  %v15067_v3 = vpop.f32.mrf.mxu1  ;;  %v19130_v16 = vld [vmem:[#allocation24 + $0x68c] ss:$16 sps:$4 sm:$0xff]   ;;  %v23058_v29 = vld [vmem:[#allocation39_spill] sm:$0xff] }
 0x89f   : > { %15275 = vmatprep.subr.bf16.mxu1 %v19121_v56 }
 0x8a1   : > { %15226 = vmatmul.mubr.bf16.vlgmr.msra.gmra.mxu1 %v22235_v37  ;;  %v15068_v37 = vpop.f32.mrf.mxu1 }
 0x8a2   : > { %15276 = vmatpush1.bf16.msra.mxu1 %v19119_v18  ;;  %15307 = vmatprep.mubr.bf16.mxu1 %v22514_v35  ;;  %v19136_v35 = vld [vmem:[#allocation24 + $0x64c] ss:$16 sps:$4 sm:$0xff]   ;;  %v13627_v18 = vrot.slane %v22527_v5, %v23059_v12  ;;  %v23060_v37 = vld [vmem:[#allocation49_spill] sm:$0xff] }
 0x8a3   : > { %15277 = vmatprep.subr.bf16.mxu1 %v19124_v22 }
 0x8a6   : > { %15278 = vmatpush1.bf16.msra.mxu1 %v19122_v0 }
 0x8a7   : > { %15279 = vmatprep.subr.bf16.mxu1 %v19127_v47 }
 0x8aa   : > { %15280 = vmatpush1.bf16.msra.mxu1 %v19125_v11 }
 0x8ab   : > { %15281 = vmatprep.subr.bf16.mxu1 %v19130_v16  ;;  %v13631_v16 = vrot.slane %v22527_v5, %v23060_v37  ;;  %v23063_v5 = vld [vmem:[#allocation37_spill] sm:$0xff] }
 0x8ae   : > { %15282 = vmatpush1.bf16.msra.mxu1 %v19128_v63 }
 0x8af   : > { %15283 = vmatprep.subr.bf16.mxu1 %v19133_v42 }
 0x8b2   : > { %15284 = vmatpush1.bf16.msra.mxu1 %v19131_v6  ;;  %v19902_v6 = vmov 1983009808  }
 0x8b3   : > { %15285 = vmatprep.subr.bf16.mxu1 %v19136_v35  ;;  %v15335_v35 = vunpack.c.l.s4 %v19902_v6 }
 0x8b6   : > { %15286 = vmatpush1.bf16.msra.mxu1 %v19134_v31 }
 0x8b7   : > { %15287 = vmatprep.subr.bf16.mxu1 %v19139_v62 }
 0x8ba   : > { %15288 = vmatpush1.bf16.msra.mxu1 %v19137_v30 }
 0x8bb   : > { %15289 = vmatprep.subr.bf16.mxu1 %v19142_v14 }
 0x8be   : > { %15290 = vmatpush1.bf16.msra.mxu1 %v19140_v60  ;;  %v15336_v60 = vunpack.c.0.s8 %v15335_v35 }
 0x8bf   : > { %15291 = vmatprep.subr.bf16.mxu1 %v19145_v21  ;;  %v23061_v21 = vld [vmem:[#allocation68_spill] sm:$0xff] }
 0x8c2   : > { %15292 = vmatpush2.bf16.msra.mxu1 %v19143_v25 }
 0x8c3   : > { %15293 = vmatprep.subr.bf16.mxu1 %v19148_v26 }
 0x8c6   : > { %15294 = vmatpush2.bf16.msra.mxu1 %v19146_v55 }
 0x8c7   : > { %15295 = vmatprep.subr.bf16.mxu1 %v19151_v44  ;;  %v23062_v44 = vld [vmem:[#allocation69_spill] sm:$0xff] }
 0x8ca   : > { %15296 = vmatpush2.bf16.msra.mxu1 %v19149_v9 }
 0x8cb   : > { %15297 = vmatprep.subr.bf16.mxu1 %v19154_v13 }
 0x8ce   : > { %15298 = vmatpush2.bf16.msra.mxu1 %v19152_v46  ;;  %v15339_v46 = vsub.s32 %v15336_v60, %v23063_v5 }
 0x8cf   : > { %15299 = vmatprep.subr.bf16.mxu1 %v19157_v23 }
 0x8d2   : > { %15300 = vmatpush2.bf16.msra.mxu1 %v19155_v59 }
 0x8d3   : > { %15301 = vmatprep.subr.bf16.mxu1 %v19160_v53 }
 0x8d6   : > { %15302 = vmatpush2.bf16.msra.mxu1 %v19158_v32 }
 0x8d7   : > { %15303 = vmatprep.subr.bf16.mxu1 %v19163_v24 }
 0x8da   : > { %15304 = vmatpush2.bf16.msra.mxu1 %v19161_v48 }
 0x8db   : > { %15305 = vmatprep.subr.bf16.mxu1 %v19166_v43 }
 0x8de   : > { %15306 = vmatpush2.bf16.msra.mxu1 %v19164_v15  ;;  %v15104_v57 = vpop.f32.mrf.mxu0 }
 0x8df   : > { %v15105_v58 = vadd.f32 %v15104_v57, %v22537_v36 }
 0x8e0   : > { %v15106_v33 = vpop.f32.mrf.mxu0 }
 0x8e1   : > { %15308 = vmatmul.mubr.bf16.vlgmr.msra.gmra.mxu1 %v22517_v4  ;;  %v15107_v40 = vadd.f32 %v15106_v33, %v22540_v17 }
 0x8e2   : > { %v15108_v10 = vpop.f32.mrf.mxu0 }
 0x8e4   : > { %v15109_v54 = vpop.f32.mrf.mxu0 }
 0x91e   : > { %v15186_v2 = vpop.f32.mrf.mxu0 }
 0x91f   : > { %v15187_v22 = vadd.f32 %v15186_v2, %v13627_v18 }
 0x920   : > { %v15188_v19 = vpop.f32.mrf.mxu0 }
 0x921   : > { %v15145_v34 = vpop.f32.mrf.mxu1  ;;  %v15189_v63 = vadd.f32 %v15188_v19, %v13631_v16 }
 0x922   : > { %v15146_v50 = vadd.f32 %v15145_v34, %v15105_v58  ;;  %v15190_v52 = vpop.f32.mrf.mxu0 }
 0x923   : > { %v15147_v20 = vpop.f32.mrf.mxu1 }
 0x924   : > { %v15316_v7 = vadd.f32 %v15146_v50, %v23057_v38  ;;  %v15148_v61 = vadd.f32 %v15147_v20, %v15107_v40  ;;  %v15191_v8 = vpop.f32.mrf.mxu0 }
 0x925   : > { %v15149_v41 = vpop.f32.mrf.mxu1 }
 0x926   : > { %v15317_v4 = vadd.f32 %v15148_v61, %v23058_v29  ;;  %v15320_v45 = vmax.f32 %v15316_v7, 0.0 }
 0x927   : > { %v15150_v56 = vpop.f32.mrf.mxu1 }
 0x928   : > { %v15321_v1 = vmax.f32 %v15317_v4, 0.0 }
 0x92a   : > { %v17144_v28 = vpack.c.bf16 %v15321_v1, %v15320_v45 }
 0x92c   : > { %v15340_v32 = vrot.slane %v17144_v28, %v15339_v46 }
 0x95e   : > { %v15268_v39 = vpop.f32.mrf.mxu0 }
 0x960   : > { %v15270_v0 = vpop.f32.mrf.mxu0 }
 0x961   : > { %v15227_v27 = vpop.f32.mrf.mxu1 }
 0x962   : > { %v15228_v49 = vadd.f32 %v15227_v27, %v15187_v22  ;;  %v15272_v17 = vpop.f32.mrf.mxu0 }
 0x963   : > { %v15229_v36 = vpop.f32.mrf.mxu1 }
 0x964   : > { %v15269_v51 = vadd.f32 %v15268_v39, %v15228_v49  ;;  %v15273_v11 = vpop.f32.mrf.mxu0  ;;  %v15230_v42 = vadd.f32 %v15229_v36, %v15189_v63 }
 0x965   : > { %v15231_v47 = vpop.f32.mrf.mxu1 }
 0x966   : > { %v15271_v62 = vadd.f32 %v15270_v0, %v15230_v42 }
 0x967   : > { %v15232_v3 = vpop.f32.mrf.mxu1 }
 0x9a1   : > { %v15309_v31 = vpop.f32.mrf.mxu1 }
 0x9a2   : > { %v15310_v30 = vadd.f32 %v15309_v31, %v15269_v51 }
 0x9a3   : > { %v15311_v14 = vpop.f32.mrf.mxu1 }
 0x9a4   : > { %v15318_v25 = vadd.f32 %v15310_v30, %v23061_v21  ;;  %v15312_v26 = vadd.f32 %v15311_v14, %v15271_v62 }
 0x9a5   : > { %v15313_v55 = vpop.f32.mrf.mxu1 }
 0x9a6   : > { %v15319_v9 = vadd.f32 %v15312_v26, %v23062_v44  ;;  %v15322_v23 = vmax.f32 %v15318_v25, 0.0 }
 0x9a7   : > { %v15314_v13 = vpop.f32.mrf.mxu1 }
 0x9a8   : > { %v15323_v59 = vmax.f32 %v15319_v9, 0.0 }
 0x9aa   : > { %v17145_v53 = vpack.c.bf16 %v15323_v59, %v15322_v23 }
 0x9ac   : > { %v15347_v24 = vrot.slane %v17145_v53, %v15339_v46 }
 0x9ae   : > { %v15348_v48 = vcombine.low %v15340_v32, %v15347_v24 }
 0x9b0   : > { %15350 = vst [vmem:[%s727_s28] sm:$0xff] %v15348_v48 }
 0x9b1   : > { %19795 = shalt.err (!%p19792_p5)
}
 0x9b2   : > { %s19796_s26 = scalar_lea.hbm %s15364_s23, 128  ;;  %s19800_s0 = scalar_lea.hbm %s23064_s8, 256 }
 0x9b3   : > { %p19797_p1 = scmp.ne.s32.totalorder %s15364_s23, %s19796_s26  ;;  %p19801_p10 = scmp.lt.s32.totalorder %s15364_s23, %s23064_s8 }
 0x9b4   : > { %p19802_p7 = scmp.lt.s32.totalorder %s19800_s0, %s19796_s26 }
 0x9b5   : > { %p19798_p9 = pnand %p19797_p1, %p23065_p3 }
 0x9b6   : > { %p19803_p2 = por %p19802_p7, %p19801_p10 }
 0x9b7   : > { %p19799_p8 = pneg %p19798_p9 }
 0x9b9   : > { %p19804_p6 = pnand %p19803_p2, %p19799_p8 }
 0x9bb   : > { %19807 = shalt.err (!%p19804_p6)
}
 0x9bc   : > { %17207 = dma.vmem_to_hbm [thread:$0]  (%p23065_p3), %s15367_s18, 128, %s15364_s23, %s15352_s9  }
 0x9bd PF: > { %s15378_s28 = sand.u32 1, %s19862_s20   ;;  %p23066_p4 = scmp.ne.s32.totalorder %s22737_s30, 0 }
 0x9be   : > { %p23067_p11 = scmp.ge.s32.totalorder %s19874_s22, 2  ;;  %s15379_s4 = scalar_lea.sflag [#allocation6], %s15378_s28 }
 0x9c0   : > { %p17254_p12 = pnand %p23067_p11, %p23066_p4 }
 0x9c2   : > { %p17255_p13 = pneg %p17254_p12 }
 0x9c4   : > { %19857 = dma.done.wait (%p17255_p13), %s15379_s4, 128  }
 0x9c5   : > { %19859 = vsyncadd (%p17255_p13), %s15379_s4, 4294967168  ;;  %p36_p0 = scmp.ge.s32.totalorder %s20146_s29, 4   ;;  %s23068_s20 = smov %s19866_s2 }
 0x9c6   : > { %s23069_s2 = smov %s19870_s21  ;;  %s23070_s21 = smov %s20158_s16 }
 0x9c7   : > { %s23071_s22 = smov %s20146_s29  ;;  %38 = sbr.rel (!%p36_p0) target bundleno = 24 (0x18), region = 209 }
 0x9cc   :  { %15384 = vsyncpa [#allocation5], 1 }
 0x9cd   :  { %15386 = vsyncpa [#allocation5 + $0x1], 1 }
 0x9ce   :  { %15387 = vsyncpa [#allocation8], 1 }
 0x9cf   :  { %15388 = vsyncpa [#allocation11], 1 }
 0x9d0   :  { %15389 = vsyncpa [#allocation14], 1 }
 0x9d1   :  { %15390 = vsyncpa [#allocation17], 1 }
 0x9d2   :  { %15391 = vsyncpa [#allocation20], 1 }
 0x9d3   :  { %15392 = vsyncpa [#allocation23], 1 }
 0x9d4   :  { %15393 = vsyncpa [#allocation26], 1 }
 0x9d5   :  { %15394 = vsyncpa [#allocation6], 1 }
 0x9d6   :  { %15396 = vsyncpa [#allocation6 + $0x1], 1 }

</bundles_post_ra>
